<compile_context>
chip_gen: v6e
topology: v6e:2x2x1
jax: 0.10.0
libtpu: 0.0.40
codegen_flags: <defaults>
</compile_context>

<pallas_src>
import functools

import numpy as np
import jax
import jax.numpy as jnp
from jax.experimental import pallas as pl
from jax.experimental.pallas import tpu as pltpu

KSIZE = 7
PAD = 3
LN_EPS = 1e-5
LANE = 128


# ----------------------------------------------------------------------------
# exact (erf-based) GELU, matching torch.nn.GELU(approximate='none')
# erf via Abramowitz & Stegun 7.1.26 (max abs err ~1.5e-7), only exp/abs/where.
# ----------------------------------------------------------------------------
def _erf(x):
    a1, a2, a3, a4, a5 = (0.254829592, -0.284496736, 1.421413741,
                          -1.453152027, 1.061405429)
    p = 0.3275911
    s = jnp.where(x >= 0.0, 1.0, -1.0)
    ax = jnp.abs(x)
    t = 1.0 / (1.0 + p * ax)
    poly = ((((a5 * t + a4) * t + a3) * t + a2) * t + a1) * t
    return s * (1.0 - poly * jnp.exp(-ax * ax))


def _gelu_exact(x):
    return 0.5 * x * (1.0 + _erf(x * 0.7071067811865476))


# ----------------------------------------------------------------------------
# Pallas kernel: one (image, row-tile) per grid step.
# ----------------------------------------------------------------------------
def _convnext_block_kernel(xpad_ref, wdw_ref, bdw_ref, ln_w_ref, ln_b_ref,
                           w1_ref, b1_ref, w2_ref, b2_ref, gamma_ref,
                           out_ref, xcol_ref,
                           *, th, width, c_real, compute_dtype):
    cp = xpad_ref.shape[-1]
    tm = th * width
    kk = KSIZE * KSIZE
    row0 = pl.multiple_of(pl.program_id(1) * th, th)

    # --- stage the 49 shifted 7x7 windows into VMEM: xcol[th, W, 49*Cp]
    #     (built from the padded image resident in VMEM; no HBM im2col).
    #     Lane offsets k*Cp are multiples of 128 -> unmasked, lane-dense stores.
    for ky in range(KSIZE):
        for kx in range(KSIZE):
            k = ky * KSIZE + kx
            win = xpad_ref[0, pl.ds(row0 + ky, th), pl.ds(kx, width), :]
            xcol_ref[:, :, k * cp:(k + 1) * cp] = win.astype(compute_dtype)

    # --- dense 7x7 conv == a single MXU contraction, K = 49*Cp, f32 accumulate
    #     (keeps the big im2col operand in VMEM scratch, not vregs).
    lhs = xcol_ref[...].reshape(tm, kk * cp)
    acc = jnp.dot(lhs, wdw_ref[...],
                  preferred_element_type=jnp.float32) + bdw_ref[...]

    # --- LayerNorm over the *real* channel count (padded channels are exact 0)
    inv_c = 1.0 / c_real
    mean = jnp.sum(acc, axis=-1, keepdims=True) * inv_c
    ex2 = jnp.sum(acc * acc, axis=-1, keepdims=True) * inv_c
    var = ex2 - mean * mean
    xn = (acc - mean) * jax.lax.rsqrt(var + LN_EPS)
    xn = xn * ln_w_ref[...] + ln_b_ref[...]

    # --- MLP: Linear -> exact GELU -> Linear (bf16 operands, f32 accumulation)
    h = jnp.dot(xn.astype(compute_dtype), w1_ref[...],
                preferred_element_type=jnp.float32) + b1_ref[...]
    h = _gelu_exact(h)
    y = jnp.dot(h.astype(compute_dtype), w2_ref[...],
                preferred_element_type=jnp.float32) + b2_ref[...]

    # --- layer scale + residual (interior of the padded block == original x)
    xres = xpad_ref[0, pl.ds(row0 + PAD, th), pl.ds(PAD, width), :]
    out_ref[0] = (y * gamma_ref[...] + xres.reshape(tm, cp)).astype(out_ref.dtype)


# ----------------------------------------------------------------------------
# Wrapper: layout plumbing (NCHW<->NHWC, lane-padding, spatial zero-pad) + call
# ----------------------------------------------------------------------------
def _round_up(v, m):
    return (v + m - 1) // m * m


@functools.partial(jax.jit, static_argnames=("compute_dtype", "tile_rows"))
def convnext_block(x_nchw, p, compute_dtype=jnp.bfloat16, tile_rows=8):
    n, cin, h, w = x_nchw.shape
    cout = p["conv_w"].shape[0]
    hid = p["fc1_w"].shape[0]
    assert cin == p["conv_w"].shape[1] and cin == cout, \
        "residual path requires in_chs == out_chs (stride=1)"

    cp = _round_up(cout, LANE)          # lane-dense channel dim
    hp = _round_up(hid, LANE)           # lane-dense hidden dim
    th = tile_rows if (h % tile_rows == 0) else h   # rows of output per tile
    tm = th * w
    kk = KSIZE * KSIZE

    # --- glue: channels-last, zero-pad channels to Cp and spatial dims by 3
    x_nhwc = jnp.transpose(x_nchw, (0, 2, 3, 1))
    xpad = jnp.pad(x_nhwc, ((0, 0), (PAD, PAD), (PAD, PAD), (0, cp - cin)))

    # --- weights packed into lane-padded, MXU-friendly layouts
    wdw = jnp.transpose(p["conv_w"], (2, 3, 1, 0))             # (7,7,I,O)
    wdw = jnp.pad(wdw, ((0, 0), (0, 0), (0, cp - cin), (0, cp - cout)))
    wdw = wdw.reshape(kk * cp, cp).astype(compute_dtype)       # (49*Cp, Cp)
    bdw = jnp.pad(p["conv_b"], (0, cp - cout)).reshape(1, cp)
    ln_w = jnp.pad(p["ln_w"], (0, cp - cout)).reshape(1, cp)
    ln_b = jnp.pad(p["ln_b"], (0, cp - cout)).reshape(1, cp)
    w1 = jnp.pad(p["fc1_w"].T, ((0, cp - cout), (0, hp - hid))).astype(compute_dtype)
    b1 = jnp.pad(p["fc1_b"], (0, hp - hid)).reshape(1, hp)
    w2 = jnp.pad(p["fc2_w"].T, ((0, hp - hid), (0, cp - cout))).astype(compute_dtype)
    b2 = jnp.pad(p["fc2_b"], (0, cp - cout)).reshape(1, cp)
    gamma = jnp.pad(p["gamma"], (0, cp - cout)).reshape(1, cp)

    kernel = functools.partial(_convnext_block_kernel, th=th, width=w,
                               c_real=cout, compute_dtype=compute_dtype)

    const = lambda i, r: (0, 0)
    grid_spec = pltpu.PrefetchScalarGridSpec(
        num_scalar_prefetch=0,
        grid=(n, h // th),
        in_specs=[
            # padded image: constant block index across the row-tile axis
            # -> fetched into VMEM once per image, reused by every row tile.
            pl.BlockSpec((1, h + 2 * PAD, w + 2 * PAD, cp),
                         lambda i, r: (i, 0, 0, 0)),
            pl.BlockSpec((kk * cp, cp), const),   # conv weight (49*Cp, Cp)
            pl.BlockSpec((1, cp), const),         # conv bias
            pl.BlockSpec((1, cp), const),         # ln weight
            pl.BlockSpec((1, cp), const),         # ln bias
            pl.BlockSpec((cp, hp), const),        # fc1 weight
            pl.BlockSpec((1, hp), const),         # fc1 bias
            pl.BlockSpec((hp, cp), const),        # fc2 weight
            pl.BlockSpec((1, cp), const),         # fc2 bias
            pl.BlockSpec((1, cp), const),         # gamma (layer scale)
        ],
        out_specs=pl.BlockSpec((1, tm, cp), lambda i, r: (i, r, 0)),
        scratch_shapes=[pltpu.VMEM((th, w, kk * cp), compute_dtype)],
    )

    # Advisory cost hint so XLA schedules neighbouring ops sensibly.
    itemsize = jnp.dtype(x_nchw.dtype).itemsize
    flops = int(2 * n * h * w * (kk * cp * cp + cp * hp + hp * cp))
    transcendentals = int(n * h * w * (hp + 1))          # GELU exp + LN rsqrt
    bytes_accessed = int(
        xpad.size * itemsize + n * h * w * cp * itemsize
        + (wdw.size + w1.size + w2.size) * 2
        + (bdw.size + ln_w.size + ln_b.size + b1.size + b2.size + gamma.size) * 4)
    cost = pl.CostEstimate(flops=flops, transcendentals=transcendentals,
                           bytes_accessed=bytes_accessed)

    out_flat = pl.pallas_call(
        kernel,
        out_shape=jax.ShapeDtypeStruct((n, h * w, cp), x_nchw.dtype),
        grid_spec=grid_spec,
        cost_estimate=cost,
        compiler_params=pltpu.CompilerParams(
            # both grid axes independent -> v7x megacore can shard either one
            dimension_semantics=("parallel", "parallel"),
            # 32 MiB is ample for this tiling on every generation; re-derive per
            # generation before growing tiles (v5e/v6e: 128 MiB phys, v7x: 64).
            vmem_limit_bytes=32 * 1024 * 1024,
        ),
    )(xpad, wdw, bdw, ln_w, ln_b, w1, b1, w2, b2, gamma)

    out = out_flat[:, :, :cout].reshape(n, h, w, cout)
    return jnp.transpose(out, (0, 3, 1, 2))


# ----------------------------------------------------------------------------
# Parameter init (deterministic, synthetic) in PyTorch layouts
# ----------------------------------------------------------------------------
def init_torch_params(key, in_chs, out_chs=None, mlp_ratio=4, ls_init_value=1e-6):
    out_chs = out_chs or in_chs
    hid = int(mlp_ratio * out_chs)
    ks = jax.random.split(key, 8)
    return {
        "conv_w": jax.random.normal(ks[0], (out_chs, in_chs, KSIZE, KSIZE),
                                    jnp.float32) / np.sqrt(in_chs * KSIZE * KSIZE),
        "conv_b": 0.1 * jax.random.normal(ks[1], (out_chs,), jnp.float32),
        "ln_w": 1.0 + 0.1 * jax.random.normal(ks[2], (out_chs,), jnp.float32),
        "ln_b": 0.1 * jax.random.normal(ks[3], (out_chs,), jnp.float32),
        "fc1_w": jax.random.normal(ks[4], (hid, out_chs), jnp.float32) / np.sqrt(out_chs),
        "fc1_b": 0.1 * jax.random.normal(ks[5], (hid,), jnp.float32),
        "fc2_w": jax.random.normal(ks[6], (out_chs, hid), jnp.float32) / np.sqrt(hid),
        "fc2_b": 0.1 * jax.random.normal(ks[7], (out_chs,), jnp.float32),
        "gamma": ls_init_value * jnp.ones((out_chs,), jnp.float32),
    }


# ----------------------------------------------------------------------------
# Pure-JAX reference (f32, HIGHEST precision) for correctness check
# ----------------------------------------------------------------------------
def convnext_block_ref(x_nchw, p):
    hi = jax.lax.Precision.HIGHEST
    y = jax.lax.conv_general_dilated(
        x_nchw, p["conv_w"], window_strides=(1, 1),
        padding=((PAD, PAD), (PAD, PAD)),
        dimension_numbers=("NCHW", "OIHW", "NCHW"), precision=hi)
    y = y + p["conv_b"][None, :, None, None]
    y = jnp.transpose(y, (0, 2, 3, 1))                       # NHWC
    mean = y.mean(-1, keepdims=True)
    var = ((y - mean) ** 2).mean(-1, keepdims=True)
    y = (y - mean) * jax.lax.rsqrt(var + LN_EPS) * p["ln_w"] + p["ln_b"]
    h = jnp.einsum("nhwc,oc->nhwo", y, p["fc1_w"], precision=hi) + p["fc1_b"]
    h = _gelu_exact(h)
    y = jnp.einsum("nhwc,oc->nhwo", h, p["fc2_w"], precision=hi) + p["fc2_b"]
    y = y * p["gamma"]
    return jnp.transpose(y, (0, 3, 1, 2)) + x_nchw


if __name__ == "__main__":
    key = jax.random.PRNGKey(0)
    kp, kx = jax.random.split(key)

    N, C, H, W = 2, 4, 16, 16
    # ls_init_value=0.1 (module default 1e-6 makes the branch numerically
    # invisible next to the residual; semantics are identical).
    torch_params = init_torch_params(kp, in_chs=C, mlp_ratio=4, ls_init_value=0.1)
    x = jax.random.normal(kx, (N, C, H, W), jnp.float32)

    out = convnext_block(x, torch_params,
                         compute_dtype=jnp.bfloat16, tile_rows=8)
    out = jax.block_until_ready(out)

    ref = convnext_block_ref(x, torch_params)
    assert out.shape == x.shape
    # bf16 MXU operands with f32 accumulation -> bf16-appropriate tolerance
    np.testing.assert_allclose(np.asarray(out), np.asarray(ref),
                               rtol=2e-2, atol=2e-2)
    print("KERNEL_OK")
</pallas_src>

<mosaic_0001>
module attributes {stable_mosaic.version = 11 : i64} {
  func.func @_convnext_block_kernel(%arg0: i32, %arg1: i32, %arg2: memref<1x22x22x128xf32, #tpu.memory_space<vmem>>, %arg3: memref<6272x128xbf16, #tpu.memory_space<vmem>>, %arg4: memref<1x128xf32, #tpu.memory_space<vmem>>, %arg5: memref<1x128xf32, #tpu.memory_space<vmem>>, %arg6: memref<1x128xf32, #tpu.memory_space<vmem>>, %arg7: memref<128x128xbf16, #tpu.memory_space<vmem>>, %arg8: memref<1x128xf32, #tpu.memory_space<vmem>>, %arg9: memref<128x128xbf16, #tpu.memory_space<vmem>>, %arg10: memref<1x128xf32, #tpu.memory_space<vmem>>, %arg11: memref<1x128xf32, #tpu.memory_space<vmem>>, %arg12: memref<1x128x128xf32, #tpu.memory_space<vmem>>, %arg13: memref<8x16x6272xbf16, #tpu.memory_space<vmem>>) attributes {dimension_semantics = [#tpu.dimension_semantics<parallel>, #tpu.dimension_semantics<parallel>], iteration_bounds = array<i64: 2, 2>, scalar_prefetch = 0 : i64, scratch_operands = 1 : i64, tpu.core_type = #tpu.core_type<tc>, window_params = [{transform_indices = @transform_0, window_bounds = array<i64: 1, 22, 22, 128>}, {pipeline_mode = #tpu.pipeline_mode<synchronous>, transform_indices = @transform_1, window_bounds = array<i64: 6272, 128>}, {pipeline_mode = #tpu.pipeline_mode<synchronous>, transform_indices = @transform_2, window_bounds = array<i64: 1, 128>}, {pipeline_mode = #tpu.pipeline_mode<synchronous>, transform_indices = @transform_3, window_bounds = array<i64: 1, 128>}, {pipeline_mode = #tpu.pipeline_mode<synchronous>, transform_indices = @transform_4, window_bounds = array<i64: 1, 128>}, {pipeline_mode = #tpu.pipeline_mode<synchronous>, transform_indices = @transform_5, window_bounds = array<i64: 128, 128>}, {pipeline_mode = #tpu.pipeline_mode<synchronous>, transform_indices = @transform_6, window_bounds = array<i64: 1, 128>}, {pipeline_mode = #tpu.pipeline_mode<synchronous>, transform_indices = @transform_7, window_bounds = array<i64: 128, 128>}, {pipeline_mode = #tpu.pipeline_mode<synchronous>, transform_indices = @transform_8, window_bounds = array<i64: 1, 128>}, {pipeline_mode = #tpu.pipeline_mode<synchronous>, transform_indices = @transform_9, window_bounds = array<i64: 1, 128>}, {transform_indices = @transform_10, window_bounds = array<i64: 1, 128, 128>}]} {
    %c8_i32 = arith.constant 8 : i32
    %0 = arith.muli %arg1, %c8_i32 : i32
    %1 = tpu.assume_multiple %0, 8 : i32
    %c0_i32 = arith.constant 0 : i32
    %2 = arith.addi %1, %c0_i32 : i32
    %c0 = arith.constant 0 : index
    %3 = arith.index_cast %2 : i32 to index
    %c0_0 = arith.constant 0 : index
    %c0_1 = arith.constant 0 : index
    %4 = vector.load %arg2[%c0, %3, %c0_0, %c0_1] : memref<1x22x22x128xf32, #tpu.memory_space<vmem>>, vector<1x8x16x128xf32>
    %5 = vector.shape_cast %4 : vector<1x8x16x128xf32> to vector<8x16x128xf32>
    %6 = arith.truncf %5 : vector<8x16x128xf32> to vector<8x16x128xbf16>
    %c0_2 = arith.constant 0 : index
    %c0_3 = arith.constant 0 : index
    %c0_4 = arith.constant 0 : index
    %7 = vector.load %arg13[%c0_2, %c0_3, %c0_4] : memref<8x16x6272xbf16, #tpu.memory_space<vmem>>, vector<8x16x128xbf16>
    tpu.vector_store %arg13[%c0_2, %c0_3, %c0_4], %6 {strides = array<i32>} : memref<8x16x6272xbf16, #tpu.memory_space<vmem>>, vector<8x16x128xbf16>,
    %c0_i32_5 = arith.constant 0 : i32
    %8 = arith.addi %1, %c0_i32_5 : i32
    %c0_6 = arith.constant 0 : index
    %9 = arith.index_cast %8 : i32 to index
    %c1 = arith.constant 1 : index
    %c0_7 = arith.constant 0 : index
    %10 = vector.load %arg2[%c0_6, %9, %c1, %c0_7] : memref<1x22x22x128xf32, #tpu.memory_space<vmem>>, vector<1x8x16x128xf32>
    %11 = vector.shape_cast %10 : vector<1x8x16x128xf32> to vector<8x16x128xf32>
    %12 = arith.truncf %11 : vector<8x16x128xf32> to vector<8x16x128xbf16>
    %c0_8 = arith.constant 0 : index
    %c0_9 = arith.constant 0 : index
    %c128 = arith.constant 128 : index
    %13 = vector.load %arg13[%c0_8, %c0_9, %c128] : memref<8x16x6272xbf16, #tpu.memory_space<vmem>>, vector<8x16x128xbf16>
    tpu.vector_store %arg13[%c0_8, %c0_9, %c128], %12 {strides = array<i32>} : memref<8x16x6272xbf16, #tpu.memory_space<vmem>>, vector<8x16x128xbf16>,
    %c0_i32_10 = arith.constant 0 : i32
    %14 = arith.addi %1, %c0_i32_10 : i32
    %c0_11 = arith.constant 0 : index
    %15 = arith.index_cast %14 : i32 to index
    %c2 = arith.constant 2 : index
    %c0_12 = arith.constant 0 : index
    %16 = vector.load %arg2[%c0_11, %15, %c2, %c0_12] : memref<1x22x22x128xf32, #tpu.memory_space<vmem>>, vector<1x8x16x128xf32>
    %17 = vector.shape_cast %16 : vector<1x8x16x128xf32> to vector<8x16x128xf32>
    %18 = arith.truncf %17 : vector<8x16x128xf32> to vector<8x16x128xbf16>
    %c0_13 = arith.constant 0 : index
    %c0_14 = arith.constant 0 : index
    %c256 = arith.constant 256 : index
    %19 = vector.load %arg13[%c0_13, %c0_14, %c256] : memref<8x16x6272xbf16, #tpu.memory_space<vmem>>, vector<8x16x128xbf16>
    tpu.vector_store %arg13[%c0_13, %c0_14, %c256], %18 {strides = array<i32>} : memref<8x16x6272xbf16, #tpu.memory_space<vmem>>, vector<8x16x128xbf16>,
    %c0_i32_15 = arith.constant 0 : i32
    %20 = arith.addi %1, %c0_i32_15 : i32
    %c0_16 = arith.constant 0 : index
    %21 = arith.index_cast %20 : i32 to index
    %c3 = arith.constant 3 : index
    %c0_17 = arith.constant 0 : index
    %22 = vector.load %arg2[%c0_16, %21, %c3, %c0_17] : memref<1x22x22x128xf32, #tpu.memory_space<vmem>>, vector<1x8x16x128xf32>
    %23 = vector.shape_cast %22 : vector<1x8x16x128xf32> to vector<8x16x128xf32>
    %24 = arith.truncf %23 : vector<8x16x128xf32> to vector<8x16x128xbf16>
    %c0_18 = arith.constant 0 : index
    %c0_19 = arith.constant 0 : index
    %c384 = arith.constant 384 : index
    %25 = vector.load %arg13[%c0_18, %c0_19, %c384] : memref<8x16x6272xbf16, #tpu.memory_space<vmem>>, vector<8x16x128xbf16>
    tpu.vector_store %arg13[%c0_18, %c0_19, %c384], %24 {strides = array<i32>} : memref<8x16x6272xbf16, #tpu.memory_space<vmem>>, vector<8x16x128xbf16>,
    %c0_i32_20 = arith.constant 0 : i32
    %26 = arith.addi %1, %c0_i32_20 : i32
    %c0_21 = arith.constant 0 : index
    %27 = arith.index_cast %26 : i32 to index
    %c4 = arith.constant 4 : index
    %c0_22 = arith.constant 0 : index
    %28 = vector.load %arg2[%c0_21, %27, %c4, %c0_22] : memref<1x22x22x128xf32, #tpu.memory_space<vmem>>, vector<1x8x16x128xf32>
    %29 = vector.shape_cast %28 : vector<1x8x16x128xf32> to vector<8x16x128xf32>
    %30 = arith.truncf %29 : vector<8x16x128xf32> to vector<8x16x128xbf16>
    %c0_23 = arith.constant 0 : index
    %c0_24 = arith.constant 0 : index
    %c512 = arith.constant 512 : index
    %31 = vector.load %arg13[%c0_23, %c0_24, %c512] : memref<8x16x6272xbf16, #tpu.memory_space<vmem>>, vector<8x16x128xbf16>
    tpu.vector_store %arg13[%c0_23, %c0_24, %c512], %30 {strides = array<i32>} : memref<8x16x6272xbf16, #tpu.memory_space<vmem>>, vector<8x16x128xbf16>,
    %c0_i32_25 = arith.constant 0 : i32
    %32 = arith.addi %1, %c0_i32_25 : i32
    %c0_26 = arith.constant 0 : index
    %33 = arith.index_cast %32 : i32 to index
    %c5 = arith.constant 5 : index
    %c0_27 = arith.constant 0 : index
    %34 = vector.load %arg2[%c0_26, %33, %c5, %c0_27] : memref<1x22x22x128xf32, #tpu.memory_space<vmem>>, vector<1x8x16x128xf32>
    %35 = vector.shape_cast %34 : vector<1x8x16x128xf32> to vector<8x16x128xf32>
    %36 = arith.truncf %35 : vector<8x16x128xf32> to vector<8x16x128xbf16>
    %c0_28 = arith.constant 0 : index
    %c0_29 = arith.constant 0 : index
    %c640 = arith.constant 640 : index
    %37 = vector.load %arg13[%c0_28, %c0_29, %c640] : memref<8x16x6272xbf16, #tpu.memory_space<vmem>>, vector<8x16x128xbf16>
    tpu.vector_store %arg13[%c0_28, %c0_29, %c640], %36 {strides = array<i32>} : memref<8x16x6272xbf16, #tpu.memory_space<vmem>>, vector<8x16x128xbf16>,
    %c0_i32_30 = arith.constant 0 : i32
    %38 = arith.addi %1, %c0_i32_30 : i32
    %c0_31 = arith.constant 0 : index
    %39 = arith.index_cast %38 : i32 to index
    %c6 = arith.constant 6 : index
    %c0_32 = arith.constant 0 : index
    %40 = vector.load %arg2[%c0_31, %39, %c6, %c0_32] : memref<1x22x22x128xf32, #tpu.memory_space<vmem>>, vector<1x8x16x128xf32>
    %41 = vector.shape_cast %40 : vector<1x8x16x128xf32> to vector<8x16x128xf32>
    %42 = arith.truncf %41 : vector<8x16x128xf32> to vector<8x16x128xbf16>
    %c0_33 = arith.constant 0 : index
    %c0_34 = arith.constant 0 : index
    %c768 = arith.constant 768 : index
    %43 = vector.load %arg13[%c0_33, %c0_34, %c768] : memref<8x16x6272xbf16, #tpu.memory_space<vmem>>, vector<8x16x128xbf16>
    tpu.vector_store %arg13[%c0_33, %c0_34, %c768], %42 {strides = array<i32>} : memref<8x16x6272xbf16, #tpu.memory_space<vmem>>, vector<8x16x128xbf16>,
    %c1_i32 = arith.constant 1 : i32
    %44 = arith.addi %1, %c1_i32 : i32
    %c0_35 = arith.constant 0 : index
    %45 = arith.index_cast %44 : i32 to index
    %c0_36 = arith.constant 0 : index
    %c0_37 = arith.constant 0 : index
    %46 = vector.load %arg2[%c0_35, %45, %c0_36, %c0_37] : memref<1x22x22x128xf32, #tpu.memory_space<vmem>>, vector<1x8x16x128xf32>
    %47 = vector.shape_cast %46 : vector<1x8x16x128xf32> to vector<8x16x128xf32>
    %48 = arith.truncf %47 : vector<8x16x128xf32> to vector<8x16x128xbf16>
    %c0_38 = arith.constant 0 : index
    %c0_39 = arith.constant 0 : index
    %c896 = arith.constant 896 : index
    %49 = vector.load %arg13[%c0_38, %c0_39, %c896] : memref<8x16x6272xbf16, #tpu.memory_space<vmem>>, vector<8x16x128xbf16>
    tpu.vector_store %arg13[%c0_38, %c0_39, %c896], %48 {strides = array<i32>} : memref<8x16x6272xbf16, #tpu.memory_space<vmem>>, vector<8x16x128xbf16>,
    %c1_i32_40 = arith.constant 1 : i32
    %50 = arith.addi %1, %c1_i32_40 : i32
    %c0_41 = arith.constant 0 : index
    %51 = arith.index_cast %50 : i32 to index
    %c1_42 = arith.constant 1 : index
    %c0_43 = arith.constant 0 : index
    %52 = vector.load %arg2[%c0_41, %51, %c1_42, %c0_43] : memref<1x22x22x128xf32, #tpu.memory_space<vmem>>, vector<1x8x16x128xf32>
    %53 = vector.shape_cast %52 : vector<1x8x16x128xf32> to vector<8x16x128xf32>
    %54 = arith.truncf %53 : vector<8x16x128xf32> to vector<8x16x128xbf16>
    %c0_44 = arith.constant 0 : index
    %c0_45 = arith.constant 0 : index
    %c1024 = arith.constant 1024 : index
    %55 = vector.load %arg13[%c0_44, %c0_45, %c1024] : memref<8x16x6272xbf16, #tpu.memory_space<vmem>>, vector<8x16x128xbf16>
    tpu.vector_store %arg13[%c0_44, %c0_45, %c1024], %54 {strides = array<i32>} : memref<8x16x6272xbf16, #tpu.memory_space<vmem>>, vector<8x16x128xbf16>,
    %c1_i32_46 = arith.constant 1 : i32
    %56 = arith.addi %1, %c1_i32_46 : i32
    %c0_47 = arith.constant 0 : index
    %57 = arith.index_cast %56 : i32 to index
    %c2_48 = arith.constant 2 : index
    %c0_49 = arith.constant 0 : index
    %58 = vector.load %arg2[%c0_47, %57, %c2_48, %c0_49] : memref<1x22x22x128xf32, #tpu.memory_space<vmem>>, vector<1x8x16x128xf32>
    %59 = vector.shape_cast %58 : vector<1x8x16x128xf32> to vector<8x16x128xf32>
    %60 = arith.truncf %59 : vector<8x16x128xf32> to vector<8x16x128xbf16>
    %c0_50 = arith.constant 0 : index
    %c0_51 = arith.constant 0 : index
    %c1152 = arith.constant 1152 : index
    %61 = vector.load %arg13[%c0_50, %c0_51, %c1152] : memref<8x16x6272xbf16, #tpu.memory_space<vmem>>, vector<8x16x128xbf16>
    tpu.vector_store %arg13[%c0_50, %c0_51, %c1152], %60 {strides = array<i32>} : memref<8x16x6272xbf16, #tpu.memory_space<vmem>>, vector<8x16x128xbf16>,
    %c1_i32_52 = arith.constant 1 : i32
    %62 = arith.addi %1, %c1_i32_52 : i32
    %c0_53 = arith.constant 0 : index
    %63 = arith.index_cast %62 : i32 to index
    %c3_54 = arith.constant 3 : index
    %c0_55 = arith.constant 0 : index
    %64 = vector.load %arg2[%c0_53, %63, %c3_54, %c0_55] : memref<1x22x22x128xf32, #tpu.memory_space<vmem>>, vector<1x8x16x128xf32>
    %65 = vector.shape_cast %64 : vector<1x8x16x128xf32> to vector<8x16x128xf32>
    %66 = arith.truncf %65 : vector<8x16x128xf32> to vector<8x16x128xbf16>
    %c0_56 = arith.constant 0 : index
    %c0_57 = arith.constant 0 : index
    %c1280 = arith.constant 1280 : index
    %67 = vector.load %arg13[%c0_56, %c0_57, %c1280] : memref<8x16x6272xbf16, #tpu.memory_space<vmem>>, vector<8x16x128xbf16>
    tpu.vector_store %arg13[%c0_56, %c0_57, %c1280], %66 {strides = array<i32>} : memref<8x16x6272xbf16, #tpu.memory_space<vmem>>, vector<8x16x128xbf16>,
    %c1_i32_58 = arith.constant 1 : i32
    %68 = arith.addi %1, %c1_i32_58 : i32
    %c0_59 = arith.constant 0 : index
    %69 = arith.index_cast %68 : i32 to index
    %c4_60 = arith.constant 4 : index
    %c0_61 = arith.constant 0 : index
    %70 = vector.load %arg2[%c0_59, %69, %c4_60, %c0_61] : memref<1x22x22x128xf32, #tpu.memory_space<vmem>>, vector<1x8x16x128xf32>
    %71 = vector.shape_cast %70 : vector<1x8x16x128xf32> to vector<8x16x128xf32>
    %72 = arith.truncf %71 : vector<8x16x128xf32> to vector<8x16x128xbf16>
    %c0_62 = arith.constant 0 : index
    %c0_63 = arith.constant 0 : index
    %c1408 = arith.constant 1408 : index
    %73 = vector.load %arg13[%c0_62, %c0_63, %c1408] : memref<8x16x6272xbf16, #tpu.memory_space<vmem>>, vector<8x16x128xbf16>
    tpu.vector_store %arg13[%c0_62, %c0_63, %c1408], %72 {strides = array<i32>} : memref<8x16x6272xbf16, #tpu.memory_space<vmem>>, vector<8x16x128xbf16>,
    %c1_i32_64 = arith.constant 1 : i32
    %74 = arith.addi %1, %c1_i32_64 : i32
    %c0_65 = arith.constant 0 : index
    %75 = arith.index_cast %74 : i32 to index
    %c5_66 = arith.constant 5 : index
    %c0_67 = arith.constant 0 : index
    %76 = vector.load %arg2[%c0_65, %75, %c5_66, %c0_67] : memref<1x22x22x128xf32, #tpu.memory_space<vmem>>, vector<1x8x16x128xf32>
    %77 = vector.shape_cast %76 : vector<1x8x16x128xf32> to vector<8x16x128xf32>
    %78 = arith.truncf %77 : vector<8x16x128xf32> to vector<8x16x128xbf16>
    %c0_68 = arith.constant 0 : index
    %c0_69 = arith.constant 0 : index
    %c1536 = arith.constant 1536 : index
    %79 = vector.load %arg13[%c0_68, %c0_69, %c1536] : memref<8x16x6272xbf16, #tpu.memory_space<vmem>>, vector<8x16x128xbf16>
    tpu.vector_store %arg13[%c0_68, %c0_69, %c1536], %78 {strides = array<i32>} : memref<8x16x6272xbf16, #tpu.memory_space<vmem>>, vector<8x16x128xbf16>,
    %c1_i32_70 = arith.constant 1 : i32
    %80 = arith.addi %1, %c1_i32_70 : i32
    %c0_71 = arith.constant 0 : index
    %81 = arith.index_cast %80 : i32 to index
    %c6_72 = arith.constant 6 : index
    %c0_73 = arith.constant 0 : index
    %82 = vector.load %arg2[%c0_71, %81, %c6_72, %c0_73] : memref<1x22x22x128xf32, #tpu.memory_space<vmem>>, vector<1x8x16x128xf32>
    %83 = vector.shape_cast %82 : vector<1x8x16x128xf32> to vector<8x16x128xf32>
    %84 = arith.truncf %83 : vector<8x16x128xf32> to vector<8x16x128xbf16>
    %c0_74 = arith.constant 0 : index
    %c0_75 = arith.constant 0 : index
    %c1664 = arith.constant 1664 : index
    %85 = vector.load %arg13[%c0_74, %c0_75, %c1664] : memref<8x16x6272xbf16, #tpu.memory_space<vmem>>, vector<8x16x128xbf16>
    tpu.vector_store %arg13[%c0_74, %c0_75, %c1664], %84 {strides = array<i32>} : memref<8x16x6272xbf16, #tpu.memory_space<vmem>>, vector<8x16x128xbf16>,
    %c2_i32 = arith.constant 2 : i32
    %86 = arith.addi %1, %c2_i32 : i32
    %c0_76 = arith.constant 0 : index
    %87 = arith.index_cast %86 : i32 to index
    %c0_77 = arith.constant 0 : index
    %c0_78 = arith.constant 0 : index
    %88 = vector.load %arg2[%c0_76, %87, %c0_77, %c0_78] : memref<1x22x22x128xf32, #tpu.memory_space<vmem>>, vector<1x8x16x128xf32>
    %89 = vector.shape_cast %88 : vector<1x8x16x128xf32> to vector<8x16x128xf32>
    %90 = arith.truncf %89 : vector<8x16x128xf32> to vector<8x16x128xbf16>
    %c0_79 = arith.constant 0 : index
    %c0_80 = arith.constant 0 : index
    %c1792 = arith.constant 1792 : index
    %91 = vector.load %arg13[%c0_79, %c0_80, %c1792] : memref<8x16x6272xbf16, #tpu.memory_space<vmem>>, vector<8x16x128xbf16>
    tpu.vector_store %arg13[%c0_79, %c0_80, %c1792], %90 {strides = array<i32>} : memref<8x16x6272xbf16, #tpu.memory_space<vmem>>, vector<8x16x128xbf16>,
    %c2_i32_81 = arith.constant 2 : i32
    %92 = arith.addi %1, %c2_i32_81 : i32
    %c0_82 = arith.constant 0 : index
    %93 = arith.index_cast %92 : i32 to index
    %c1_83 = arith.constant 1 : index
    %c0_84 = arith.constant 0 : index
    %94 = vector.load %arg2[%c0_82, %93, %c1_83, %c0_84] : memref<1x22x22x128xf32, #tpu.memory_space<vmem>>, vector<1x8x16x128xf32>
    %95 = vector.shape_cast %94 : vector<1x8x16x128xf32> to vector<8x16x128xf32>
    %96 = arith.truncf %95 : vector<8x16x128xf32> to vector<8x16x128xbf16>
    %c0_85 = arith.constant 0 : index
    %c0_86 = arith.constant 0 : index
    %c1920 = arith.constant 1920 : index
    %97 = vector.load %arg13[%c0_85, %c0_86, %c1920] : memref<8x16x6272xbf16, #tpu.memory_space<vmem>>, vector<8x16x128xbf16>
    tpu.vector_store %arg13[%c0_85, %c0_86, %c1920], %96 {strides = array<i32>} : memref<8x16x6272xbf16, #tpu.memory_space<vmem>>, vector<8x16x128xbf16>,
    %c2_i32_87 = arith.constant 2 : i32
    %98 = arith.addi %1, %c2_i32_87 : i32
    %c0_88 = arith.constant 0 : index
    %99 = arith.index_cast %98 : i32 to index
    %c2_89 = arith.constant 2 : index
    %c0_90 = arith.constant 0 : index
    %100 = vector.load %arg2[%c0_88, %99, %c2_89, %c0_90] : memref<1x22x22x128xf32, #tpu.memory_space<vmem>>, vector<1x8x16x128xf32>
    %101 = vector.shape_cast %100 : vector<1x8x16x128xf32> to vector<8x16x128xf32>
    %102 = arith.truncf %101 : vector<8x16x128xf32> to vector<8x16x128xbf16>
    %c0_91 = arith.constant 0 : index
    %c0_92 = arith.constant 0 : index
    %c2048 = arith.constant 2048 : index
    %103 = vector.load %arg13[%c0_91, %c0_92, %c2048] : memref<8x16x6272xbf16, #tpu.memory_space<vmem>>, vector<8x16x128xbf16>
    tpu.vector_store %arg13[%c0_91, %c0_92, %c2048], %102 {strides = array<i32>} : memref<8x16x6272xbf16, #tpu.memory_space<vmem>>, vector<8x16x128xbf16>,
    %c2_i32_93 = arith.constant 2 : i32
    %104 = arith.addi %1, %c2_i32_93 : i32
    %c0_94 = arith.constant 0 : index
    %105 = arith.index_cast %104 : i32 to index
    %c3_95 = arith.constant 3 : index
    %c0_96 = arith.constant 0 : index
    %106 = vector.load %arg2[%c0_94, %105, %c3_95, %c0_96] : memref<1x22x22x128xf32, #tpu.memory_space<vmem>>, vector<1x8x16x128xf32>
    %107 = vector.shape_cast %106 : vector<1x8x16x128xf32> to vector<8x16x128xf32>
    %108 = arith.truncf %107 : vector<8x16x128xf32> to vector<8x16x128xbf16>
    %c0_97 = arith.constant 0 : index
    %c0_98 = arith.constant 0 : index
    %c2176 = arith.constant 2176 : index
    %109 = vector.load %arg13[%c0_97, %c0_98, %c2176] : memref<8x16x6272xbf16, #tpu.memory_space<vmem>>, vector<8x16x128xbf16>
    tpu.vector_store %arg13[%c0_97, %c0_98, %c2176], %108 {strides = array<i32>} : memref<8x16x6272xbf16, #tpu.memory_space<vmem>>, vector<8x16x128xbf16>,
    %c2_i32_99 = arith.constant 2 : i32
    %110 = arith.addi %1, %c2_i32_99 : i32
    %c0_100 = arith.constant 0 : index
    %111 = arith.index_cast %110 : i32 to index
    %c4_101 = arith.constant 4 : index
    %c0_102 = arith.constant 0 : index
    %112 = vector.load %arg2[%c0_100, %111, %c4_101, %c0_102] : memref<1x22x22x128xf32, #tpu.memory_space<vmem>>, vector<1x8x16x128xf32>
    %113 = vector.shape_cast %112 : vector<1x8x16x128xf32> to vector<8x16x128xf32>
    %114 = arith.truncf %113 : vector<8x16x128xf32> to vector<8x16x128xbf16>
    %c0_103 = arith.constant 0 : index
    %c0_104 = arith.constant 0 : index
    %c2304 = arith.constant 2304 : index
    %115 = vector.load %arg13[%c0_103, %c0_104, %c2304] : memref<8x16x6272xbf16, #tpu.memory_space<vmem>>, vector<8x16x128xbf16>
    tpu.vector_store %arg13[%c0_103, %c0_104, %c2304], %114 {strides = array<i32>} : memref<8x16x6272xbf16, #tpu.memory_space<vmem>>, vector<8x16x128xbf16>,
    %c2_i32_105 = arith.constant 2 : i32
    %116 = arith.addi %1, %c2_i32_105 : i32
    %c0_106 = arith.constant 0 : index
    %117 = arith.index_cast %116 : i32 to index
    %c5_107 = arith.constant 5 : index
    %c0_108 = arith.constant 0 : index
    %118 = vector.load %arg2[%c0_106, %117, %c5_107, %c0_108] : memref<1x22x22x128xf32, #tpu.memory_space<vmem>>, vector<1x8x16x128xf32>
    %119 = vector.shape_cast %118 : vector<1x8x16x128xf32> to vector<8x16x128xf32>
    %120 = arith.truncf %119 : vector<8x16x128xf32> to vector<8x16x128xbf16>
    %c0_109 = arith.constant 0 : index
    %c0_110 = arith.constant 0 : index
    %c2432 = arith.constant 2432 : index
    %121 = vector.load %arg13[%c0_109, %c0_110, %c2432] : memref<8x16x6272xbf16, #tpu.memory_space<vmem>>, vector<8x16x128xbf16>
    tpu.vector_store %arg13[%c0_109, %c0_110, %c2432], %120 {strides = array<i32>} : memref<8x16x6272xbf16, #tpu.memory_space<vmem>>, vector<8x16x128xbf16>,
    %c2_i32_111 = arith.constant 2 : i32
    %122 = arith.addi %1, %c2_i32_111 : i32
    %c0_112 = arith.constant 0 : index
    %123 = arith.index_cast %122 : i32 to index
    %c6_113 = arith.constant 6 : index
    %c0_114 = arith.constant 0 : index
    %124 = vector.load %arg2[%c0_112, %123, %c6_113, %c0_114] : memref<1x22x22x128xf32, #tpu.memory_space<vmem>>, vector<1x8x16x128xf32>
    %125 = vector.shape_cast %124 : vector<1x8x16x128xf32> to vector<8x16x128xf32>
    %126 = arith.truncf %125 : vector<8x16x128xf32> to vector<8x16x128xbf16>
    %c0_115 = arith.constant 0 : index
    %c0_116 = arith.constant 0 : index
    %c2560 = arith.constant 2560 : index
    %127 = vector.load %arg13[%c0_115, %c0_116, %c2560] : memref<8x16x6272xbf16, #tpu.memory_space<vmem>>, vector<8x16x128xbf16>
    tpu.vector_store %arg13[%c0_115, %c0_116, %c2560], %126 {strides = array<i32>} : memref<8x16x6272xbf16, #tpu.memory_space<vmem>>, vector<8x16x128xbf16>,
    %c3_i32 = arith.constant 3 : i32
    %128 = arith.addi %1, %c3_i32 : i32
    %c0_117 = arith.constant 0 : index
    %129 = arith.index_cast %128 : i32 to index
    %c0_118 = arith.constant 0 : index
    %c0_119 = arith.constant 0 : index
    %130 = vector.load %arg2[%c0_117, %129, %c0_118, %c0_119] : memref<1x22x22x128xf32, #tpu.memory_space<vmem>>, vector<1x8x16x128xf32>
    %131 = vector.shape_cast %130 : vector<1x8x16x128xf32> to vector<8x16x128xf32>
    %132 = arith.truncf %131 : vector<8x16x128xf32> to vector<8x16x128xbf16>
    %c0_120 = arith.constant 0 : index
    %c0_121 = arith.constant 0 : index
    %c2688 = arith.constant 2688 : index
    %133 = vector.load %arg13[%c0_120, %c0_121, %c2688] : memref<8x16x6272xbf16, #tpu.memory_space<vmem>>, vector<8x16x128xbf16>
    tpu.vector_store %arg13[%c0_120, %c0_121, %c2688], %132 {strides = array<i32>} : memref<8x16x6272xbf16, #tpu.memory_space<vmem>>, vector<8x16x128xbf16>,
    %c3_i32_122 = arith.constant 3 : i32
    %134 = arith.addi %1, %c3_i32_122 : i32
    %c0_123 = arith.constant 0 : index
    %135 = arith.index_cast %134 : i32 to index
    %c1_124 = arith.constant 1 : index
    %c0_125 = arith.constant 0 : index
    %136 = vector.load %arg2[%c0_123, %135, %c1_124, %c0_125] : memref<1x22x22x128xf32, #tpu.memory_space<vmem>>, vector<1x8x16x128xf32>
    %137 = vector.shape_cast %136 : vector<1x8x16x128xf32> to vector<8x16x128xf32>
    %138 = arith.truncf %137 : vector<8x16x128xf32> to vector<8x16x128xbf16>
    %c0_126 = arith.constant 0 : index
    %c0_127 = arith.constant 0 : index
    %c2816 = arith.constant 2816 : index
    %139 = vector.load %arg13[%c0_126, %c0_127, %c2816] : memref<8x16x6272xbf16, #tpu.memory_space<vmem>>, vector<8x16x128xbf16>
    tpu.vector_store %arg13[%c0_126, %c0_127, %c2816], %138 {strides = array<i32>} : memref<8x16x6272xbf16, #tpu.memory_space<vmem>>, vector<8x16x128xbf16>,
    %c3_i32_128 = arith.constant 3 : i32
    %140 = arith.addi %1, %c3_i32_128 : i32
    %c0_129 = arith.constant 0 : index
    %141 = arith.index_cast %140 : i32 to index
    %c2_130 = arith.constant 2 : index
    %c0_131 = arith.constant 0 : index
    %142 = vector.load %arg2[%c0_129, %141, %c2_130, %c0_131] : memref<1x22x22x128xf32, #tpu.memory_space<vmem>>, vector<1x8x16x128xf32>
    %143 = vector.shape_cast %142 : vector<1x8x16x128xf32> to vector<8x16x128xf32>
    %144 = arith.truncf %143 : vector<8x16x128xf32> to vector<8x16x128xbf16>
    %c0_132 = arith.constant 0 : index
    %c0_133 = arith.constant 0 : index
    %c2944 = arith.constant 2944 : index
    %145 = vector.load %arg13[%c0_132, %c0_133, %c2944] : memref<8x16x6272xbf16, #tpu.memory_space<vmem>>, vector<8x16x128xbf16>
    tpu.vector_store %arg13[%c0_132, %c0_133, %c2944], %144 {strides = array<i32>} : memref<8x16x6272xbf16, #tpu.memory_space<vmem>>, vector<8x16x128xbf16>,
    %c3_i32_134 = arith.constant 3 : i32
    %146 = arith.addi %1, %c3_i32_134 : i32
    %c0_135 = arith.constant 0 : index
    %147 = arith.index_cast %146 : i32 to index
    %c3_136 = arith.constant 3 : index
    %c0_137 = arith.constant 0 : index
    %148 = vector.load %arg2[%c0_135, %147, %c3_136, %c0_137] : memref<1x22x22x128xf32, #tpu.memory_space<vmem>>, vector<1x8x16x128xf32>
    %149 = vector.shape_cast %148 : vector<1x8x16x128xf32> to vector<8x16x128xf32>
    %150 = arith.truncf %149 : vector<8x16x128xf32> to vector<8x16x128xbf16>
    %c0_138 = arith.constant 0 : index
    %c0_139 = arith.constant 0 : index
    %c3072 = arith.constant 3072 : index
    %151 = vector.load %arg13[%c0_138, %c0_139, %c3072] : memref<8x16x6272xbf16, #tpu.memory_space<vmem>>, vector<8x16x128xbf16>
    tpu.vector_store %arg13[%c0_138, %c0_139, %c3072], %150 {strides = array<i32>} : memref<8x16x6272xbf16, #tpu.memory_space<vmem>>, vector<8x16x128xbf16>,
    %c3_i32_140 = arith.constant 3 : i32
    %152 = arith.addi %1, %c3_i32_140 : i32
    %c0_141 = arith.constant 0 : index
    %153 = arith.index_cast %152 : i32 to index
    %c4_142 = arith.constant 4 : index
    %c0_143 = arith.constant 0 : index
    %154 = vector.load %arg2[%c0_141, %153, %c4_142, %c0_143] : memref<1x22x22x128xf32, #tpu.memory_space<vmem>>, vector<1x8x16x128xf32>
    %155 = vector.shape_cast %154 : vector<1x8x16x128xf32> to vector<8x16x128xf32>
    %156 = arith.truncf %155 : vector<8x16x128xf32> to vector<8x16x128xbf16>
    %c0_144 = arith.constant 0 : index
    %c0_145 = arith.constant 0 : index
    %c3200 = arith.constant 3200 : index
    %157 = vector.load %arg13[%c0_144, %c0_145, %c3200] : memref<8x16x6272xbf16, #tpu.memory_space<vmem>>, vector<8x16x128xbf16>
    tpu.vector_store %arg13[%c0_144, %c0_145, %c3200], %156 {strides = array<i32>} : memref<8x16x6272xbf16, #tpu.memory_space<vmem>>, vector<8x16x128xbf16>,
    %c3_i32_146 = arith.constant 3 : i32
    %158 = arith.addi %1, %c3_i32_146 : i32
    %c0_147 = arith.constant 0 : index
    %159 = arith.index_cast %158 : i32 to index
    %c5_148 = arith.constant 5 : index
    %c0_149 = arith.constant 0 : index
    %160 = vector.load %arg2[%c0_147, %159, %c5_148, %c0_149] : memref<1x22x22x128xf32, #tpu.memory_space<vmem>>, vector<1x8x16x128xf32>
    %161 = vector.shape_cast %160 : vector<1x8x16x128xf32> to vector<8x16x128xf32>
    %162 = arith.truncf %161 : vector<8x16x128xf32> to vector<8x16x128xbf16>
    %c0_150 = arith.constant 0 : index
    %c0_151 = arith.constant 0 : index
    %c3328 = arith.constant 3328 : index
    %163 = vector.load %arg13[%c0_150, %c0_151, %c3328] : memref<8x16x6272xbf16, #tpu.memory_space<vmem>>, vector<8x16x128xbf16>
    tpu.vector_store %arg13[%c0_150, %c0_151, %c3328], %162 {strides = array<i32>} : memref<8x16x6272xbf16, #tpu.memory_space<vmem>>, vector<8x16x128xbf16>,
    %c3_i32_152 = arith.constant 3 : i32
    %164 = arith.addi %1, %c3_i32_152 : i32
    %c0_153 = arith.constant 0 : index
    %165 = arith.index_cast %164 : i32 to index
    %c6_154 = arith.constant 6 : index
    %c0_155 = arith.constant 0 : index
    %166 = vector.load %arg2[%c0_153, %165, %c6_154, %c0_155] : memref<1x22x22x128xf32, #tpu.memory_space<vmem>>, vector<1x8x16x128xf32>
    %167 = vector.shape_cast %166 : vector<1x8x16x128xf32> to vector<8x16x128xf32>
    %168 = arith.truncf %167 : vector<8x16x128xf32> to vector<8x16x128xbf16>
    %c0_156 = arith.constant 0 : index
    %c0_157 = arith.constant 0 : index
    %c3456 = arith.constant 3456 : index
    %169 = vector.load %arg13[%c0_156, %c0_157, %c3456] : memref<8x16x6272xbf16, #tpu.memory_space<vmem>>, vector<8x16x128xbf16>
    tpu.vector_store %arg13[%c0_156, %c0_157, %c3456], %168 {strides = array<i32>} : memref<8x16x6272xbf16, #tpu.memory_space<vmem>>, vector<8x16x128xbf16>,
    %c4_i32 = arith.constant 4 : i32
    %170 = arith.addi %1, %c4_i32 : i32
    %c0_158 = arith.constant 0 : index
    %171 = arith.index_cast %170 : i32 to index
    %c0_159 = arith.constant 0 : index
    %c0_160 = arith.constant 0 : index
    %172 = vector.load %arg2[%c0_158, %171, %c0_159, %c0_160] : memref<1x22x22x128xf32, #tpu.memory_space<vmem>>, vector<1x8x16x128xf32>
    %173 = vector.shape_cast %172 : vector<1x8x16x128xf32> to vector<8x16x128xf32>
    %174 = arith.truncf %173 : vector<8x16x128xf32> to vector<8x16x128xbf16>
    %c0_161 = arith.constant 0 : index
    %c0_162 = arith.constant 0 : index
    %c3584 = arith.constant 3584 : index
    %175 = vector.load %arg13[%c0_161, %c0_162, %c3584] : memref<8x16x6272xbf16, #tpu.memory_space<vmem>>, vector<8x16x128xbf16>
    tpu.vector_store %arg13[%c0_161, %c0_162, %c3584], %174 {strides = array<i32>} : memref<8x16x6272xbf16, #tpu.memory_space<vmem>>, vector<8x16x128xbf16>,
    %c4_i32_163 = arith.constant 4 : i32
    %176 = arith.addi %1, %c4_i32_163 : i32
    %c0_164 = arith.constant 0 : index
    %177 = arith.index_cast %176 : i32 to index
    %c1_165 = arith.constant 1 : index
    %c0_166 = arith.constant 0 : index
    %178 = vector.load %arg2[%c0_164, %177, %c1_165, %c0_166] : memref<1x22x22x128xf32, #tpu.memory_space<vmem>>, vector<1x8x16x128xf32>
    %179 = vector.shape_cast %178 : vector<1x8x16x128xf32> to vector<8x16x128xf32>
    %180 = arith.truncf %179 : vector<8x16x128xf32> to vector<8x16x128xbf16>
    %c0_167 = arith.constant 0 : index
    %c0_168 = arith.constant 0 : index
    %c3712 = arith.constant 3712 : index
    %181 = vector.load %arg13[%c0_167, %c0_168, %c3712] : memref<8x16x6272xbf16, #tpu.memory_space<vmem>>, vector<8x16x128xbf16>
    tpu.vector_store %arg13[%c0_167, %c0_168, %c3712], %180 {strides = array<i32>} : memref<8x16x6272xbf16, #tpu.memory_space<vmem>>, vector<8x16x128xbf16>,
    %c4_i32_169 = arith.constant 4 : i32
    %182 = arith.addi %1, %c4_i32_169 : i32
    %c0_170 = arith.constant 0 : index
    %183 = arith.index_cast %182 : i32 to index
    %c2_171 = arith.constant 2 : index
    %c0_172 = arith.constant 0 : index
    %184 = vector.load %arg2[%c0_170, %183, %c2_171, %c0_172] : memref<1x22x22x128xf32, #tpu.memory_space<vmem>>, vector<1x8x16x128xf32>
    %185 = vector.shape_cast %184 : vector<1x8x16x128xf32> to vector<8x16x128xf32>
    %186 = arith.truncf %185 : vector<8x16x128xf32> to vector<8x16x128xbf16>
    %c0_173 = arith.constant 0 : index
    %c0_174 = arith.constant 0 : index
    %c3840 = arith.constant 3840 : index
    %187 = vector.load %arg13[%c0_173, %c0_174, %c3840] : memref<8x16x6272xbf16, #tpu.memory_space<vmem>>, vector<8x16x128xbf16>
    tpu.vector_store %arg13[%c0_173, %c0_174, %c3840], %186 {strides = array<i32>} : memref<8x16x6272xbf16, #tpu.memory_space<vmem>>, vector<8x16x128xbf16>,
    %c4_i32_175 = arith.constant 4 : i32
    %188 = arith.addi %1, %c4_i32_175 : i32
    %c0_176 = arith.constant 0 : index
    %189 = arith.index_cast %188 : i32 to index
    %c3_177 = arith.constant 3 : index
    %c0_178 = arith.constant 0 : index
    %190 = vector.load %arg2[%c0_176, %189, %c3_177, %c0_178] : memref<1x22x22x128xf32, #tpu.memory_space<vmem>>, vector<1x8x16x128xf32>
    %191 = vector.shape_cast %190 : vector<1x8x16x128xf32> to vector<8x16x128xf32>
    %192 = arith.truncf %191 : vector<8x16x128xf32> to vector<8x16x128xbf16>
    %c0_179 = arith.constant 0 : index
    %c0_180 = arith.constant 0 : index
    %c3968 = arith.constant 3968 : index
    %193 = vector.load %arg13[%c0_179, %c0_180, %c3968] : memref<8x16x6272xbf16, #tpu.memory_space<vmem>>, vector<8x16x128xbf16>
    tpu.vector_store %arg13[%c0_179, %c0_180, %c3968], %192 {strides = array<i32>} : memref<8x16x6272xbf16, #tpu.memory_space<vmem>>, vector<8x16x128xbf16>,
    %c4_i32_181 = arith.constant 4 : i32
    %194 = arith.addi %1, %c4_i32_181 : i32
    %c0_182 = arith.constant 0 : index
    %195 = arith.index_cast %194 : i32 to index
    %c4_183 = arith.constant 4 : index
    %c0_184 = arith.constant 0 : index
    %196 = vector.load %arg2[%c0_182, %195, %c4_183, %c0_184] : memref<1x22x22x128xf32, #tpu.memory_space<vmem>>, vector<1x8x16x128xf32>
    %197 = vector.shape_cast %196 : vector<1x8x16x128xf32> to vector<8x16x128xf32>
    %198 = arith.truncf %197 : vector<8x16x128xf32> to vector<8x16x128xbf16>
    %c0_185 = arith.constant 0 : index
    %c0_186 = arith.constant 0 : index
    %c4096 = arith.constant 4096 : index
    %199 = vector.load %arg13[%c0_185, %c0_186, %c4096] : memref<8x16x6272xbf16, #tpu.memory_space<vmem>>, vector<8x16x128xbf16>
    tpu.vector_store %arg13[%c0_185, %c0_186, %c4096], %198 {strides = array<i32>} : memref<8x16x6272xbf16, #tpu.memory_space<vmem>>, vector<8x16x128xbf16>,
    %c4_i32_187 = arith.constant 4 : i32
    %200 = arith.addi %1, %c4_i32_187 : i32
    %c0_188 = arith.constant 0 : index
    %201 = arith.index_cast %200 : i32 to index
    %c5_189 = arith.constant 5 : index
    %c0_190 = arith.constant 0 : index
    %202 = vector.load %arg2[%c0_188, %201, %c5_189, %c0_190] : memref<1x22x22x128xf32, #tpu.memory_space<vmem>>, vector<1x8x16x128xf32>
    %203 = vector.shape_cast %202 : vector<1x8x16x128xf32> to vector<8x16x128xf32>
    %204 = arith.truncf %203 : vector<8x16x128xf32> to vector<8x16x128xbf16>
    %c0_191 = arith.constant 0 : index
    %c0_192 = arith.constant 0 : index
    %c4224 = arith.constant 4224 : index
    %205 = vector.load %arg13[%c0_191, %c0_192, %c4224] : memref<8x16x6272xbf16, #tpu.memory_space<vmem>>, vector<8x16x128xbf16>
    tpu.vector_store %arg13[%c0_191, %c0_192, %c4224], %204 {strides = array<i32>} : memref<8x16x6272xbf16, #tpu.memory_space<vmem>>, vector<8x16x128xbf16>,
    %c4_i32_193 = arith.constant 4 : i32
    %206 = arith.addi %1, %c4_i32_193 : i32
    %c0_194 = arith.constant 0 : index
    %207 = arith.index_cast %206 : i32 to index
    %c6_195 = arith.constant 6 : index
    %c0_196 = arith.constant 0 : index
    %208 = vector.load %arg2[%c0_194, %207, %c6_195, %c0_196] : memref<1x22x22x128xf32, #tpu.memory_space<vmem>>, vector<1x8x16x128xf32>
    %209 = vector.shape_cast %208 : vector<1x8x16x128xf32> to vector<8x16x128xf32>
    %210 = arith.truncf %209 : vector<8x16x128xf32> to vector<8x16x128xbf16>
    %c0_197 = arith.constant 0 : index
    %c0_198 = arith.constant 0 : index
    %c4352 = arith.constant 4352 : index
    %211 = vector.load %arg13[%c0_197, %c0_198, %c4352] : memref<8x16x6272xbf16, #tpu.memory_space<vmem>>, vector<8x16x128xbf16>
    tpu.vector_store %arg13[%c0_197, %c0_198, %c4352], %210 {strides = array<i32>} : memref<8x16x6272xbf16, #tpu.memory_space<vmem>>, vector<8x16x128xbf16>,
    %c5_i32 = arith.constant 5 : i32
    %212 = arith.addi %1, %c5_i32 : i32
    %c0_199 = arith.constant 0 : index
    %213 = arith.index_cast %212 : i32 to index
    %c0_200 = arith.constant 0 : index
    %c0_201 = arith.constant 0 : index
    %214 = vector.load %arg2[%c0_199, %213, %c0_200, %c0_201] : memref<1x22x22x128xf32, #tpu.memory_space<vmem>>, vector<1x8x16x128xf32>
    %215 = vector.shape_cast %214 : vector<1x8x16x128xf32> to vector<8x16x128xf32>
    %216 = arith.truncf %215 : vector<8x16x128xf32> to vector<8x16x128xbf16>
    %c0_202 = arith.constant 0 : index
    %c0_203 = arith.constant 0 : index
    %c4480 = arith.constant 4480 : index
    %217 = vector.load %arg13[%c0_202, %c0_203, %c4480] : memref<8x16x6272xbf16, #tpu.memory_space<vmem>>, vector<8x16x128xbf16>
    tpu.vector_store %arg13[%c0_202, %c0_203, %c4480], %216 {strides = array<i32>} : memref<8x16x6272xbf16, #tpu.memory_space<vmem>>, vector<8x16x128xbf16>,
    %c5_i32_204 = arith.constant 5 : i32
    %218 = arith.addi %1, %c5_i32_204 : i32
    %c0_205 = arith.constant 0 : index
    %219 = arith.index_cast %218 : i32 to index
    %c1_206 = arith.constant 1 : index
    %c0_207 = arith.constant 0 : index
    %220 = vector.load %arg2[%c0_205, %219, %c1_206, %c0_207] : memref<1x22x22x128xf32, #tpu.memory_space<vmem>>, vector<1x8x16x128xf32>
    %221 = vector.shape_cast %220 : vector<1x8x16x128xf32> to vector<8x16x128xf32>
    %222 = arith.truncf %221 : vector<8x16x128xf32> to vector<8x16x128xbf16>
    %c0_208 = arith.constant 0 : index
    %c0_209 = arith.constant 0 : index
    %c4608 = arith.constant 4608 : index
    %223 = vector.load %arg13[%c0_208, %c0_209, %c4608] : memref<8x16x6272xbf16, #tpu.memory_space<vmem>>, vector<8x16x128xbf16>
    tpu.vector_store %arg13[%c0_208, %c0_209, %c4608], %222 {strides = array<i32>} : memref<8x16x6272xbf16, #tpu.memory_space<vmem>>, vector<8x16x128xbf16>,
    %c5_i32_210 = arith.constant 5 : i32
    %224 = arith.addi %1, %c5_i32_210 : i32
    %c0_211 = arith.constant 0 : index
    %225 = arith.index_cast %224 : i32 to index
    %c2_212 = arith.constant 2 : index
    %c0_213 = arith.constant 0 : index
    %226 = vector.load %arg2[%c0_211, %225, %c2_212, %c0_213] : memref<1x22x22x128xf32, #tpu.memory_space<vmem>>, vector<1x8x16x128xf32>
    %227 = vector.shape_cast %226 : vector<1x8x16x128xf32> to vector<8x16x128xf32>
    %228 = arith.truncf %227 : vector<8x16x128xf32> to vector<8x16x128xbf16>
    %c0_214 = arith.constant 0 : index
    %c0_215 = arith.constant 0 : index
    %c4736 = arith.constant 4736 : index
    %229 = vector.load %arg13[%c0_214, %c0_215, %c4736] : memref<8x16x6272xbf16, #tpu.memory_space<vmem>>, vector<8x16x128xbf16>
    tpu.vector_store %arg13[%c0_214, %c0_215, %c4736], %228 {strides = array<i32>} : memref<8x16x6272xbf16, #tpu.memory_space<vmem>>, vector<8x16x128xbf16>,
    %c5_i32_216 = arith.constant 5 : i32
    %230 = arith.addi %1, %c5_i32_216 : i32
    %c0_217 = arith.constant 0 : index
    %231 = arith.index_cast %230 : i32 to index
    %c3_218 = arith.constant 3 : index
    %c0_219 = arith.constant 0 : index
    %232 = vector.load %arg2[%c0_217, %231, %c3_218, %c0_219] : memref<1x22x22x128xf32, #tpu.memory_space<vmem>>, vector<1x8x16x128xf32>
    %233 = vector.shape_cast %232 : vector<1x8x16x128xf32> to vector<8x16x128xf32>
    %234 = arith.truncf %233 : vector<8x16x128xf32> to vector<8x16x128xbf16>
    %c0_220 = arith.constant 0 : index
    %c0_221 = arith.constant 0 : index
    %c4864 = arith.constant 4864 : index
    %235 = vector.load %arg13[%c0_220, %c0_221, %c4864] : memref<8x16x6272xbf16, #tpu.memory_space<vmem>>, vector<8x16x128xbf16>
    tpu.vector_store %arg13[%c0_220, %c0_221, %c4864], %234 {strides = array<i32>} : memref<8x16x6272xbf16, #tpu.memory_space<vmem>>, vector<8x16x128xbf16>,
    %c5_i32_222 = arith.constant 5 : i32
    %236 = arith.addi %1, %c5_i32_222 : i32
    %c0_223 = arith.constant 0 : index
    %237 = arith.index_cast %236 : i32 to index
    %c4_224 = arith.constant 4 : index
    %c0_225 = arith.constant 0 : index
    %238 = vector.load %arg2[%c0_223, %237, %c4_224, %c0_225] : memref<1x22x22x128xf32, #tpu.memory_space<vmem>>, vector<1x8x16x128xf32>
    %239 = vector.shape_cast %238 : vector<1x8x16x128xf32> to vector<8x16x128xf32>
    %240 = arith.truncf %239 : vector<8x16x128xf32> to vector<8x16x128xbf16>
    %c0_226 = arith.constant 0 : index
    %c0_227 = arith.constant 0 : index
    %c4992 = arith.constant 4992 : index
    %241 = vector.load %arg13[%c0_226, %c0_227, %c4992] : memref<8x16x6272xbf16, #tpu.memory_space<vmem>>, vector<8x16x128xbf16>
    tpu.vector_store %arg13[%c0_226, %c0_227, %c4992], %240 {strides = array<i32>} : memref<8x16x6272xbf16, #tpu.memory_space<vmem>>, vector<8x16x128xbf16>,
    %c5_i32_228 = arith.constant 5 : i32
    %242 = arith.addi %1, %c5_i32_228 : i32
    %c0_229 = arith.constant 0 : index
    %243 = arith.index_cast %242 : i32 to index
    %c5_230 = arith.constant 5 : index
    %c0_231 = arith.constant 0 : index
    %244 = vector.load %arg2[%c0_229, %243, %c5_230, %c0_231] : memref<1x22x22x128xf32, #tpu.memory_space<vmem>>, vector<1x8x16x128xf32>
    %245 = vector.shape_cast %244 : vector<1x8x16x128xf32> to vector<8x16x128xf32>
    %246 = arith.truncf %245 : vector<8x16x128xf32> to vector<8x16x128xbf16>
    %c0_232 = arith.constant 0 : index
    %c0_233 = arith.constant 0 : index
    %c5120 = arith.constant 5120 : index
    %247 = vector.load %arg13[%c0_232, %c0_233, %c5120] : memref<8x16x6272xbf16, #tpu.memory_space<vmem>>, vector<8x16x128xbf16>
    tpu.vector_store %arg13[%c0_232, %c0_233, %c5120], %246 {strides = array<i32>} : memref<8x16x6272xbf16, #tpu.memory_space<vmem>>, vector<8x16x128xbf16>,
    %c5_i32_234 = arith.constant 5 : i32
    %248 = arith.addi %1, %c5_i32_234 : i32
    %c0_235 = arith.constant 0 : index
    %249 = arith.index_cast %248 : i32 to index
    %c6_236 = arith.constant 6 : index
    %c0_237 = arith.constant 0 : index
    %250 = vector.load %arg2[%c0_235, %249, %c6_236, %c0_237] : memref<1x22x22x128xf32, #tpu.memory_space<vmem>>, vector<1x8x16x128xf32>
    %251 = vector.shape_cast %250 : vector<1x8x16x128xf32> to vector<8x16x128xf32>
    %252 = arith.truncf %251 : vector<8x16x128xf32> to vector<8x16x128xbf16>
    %c0_238 = arith.constant 0 : index
    %c0_239 = arith.constant 0 : index
    %c5248 = arith.constant 5248 : index
    %253 = vector.load %arg13[%c0_238, %c0_239, %c5248] : memref<8x16x6272xbf16, #tpu.memory_space<vmem>>, vector<8x16x128xbf16>
    tpu.vector_store %arg13[%c0_238, %c0_239, %c5248], %252 {strides = array<i32>} : memref<8x16x6272xbf16, #tpu.memory_space<vmem>>, vector<8x16x128xbf16>,
    %c6_i32 = arith.constant 6 : i32
    %254 = arith.addi %1, %c6_i32 : i32
    %c0_240 = arith.constant 0 : index
    %255 = arith.index_cast %254 : i32 to index
    %c0_241 = arith.constant 0 : index
    %c0_242 = arith.constant 0 : index
    %256 = vector.load %arg2[%c0_240, %255, %c0_241, %c0_242] : memref<1x22x22x128xf32, #tpu.memory_space<vmem>>, vector<1x8x16x128xf32>
    %257 = vector.shape_cast %256 : vector<1x8x16x128xf32> to vector<8x16x128xf32>
    %258 = arith.truncf %257 : vector<8x16x128xf32> to vector<8x16x128xbf16>
    %c0_243 = arith.constant 0 : index
    %c0_244 = arith.constant 0 : index
    %c5376 = arith.constant 5376 : index
    %259 = vector.load %arg13[%c0_243, %c0_244, %c5376] : memref<8x16x6272xbf16, #tpu.memory_space<vmem>>, vector<8x16x128xbf16>
    tpu.vector_store %arg13[%c0_243, %c0_244, %c5376], %258 {strides = array<i32>} : memref<8x16x6272xbf16, #tpu.memory_space<vmem>>, vector<8x16x128xbf16>,
    %c6_i32_245 = arith.constant 6 : i32
    %260 = arith.addi %1, %c6_i32_245 : i32
    %c0_246 = arith.constant 0 : index
    %261 = arith.index_cast %260 : i32 to index
    %c1_247 = arith.constant 1 : index
    %c0_248 = arith.constant 0 : index
    %262 = vector.load %arg2[%c0_246, %261, %c1_247, %c0_248] : memref<1x22x22x128xf32, #tpu.memory_space<vmem>>, vector<1x8x16x128xf32>
    %263 = vector.shape_cast %262 : vector<1x8x16x128xf32> to vector<8x16x128xf32>
    %264 = arith.truncf %263 : vector<8x16x128xf32> to vector<8x16x128xbf16>
    %c0_249 = arith.constant 0 : index
    %c0_250 = arith.constant 0 : index
    %c5504 = arith.constant 5504 : index
    %265 = vector.load %arg13[%c0_249, %c0_250, %c5504] : memref<8x16x6272xbf16, #tpu.memory_space<vmem>>, vector<8x16x128xbf16>
    tpu.vector_store %arg13[%c0_249, %c0_250, %c5504], %264 {strides = array<i32>} : memref<8x16x6272xbf16, #tpu.memory_space<vmem>>, vector<8x16x128xbf16>,
    %c6_i32_251 = arith.constant 6 : i32
    %266 = arith.addi %1, %c6_i32_251 : i32
    %c0_252 = arith.constant 0 : index
    %267 = arith.index_cast %266 : i32 to index
    %c2_253 = arith.constant 2 : index
    %c0_254 = arith.constant 0 : index
    %268 = vector.load %arg2[%c0_252, %267, %c2_253, %c0_254] : memref<1x22x22x128xf32, #tpu.memory_space<vmem>>, vector<1x8x16x128xf32>
    %269 = vector.shape_cast %268 : vector<1x8x16x128xf32> to vector<8x16x128xf32>
    %270 = arith.truncf %269 : vector<8x16x128xf32> to vector<8x16x128xbf16>
    %c0_255 = arith.constant 0 : index
    %c0_256 = arith.constant 0 : index
    %c5632 = arith.constant 5632 : index
    %271 = vector.load %arg13[%c0_255, %c0_256, %c5632] : memref<8x16x6272xbf16, #tpu.memory_space<vmem>>, vector<8x16x128xbf16>
    tpu.vector_store %arg13[%c0_255, %c0_256, %c5632], %270 {strides = array<i32>} : memref<8x16x6272xbf16, #tpu.memory_space<vmem>>, vector<8x16x128xbf16>,
    %c6_i32_257 = arith.constant 6 : i32
    %272 = arith.addi %1, %c6_i32_257 : i32
    %c0_258 = arith.constant 0 : index
    %273 = arith.index_cast %272 : i32 to index
    %c3_259 = arith.constant 3 : index
    %c0_260 = arith.constant 0 : index
    %274 = vector.load %arg2[%c0_258, %273, %c3_259, %c0_260] : memref<1x22x22x128xf32, #tpu.memory_space<vmem>>, vector<1x8x16x128xf32>
    %275 = vector.shape_cast %274 : vector<1x8x16x128xf32> to vector<8x16x128xf32>
    %276 = arith.truncf %275 : vector<8x16x128xf32> to vector<8x16x128xbf16>
    %c0_261 = arith.constant 0 : index
    %c0_262 = arith.constant 0 : index
    %c5760 = arith.constant 5760 : index
    %277 = vector.load %arg13[%c0_261, %c0_262, %c5760] : memref<8x16x6272xbf16, #tpu.memory_space<vmem>>, vector<8x16x128xbf16>
    tpu.vector_store %arg13[%c0_261, %c0_262, %c5760], %276 {strides = array<i32>} : memref<8x16x6272xbf16, #tpu.memory_space<vmem>>, vector<8x16x128xbf16>,
    %c6_i32_263 = arith.constant 6 : i32
    %278 = arith.addi %1, %c6_i32_263 : i32
    %c0_264 = arith.constant 0 : index
    %279 = arith.index_cast %278 : i32 to index
    %c4_265 = arith.constant 4 : index
    %c0_266 = arith.constant 0 : index
    %280 = vector.load %arg2[%c0_264, %279, %c4_265, %c0_266] : memref<1x22x22x128xf32, #tpu.memory_space<vmem>>, vector<1x8x16x128xf32>
    %281 = vector.shape_cast %280 : vector<1x8x16x128xf32> to vector<8x16x128xf32>
    %282 = arith.truncf %281 : vector<8x16x128xf32> to vector<8x16x128xbf16>
    %c0_267 = arith.constant 0 : index
    %c0_268 = arith.constant 0 : index
    %c5888 = arith.constant 5888 : index
    %283 = vector.load %arg13[%c0_267, %c0_268, %c5888] : memref<8x16x6272xbf16, #tpu.memory_space<vmem>>, vector<8x16x128xbf16>
    tpu.vector_store %arg13[%c0_267, %c0_268, %c5888], %282 {strides = array<i32>} : memref<8x16x6272xbf16, #tpu.memory_space<vmem>>, vector<8x16x128xbf16>,
    %c6_i32_269 = arith.constant 6 : i32
    %284 = arith.addi %1, %c6_i32_269 : i32
    %c0_270 = arith.constant 0 : index
    %285 = arith.index_cast %284 : i32 to index
    %c5_271 = arith.constant 5 : index
    %c0_272 = arith.constant 0 : index
    %286 = vector.load %arg2[%c0_270, %285, %c5_271, %c0_272] : memref<1x22x22x128xf32, #tpu.memory_space<vmem>>, vector<1x8x16x128xf32>
    %287 = vector.shape_cast %286 : vector<1x8x16x128xf32> to vector<8x16x128xf32>
    %288 = arith.truncf %287 : vector<8x16x128xf32> to vector<8x16x128xbf16>
    %c0_273 = arith.constant 0 : index
    %c0_274 = arith.constant 0 : index
    %c6016 = arith.constant 6016 : index
    %289 = vector.load %arg13[%c0_273, %c0_274, %c6016] : memref<8x16x6272xbf16, #tpu.memory_space<vmem>>, vector<8x16x128xbf16>
    tpu.vector_store %arg13[%c0_273, %c0_274, %c6016], %288 {strides = array<i32>} : memref<8x16x6272xbf16, #tpu.memory_space<vmem>>, vector<8x16x128xbf16>,
    %c6_i32_275 = arith.constant 6 : i32
    %290 = arith.addi %1, %c6_i32_275 : i32
    %c0_276 = arith.constant 0 : index
    %291 = arith.index_cast %290 : i32 to index
    %c6_277 = arith.constant 6 : index
    %c0_278 = arith.constant 0 : index
    %292 = vector.load %arg2[%c0_276, %291, %c6_277, %c0_278] : memref<1x22x22x128xf32, #tpu.memory_space<vmem>>, vector<1x8x16x128xf32>
    %293 = vector.shape_cast %292 : vector<1x8x16x128xf32> to vector<8x16x128xf32>
    %294 = arith.truncf %293 : vector<8x16x128xf32> to vector<8x16x128xbf16>
    %c0_279 = arith.constant 0 : index
    %c0_280 = arith.constant 0 : index
    %c6144 = arith.constant 6144 : index
    %295 = vector.load %arg13[%c0_279, %c0_280, %c6144] : memref<8x16x6272xbf16, #tpu.memory_space<vmem>>, vector<8x16x128xbf16>
    tpu.vector_store %arg13[%c0_279, %c0_280, %c6144], %294 {strides = array<i32>} : memref<8x16x6272xbf16, #tpu.memory_space<vmem>>, vector<8x16x128xbf16>,
    %c0_281 = arith.constant 0 : index
    %c0_282 = arith.constant 0 : index
    %c0_283 = arith.constant 0 : index
    %296 = vector.load %arg13[%c0_281, %c0_282, %c0_283] : memref<8x16x6272xbf16, #tpu.memory_space<vmem>>, vector<8x16x6272xbf16>
    %297 = vector.shape_cast %296 : vector<8x16x6272xbf16> to vector<128x6272xbf16>
    %c0_284 = arith.constant 0 : index
    %c0_285 = arith.constant 0 : index
    %298 = vector.load %arg3[%c0_284, %c0_285] : memref<6272x128xbf16, #tpu.memory_space<vmem>>, vector<6272x128xbf16>
    %cst = arith.constant dense<0.000000e+00> : vector<128x128xf32>
    %299 = tpu.matmul %297, %298, %cst {dimension_numbers = #tpu.dot_dimension_numbers<[1], [0], [0], [1], [0, 0, 1, 1], [], []>} : vector<128x6272xbf16>, vector<6272x128xbf16>, vector<128x128xf32> -> vector<128x128xf32>
    %c0_286 = arith.constant 0 : index
    %c0_287 = arith.constant 0 : index
    %300 = vector.load %arg4[%c0_286, %c0_287] : memref<1x128xf32, #tpu.memory_space<vmem>>, vector<1x128xf32>
    %301 = vector.broadcast %300 : vector<1x128xf32> to vector<128x128xf32>
    %302 = arith.addf %299, %301 : vector<128x128xf32>
    %cst_288 = arith.constant dense<0.000000e+00> : vector<128xf32>
    %303 = vector.multi_reduction <add>, %302, %cst_288 [1] : vector<128x128xf32> to vector<128xf32>
    %304 = vector.shape_cast %303 : vector<128xf32> to vector<128x1xf32>
    %cst_289 = arith.constant 2.500000e-01 : f32
    %305 = vector.broadcast %cst_289 : f32 to vector<128x1xf32>
    %306 = arith.mulf %304, %305 : vector<128x1xf32>
    %307 = arith.mulf %302, %302 : vector<128x128xf32>
    %cst_290 = arith.constant dense<0.000000e+00> : vector<128xf32>
    %308 = vector.multi_reduction <add>, %307, %cst_290 [1] : vector<128x128xf32> to vector<128xf32>
    %309 = vector.shape_cast %308 : vector<128xf32> to vector<128x1xf32>
    %cst_291 = arith.constant 2.500000e-01 : f32
    %310 = vector.broadcast %cst_291 : f32 to vector<128x1xf32>
    %311 = arith.mulf %309, %310 : vector<128x1xf32>
    %312 = arith.mulf %306, %306 : vector<128x1xf32>
    %313 = arith.subf %311, %312 : vector<128x1xf32>
    %314 = vector.broadcast %306 : vector<128x1xf32> to vector<128x128xf32>
    %315 = arith.subf %302, %314 : vector<128x128xf32>
    %cst_292 = arith.constant 9.99999974E-6 : f32
    %316 = vector.broadcast %cst_292 : f32 to vector<128x1xf32>
    %317 = arith.addf %313, %316 : vector<128x1xf32>
    %318 = math.rsqrt %317 : vector<128x1xf32>
    %319 = vector.broadcast %318 : vector<128x1xf32> to vector<128x128xf32>
    %320 = arith.mulf %315, %319 : vector<128x128xf32>
    %c0_293 = arith.constant 0 : index
    %c0_294 = arith.constant 0 : index
    %321 = vector.load %arg5[%c0_293, %c0_294] : memref<1x128xf32, #tpu.memory_space<vmem>>, vector<1x128xf32>
    %322 = vector.broadcast %321 : vector<1x128xf32> to vector<128x128xf32>
    %323 = arith.mulf %320, %322 : vector<128x128xf32>
    %c0_295 = arith.constant 0 : index
    %c0_296 = arith.constant 0 : index
    %324 = vector.load %arg6[%c0_295, %c0_296] : memref<1x128xf32, #tpu.memory_space<vmem>>, vector<1x128xf32>
    %325 = vector.broadcast %324 : vector<1x128xf32> to vector<128x128xf32>
    %326 = arith.addf %323, %325 : vector<128x128xf32>
    %327 = arith.truncf %326 : vector<128x128xf32> to vector<128x128xbf16>
    %c0_297 = arith.constant 0 : index
    %c0_298 = arith.constant 0 : index
    %328 = vector.load %arg7[%c0_297, %c0_298] : memref<128x128xbf16, #tpu.memory_space<vmem>>, vector<128x128xbf16>
    %cst_299 = arith.constant dense<0.000000e+00> : vector<128x128xf32>
    %329 = tpu.matmul %327, %328, %cst_299 {dimension_numbers = #tpu.dot_dimension_numbers<[1], [0], [0], [1], [0, 0, 1, 1], [], []>} : vector<128x128xbf16>, vector<128x128xbf16>, vector<128x128xf32> -> vector<128x128xf32>
    %c0_300 = arith.constant 0 : index
    %c0_301 = arith.constant 0 : index
    %330 = vector.load %arg8[%c0_300, %c0_301] : memref<1x128xf32, #tpu.memory_space<vmem>>, vector<1x128xf32>
    %331 = vector.broadcast %330 : vector<1x128xf32> to vector<128x128xf32>
    %332 = arith.addf %329, %331 : vector<128x128xf32>
    %cst_302 = arith.constant 5.000000e-01 : f32
    %333 = vector.broadcast %cst_302 : f32 to vector<128x128xf32>
    %334 = arith.mulf %333, %332 : vector<128x128xf32>
    %cst_303 = arith.constant 0.707106769 : f32
    %335 = vector.broadcast %cst_303 : f32 to vector<128x128xf32>
    %336 = arith.mulf %332, %335 : vector<128x128xf32>
    %cst_304 = arith.constant 0.000000e+00 : f32
    %337 = vector.broadcast %cst_304 : f32 to vector<128x128xf32>
    %338 = arith.cmpf oge, %336, %337 : vector<128x128xf32>
    %cst_305 = arith.constant 1.000000e+00 : f32
    %cst_306 = arith.constant -1.000000e+00 : f32
    %339 = vector.broadcast %cst_305 : f32 to vector<128x128xf32>
    %340 = vector.broadcast %cst_306 : f32 to vector<128x128xf32>
    %341 = arith.select %338, %339, %340 : vector<128x128xi1>, vector<128x128xf32>
    %342 = math.absf %336 : vector<128x128xf32>
    %cst_307 = arith.constant 0.327591091 : f32
    %343 = vector.broadcast %cst_307 : f32 to vector<128x128xf32>
    %344 = arith.mulf %343, %342 : vector<128x128xf32>
    %cst_308 = arith.constant 1.000000e+00 : f32
    %345 = vector.broadcast %cst_308 : f32 to vector<128x128xf32>
    %346 = arith.addf %345, %344 : vector<128x128xf32>
    %cst_309 = arith.constant 1.000000e+00 : f32
    %347 = vector.broadcast %cst_309 : f32 to vector<128x128xf32>
    %348 = arith.divf %347, %346 : vector<128x128xf32>
    %cst_310 = arith.constant 1.06140542 : f32
    %349 = vector.broadcast %cst_310 : f32 to vector<128x128xf32>
    %350 = arith.mulf %349, %348 : vector<128x128xf32>
    %cst_311 = arith.constant -1.45315206 : f32
    %351 = vector.broadcast %cst_311 : f32 to vector<128x128xf32>
    %352 = arith.addf %350, %351 : vector<128x128xf32>
    %353 = arith.mulf %352, %348 : vector<128x128xf32>
    %cst_312 = arith.constant 1.42141378 : f32
    %354 = vector.broadcast %cst_312 : f32 to vector<128x128xf32>
    %355 = arith.addf %353, %354 : vector<128x128xf32>
    %356 = arith.mulf %355, %348 : vector<128x128xf32>
    %cst_313 = arith.constant -0.284496725 : f32
    %357 = vector.broadcast %cst_313 : f32 to vector<128x128xf32>
    %358 = arith.addf %356, %357 : vector<128x128xf32>
    %359 = arith.mulf %358, %348 : vector<128x128xf32>
    %cst_314 = arith.constant 0.254829586 : f32
    %360 = vector.broadcast %cst_314 : f32 to vector<128x128xf32>
    %361 = arith.addf %359, %360 : vector<128x128xf32>
    %362 = arith.mulf %361, %348 : vector<128x128xf32>
    %cst_315 = arith.constant 0.000000e+00 : f32
    %363 = vector.broadcast %cst_315 : f32 to vector<128x128xf32>
    %364 = arith.subf %363, %342 : vector<128x128xf32>
    %365 = arith.mulf %364, %342 : vector<128x128xf32>
    %366 = math.exp %365 : vector<128x128xf32>
    %367 = arith.mulf %362, %366 : vector<128x128xf32>
    %cst_316 = arith.constant 1.000000e+00 : f32
    %368 = vector.broadcast %cst_316 : f32 to vector<128x128xf32>
    %369 = arith.subf %368, %367 : vector<128x128xf32>
    %370 = arith.mulf %341, %369 : vector<128x128xf32>
    %cst_317 = arith.constant 1.000000e+00 : f32
    %371 = vector.broadcast %cst_317 : f32 to vector<128x128xf32>
    %372 = arith.addf %371, %370 : vector<128x128xf32>
    %373 = arith.mulf %334, %372 : vector<128x128xf32>
    %374 = arith.truncf %373 : vector<128x128xf32> to vector<128x128xbf16>
    %c0_318 = arith.constant 0 : index
    %c0_319 = arith.constant 0 : index
    %375 = vector.load %arg9[%c0_318, %c0_319] : memref<128x128xbf16, #tpu.memory_space<vmem>>, vector<128x128xbf16>
    %cst_320 = arith.constant dense<0.000000e+00> : vector<128x128xf32>
    %376 = tpu.matmul %374, %375, %cst_320 {dimension_numbers = #tpu.dot_dimension_numbers<[1], [0], [0], [1], [0, 0, 1, 1], [], []>} : vector<128x128xbf16>, vector<128x128xbf16>, vector<128x128xf32> -> vector<128x128xf32>
    %c0_321 = arith.constant 0 : index
    %c0_322 = arith.constant 0 : index
    %377 = vector.load %arg10[%c0_321, %c0_322] : memref<1x128xf32, #tpu.memory_space<vmem>>, vector<1x128xf32>
    %378 = vector.broadcast %377 : vector<1x128xf32> to vector<128x128xf32>
    %379 = arith.addf %376, %378 : vector<128x128xf32>
    %c3_i32_323 = arith.constant 3 : i32
    %380 = arith.addi %1, %c3_i32_323 : i32
    %c0_324 = arith.constant 0 : index
    %381 = arith.index_cast %380 : i32 to index
    %c3_325 = arith.constant 3 : index
    %c0_326 = arith.constant 0 : index
    %382 = vector.load %arg2[%c0_324, %381, %c3_325, %c0_326] : memref<1x22x22x128xf32, #tpu.memory_space<vmem>>, vector<1x8x16x128xf32>
    %383 = vector.shape_cast %382 : vector<1x8x16x128xf32> to vector<8x16x128xf32>
    %c0_327 = arith.constant 0 : index
    %c0_328 = arith.constant 0 : index
    %384 = vector.load %arg11[%c0_327, %c0_328] : memref<1x128xf32, #tpu.memory_space<vmem>>, vector<1x128xf32>
    %385 = vector.broadcast %384 : vector<1x128xf32> to vector<128x128xf32>
    %386 = arith.mulf %379, %385 : vector<128x128xf32>
    %387 = vector.shape_cast %383 : vector<8x16x128xf32> to vector<128x128xf32>
    %388 = arith.addf %386, %387 : vector<128x128xf32>
    %c0_329 = arith.constant 0 : index
    %c0_330 = arith.constant 0 : index
    %c0_331 = arith.constant 0 : index
    %389 = vector.load %arg12[%c0_329, %c0_330, %c0_331] : memref<1x128x128xf32, #tpu.memory_space<vmem>>, vector<1x128x128xf32>
    %390 = vector.shape_cast %389 : vector<1x128x128xf32> to vector<128x128xf32>
    %391 = vector.shape_cast %388 : vector<128x128xf32> to vector<1x128x128xf32>
    tpu.vector_store %arg12[%c0_329, %c0_330, %c0_331], %391 {strides = array<i32>} : memref<1x128x128xf32, #tpu.memory_space<vmem>>, vector<1x128x128xf32>,
    return
  }
  func.func @transform_0(%arg0: i32, %arg1: i32) -> (i32, i32, i32, i32) {
    %c0_i32 = arith.constant 0 : i32
    %c0_i32_0 = arith.constant 0 : i32
    %c0_i32_1 = arith.constant 0 : i32
    %c0_i32_2 = arith.constant 0 : i32
    return %arg0, %c0_i32, %c0_i32_0, %c0_i32_1 : i32, i32, i32, i32
  }
  func.func @transform_1(%arg0: i32, %arg1: i32) -> (i32, i32) {
    %c0_i32 = arith.constant 0 : i32
    %c0_i32_0 = arith.constant 0 : i32
    %c0_i32_1 = arith.constant 0 : i32
    return %c0_i32, %c0_i32_0 : i32, i32
  }
  func.func @transform_2(%arg0: i32, %arg1: i32) -> (i32, i32) {
    %c0_i32 = arith.constant 0 : i32
    %c0_i32_0 = arith.constant 0 : i32
    %c0_i32_1 = arith.constant 0 : i32
    return %c0_i32, %c0_i32_0 : i32, i32
  }
  func.func @transform_3(%arg0: i32, %arg1: i32) -> (i32, i32) {
    %c0_i32 = arith.constant 0 : i32
    %c0_i32_0 = arith.constant 0 : i32
    %c0_i32_1 = arith.constant 0 : i32
    return %c0_i32, %c0_i32_0 : i32, i32
  }
  func.func @transform_4(%arg0: i32, %arg1: i32) -> (i32, i32) {
    %c0_i32 = arith.constant 0 : i32
    %c0_i32_0 = arith.constant 0 : i32
    %c0_i32_1 = arith.constant 0 : i32
    return %c0_i32, %c0_i32_0 : i32, i32
  }
  func.func @transform_5(%arg0: i32, %arg1: i32) -> (i32, i32) {
    %c0_i32 = arith.constant 0 : i32
    %c0_i32_0 = arith.constant 0 : i32
    %c0_i32_1 = arith.constant 0 : i32
    return %c0_i32, %c0_i32_0 : i32, i32
  }
  func.func @transform_6(%arg0: i32, %arg1: i32) -> (i32, i32) {
    %c0_i32 = arith.constant 0 : i32
    %c0_i32_0 = arith.constant 0 : i32
    %c0_i32_1 = arith.constant 0 : i32
    return %c0_i32, %c0_i32_0 : i32, i32
  }
  func.func @transform_7(%arg0: i32, %arg1: i32) -> (i32, i32) {
    %c0_i32 = arith.constant 0 : i32
    %c0_i32_0 = arith.constant 0 : i32
    %c0_i32_1 = arith.constant 0 : i32
    return %c0_i32, %c0_i32_0 : i32, i32
  }
  func.func @transform_8(%arg0: i32, %arg1: i32) -> (i32, i32) {
    %c0_i32 = arith.constant 0 : i32
    %c0_i32_0 = arith.constant 0 : i32
    %c0_i32_1 = arith.constant 0 : i32
    return %c0_i32, %c0_i32_0 : i32, i32
  }
  func.func @transform_9(%arg0: i32, %arg1: i32) -> (i32, i32) {
    %c0_i32 = arith.constant 0 : i32
    %c0_i32_0 = arith.constant 0 : i32
    %c0_i32_1 = arith.constant 0 : i32
    return %c0_i32, %c0_i32_0 : i32, i32
  }
  func.func @transform_10(%arg0: i32, %arg1: i32) -> (i32, i32, i32) {
    %c0_i32 = arith.constant 0 : i32
    %c0_i32_0 = arith.constant 0 : i32
    return %arg0, %arg1, %c0_i32 : i32, i32, i32
  }
}

</mosaic_0001>

<bundles_post_ra>
// kernel: convnext_block.1
= control target key start
LH: loop header
LB: loop body
LE: loop exit
PB: predicated region body
PF: predicated region fallthrough
CT: control target
= control target key end

     0   :  { %s20273_s13 = smov 0   ;;  %s20275_s14 = smov 0   ;;  %s23617_s0 = inlined_call_operand.vmem [shape: f32[2,22,22,128], index: 0, kind: input, shape index: {}]   ;;  %s23618_s1 = inlined_call_operand.vmem [shape: bf16[6272,128], index: 1, kind: input, shape index: {}]   ;;  %s23619_s2 = inlined_call_operand.vmem [shape: f32[1,128], index: 2, kind: input, shape index: {}]   ;;  %s23620_s3 = inlined_call_operand.vmem [shape: f32[1,128], index: 3, kind: input, shape index: {}]   ;;  %s23621_s4 = inlined_call_operand.vmem [shape: f32[1,128], index: 4, kind: input, shape index: {}]   ;;  %s23622_s5 = inlined_call_operand.vmem [shape: bf16[128,128], index: 5, kind: input, shape index: {}]   ;;  %s23623_s6 = inlined_call_operand.vmem [shape: f32[1,128], index: 6, kind: input, shape index: {}]   ;;  %s23624_s7 = inlined_call_operand.vmem [shape: bf16[128,128], index: 7, kind: input, shape index: {}]   ;;  %s23625_s8 = inlined_call_operand.vmem [shape: f32[1,128], index: 8, kind: input, shape index: {}]   ;;  %s23626_s9 = inlined_call_operand.vmem [shape: f32[1,128], index: 9, kind: input, shape index: {}]   ;;  %s23627_s10 = inlined_call_operand.vmem [shape: f32[2,256,128], index: 10, kind: output, shape index: {}]  }
   0x1   :  { %s20277_s15 = smov 0   ;;  %s20279_s16 = smov 0  }
   0x2   :  { %s20281_s17 = smov 0  }
   0x3 LB: > { %s29_s18 = sadd.s32 1, %s20207_s15  ;;  %s32_s19 = sadd.s32 1, %s20211_s16  ;;  %s20215_s17 = sphi %s20281_s17, %s20_s17   ;;  %s20211_s16 = sphi %s20279_s16, %s23653_s16   ;;  %s20207_s15 = sphi %s20277_s15, %s23652_s15   ;;  %s20203_s14 = sphi %s20275_s14, %s23651_s14   ;;  %s20199_s13 = sphi %s20273_s13, %s23650_s13  }
   0x4   : > { %p30_p0 = scmp.ge.s32.totalorder %s29_s18, 2  ;;  %p14268_p1 = scmp.ge.s32.totalorder %s20215_s17, 1 }
   0x5   : > { %p326_p2 = scmp.lt.s32.totalorder %s20215_s17, 5 }
   0x6   : > { %s23655_s18 = smov (%p30_p0, %s29_s18), 0  ;;  %s23657_s19 = smov (!%p30_p0, %s32_s19), %s20211_s16 }
   0x7   : > { %p327_p3 = pnand %p14268_p1, %p326_p2  ;;  %p34_p4 = scmp.ge.s32.totalorder %s23657_s19, 2 }
   0x9   : > { %s23659_s19 = smov (%p34_p4, %s23657_s19), 0  ;;  %330 = sbr.rel (%p327_p3) target bundleno = 1781 (0x6f5), region = 60 }
   0xe   : > { %v19089_v0 = vld [vmem:[%s23618_s1 + $0x78] sm:$0xff]   ;;  %v19093_v4 = vld [vmem:[%s23618_s1 + $0x70] sm:$0xff]   ;;  %v19097_v8 = vld [vmem:[%s23618_s1 + $0x68] sm:$0xff]   ;;  %p368_p5 = scmp.lt.s32.totalorder %s20203_s14, 1  ;;  %s14274_s12 = smul.u32 192, %s20199_s13 }
   0xf   : > { %v19090_v1 = vld [vmem:[%s23618_s1 + $0x38] sm:$0xff]   ;;  %17351 = vmatprep.subr.bf16.mxu0 %v19089_v0  ;;  %v19094_v5 = vld [vmem:[%s23618_s1 + $0x30] sm:$0xff]   ;;  %v19098_v9 = vld [vmem:[%s23618_s1 + $0x28] sm:$0xff]   ;;  %s14270_s30 = sshll.u32 %s20199_s13, 4 }
  0x10   : > { %v19091_v2 = vld [vmem:[%s23618_s1 + $0xf8] sm:$0xff]   ;;  %17352 = vmatpush3.bf16.msra.mxu0 %v19090_v1  ;;  %v19095_v6 = vld [vmem:[%s23618_s1 + $0xf0] sm:$0xff]   ;;  %v19099_v10 = vld [vmem:[%s23618_s1 + $0xe8] sm:$0xff]   ;;  %s23661_s14 = smov (!%p368_p5, %s20203_s14), 1  ;;  %p376_p6 = scmp.lt.s32.totalorder %s14270_s30, 31 }
  0x11   : > { %v19092_v3 = vld [vmem:[%s23618_s1 + $0xb8] sm:$0xff]   ;;  %17415 = vmatprep.subr.bf16.mxu1 %v19091_v2  ;;  %17353 = vmatprep.subr.bf16.mxu0 %v19093_v4  ;;  %v19096_v7 = vld [vmem:[%s23618_s1 + $0xb0] sm:$0xff]   ;;  %v19100_v11 = vld [vmem:[%s23618_s1 + $0xa8] sm:$0xff]   ;;  %s19047_s25 = smul.u32 528, %s23661_s14  ;;  %s14271_s11 = sshll.u32 %s23661_s14, 5 }
  0x12   : > { %17416 = vmatpush3.bf16.msra.mxu1 %v19092_v3  ;;  %v19101_v12 = vld [vmem:[%s23618_s1 + $0x60] sm:$0xff]   ;;  %v19105_v16 = vld [vmem:[%s23618_s1 + $0x58] sm:$0xff]   ;;  %v19109_v20 = vld [vmem:[%s23618_s1 + $0x50] sm:$0xff]   ;;  %s23663_s30 = smov (!%p376_p6, %s14270_s30), 31 }
  0x13   : > { %17417 = vmatprep.subr.bf16.mxu1 %v19095_v6  ;;  %v19102_v13 = vld [vmem:[%s23618_s1 + $0x20] sm:$0xff]   ;;  %v19106_v17 = vld [vmem:[%s23618_s1 + $0x18] sm:$0xff]   ;;  %v19110_v21 = vld [vmem:[%s23618_s1 + $0x10] sm:$0xff]   ;;  %s372_s24 = scalar_lea.vmem %s23617_s0, %s19047_s25  ;;  %s379_s25 = sadd.s32 %s14271_s11, %s23663_s30 }
  0x14   : > { %17354 = vmatpush3.bf16.msra.mxu0 %v19094_v5  ;;  %v19103_v14 = vld [vmem:[%s23618_s1 + $0xe0] sm:$0xff]   ;;  %v19107_v18 = vld [vmem:[%s23618_s1 + $0xd8] sm:$0xff]   ;;  %v19111_v22 = vld [vmem:[%s23618_s1 + $0xd0] sm:$0xff]   ;;  %s20403_s20 = scalar_lea.vmem %s372_s24, %s14274_s12  ;;  %s14272_s24 = sshll.u32 %s379_s25, 3 }
  0x15   : > { %17355 = vmatprep.subr.bf16.mxu0 %v19097_v8  ;;  %v19104_v15 = vld [vmem:[%s23618_s1 + $0xa0] sm:$0xff]   ;;  %v19108_v19 = vld [vmem:[%s23618_s1 + $0x98] sm:$0xff]   ;;  %v19112_v23 = vld [vmem:[%s23618_s1 + $0x90] sm:$0xff]   ;;  %s23540_s26 = scalar_lea.vmem %s23627_s10, %s14272_s24 }
  0x16   : > { %17418 = vmatpush3.bf16.msra.mxu1 %v19096_v7  ;;  %v19113_v24 = vld [vmem:[%s23618_s1 + $0x48] sm:$0xff]   ;;  %v19117_v28 = vld [vmem:[%s23618_s1 + $0x40] sm:$0xff]   ;;  %v19124_v40 = vld [vmem:[%s23618_s1 + $0x178] sm:$0xff]  }
  0x17   : > { %17419 = vmatprep.subr.bf16.mxu1 %v19099_v10  ;;  %v19114_v25 = vld [vmem:[%s23618_s1 + $0x8] sm:$0xff]   ;;  %v19118_v29 = vld [vmem:[%s23618_s1] sm:$0xff]   ;;  %v389_v49 = vld [vmem:[%s20403_s20 + $0x18] sm:$0xff] }
  0x18   : > { %17356 = vmatpush3.bf16.msra.mxu0 %v19098_v9  ;;  %v19115_v26 = vld [vmem:[%s23618_s1 + $0xc8] sm:$0xff]   ;;  %v19119_v30 = vld [vmem:[%s23618_s1 + $0xc0] sm:$0xff]   ;;  %v16569_v51 = vpack.c.bf16 %v389_v49, %v389_v49  ;;  %v19128_v60 = vld [vmem:[%s23618_s1 + $0x138] sm:$0xff]  }
  0x19   : > { %17357 = vmatprep.subr.bf16.mxu0 %v19101_v12  ;;  %v19116_v27 = vld [vmem:[%s23618_s1 + $0x88] sm:$0xff]   ;;  %v387_v31 = vld [vmem:[%s20403_s20] sm:$0xff]  ;;  %v19132_v1 = vld [vmem:[%s23618_s1 + $0x170] sm:$0xff]  }
  0x1a   : > { %17420 = vmatpush3.bf16.msra.mxu1 %v19100_v11  ;;  %v388_v32 = vld [vmem:[%s20403_s20 + $0x8] sm:$0xff]  ;;  %v16567_v34 = vpack.c.bf16 %v387_v31, %v387_v31  ;;  %v19123_v39 = vld [vmem:[%s23618_s1 + $0x80] sm:$0xff]   ;;  %469 = vst [vmem:[#allocation2 + $0x188] sm:$0xf] %v16569_v51  ;;  %1142 = vst [vmem:[#allocation2 + $0x1c] sm:$0xf] %v16569_v51 }
  0x1b   : > { %17421 = vmatprep.subr.bf16.mxu1 %v19103_v14  ;;  %v483_v33 = vld [vmem:[%s20403_s20 + $0x1] sm:$0xff]  ;;  %v16568_v35 = vpack.c.bf16 %v388_v32, %v388_v32  ;;  %v484_v36 = vld [vmem:[%s20403_s20 + $0x9] sm:$0xff]  ;;  %v485_v52 = vld [vmem:[%s20403_s20 + $0x19] sm:$0xff] }
  0x1c   : > { %17358 = vmatpush3.bf16.msra.mxu0 %v19102_v13  ;;  %v16583_v37 = vpack.c.bf16 %v483_v33, %v483_v33  ;;  %v16584_v38 = vpack.c.bf16 %v484_v36, %v484_v36  ;;  %467 = vst [vmem:[#allocation2] sm:$0xf] %v16567_v34  ;;  %v579_v41 = vld [vmem:[%s20403_s20 + $0x2] sm:$0xff]  ;;  %v580_v42 = vld [vmem:[%s20403_s20 + $0xa] sm:$0xff]  ;;  %v16585_v55 = vpack.c.bf16 %v485_v52, %v485_v52  ;;  %v581_v57 = vld [vmem:[%s20403_s20 + $0x1a] sm:$0xff] }
  0x1d   : > { %17359 = vmatprep.subr.bf16.mxu0 %v19105_v16  ;;  %468 = vst [vmem:[#allocation2 + $0xc4] sm:$0xf] %v16568_v35  ;;  %v16599_v43 = vpack.c.bf16 %v579_v41, %v579_v41  ;;  %v16600_v44 = vpack.c.bf16 %v580_v42, %v580_v42  ;;  %v675_v45 = vld [vmem:[%s20403_s20 + $0x3] sm:$0xff]  ;;  %v676_v46 = vld [vmem:[%s20403_s20 + $0xb] sm:$0xff]  ;;  %v677_v59 = vld [vmem:[%s20403_s20 + $0x1b] sm:$0xff]  ;;  %v16601_v61 = vpack.c.bf16 %v581_v57, %v581_v57 }
  0x1e   : > { %17422 = vmatpush3.bf16.msra.mxu1 %v19104_v15  ;;  %563 = vst [vmem:[#allocation2 + $0x4] sm:$0xf] %v16583_v37  ;;  %564 = vst [vmem:[#allocation2 + $0xc8] sm:$0xf] %v16584_v38  ;;  %v16615_v47 = vpack.c.bf16 %v675_v45, %v675_v45  ;;  %v16616_v48 = vpack.c.bf16 %v676_v46, %v676_v46  ;;  %v390_v50 = vld [vmem:[%s20403_s20 + $0x20] sm:$0xff]  ;;  %v16617_v0 = vpack.c.bf16 %v677_v59, %v677_v59  ;;  %v391_v3 = vld [vmem:[%s20403_s20 + $0x30] sm:$0xff] }
  0x1f   : > { %17423 = vmatprep.subr.bf16.mxu1 %v19107_v18  ;;  %659 = vst [vmem:[#allocation2 + $0x8] sm:$0xf] %v16599_v43  ;;  %660 = vst [vmem:[#allocation2 + $0xcc] sm:$0xf] %v16600_v44  ;;  %v486_v53 = vld [vmem:[%s20403_s20 + $0x21] sm:$0xff]  ;;  %v16570_v54 = vpack.c.bf16 %v390_v50, %v390_v50  ;;  %v16571_v6 = vpack.c.bf16 %v391_v3, %v391_v3  ;;  %v392_v7 = vld [vmem:[%s20403_s20 + $0x38] sm:$0xff] }
  0x20   : > { %17360 = vmatpush3.bf16.msra.mxu0 %v19106_v17  ;;  %755 = vst [vmem:[#allocation2 + $0xc] sm:$0xf] %v16615_v47  ;;  %756 = vst [vmem:[#allocation2 + $0xd0] sm:$0xf] %v16616_v48  ;;  %v16586_v56 = vpack.c.bf16 %v486_v53, %v486_v53  ;;  %v582_v58 = vld [vmem:[%s20403_s20 + $0x22] sm:$0xff]  ;;  %v487_v8 = vld [vmem:[%s20403_s20 + $0x31] sm:$0xff]  ;;  %v16572_v11 = vpack.c.bf16 %v392_v7, %v392_v7 }
  0x21   : > { %17361 = vmatprep.subr.bf16.mxu0 %v19109_v20  ;;  %470 = vst [vmem:[#allocation2 + $0x24c] sm:$0xf] %v16570_v54  ;;  %565 = vst [vmem:[#allocation2 + $0x18c] sm:$0xf] %v16585_v55  ;;  %v16602_v62 = vpack.c.bf16 %v582_v58, %v582_v58  ;;  %v678_v63 = vld [vmem:[%s20403_s20 + $0x23] sm:$0xff]  ;;  %v488_v9 = vld [vmem:[%s20403_s20 + $0x39] sm:$0xff]  ;;  %v16587_v12 = vpack.c.bf16 %v487_v8, %v487_v8 }
  0x22   : > { %17424 = vmatpush3.bf16.msra.mxu1 %v19108_v19  ;;  %566 = vst [vmem:[#allocation2 + $0x250] sm:$0xf] %v16586_v56  ;;  %1143 = vst [vmem:[#allocation2 + $0xe0] sm:$0xf] %v16570_v54  ;;  %v16618_v2 = vpack.c.bf16 %v678_v63, %v678_v63  ;;  %v19135_v10 = vld [vmem:[%s23618_s1 + $0x130] sm:$0xff]   ;;  %v16588_v13 = vpack.c.bf16 %v488_v9, %v488_v9  ;;  %v19140_v15 = vld [vmem:[%s23618_s1 + $0x168] sm:$0xff]  }
  0x23   : > { %17425 = vmatprep.subr.bf16.mxu1 %v19111_v22  ;;  %661 = vst [vmem:[#allocation2 + $0x190] sm:$0xf] %v16601_v61  ;;  %662 = vst [vmem:[#allocation2 + $0x254] sm:$0xf] %v16602_v62  ;;  %v583_v17 = vld [vmem:[%s20403_s20 + $0x32] sm:$0xff]  ;;  %v584_v18 = vld [vmem:[%s20403_s20 + $0x3a] sm:$0xff] }
  0x24   : > { %17362 = vmatpush3.bf16.msra.mxu0 %v19110_v21  ;;  %v19120_v4 = vld [vmem:[#allocation2] ss:$196 sps:$4 sm:$0xff]   ;;  %757 = vst [vmem:[#allocation2 + $0x194] sm:$0xf] %v16617_v0  ;;  %758 = vst [vmem:[#allocation2 + $0x258] sm:$0xf] %v16618_v2  ;;  %v16603_v20 = vpack.c.bf16 %v583_v17, %v583_v17  ;;  %v16604_v21 = vpack.c.bf16 %v584_v18, %v584_v18 }
  0x25   : > { %17363 = vmatprep.subr.bf16.mxu0 %v19113_v24  ;;  %v19122_v5 = vld [vmem:[#allocation2 + $0x4] ss:$196 sps:$4 sm:$0xff]   ;;  %471 = vst [vmem:[#allocation2 + $0x310] sm:$0xf] %v16571_v6  ;;  %1144 = vst [vmem:[#allocation2 + $0x1a4] sm:$0xf] %v16571_v6 }
  0x26   : > { %17426 = vmatpush3.bf16.msra.mxu1 %v19112_v23  ;;  %10652 = vmatprep.mubr.bf16.mxu0 %v19122_v5  ;;  %v19125_v14 = vld [vmem:[#allocation2 + $0x8] ss:$196 sps:$4 sm:$0xff]   ;;  %472 = vst [vmem:[#allocation2 + $0x3d4] sm:$0xf] %v16572_v11  ;;  %567 = vst [vmem:[#allocation2 + $0x314] sm:$0xf] %v16587_v12 }
  0x27   : > { %17427 = vmatprep.subr.bf16.mxu1 %v19115_v26  ;;  %v19127_v16 = vld [vmem:[#allocation2 + $0xc] ss:$196 sps:$4 sm:$0xff]   ;;  %568 = vst [vmem:[#allocation2 + $0x3d8] sm:$0xf] %v16588_v13  ;;  %1145 = vst [vmem:[#allocation2 + $0x268] sm:$0xf] %v16572_v11 }
  0x28   : > { %17364 = vmatpush3.bf16.msra.mxu0 %v19114_v25  ;;  %10749 = vmatprep.mubr.bf16.mxu1 %v19127_v16  ;;  %v19131_v22 = vld [vmem:[#allocation2 + $0x188] ss:$196 sps:$4 sm:$0xff]   ;;  %v679_v23 = vld [vmem:[%s20403_s20 + $0x33] sm:$0xff]  ;;  %v680_v24 = vld [vmem:[%s20403_s20 + $0x3b] sm:$0xff]  ;;  %663 = vst [vmem:[#allocation2 + $0x318] sm:$0xf] %v16603_v20 }
  0x29   : > { %17365 = vmatprep.subr.bf16.mxu0 %v19117_v28  ;;  %v19129_v19 = vld [vmem:[#allocation2 + $0x18c] ss:$196 sps:$4 sm:$0xff]   ;;  %664 = vst [vmem:[#allocation2 + $0x3dc] sm:$0xf] %v16604_v21  ;;  %v16619_v25 = vpack.c.bf16 %v679_v23, %v679_v23  ;;  %v16620_v26 = vpack.c.bf16 %v680_v24, %v680_v24  ;;  %v19151_v49 = vld [vmem:[%s23618_s1 + $0x120] sm:$0xff]   ;;  %v19159_v7 = vld [vmem:[%s23618_s1 + $0x118] sm:$0xff]  }
  0x2a   : > { %17428 = vmatpush3.bf16.msra.mxu1 %v19116_v27  ;;  %v19136_v28 = vld [vmem:[#allocation2 + $0x190] ss:$196 sps:$4 sm:$0xff]   ;;  %v395_v50 = vld [vmem:[%s20403_s20 + $0x60] sm:$0xff]  ;;  %v396_v51 = vld [vmem:[%s20403_s20 + $0x68] sm:$0xff] }
  0x2b   : > { %17429 = vmatprep.subr.bf16.mxu1 %v19119_v30  ;;  %v19133_v27 = vld [vmem:[#allocation2 + $0x194] ss:$196 sps:$4 sm:$0xff]   ;;  %759 = vst [vmem:[#allocation2 + $0x31c] sm:$0xf] %v16619_v25  ;;  %760 = vst [vmem:[#allocation2 + $0x3e0] sm:$0xf] %v16620_v26  ;;  %v16575_v53 = vpack.c.bf16 %v395_v50, %v395_v50  ;;  %v16576_v54 = vpack.c.bf16 %v396_v51, %v396_v51 }
  0x2c   : > { %17366 = vmatpush3.bf16.msra.mxu0 %v19118_v29  ;;  %v19143_v29 = vld [vmem:[%s23618_s1 + $0x128] sm:$0xff]   ;;  %v394_v31 = vld [vmem:[%s20403_s20 + $0x50] sm:$0xff]  ;;  %v19161_v8 = vld [vmem:[%s23618_s1 + $0x1f8] sm:$0xff]  }
  0x2d   : > { %17479 = vmatprep.subr.bf16.mxu0 %v19124_v40  ;;  %v393_v30 = vld [vmem:[%s20403_s20 + $0x48] sm:$0xff]  ;;  %v16574_v33 = vpack.c.bf16 %v394_v31, %v394_v31  ;;  %v490_v35 = vld [vmem:[%s20403_s20 + $0x51] sm:$0xff]  ;;  %475 = vst [vmem:[#allocation2 + $0x620] sm:$0xf] %v16575_v53  ;;  %476 = vst [vmem:[#allocation2 + $0x6e4] sm:$0xf] %v16576_v54 }
  0x2e   : > { %17430 = vmatpush3.bf16.msra.mxu1 %v19123_v39  ;;  %v16573_v32 = vpack.c.bf16 %v393_v30, %v393_v30  ;;  %v489_v34 = vld [vmem:[%s20403_s20 + $0x49] sm:$0xff]  ;;  %v19137_v36 = vld [vmem:[#allocation2 + $0x314] ss:$196 sps:$4 sm:$0xff]   ;;  %v16590_v38 = vpack.c.bf16 %v490_v35, %v490_v35  ;;  %v19148_v39 = vld [vmem:[%s23618_s1 + $0x160] sm:$0xff]   ;;  %1148 = vst [vmem:[#allocation2 + $0x4b4] sm:$0xf] %v16575_v53 }
  0x2f   : > { %10653 = vmatmul.mubr.bf16.vlgmr.msra.gmra.mxu0 %v19120_v4  ;;  %v16589_v37 = vpack.c.bf16 %v489_v34, %v489_v34  ;;  %474 = vst [vmem:[#allocation2 + $0x55c] sm:$0xf] %v16574_v33  ;;  %1147 = vst [vmem:[#allocation2 + $0x3f0] sm:$0xf] %v16574_v33  ;;  %v19139_v40 = vld [vmem:[#allocation2 + $0x310] ss:$196 sps:$4 sm:$0xff]   ;;  %17543 = vmatprep.subr.bf16.mxu1 %v19161_v8 }
  0x30   : > { %17480 = vmatpush3.bf16.msra.mxu0 %v19128_v60  ;;  %10660 = vmatprep.mubr.bf16.mxu0 %v19129_v19  ;;  %473 = vst [vmem:[#allocation2 + $0x498] sm:$0xf] %v16573_v32  ;;  %1146 = vst [vmem:[#allocation2 + $0x32c] sm:$0xf] %v16573_v32  ;;  %v585_v41 = vld [vmem:[%s20403_s20 + $0x4a] sm:$0xff]  ;;  %v586_v42 = vld [vmem:[%s20403_s20 + $0x52] sm:$0xff] }
  0x31   : > { %17481 = vmatprep.subr.bf16.mxu0 %v19132_v1  ;;  %10750 = vmatmul.mubr.bf16.vlgmr.msra.gmra.mxu1 %v19125_v14  ;;  %569 = vst [vmem:[#allocation2 + $0x49c] sm:$0xf] %v16589_v37  ;;  %570 = vst [vmem:[#allocation2 + $0x560] sm:$0xf] %v16590_v38  ;;  %v681_v43 = vld [vmem:[%s20403_s20 + $0x4b] sm:$0xff]  ;;  %v16605_v44 = vpack.c.bf16 %v585_v41, %v585_v41  ;;  %v16606_v45 = vpack.c.bf16 %v586_v42, %v586_v42  ;;  %v682_v46 = vld [vmem:[%s20403_s20 + $0x53] sm:$0xff] }
  0x32   : > { %10757 = vmatprep.mubr.bf16.mxu1 %v19133_v27  ;;  %v16621_v47 = vpack.c.bf16 %v681_v43, %v681_v43  ;;  %v16622_v48 = vpack.c.bf16 %v682_v46, %v682_v46  ;;  %v19141_v52 = vld [vmem:[#allocation2 + $0x31c] ss:$196 sps:$4 sm:$0xff]   ;;  %v492_v57 = vld [vmem:[%s20403_s20 + $0x69] sm:$0xff]  ;;  %1149 = vst [vmem:[#allocation2 + $0x578] sm:$0xf] %v16576_v54  ;;  %v591_v51 = vld [vmem:[%s20403_s20 + $0x92] sm:$0xff] }
  0x33   : > { %665 = vst [vmem:[#allocation2 + $0x4a0] sm:$0xf] %v16605_v44  ;;  %666 = vst [vmem:[#allocation2 + $0x564] sm:$0xf] %v16606_v45  ;;  %v19144_v55 = vld [vmem:[#allocation2 + $0x318] ss:$196 sps:$4 sm:$0xff]   ;;  %v16592_v59 = vpack.c.bf16 %v492_v57, %v492_v57 }
  0x34   : > { %17482 = vmatpush3.bf16.msra.mxu0 %v19135_v10  ;;  %761 = vst [vmem:[#allocation2 + $0x4a4] sm:$0xf] %v16621_v47  ;;  %762 = vst [vmem:[#allocation2 + $0x568] sm:$0xf] %v16622_v48  ;;  %v491_v56 = vld [vmem:[%s20403_s20 + $0x61] sm:$0xff]  ;;  %v19156_v60 = vld [vmem:[%s23618_s1 + $0x158] sm:$0xff]  }
  0x35   : > { %17483 = vmatprep.subr.bf16.mxu0 %v19140_v15  ;;  %v16591_v58 = vpack.c.bf16 %v491_v56, %v491_v56  ;;  %v587_v61 = vld [vmem:[%s20403_s20 + $0x62] sm:$0xff]  ;;  %v588_v62 = vld [vmem:[%s20403_s20 + $0x6a] sm:$0xff]  ;;  %572 = vst [vmem:[#allocation2 + $0x6e8] sm:$0xf] %v16592_v59  ;;  %v19162_v11 = vld [vmem:[%s23618_s1 + $0x1b8] sm:$0xff]  }
  0x36   : > { %v683_v63 = vld [vmem:[%s20403_s20 + $0x63] sm:$0xff]  ;;  %v16607_v1 = vpack.c.bf16 %v587_v61, %v587_v61  ;;  %v16608_v2 = vpack.c.bf16 %v588_v62, %v588_v62  ;;  %v684_v5 = vld [vmem:[%s20403_s20 + $0x6b] sm:$0xff]  ;;  %17544 = vmatpush3.bf16.msra.mxu1 %v19162_v11  ;;  %v397_v14 = vld [vmem:[%s20403_s20 + $0x78] sm:$0xff] }
  0x37   : > { %10661 = vmatmul.mubr.bf16.gmra.mxu0 %v19131_v22  ;;  %571 = vst [vmem:[#allocation2 + $0x624] sm:$0xf] %v16591_v58  ;;  %v16623_v3 = vpack.c.bf16 %v683_v63, %v683_v63  ;;  %v19147_v4 = vld [vmem:[#allocation2 + $0x498] ss:$196 sps:$4 sm:$0xff]   ;;  %v16624_v6 = vpack.c.bf16 %v684_v5, %v684_v5  ;;  %v19163_v12 = vld [vmem:[%s23618_s1 + $0x1f0] sm:$0xff]   ;;  %v398_v15 = vld [vmem:[%s20403_s20 + $0x80] sm:$0xff]  ;;  %v16577_v16 = vpack.c.bf16 %v397_v14, %v397_v14 }
  0x38   : > { %17484 = vmatpush3.bf16.msra.mxu0 %v19143_v29  ;;  %10668 = vmatprep.mubr.bf16.mxu0 %v19137_v36  ;;  %v19145_v0 = vld [vmem:[#allocation2 + $0x49c] ss:$196 sps:$4 sm:$0xff]   ;;  %667 = vst [vmem:[#allocation2 + $0x628] sm:$0xf] %v16607_v1  ;;  %668 = vst [vmem:[#allocation2 + $0x6ec] sm:$0xf] %v16608_v2  ;;  %v16578_v17 = vpack.c.bf16 %v398_v15, %v398_v15 }
  0x39   : > { %17485 = vmatprep.subr.bf16.mxu0 %v19148_v39  ;;  %10758 = vmatmul.mubr.bf16.gmra.mxu1 %v19136_v28  ;;  %763 = vst [vmem:[#allocation2 + $0x62c] sm:$0xf] %v16623_v3  ;;  %764 = vst [vmem:[#allocation2 + $0x6f0] sm:$0xf] %v16624_v6  ;;  %v493_v18 = vld [vmem:[%s20403_s20 + $0x79] sm:$0xff]  ;;  %v494_v19 = vld [vmem:[%s20403_s20 + $0x81] sm:$0xff] }
  0x3a   : > { %10765 = vmatprep.mubr.bf16.mxu1 %v19141_v52  ;;  %v19152_v10 = vld [vmem:[#allocation2 + $0x4a0] ss:$196 sps:$4 sm:$0xff]   ;;  %17545 = vmatprep.subr.bf16.mxu1 %v19163_v12  ;;  %v16593_v20 = vpack.c.bf16 %v493_v18, %v493_v18  ;;  %v16594_v21 = vpack.c.bf16 %v494_v19, %v494_v19  ;;  %v19166_v22 = vld [vmem:[%s23618_s1 + $0x1b0] sm:$0xff]   ;;  %477 = vst [vmem:[#allocation2 + $0x7a8] sm:$0xf] %v16577_v16  ;;  %v19173_v36 = vld [vmem:[%s23618_s1 + $0x1e8] sm:$0xff]  }
  0x3b   : > { %v19149_v9 = vld [vmem:[#allocation2 + $0x4a4] ss:$196 sps:$4 sm:$0xff]   ;;  %478 = vst [vmem:[#allocation2 + $0x86c] sm:$0xf] %v16578_v17  ;;  %1150 = vst [vmem:[#allocation2 + $0x63c] sm:$0xf] %v16577_v16  ;;  %17546 = vmatpush3.bf16.msra.mxu1 %v19166_v22 }
  0x3c   : > { %17486 = vmatpush3.bf16.msra.mxu0 %v19151_v49  ;;  %v19155_v23 = vld [vmem:[#allocation2 + $0x620] ss:$196 sps:$4 sm:$0xff]   ;;  %1151 = vst [vmem:[#allocation2 + $0x700] sm:$0xf] %v16578_v17  ;;  %573 = vst [vmem:[#allocation2 + $0x7ac] sm:$0xf] %v16593_v20  ;;  %17547 = vmatprep.subr.bf16.mxu1 %v19173_v36 }
  0x3d   : > { %17487 = vmatprep.subr.bf16.mxu0 %v19156_v60  ;;  %574 = vst [vmem:[#allocation2 + $0x870] sm:$0xf] %v16594_v21  ;;  %v19168_v25 = vld [vmem:[%s23618_s1 + $0x150] sm:$0xff]   ;;  %v589_v27 = vld [vmem:[%s20403_s20 + $0x7a] sm:$0xff]  ;;  %v590_v28 = vld [vmem:[%s20403_s20 + $0x82] sm:$0xff] }
  0x3e   : > { %v19153_v13 = vld [vmem:[#allocation2 + $0x624] ss:$196 sps:$4 sm:$0xff]   ;;  %v685_v29 = vld [vmem:[%s20403_s20 + $0x7b] sm:$0xff]  ;;  %v16609_v30 = vpack.c.bf16 %v589_v27, %v589_v27  ;;  %v16610_v31 = vpack.c.bf16 %v590_v28, %v590_v28  ;;  %v19171_v35 = vld [vmem:[%s23618_s1 + $0x110] sm:$0xff]  }
  0x3f   : > { %10669 = vmatmul.mubr.bf16.gmra.mxu0 %v19139_v40  ;;  %v19160_v26 = vld [vmem:[#allocation2 + $0x628] ss:$196 sps:$4 sm:$0xff]   ;;  %v16625_v33 = vpack.c.bf16 %v685_v29, %v685_v29  ;;  %v19175_v38 = vld [vmem:[%s23618_s1 + $0x1e0] sm:$0xff]   ;;  %v399_v39 = vld [vmem:[%s20403_s20 + $0x90] sm:$0xff] }
  0x40   : > { %10676 = vmatprep.mubr.bf16.mxu0 %v19145_v0  ;;  %17488 = vmatpush3.bf16.msra.mxu0 %v19159_v7  ;;  %v19157_v24 = vld [vmem:[#allocation2 + $0x62c] ss:$196 sps:$4 sm:$0xff]   ;;  %v686_v32 = vld [vmem:[%s20403_s20 + $0x83] sm:$0xff]  ;;  %669 = vst [vmem:[#allocation2 + $0x7b0] sm:$0xf] %v16609_v30  ;;  %v400_v40 = vld [vmem:[%s20403_s20 + $0x98] sm:$0xff]  ;;  %v16579_v42 = vpack.c.bf16 %v399_v39, %v399_v39 }
  0x41   : > { %10766 = vmatmul.mubr.bf16.gmra.mxu1 %v19144_v55  ;;  %17489 = vmatprep.subr.bf16.mxu0 %v19168_v25  ;;  %v16626_v34 = vpack.c.bf16 %v686_v32, %v686_v32  ;;  %670 = vst [vmem:[#allocation2 + $0x874] sm:$0xf] %v16610_v31  ;;  %765 = vst [vmem:[#allocation2 + $0x7b4] sm:$0xf] %v16625_v33  ;;  %v19174_v37 = vld [vmem:[%s23618_s1 + $0x1a8] sm:$0xff]   ;;  %v16580_v43 = vpack.c.bf16 %v400_v40, %v400_v40  ;;  %v495_v45 = vld [vmem:[%s20403_s20 + $0x91] sm:$0xff] }
  0x42   : > { %10773 = vmatprep.mubr.bf16.mxu1 %v19149_v9  ;;  %v19167_v44 = vld [vmem:[#allocation2 + $0x7a8] ss:$196 sps:$4 sm:$0xff]   ;;  %17548 = vmatpush3.bf16.msra.mxu1 %v19174_v37  ;;  %v496_v46 = vld [vmem:[%s20403_s20 + $0x99] sm:$0xff]  ;;  %479 = vst [vmem:[#allocation2 + $0x930] sm:$0xf] %v16579_v42  ;;  %v16595_v47 = vpack.c.bf16 %v495_v45, %v495_v45  ;;  %v16611_v55 = vpack.c.bf16 %v591_v51, %v591_v51  ;;  %v19187_v0 = vld [vmem:[%s23618_s1 + $0x1d0] sm:$0xff]  }
  0x43   : > { %766 = vst [vmem:[#allocation2 + $0x878] sm:$0xf] %v16626_v34  ;;  %17549 = vmatprep.subr.bf16.mxu1 %v19175_v38  ;;  %480 = vst [vmem:[#allocation2 + $0x9f4] sm:$0xf] %v16580_v43  ;;  %v16596_v48 = vpack.c.bf16 %v496_v46, %v496_v46  ;;  %v19178_v49 = vld [vmem:[%s23618_s1 + $0x1a0] sm:$0xff]   ;;  %v19180_v50 = vld [vmem:[%s23618_s1 + $0x148] sm:$0xff]  }
  0x44   : > { %17490 = vmatpush3.bf16.msra.mxu0 %v19171_v35  ;;  %v19164_v41 = vld [vmem:[#allocation2 + $0x7ac] ss:$196 sps:$4 sm:$0xff]   ;;  %1152 = vst [vmem:[#allocation2 + $0x7c4] sm:$0xf] %v16579_v42  ;;  %1153 = vst [vmem:[#allocation2 + $0x888] sm:$0xf] %v16580_v43 }
  0x45   : > { %575 = vst [vmem:[#allocation2 + $0x934] sm:$0xf] %v16595_v47  ;;  %576 = vst [vmem:[#allocation2 + $0x9f8] sm:$0xf] %v16596_v48  ;;  %v592_v52 = vld [vmem:[%s20403_s20 + $0x9a] sm:$0xff]  ;;  %17491 = vmatprep.subr.bf16.mxu0 %v19180_v50  ;;  %v19183_v61 = vld [vmem:[%s23618_s1 + $0x108] sm:$0xff]  }
  0x46   : > { %17550 = vmatpush3.bf16.msra.mxu1 %v19178_v49  ;;  %v16612_v56 = vpack.c.bf16 %v592_v52, %v592_v52  ;;  %v687_v57 = vld [vmem:[%s20403_s20 + $0x93] sm:$0xff]  ;;  %v688_v58 = vld [vmem:[%s20403_s20 + $0x9b] sm:$0xff]  ;;  %671 = vst [vmem:[#allocation2 + $0x938] sm:$0xf] %v16611_v55  ;;  %v401_v1 = vld [vmem:[%s20403_s20 + $0xa8] sm:$0xff] }
  0x47   : > { %10677 = vmatmul.mubr.bf16.gmra.mxu0 %v19147_v4  ;;  %v16627_v59 = vpack.c.bf16 %v687_v57, %v687_v57  ;;  %v16628_v60 = vpack.c.bf16 %v688_v58, %v688_v58  ;;  %v19185_v62 = vld [vmem:[%s23618_s1 + $0x1d8] sm:$0xff]   ;;  %v16581_v3 = vpack.c.bf16 %v401_v1, %v401_v1  ;;  %v402_v5 = vld [vmem:[%s20403_s20 + $0xb0] sm:$0xff]  ;;  %v19192_v12 = vld [vmem:[%s23618_s1 + $0x140] sm:$0xff]  }
  0x48   : > { %10684 = vmatprep.mubr.bf16.mxu0 %v19153_v13  ;;  %v19172_v54 = vld [vmem:[#allocation2 + $0x7b0] ss:$196 sps:$4 sm:$0xff]   ;;  %672 = vst [vmem:[#allocation2 + $0x9fc] sm:$0xf] %v16612_v56  ;;  %17492 = vmatpush3.bf16.msra.mxu0 %v19183_v61  ;;  %v19186_v63 = vld [vmem:[%s23618_s1 + $0x198] sm:$0xff]   ;;  %v16582_v7 = vpack.c.bf16 %v402_v5, %v402_v5  ;;  %v19198_v25 = vld [vmem:[%s23618_s1 + $0x188] sm:$0xff]  }
  0x49   : > { %10774 = vmatmul.mubr.bf16.gmra.mxu1 %v19152_v10  ;;  %767 = vst [vmem:[#allocation2 + $0x93c] sm:$0xf] %v16627_v59  ;;  %768 = vst [vmem:[#allocation2 + $0xa00] sm:$0xf] %v16628_v60  ;;  %17551 = vmatprep.subr.bf16.mxu1 %v19185_v62  ;;  %v497_v6 = vld [vmem:[%s20403_s20 + $0xa9] sm:$0xff]  ;;  %v498_v8 = vld [vmem:[%s20403_s20 + $0xb1] sm:$0xff] }
  0x4a   : > { %10781 = vmatprep.mubr.bf16.mxu1 %v19157_v24  ;;  %v19169_v53 = vld [vmem:[#allocation2 + $0x7b4] ss:$196 sps:$4 sm:$0xff]   ;;  %17552 = vmatpush3.bf16.msra.mxu1 %v19186_v63  ;;  %481 = vst [vmem:[#allocation2 + $0xab8] sm:$0xf] %v16581_v3  ;;  %v16597_v9 = vpack.c.bf16 %v497_v6, %v497_v6  ;;  %1154 = vst [vmem:[#allocation2 + $0x94c] sm:$0xf] %v16581_v3  ;;  %v16598_v10 = vpack.c.bf16 %v498_v8, %v498_v8 }
  0x4b   : > { %v19179_v4 = vld [vmem:[#allocation2 + $0x930] ss:$196 sps:$4 sm:$0xff]   ;;  %17553 = vmatprep.subr.bf16.mxu1 %v19187_v0  ;;  %482 = vst [vmem:[#allocation2 + $0xb7c] sm:$0xf] %v16582_v7  ;;  %1155 = vst [vmem:[#allocation2 + $0xa10] sm:$0xf] %v16582_v7  ;;  %17493 = vmatprep.subr.bf16.mxu0 %v19192_v12 }
  0x4c   : > { %v19176_v2 = vld [vmem:[#allocation2 + $0x934] ss:$196 sps:$4 sm:$0xff]   ;;  %577 = vst [vmem:[#allocation2 + $0xabc] sm:$0xf] %v16597_v9  ;;  %v593_v13 = vld [vmem:[%s20403_s20 + $0xaa] sm:$0xff]  ;;  %v19203_v37 = vld [vmem:[%s23618_s1 + $0x180] sm:$0xff]  }
  0x4d   : > { %v19190_v11 = vld [vmem:[%s23618_s1 + $0x190] sm:$0xff]   ;;  %578 = vst [vmem:[#allocation2 + $0xb80] sm:$0xf] %v16598_v10  ;;  %v16613_v16 = vpack.c.bf16 %v593_v13, %v593_v13  ;;  %v19197_v24 = vld [vmem:[%s23618_s1 + $0x1c8] sm:$0xff]   ;;  %v19204_v38 = vld [vmem:[%s23618_s1 + $0x278] sm:$0xff]  }
  0x4e   : > { %v594_v14 = vld [vmem:[%s20403_s20 + $0xb2] sm:$0xff]  ;;  %17554 = vmatpush3.bf16.msra.mxu1 %v19190_v11  ;;  %v771_v27 = vld [vmem:[%s20403_s20 + $0x4] sm:$0xff]  ;;  %v773_v45 = vld [vmem:[%s20403_s20 + $0x1c] sm:$0xff] }
  0x4f   : > { %10685 = vmatmul.mubr.bf16.gmra.mxu0 %v19155_v23  ;;  %v16614_v17 = vpack.c.bf16 %v594_v14, %v594_v14  ;;  %v19184_v18 = vld [vmem:[#allocation2 + $0x938] ss:$196 sps:$4 sm:$0xff]   ;;  %v689_v19 = vld [vmem:[%s20403_s20 + $0xab] sm:$0xff]  ;;  %673 = vst [vmem:[#allocation2 + $0xac0] sm:$0xf] %v16613_v16  ;;  %v19195_v23 = vld [vmem:[%s23618_s1 + $0x100] sm:$0xff]   ;;  %17555 = vmatprep.subr.bf16.mxu1 %v19197_v24  ;;  %v16631_v31 = vpack.c.bf16 %v771_v27, %v771_v27 }
  0x50   : > { %10692 = vmatprep.mubr.bf16.mxu0 %v19164_v41  ;;  %v19181_v15 = vld [vmem:[#allocation2 + $0x93c] ss:$196 sps:$4 sm:$0xff]   ;;  %v690_v20 = vld [vmem:[%s20403_s20 + $0xb3] sm:$0xff]  ;;  %v16629_v21 = vpack.c.bf16 %v689_v19, %v689_v19  ;;  %17494 = vmatpush3.bf16.msra.mxu0 %v19195_v23  ;;  %v867_v33 = vld [vmem:[%s20403_s20 + $0x5] sm:$0xff]  ;;  %v16633_v47 = vpack.c.bf16 %v773_v45, %v773_v45 }
  0x51   : > { %10782 = vmatmul.mubr.bf16.gmra.mxu1 %v19160_v26  ;;  %674 = vst [vmem:[#allocation2 + $0xb84] sm:$0xf] %v16614_v17  ;;  %v16630_v22 = vpack.c.bf16 %v690_v20, %v690_v20  ;;  %v19199_v26 = vld [vmem:[%s23618_s1 + $0x1c0] sm:$0xff]   ;;  %v772_v28 = vld [vmem:[%s20403_s20 + $0xc] sm:$0xff]  ;;  %851 = vst [vmem:[#allocation2 + $0x10] sm:$0xf] %v16631_v31  ;;  %v16647_v35 = vpack.c.bf16 %v867_v33, %v867_v33  ;;  %17607 = vmatprep.subr.bf16.mxu0 %v19204_v38 }
  0x52   : > { %10789 = vmatprep.mubr.bf16.mxu1 %v19169_v53  ;;  %769 = vst [vmem:[#allocation2 + $0xac4] sm:$0xf] %v16629_v21  ;;  %17556 = vmatpush3.bf16.msra.mxu1 %v19198_v25  ;;  %v19191_v30 = vld [vmem:[#allocation2 + $0xab8] ss:$196 sps:$4 sm:$0xff]   ;;  %v16632_v32 = vpack.c.bf16 %v772_v28, %v772_v28  ;;  %v868_v34 = vld [vmem:[%s20403_s20 + $0xd] sm:$0xff]  ;;  %v774_v46 = vld [vmem:[%s20403_s20 + $0x24] sm:$0xff] }
  0x53   : > { %770 = vst [vmem:[#allocation2 + $0xb88] sm:$0xf] %v16630_v22  ;;  %17557 = vmatprep.subr.bf16.mxu1 %v19199_v26  ;;  %v16648_v36 = vpack.c.bf16 %v868_v34, %v868_v34  ;;  %v963_v39 = vld [vmem:[%s20403_s20 + $0x6] sm:$0xff]  ;;  %947 = vst [vmem:[#allocation2 + $0x14] sm:$0xf] %v16647_v35  ;;  %v964_v43 = vld [vmem:[%s20403_s20 + $0xe] sm:$0xff]  ;;  %v16634_v50 = vpack.c.bf16 %v774_v46, %v774_v46 }
  0x54   : > { %v19188_v29 = vld [vmem:[#allocation2 + $0xabc] ss:$196 sps:$4 sm:$0xff]   ;;  %852 = vst [vmem:[#allocation2 + $0xd4] sm:$0xf] %v16632_v32  ;;  %v16663_v41 = vpack.c.bf16 %v963_v39, %v963_v39  ;;  %v870_v49 = vld [vmem:[%s20403_s20 + $0x25] sm:$0xff]  ;;  %v775_v58 = vld [vmem:[%s20403_s20 + $0x34] sm:$0xff] }
  0x55   : > { %948 = vst [vmem:[#allocation2 + $0xd8] sm:$0xf] %v16648_v36  ;;  %v869_v48 = vld [vmem:[%s20403_s20 + $0x1d] sm:$0xff]  ;;  %v16650_v52 = vpack.c.bf16 %v870_v49, %v870_v49  ;;  %853 = vst [vmem:[#allocation2 + $0x198] sm:$0xf] %v16633_v47  ;;  %v19212_v60 = vld [vmem:[%s23618_s1 + $0x270] sm:$0xff]   ;;  %v16635_v61 = vpack.c.bf16 %v775_v58, %v775_v58 }
  0x56   : > { %17558 = vmatpush3.bf16.msra.mxu1 %v19203_v37  ;;  %1043 = vst [vmem:[#allocation2 + $0x18] sm:$0xf] %v16663_v41  ;;  %v16649_v51 = vpack.c.bf16 %v869_v48, %v869_v48  ;;  %v965_v53 = vld [vmem:[%s20403_s20 + $0x1e] sm:$0xff]  ;;  %1526 = vst [vmem:[#allocation2 + $0x2c] sm:$0xf] %v16633_v47  ;;  %v871_v0 = vld [vmem:[%s20403_s20 + $0x35] sm:$0xff] }
  0x57   : > { %10693 = vmatmul.mubr.bf16.gmra.mxu0 %v19167_v44  ;;  %v16664_v44 = vpack.c.bf16 %v964_v43, %v964_v43  ;;  %v19208_v55 = vld [vmem:[%s23618_s1 + $0x238] sm:$0xff]   ;;  %854 = vst [vmem:[#allocation2 + $0x25c] sm:$0xf] %v16634_v50  ;;  %950 = vst [vmem:[#allocation2 + $0x260] sm:$0xf] %v16650_v52  ;;  %v16665_v56 = vpack.c.bf16 %v965_v53, %v965_v53  ;;  %v16651_v3 = vpack.c.bf16 %v871_v0, %v871_v0  ;;  %v19220_v9 = vld [vmem:[%s23618_s1 + $0x268] sm:$0xff]  }
  0x58   : > { %10700 = vmatprep.mubr.bf16.mxu0 %v19176_v2  ;;  %v19196_v42 = vld [vmem:[#allocation2 + $0xac0] ss:$196 sps:$4 sm:$0xff]   ;;  %949 = vst [vmem:[#allocation2 + $0x19c] sm:$0xf] %v16649_v51  ;;  %1527 = vst [vmem:[#allocation2 + $0xf0] sm:$0xf] %v16634_v50 }
  0x59   : > { %10790 = vmatmul.mubr.bf16.gmra.mxu1 %v19172_v54  ;;  %1044 = vst [vmem:[#allocation2 + $0xdc] sm:$0xf] %v16664_v44  ;;  %v966_v54 = vld [vmem:[%s20403_s20 + $0x26] sm:$0xff]  ;;  %1045 = vst [vmem:[#allocation2 + $0x1a0] sm:$0xf] %v16665_v56  ;;  %v776_v63 = vld [vmem:[%s20403_s20 + $0x3c] sm:$0xff] }
  0x5a   : > { %10797 = vmatprep.mubr.bf16.mxu1 %v19181_v15  ;;  %v19193_v40 = vld [vmem:[#allocation2 + $0xac4] ss:$196 sps:$4 sm:$0xff]   ;;  %v16666_v57 = vpack.c.bf16 %v966_v54, %v966_v54  ;;  %v16636_v1 = vpack.c.bf16 %v776_v63, %v776_v63  ;;  %855 = vst [vmem:[#allocation2 + $0x320] sm:$0xf] %v16635_v61  ;;  %1528 = vst [vmem:[#allocation2 + $0x1b4] sm:$0xf] %v16635_v61 }
  0x5b   : > { %v19200_v59 = vld [vmem:[#allocation2 + $0x10] ss:$196 sps:$4 sm:$0xff]   ;;  %v872_v2 = vld [vmem:[%s20403_s20 + $0x3d] sm:$0xff]  ;;  %951 = vst [vmem:[#allocation2 + $0x324] sm:$0xf] %v16651_v3  ;;  %v19223_v15 = vld [vmem:[%s23618_s1 + $0x228] sm:$0xff]  }
  0x5c   : > { %v19202_v62 = vld [vmem:[#allocation2 + $0x14] ss:$196 sps:$4 sm:$0xff]   ;;  %1046 = vst [vmem:[#allocation2 + $0x264] sm:$0xf] %v16666_v57  ;;  %v16652_v5 = vpack.c.bf16 %v872_v2, %v872_v2  ;;  %v19207_v8 = vld [vmem:[#allocation2 + $0x1c] ss:$196 sps:$4 sm:$0xff]  }
  0x5d   : > { %v967_v6 = vld [vmem:[%s20403_s20 + $0x36] sm:$0xff]  ;;  %856 = vst [vmem:[#allocation2 + $0x3e4] sm:$0xf] %v16636_v1  ;;  %1529 = vst [vmem:[#allocation2 + $0x278] sm:$0xf] %v16636_v1  ;;  %v968_v11 = vld [vmem:[%s20403_s20 + $0x3e] sm:$0xff] }
  0x5e   : > { %v16667_v10 = vpack.c.bf16 %v967_v6, %v967_v6  ;;  %952 = vst [vmem:[#allocation2 + $0x3e8] sm:$0xf] %v16652_v5  ;;  %v16668_v13 = vpack.c.bf16 %v968_v11, %v968_v11  ;;  %v19211_v14 = vld [vmem:[#allocation2 + $0x198] ss:$196 sps:$4 sm:$0xff]   ;;  %v777_v16 = vld [vmem:[%s20403_s20 + $0x4c] sm:$0xff]  ;;  %v19228_v26 = vld [vmem:[%s23618_s1 + $0x260] sm:$0xff]  }
  0x5f   : > { %10701 = vmatmul.mubr.bf16.gmra.mxu0 %v19179_v4  ;;  %v19215_v4 = vld [vmem:[%s23618_s1 + $0x230] sm:$0xff]   ;;  %v19209_v12 = vld [vmem:[#allocation2 + $0x19c] ss:$196 sps:$4 sm:$0xff]   ;;  %v19213_v17 = vld [vmem:[#allocation2 + $0x1a4] ss:$196 sps:$4 sm:$0xff]  }
  0x60   : > { %10708 = vmatprep.mubr.bf16.mxu0 %v19188_v29  ;;  %v19205_v7 = vld [vmem:[#allocation2 + $0x18] ss:$196 sps:$4 sm:$0xff]   ;;  %1047 = vst [vmem:[#allocation2 + $0x328] sm:$0xf] %v16667_v10  ;;  %1048 = vst [vmem:[#allocation2 + $0x3ec] sm:$0xf] %v16668_v13 }
  0x61   : > { %10798 = vmatmul.mubr.bf16.gmra.mxu1 %v19184_v18  ;;  %v16637_v18 = vpack.c.bf16 %v777_v16, %v777_v16  ;;  %v778_v20 = vld [vmem:[%s20403_s20 + $0x54] sm:$0xff]  ;;  %v19231_v32 = vld [vmem:[%s23618_s1 + $0x220] sm:$0xff]   ;;  %v19221_v35 = vld [vmem:[#allocation2 + $0x32c] ss:$196 sps:$4 sm:$0xff]  }
  0x62   : > { %10805 = vmatprep.mubr.bf16.mxu1 %v19193_v40  ;;  %v873_v21 = vld [vmem:[%s20403_s20 + $0x4d] sm:$0xff]  ;;  %v16638_v22 = vpack.c.bf16 %v778_v20, %v778_v20  ;;  %v874_v23 = vld [vmem:[%s20403_s20 + $0x55] sm:$0xff]  ;;  %v779_v33 = vld [vmem:[%s20403_s20 + $0x64] sm:$0xff] }
  0x63   : > { %v19216_v19 = vld [vmem:[#allocation2 + $0x1a0] ss:$196 sps:$4 sm:$0xff]   ;;  %857 = vst [vmem:[#allocation2 + $0x4a8] sm:$0xf] %v16637_v18  ;;  %v16653_v24 = vpack.c.bf16 %v873_v21, %v873_v21  ;;  %1530 = vst [vmem:[#allocation2 + $0x33c] sm:$0xf] %v16637_v18  ;;  %v16654_v25 = vpack.c.bf16 %v874_v23, %v874_v23  ;;  %v16639_v36 = vpack.c.bf16 %v779_v33, %v779_v33 }
  0x64   : > { %v969_v27 = vld [vmem:[%s20403_s20 + $0x4e] sm:$0xff]  ;;  %858 = vst [vmem:[#allocation2 + $0x56c] sm:$0xf] %v16638_v22  ;;  %1531 = vst [vmem:[#allocation2 + $0x400] sm:$0xf] %v16638_v22  ;;  %v875_v38 = vld [vmem:[%s20403_s20 + $0x65] sm:$0xff] }
  0x65   : > { %v19217_v28 = vld [vmem:[#allocation2 + $0x324] ss:$196 sps:$4 sm:$0xff]   ;;  %953 = vst [vmem:[#allocation2 + $0x4ac] sm:$0xf] %v16653_v24  ;;  %v16669_v29 = vpack.c.bf16 %v969_v27, %v969_v27  ;;  %954 = vst [vmem:[#allocation2 + $0x570] sm:$0xf] %v16654_v25 }
  0x66   : > { %v19219_v34 = vld [vmem:[#allocation2 + $0x320] ss:$196 sps:$4 sm:$0xff]   ;;  %v780_v37 = vld [vmem:[%s20403_s20 + $0x6c] sm:$0xff]  ;;  %859 = vst [vmem:[#allocation2 + $0x630] sm:$0xf] %v16639_v36  ;;  %v19236_v44 = vld [vmem:[%s23618_s1 + $0x258] sm:$0xff]  }
  0x67   : > { %10709 = vmatmul.mubr.bf16.gmra.mxu0 %v19191_v30  ;;  %v970_v30 = vld [vmem:[%s20403_s20 + $0x56] sm:$0xff]  ;;  %1049 = vst [vmem:[#allocation2 + $0x4b0] sm:$0xf] %v16669_v29  ;;  %v876_v39 = vld [vmem:[%s20403_s20 + $0x6d] sm:$0xff]  ;;  %v16640_v41 = vpack.c.bf16 %v780_v37, %v780_v37  ;;  %1532 = vst [vmem:[#allocation2 + $0x4c4] sm:$0xf] %v16639_v36 }
  0x68   : > { %10846 = vmatprep.mubr.bf16.mxu0 %v19202_v62  ;;  %v16670_v31 = vpack.c.bf16 %v970_v30, %v970_v30  ;;  %v19224_v40 = vld [vmem:[#allocation2 + $0x328] ss:$196 sps:$4 sm:$0xff]   ;;  %v16656_v43 = vpack.c.bf16 %v876_v39, %v876_v39  ;;  %v19239_v49 = vld [vmem:[%s23618_s1 + $0x218] sm:$0xff]   ;;  %v19248_v5 = vld [vmem:[%s23618_s1 + $0x250] sm:$0xff]  }
  0x69   : > { %10806 = vmatmul.mubr.bf16.gmra.mxu1 %v19196_v42  ;;  %v16655_v42 = vpack.c.bf16 %v875_v38, %v875_v38  ;;  %v971_v45 = vld [vmem:[%s20403_s20 + $0x66] sm:$0xff]  ;;  %v972_v46 = vld [vmem:[%s20403_s20 + $0x6e] sm:$0xff]  ;;  %860 = vst [vmem:[#allocation2 + $0x6f4] sm:$0xf] %v16640_v41  ;;  %1533 = vst [vmem:[#allocation2 + $0x588] sm:$0xf] %v16640_v41 }
  0x6a   : > { %10943 = vmatprep.mubr.bf16.mxu1 %v19207_v8  ;;  %1050 = vst [vmem:[#allocation2 + $0x574] sm:$0xf] %v16670_v31  ;;  %956 = vst [vmem:[#allocation2 + $0x6f8] sm:$0xf] %v16656_v43  ;;  %v16671_v47 = vpack.c.bf16 %v971_v45, %v971_v45  ;;  %v16672_v48 = vpack.c.bf16 %v972_v46, %v972_v46  ;;  %v19241_v51 = vld [vmem:[%s23618_s1 + $0x2f8] sm:$0xff]   ;;  %v782_v57 = vld [vmem:[%s20403_s20 + $0x84] sm:$0xff] }
  0x6b   : > { %955 = vst [vmem:[#allocation2 + $0x634] sm:$0xf] %v16655_v42  ;;  %v19227_v52 = vld [vmem:[#allocation2 + $0x4a8] ss:$196 sps:$4 sm:$0xff]   ;;  %v19229_v53 = vld [vmem:[#allocation2 + $0x4b4] ss:$196 sps:$4 sm:$0xff]   ;;  %17671 = vmatprep.subr.bf16.mxu1 %v19241_v51 }
  0x6c   : > { %v19225_v50 = vld [vmem:[#allocation2 + $0x4ac] ss:$196 sps:$4 sm:$0xff]   ;;  %1051 = vst [vmem:[#allocation2 + $0x638] sm:$0xf] %v16671_v47  ;;  %1052 = vst [vmem:[#allocation2 + $0x6fc] sm:$0xf] %v16672_v48 }
  0x6d   : > { %v19242_v54 = vld [vmem:[%s23618_s1 + $0x2b8] sm:$0xff]   ;;  %v878_v63 = vld [vmem:[%s20403_s20 + $0x85] sm:$0xff]  ;;  %v19251_v10 = vld [vmem:[%s23618_s1 + $0x210] sm:$0xff]  }
  0x6e   : > { %v781_v56 = vld [vmem:[%s20403_s20 + $0x7c] sm:$0xff]  ;;  %v16658_v2 = vpack.c.bf16 %v878_v63, %v878_v63  ;;  %v19254_v13 = vld [vmem:[%s23618_s1 + $0x2a8] sm:$0xff]   ;;  %v19267_v36 = vld [vmem:[%s23618_s1 + $0x2d0] sm:$0xff]  }
  0x6f   : > { %10847 = vmatmul.mubr.bf16.vlgmr.msra.gmra.mxu0 %v19200_v59  ;;  %v16641_v59 = vpack.c.bf16 %v781_v56, %v781_v56  ;;  %v877_v62 = vld [vmem:[%s20403_s20 + $0x7d] sm:$0xff]  ;;  %v19263_v33 = vld [vmem:[%s23618_s1 + $0x208] sm:$0xff]   ;;  %v786_v38 = vld [vmem:[%s20403_s20 + $0xb4] sm:$0xff] }
  0x70   : > { %17608 = vmatpush3.bf16.msra.mxu0 %v19208_v55  ;;  %10854 = vmatprep.mubr.bf16.mxu0 %v19209_v12  ;;  %v19243_v55 = vld [vmem:[%s23618_s1 + $0x2f0] sm:$0xff]   ;;  %v19237_v0 = vld [vmem:[#allocation2 + $0x63c] ss:$196 sps:$4 sm:$0xff]   ;;  %v16657_v1 = vpack.c.bf16 %v877_v62, %v877_v62  ;;  %958 = vst [vmem:[#allocation2 + $0x880] sm:$0xf] %v16658_v2  ;;  %v19253_v12 = vld [vmem:[%s23618_s1 + $0x2e8] sm:$0xff]   ;;  %v16646_v43 = vpack.c.bf16 %v786_v38, %v786_v38 }
  0x71   : > { %17609 = vmatprep.subr.bf16.mxu0 %v19212_v60  ;;  %10944 = vmatmul.mubr.bf16.vlgmr.msra.gmra.mxu1 %v19205_v7  ;;  %v16642_v60 = vpack.c.bf16 %v782_v57, %v782_v57  ;;  %v19232_v61 = vld [vmem:[#allocation2 + $0x4b0] ss:$196 sps:$4 sm:$0xff]   ;;  %861 = vst [vmem:[#allocation2 + $0x7b8] sm:$0xf] %v16641_v59  ;;  %1534 = vst [vmem:[#allocation2 + $0x64c] sm:$0xf] %v16641_v59 }
  0x72   : > { %10951 = vmatprep.mubr.bf16.mxu1 %v19213_v17  ;;  %v19233_v58 = vld [vmem:[#allocation2 + $0x634] ss:$196 sps:$4 sm:$0xff]   ;;  %17672 = vmatpush3.bf16.msra.mxu1 %v19242_v54  ;;  %957 = vst [vmem:[#allocation2 + $0x7bc] sm:$0xf] %v16657_v1  ;;  %v973_v6 = vld [vmem:[%s20403_s20 + $0x7e] sm:$0xff]  ;;  %v974_v7 = vld [vmem:[%s20403_s20 + $0x86] sm:$0xff] }
  0x73   : > { %17673 = vmatprep.subr.bf16.mxu1 %v19243_v55  ;;  %862 = vst [vmem:[#allocation2 + $0x87c] sm:$0xf] %v16642_v60  ;;  %1535 = vst [vmem:[#allocation2 + $0x710] sm:$0xf] %v16642_v60  ;;  %v19235_v3 = vld [vmem:[#allocation2 + $0x630] ss:$196 sps:$4 sm:$0xff]   ;;  %v16673_v8 = vpack.c.bf16 %v973_v6, %v973_v6 }
  0x74   : > { %17610 = vmatpush3.bf16.msra.mxu0 %v19215_v4  ;;  %v19246_v4 = vld [vmem:[%s23618_s1 + $0x2b0] sm:$0xff]   ;;  %v19240_v11 = vld [vmem:[#allocation2 + $0x638] ss:$196 sps:$4 sm:$0xff]   ;;  %v19258_v25 = vld [vmem:[%s23618_s1 + $0x2a0] sm:$0xff]   ;;  %866 = vst [vmem:[#allocation2 + $0xb8c] sm:$0xf] %v16646_v43 }
  0x75   : > { %17611 = vmatprep.subr.bf16.mxu0 %v19220_v9  ;;  %v16674_v9 = vpack.c.bf16 %v974_v7, %v974_v7  ;;  %1053 = vst [vmem:[#allocation2 + $0x7c0] sm:$0xf] %v16673_v8  ;;  %v784_v16 = vld [vmem:[%s20403_s20 + $0x9c] sm:$0xff]  ;;  %v785_v37 = vld [vmem:[%s20403_s20 + $0xac] sm:$0xff]  ;;  %1539 = vst [vmem:[#allocation2 + $0xa20] sm:$0xf] %v16646_v43 }
  0x76   : > { %17674 = vmatpush3.bf16.msra.mxu1 %v19246_v4  ;;  %v879_v17 = vld [vmem:[%s20403_s20 + $0x95] sm:$0xff]  ;;  %v16644_v20 = vpack.c.bf16 %v784_v16, %v784_v16  ;;  %v880_v23 = vld [vmem:[%s20403_s20 + $0x9d] sm:$0xff]  ;;  %v881_v39 = vld [vmem:[%s20403_s20 + $0xad] sm:$0xff]  ;;  %v16645_v42 = vpack.c.bf16 %v785_v37, %v785_v37 }
  0x77   : > { %10855 = vmatmul.mubr.bf16.gmra.mxu0 %v19211_v14  ;;  %1054 = vst [vmem:[#allocation2 + $0x884] sm:$0xf] %v16674_v9  ;;  %17675 = vmatprep.subr.bf16.mxu1 %v19253_v12  ;;  %v19255_v14 = vld [vmem:[%s23618_s1 + $0x2e0] sm:$0xff]   ;;  %v16659_v21 = vpack.c.bf16 %v879_v17, %v879_v17  ;;  %v16660_v24 = vpack.c.bf16 %v880_v23, %v880_v23  ;;  %v975_v27 = vld [vmem:[%s20403_s20 + $0x96] sm:$0xff]  ;;  %v14404_v55 = vld [vmem:[%s20403_s20 + $0xc8] sm:$0xff] }
  0x78   : > { %17612 = vmatpush3.bf16.msra.mxu0 %v19223_v15  ;;  %10862 = vmatprep.mubr.bf16.mxu0 %v19217_v28  ;;  %v783_v15 = vld [vmem:[%s20403_s20 + $0x94] sm:$0xff]  ;;  %864 = vst [vmem:[#allocation2 + $0xa04] sm:$0xf] %v16644_v20  ;;  %1537 = vst [vmem:[#allocation2 + $0x898] sm:$0xf] %v16644_v20  ;;  %v16675_v29 = vpack.c.bf16 %v975_v27, %v975_v27  ;;  %v976_v31 = vld [vmem:[%s20403_s20 + $0x9e] sm:$0xff] }
  0x79   : > { %17613 = vmatprep.subr.bf16.mxu0 %v19228_v26  ;;  %10952 = vmatmul.mubr.bf16.gmra.mxu1 %v19216_v19  ;;  %v19244_v18 = vld [vmem:[#allocation2 + $0x7bc] ss:$196 sps:$4 sm:$0xff]   ;;  %v16643_v19 = vpack.c.bf16 %v783_v15, %v783_v15  ;;  %959 = vst [vmem:[#allocation2 + $0x944] sm:$0xf] %v16659_v21  ;;  %v19260_v26 = vld [vmem:[%s23618_s1 + $0x248] sm:$0xff]   ;;  %v19270_v47 = vld [vmem:[%s23618_s1 + $0x290] sm:$0xff]  }
  0x7a   : > { %10959 = vmatprep.mubr.bf16.mxu1 %v19221_v35  ;;  %17676 = vmatpush3.bf16.msra.mxu1 %v19254_v13  ;;  %v19247_v22 = vld [vmem:[#allocation2 + $0x7b8] ss:$196 sps:$4 sm:$0xff]   ;;  %v19249_v28 = vld [vmem:[#allocation2 + $0x7c4] ss:$196 sps:$4 sm:$0xff]   ;;  %960 = vst [vmem:[#allocation2 + $0xa08] sm:$0xf] %v16660_v24 }
  0x7b   : > { %17677 = vmatprep.subr.bf16.mxu1 %v19255_v14  ;;  %863 = vst [vmem:[#allocation2 + $0x940] sm:$0xf] %v16643_v19  ;;  %1536 = vst [vmem:[#allocation2 + $0x7d4] sm:$0xf] %v16643_v19  ;;  %v19266_v35 = vld [vmem:[%s23618_s1 + $0x298] sm:$0xff]   ;;  %v19272_v48 = vld [vmem:[%s23618_s1 + $0x240] sm:$0xff]  }
  0x7c   : > { %17614 = vmatpush3.bf16.msra.mxu0 %v19231_v32  ;;  %v16676_v32 = vpack.c.bf16 %v976_v31, %v976_v31  ;;  %1055 = vst [vmem:[#allocation2 + $0x948] sm:$0xf] %v16675_v29  ;;  %v882_v45 = vld [vmem:[%s20403_s20 + $0xb5] sm:$0xff]  ;;  %865 = vst [vmem:[#allocation2 + $0xac8] sm:$0xf] %v16645_v42  ;;  %v14403_v54 = vld [vmem:[%s20403_s20 + $0xc0] sm:$0xff] }
  0x7d   : > { %17615 = vmatprep.subr.bf16.mxu0 %v19236_v44  ;;  %v16661_v44 = vpack.c.bf16 %v881_v39, %v881_v39  ;;  %v16662_v46 = vpack.c.bf16 %v882_v45, %v882_v45  ;;  %1538 = vst [vmem:[#allocation2 + $0x95c] sm:$0xf] %v16645_v42  ;;  %v16693_v57 = vpack.c.bf16 %v14403_v54, %v14403_v54  ;;  %v19275_v59 = vld [vmem:[%s23618_s1 + $0x200] sm:$0xff]   ;;  %v19277_v60 = vld [vmem:[%s23618_s1 + $0x2c8] sm:$0xff]   ;;  %v14423_v17 = vld [vmem:[%s20403_s20 + $0x31] sm:$0xff] }
  0x7e   : > { %17678 = vmatpush3.bf16.msra.mxu1 %v19258_v25  ;;  %v19252_v30 = vld [vmem:[#allocation2 + $0x7c0] ss:$196 sps:$4 sm:$0xff]   ;;  %1056 = vst [vmem:[#allocation2 + $0xa0c] sm:$0xf] %v16676_v32  ;;  %v16697_v19 = vpack.c.bf16 %v14423_v17, %v14423_v17  ;;  %v14455_v20 = vld [vmem:[%s20403_s20 + $0x32] sm:$0xff]  ;;  %v19300_v45 = vld [vmem:[%s23618_s1 + $0x368] sm:$0xff]  }
  0x7f   : > { %10863 = vmatmul.mubr.bf16.gmra.mxu0 %v19219_v34  ;;  %v19265_v34 = vld [vmem:[%s23618_s1 + $0x2d8] sm:$0xff]   ;;  %961 = vst [vmem:[#allocation2 + $0xacc] sm:$0xf] %v16661_v44  ;;  %962 = vst [vmem:[#allocation2 + $0xb90] sm:$0xf] %v16662_v46  ;;  %v19279_v62 = vld [vmem:[%s23618_s1 + $0x2c0] sm:$0xff]   ;;  %v16713_v23 = vpack.c.bf16 %v14455_v20, %v14455_v20 }
  0x80   : > { %17616 = vmatpush3.bf16.msra.mxu0 %v19239_v49  ;;  %10870 = vmatprep.mubr.bf16.mxu0 %v19225_v50  ;;  %v977_v49 = vld [vmem:[%s20403_s20 + $0xae] sm:$0xff]  ;;  %1156 = vst [vmem:[#allocation2 + $0xad4] sm:$0xf] %v16693_v57  ;;  %v14421_v63 = vld [vmem:[%s20403_s20 + $0x19] sm:$0xff]  ;;  %v14454_v6 = vld [vmem:[%s20403_s20 + $0x22] sm:$0xff] }
  0x81   : > { %10960 = vmatmul.mubr.bf16.gmra.mxu1 %v19224_v40  ;;  %17617 = vmatprep.subr.bf16.mxu0 %v19248_v5  ;;  %v19256_v40 = vld [vmem:[#allocation2 + $0x944] ss:$196 sps:$4 sm:$0xff]   ;;  %v19261_v50 = vld [vmem:[#allocation2 + $0x94c] ss:$196 sps:$4 sm:$0xff]   ;;  %v14453_v5 = vld [vmem:[%s20403_s20 + $0x1a] sm:$0xff]  ;;  %v16712_v8 = vpack.c.bf16 %v14454_v6, %v14454_v6 }
  0x82   : > { %10967 = vmatprep.mubr.bf16.mxu1 %v19229_v53  ;;  %17679 = vmatprep.subr.bf16.mxu1 %v19265_v34  ;;  %v19259_v41 = vld [vmem:[#allocation2 + $0x940] ss:$196 sps:$4 sm:$0xff]   ;;  %v978_v53 = vld [vmem:[%s20403_s20 + $0xb6] sm:$0xff]  ;;  %v16711_v7 = vpack.c.bf16 %v14453_v5, %v14453_v5  ;;  %1240 = vst [vmem:[#allocation2 + $0x1a8] sm:$0xf] %v16697_v19  ;;  %v14489_v42 = vld [vmem:[%s20403_s20 + $0x4b] sm:$0xff] }
  0x83   : > { %17680 = vmatpush3.bf16.msra.mxu1 %v19266_v35  ;;  %v16678_v56 = vpack.c.bf16 %v978_v53, %v978_v53  ;;  %v19271_v2 = vld [vmem:[#allocation2 + $0xac8] ss:$196 sps:$4 sm:$0xff]   ;;  %v19283_v9 = vld [vmem:[%s23618_s1 + $0x280] sm:$0xff]   ;;  %1335 = vst [vmem:[#allocation2 + $0xe8] sm:$0xf] %v16712_v8  ;;  %v14487_v25 = vld [vmem:[%s20403_s20 + $0x33] sm:$0xff]  ;;  %v16731_v46 = vpack.c.bf16 %v14489_v42, %v14489_v42 }
  0x84   : > { %17618 = vmatpush3.bf16.msra.mxu0 %v19251_v10  ;;  %17681 = vmatprep.subr.bf16.mxu1 %v19267_v36  ;;  %v19284_v10 = vld [vmem:[%s23618_s1 + $0x378] sm:$0xff]   ;;  %1334 = vst [vmem:[#allocation2 + $0x24] sm:$0xf] %v16711_v7  ;;  %v14486_v15 = vld [vmem:[%s20403_s20 + $0x23] sm:$0xff]  ;;  %1913 = vst [vmem:[#allocation2 + $0x3c] sm:$0xf] %v16697_v19 }
  0x85   : > { %17619 = vmatprep.subr.bf16.mxu0 %v19260_v26  ;;  %v19264_v51 = vld [vmem:[#allocation2 + $0x948] ss:$196 sps:$4 sm:$0xff]   ;;  %1058 = vst [vmem:[#allocation2 + $0xb94] sm:$0xf] %v16678_v56  ;;  %v16728_v16 = vpack.c.bf16 %v14486_v15, %v14486_v15  ;;  %v14456_v21 = vld [vmem:[%s20403_s20 + $0x3a] sm:$0xff]  ;;  %v19292_v32 = vld [vmem:[%s23618_s1 + $0x370] sm:$0xff]  }
  0x86   : > { %v19268_v1 = vld [vmem:[#allocation2 + $0xacc] ss:$196 sps:$4 sm:$0xff]   ;;  %v16714_v24 = vpack.c.bf16 %v14456_v21, %v14456_v21  ;;  %v14488_v26 = vld [vmem:[%s20403_s20 + $0x3b] sm:$0xff]  ;;  %1336 = vst [vmem:[#allocation2 + $0x1ac] sm:$0xf] %v16713_v23 }
  0x87   : > { %10871 = vmatmul.mubr.bf16.gmra.mxu0 %v19227_v52  ;;  %17682 = vmatpush3.bf16.msra.mxu1 %v19270_v47  ;;  %v16677_v52 = vpack.c.bf16 %v977_v49, %v977_v49  ;;  %1431 = vst [vmem:[#allocation2 + $0xec] sm:$0xf] %v16728_v16  ;;  %v19288_v27 = vld [vmem:[%s23618_s1 + $0x338] sm:$0xff]   ;;  %v16730_v29 = vpack.c.bf16 %v14488_v26, %v14488_v26  ;;  %v14457_v36 = vld [vmem:[%s20403_s20 + $0x4a] sm:$0xff]  ;;  %1434 = vst [vmem:[#allocation2 + $0x338] sm:$0xf] %v16731_v46 }
  0x88   : > { %10878 = vmatprep.mubr.bf16.mxu0 %v19233_v58  ;;  %17620 = vmatpush3.bf16.msra.mxu0 %v19263_v33  ;;  %v16694_v58 = vpack.c.bf16 %v14404_v55, %v14404_v55  ;;  %1337 = vst [vmem:[#allocation2 + $0x270] sm:$0xf] %v16714_v24  ;;  %v14426_v35 = vld [vmem:[%s20403_s20 + $0x51] sm:$0xff]  ;;  %v16715_v39 = vpack.c.bf16 %v14457_v36, %v14457_v36  ;;  %v14428_v56 = vld [vmem:[%s20403_s20 + $0x69] sm:$0xff]  ;;  %v14429_v5 = vld [vmem:[%s20403_s20 + $0x79] sm:$0xff] }
  0x89   : > { %10968 = vmatmul.mubr.bf16.gmra.mxu1 %v19232_v61  ;;  %17621 = vmatprep.subr.bf16.mxu0 %v19272_v48  ;;  %1057 = vst [vmem:[#allocation2 + $0xad0] sm:$0xf] %v16677_v52  ;;  %v19278_v61 = vld [vmem:[%s23618_s1 + $0x288] sm:$0xff]   ;;  %1433 = vst [vmem:[#allocation2 + $0x274] sm:$0xf] %v16730_v29  ;;  %v16700_v37 = vpack.c.bf16 %v14426_v35, %v14426_v35  ;;  %v14458_v38 = vld [vmem:[%s20403_s20 + $0x52] sm:$0xff]  ;;  %v16703_v8 = vpack.c.bf16 %v14429_v5, %v14429_v5 }
  0x8a   : > { %10975 = vmatprep.mubr.bf16.mxu1 %v19237_v0  ;;  %1157 = vst [vmem:[#allocation2 + $0xb98] sm:$0xf] %v16694_v58  ;;  %17683 = vmatprep.subr.bf16.mxu1 %v19277_v60  ;;  %v14422_v0 = vld [vmem:[%s20403_s20 + $0x21] sm:$0xff]  ;;  %v19287_v44 = vld [vmem:[#allocation2 + $0x2c] ss:$196 sps:$4 sm:$0xff]   ;;  %v16702_v58 = vpack.c.bf16 %v14428_v56, %v14428_v56  ;;  %v19316_v16 = vld [vmem:[%s23618_s1 + $0x358] sm:$0xff]  }
  0x8b   : > { %17684 = vmatpush3.bf16.msra.mxu1 %v19278_v61  ;;  %v16696_v4 = vpack.c.bf16 %v14422_v0, %v14422_v0  ;;  %v19282_v34 = vld [vmem:[#allocation2 + $0x24] ss:$196 sps:$4 sm:$0xff]   ;;  %1243 = vst [vmem:[#allocation2 + $0x3f4] sm:$0xf] %v16700_v37  ;;  %1338 = vst [vmem:[#allocation2 + $0x334] sm:$0xf] %v16715_v39 }
  0x8c   : > { %17622 = vmatpush3.bf16.msra.mxu0 %v19275_v59  ;;  %17685 = vmatprep.subr.bf16.mxu1 %v19279_v62  ;;  %1916 = vst [vmem:[#allocation2 + $0x288] sm:$0xf] %v16700_v37  ;;  %v14490_v47 = vld [vmem:[%s20403_s20 + $0x53] sm:$0xff]  ;;  %v14427_v52 = vld [vmem:[%s20403_s20 + $0x61] sm:$0xff]  ;;  %v14460_v59 = vld [vmem:[%s20403_s20 + $0x6a] sm:$0xff] }
  0x8d   : > { %1239 = vst [vmem:[#allocation2 + $0xe4] sm:$0xf] %v16696_v4  ;;  %17735 = vmatprep.subr.bf16.mxu0 %v19284_v10  ;;  %v16732_v49 = vpack.c.bf16 %v14490_v47, %v14490_v47  ;;  %v19293_v53 = vld [vmem:[#allocation2 + $0x1b4] ss:$196 sps:$4 sm:$0xff]   ;;  %v16701_v54 = vpack.c.bf16 %v14427_v52, %v14427_v52  ;;  %v14459_v57 = vld [vmem:[%s20403_s20 + $0x62] sm:$0xff]  ;;  %v16718_v61 = vpack.c.bf16 %v14460_v59, %v14460_v59 }
  0x8e   : > { %v16717_v60 = vpack.c.bf16 %v14459_v57, %v14459_v57  ;;  %v19308_v62 = vld [vmem:[%s23618_s1 + $0x360] sm:$0xff]   ;;  %1245 = vst [vmem:[#allocation2 + $0x57c] sm:$0xf] %v16702_v58  ;;  %1918 = vst [vmem:[#allocation2 + $0x410] sm:$0xf] %v16702_v58  ;;  %v19319_v21 = vld [vmem:[%s23618_s1 + $0x318] sm:$0xff]  }
  0x8f   : > { %10879 = vmatmul.mubr.bf16.gmra.mxu0 %v19235_v3  ;;  %v16695_v3 = vpack.c.bf16 %v14421_v63, %v14421_v63  ;;  %17686 = vmatpush3.bf16.msra.mxu1 %v19283_v9  ;;  %v19289_v48 = vld [vmem:[#allocation2 + $0x1ac] ss:$196 sps:$4 sm:$0xff]   ;;  %1435 = vst [vmem:[#allocation2 + $0x3fc] sm:$0xf] %v16732_v49  ;;  %1244 = vst [vmem:[#allocation2 + $0x4b8] sm:$0xf] %v16701_v54 }
  0x90   : > { %10886 = vmatprep.mubr.bf16.mxu0 %v19244_v18  ;;  %v19276_v14 = vld [vmem:[#allocation2 + $0xad0] ss:$196 sps:$4 sm:$0xff]   ;;  %v14424_v18 = vld [vmem:[%s20403_s20 + $0x39] sm:$0xff]  ;;  %1917 = vst [vmem:[#allocation2 + $0x34c] sm:$0xf] %v16701_v54  ;;  %v14491_v63 = vld [vmem:[%s20403_s20 + $0x63] sm:$0xff] }
  0x91   : > { %10976 = vmatmul.mubr.bf16.gmra.mxu1 %v19240_v11  ;;  %1238 = vst [vmem:[#allocation2 + $0x20] sm:$0xf] %v16695_v3  ;;  %v14485_v11 = vld [vmem:[%s20403_s20 + $0x1b] sm:$0xff]  ;;  %1340 = vst [vmem:[#allocation2 + $0x4bc] sm:$0xf] %v16717_v60  ;;  %v14495_v42 = vld [vmem:[%s20403_s20 + $0x93] sm:$0xff] }
  0x92   : > { %10983 = vmatprep.mubr.bf16.mxu1 %v19249_v28  ;;  %v19273_v12 = vld [vmem:[#allocation2 + $0xad4] ss:$196 sps:$4 sm:$0xff]   ;;  %v16727_v13 = vpack.c.bf16 %v14485_v11, %v14485_v11  ;;  %v16729_v28 = vpack.c.bf16 %v14487_v25, %v14487_v25  ;;  %1341 = vst [vmem:[#allocation2 + $0x580] sm:$0xf] %v16718_v61  ;;  %v19311_v4 = vld [vmem:[%s23618_s1 + $0x320] sm:$0xff]   ;;  %v19334_v49 = vld [vmem:[%s23618_s1 + $0x3a8] sm:$0xff]  }
  0x93   : > { %v19301_v7 = vld [vmem:[#allocation2 + $0x33c] ss:$196 sps:$4 sm:$0xff]   ;;  %1246 = vst [vmem:[#allocation2 + $0x640] sm:$0xf] %v16703_v8  ;;  %1919 = vst [vmem:[#allocation2 + $0x4d4] sm:$0xf] %v16703_v8 }
  0x94   : > { %1430 = vst [vmem:[#allocation2 + $0x28] sm:$0xf] %v16727_v13  ;;  %1432 = vst [vmem:[#allocation2 + $0x1b0] sm:$0xf] %v16729_v28  ;;  %v14430_v9 = vld [vmem:[%s20403_s20 + $0x81] sm:$0xff]  ;;  %v19321_v23 = vld [vmem:[%s23618_s1 + $0x3f8] sm:$0xff]  }
  0x95   : > { %v14461_v10 = vld [vmem:[%s20403_s20 + $0x7a] sm:$0xff]  ;;  %v14462_v11 = vld [vmem:[%s20403_s20 + $0x82] sm:$0xff]  ;;  %v16704_v13 = vpack.c.bf16 %v14430_v9, %v14430_v9  ;;  %17799 = vmatprep.subr.bf16.mxu1 %v19321_v23  ;;  %v14431_v28 = vld [vmem:[%s20403_s20 + $0x91] sm:$0xff] }
  0x96   : > { %v16720_v15 = vpack.c.bf16 %v14462_v11, %v14462_v11  ;;  %v14493_v17 = vld [vmem:[%s20403_s20 + $0x7b] sm:$0xff]  ;;  %v19309_v25 = vld [vmem:[#allocation2 + $0x4c4] ss:$196 sps:$4 sm:$0xff]   ;;  %v19317_v36 = vld [vmem:[#allocation2 + $0x64c] ss:$196 sps:$4 sm:$0xff]  }
  0x97   : > { %10887 = vmatmul.mubr.bf16.gmra.mxu0 %v19247_v22  ;;  %v16698_v22 = vpack.c.bf16 %v14424_v18, %v14424_v18  ;;  %v14494_v18 = vld [vmem:[%s20403_s20 + $0x83] sm:$0xff]  ;;  %1247 = vst [vmem:[#allocation2 + $0x704] sm:$0xf] %v16704_v13  ;;  %v16735_v19 = vpack.c.bf16 %v14493_v17, %v14493_v17  ;;  %1920 = vst [vmem:[#allocation2 + $0x598] sm:$0xf] %v16704_v13  ;;  %v19322_v26 = vld [vmem:[%s23618_s1 + $0x3b8] sm:$0xff]  }
  0x98   : > { %10894 = vmatprep.mubr.bf16.mxu0 %v19256_v40  ;;  %v19280_v31 = vld [vmem:[#allocation2 + $0x20] ss:$196 sps:$4 sm:$0xff]   ;;  %v19295_v40 = vld [vmem:[%s23618_s1 + $0x330] sm:$0xff]   ;;  %1343 = vst [vmem:[#allocation2 + $0x708] sm:$0xf] %v16720_v15  ;;  %v16736_v20 = vpack.c.bf16 %v14494_v18, %v14494_v18  ;;  %v19343_v5 = vld [vmem:[%s23618_s1 + $0x308] sm:$0xff]  }
  0x99   : > { %10984 = vmatmul.mubr.bf16.gmra.mxu1 %v19252_v30  ;;  %1241 = vst [vmem:[#allocation2 + $0x26c] sm:$0xf] %v16698_v22  ;;  %v14425_v30 = vld [vmem:[%s20403_s20 + $0x49] sm:$0xff]  ;;  %1914 = vst [vmem:[#allocation2 + $0x100] sm:$0xf] %v16698_v22  ;;  %v14432_v29 = vld [vmem:[%s20403_s20 + $0x99] sm:$0xff] }
  0x9a   : > { %10991 = vmatprep.mubr.bf16.mxu1 %v19261_v50  ;;  %v16699_v33 = vpack.c.bf16 %v14425_v30, %v14425_v30  ;;  %v19305_v22 = vld [vmem:[#allocation2 + $0x4bc] ss:$196 sps:$4 sm:$0xff]   ;;  %1438 = vst [vmem:[#allocation2 + $0x648] sm:$0xf] %v16735_v19  ;;  %1439 = vst [vmem:[#allocation2 + $0x70c] sm:$0xf] %v16736_v20 }
  0x9b   : > { %v19285_v43 = vld [vmem:[#allocation2 + $0x28] ss:$196 sps:$4 sm:$0xff]   ;;  %v19296_v55 = vld [vmem:[#allocation2 + $0x1b0] ss:$196 sps:$4 sm:$0xff]   ;;  %v19307_v24 = vld [vmem:[#allocation2 + $0x4b8] ss:$196 sps:$4 sm:$0xff]  }
  0x9c   : > { %1242 = vst [vmem:[#allocation2 + $0x330] sm:$0xf] %v16699_v33  ;;  %1915 = vst [vmem:[#allocation2 + $0x1c4] sm:$0xf] %v16699_v33  ;;  %v14464_v35 = vld [vmem:[%s20403_s20 + $0x9a] sm:$0xff]  ;;  %v19331_v46 = vld [vmem:[%s23618_s1 + $0x310] sm:$0xff]  }
  0x9d   : > { %v14434_v52 = vld [vmem:[%s20403_s20 + $0xb1] sm:$0xff]  ;;  %v19338_v61 = vld [vmem:[%s23618_s1 + $0x3a0] sm:$0xff]  }
  0x9e   : > { %v19315_v39 = vld [vmem:[#allocation2 + $0x640] ss:$196 sps:$4 sm:$0xff]   ;;  %v16708_v56 = vpack.c.bf16 %v14434_v52, %v14434_v52  ;;  %v14466_v59 = vld [vmem:[%s20403_s20 + $0xb2] sm:$0xff]  ;;  %v14468_v17 = vld [vmem:[%s20403_s20 + $0xca] sm:$0xff] }
  0x9f   : > { %10895 = vmatmul.mubr.bf16.gmra.mxu0 %v19259_v41  ;;  %v16716_v41 = vpack.c.bf16 %v14458_v38, %v14458_v38  ;;  %v16722_v38 = vpack.c.bf16 %v14464_v35, %v14464_v35  ;;  %v16724_v60 = vpack.c.bf16 %v14466_v59, %v14466_v59  ;;  %v19347_v8 = vld [vmem:[%s23618_s1 + $0x3d0] sm:$0xff]   ;;  %v14435_v9 = vld [vmem:[%s20403_s20 + $0xc1] sm:$0xff]  ;;  %v16726_v18 = vpack.c.bf16 %v14468_v17, %v14468_v17 }
  0xa0   : > { %10902 = vmatprep.mubr.bf16.mxu0 %v19268_v1  ;;  %v19291_v50 = vld [vmem:[#allocation2 + $0x1a8] ss:$196 sps:$4 sm:$0xff]   ;;  %v16733_v1 = vpack.c.bf16 %v14491_v63, %v14491_v63  ;;  %1251 = vst [vmem:[#allocation2 + $0xa14] sm:$0xf] %v16708_v56  ;;  %1924 = vst [vmem:[#allocation2 + $0x8a8] sm:$0xf] %v16708_v56 }
  0xa1   : > { %10992 = vmatmul.mubr.bf16.gmra.mxu1 %v19264_v51  ;;  %1339 = vst [vmem:[#allocation2 + $0x3f8] sm:$0xf] %v16716_v41  ;;  %v19303_v51 = vld [vmem:[%s23618_s1 + $0x328] sm:$0xff]   ;;  %1345 = vst [vmem:[#allocation2 + $0x890] sm:$0xf] %v16722_v38  ;;  %v19328_v41 = vld [vmem:[%s23618_s1 + $0x350] sm:$0xff]  }
  0xa2   : > { %10999 = vmatprep.mubr.bf16.mxu1 %v19273_v12  ;;  %1436 = vst [vmem:[#allocation2 + $0x4c0] sm:$0xf] %v16733_v1  ;;  %v19304_v12 = vld [vmem:[#allocation2 + $0x338] ss:$196 sps:$4 sm:$0xff]   ;;  %v19320_v47 = vld [vmem:[#allocation2 + $0x648] ss:$196 sps:$4 sm:$0xff]  }
  0xa3   : > { %v19299_v6 = vld [vmem:[#allocation2 + $0x330] ss:$196 sps:$4 sm:$0xff]   ;;  %1347 = vst [vmem:[#allocation2 + $0xa18] sm:$0xf] %v16724_v60  ;;  %v14467_v11 = vld [vmem:[%s20403_s20 + $0xc2] sm:$0xff] }
  0xa4   : > { %v14497_v63 = vld [vmem:[%s20403_s20 + $0xab] sm:$0xff]  ;;  %v19352_v20 = vld [vmem:[%s23618_s1 + $0x340] sm:$0xff]   ;;  %1349 = vst [vmem:[#allocation2 + $0xba0] sm:$0xf] %v16726_v18 }
  0xa5   : > { %v16739_v1 = vpack.c.bf16 %v14497_v63, %v14497_v63  ;;  %v19350_v19 = vld [vmem:[%s23618_s1 + $0x390] sm:$0xff]   ;;  %v19363_v56 = vld [vmem:[%s23618_s1 + $0x380] sm:$0xff]  }
  0xa6   : > { %v14584_v17 = vld [vmem:[%s20403_s20 + $0x3e] sm:$0xff] }
  0xa7   : > { %10903 = vmatmul.mubr.bf16.gmra.mxu0 %v19271_v2  ;;  %v14492_v2 = vld [vmem:[%s20403_s20 + $0x6b] sm:$0xff]  ;;  %1442 = vst [vmem:[#allocation2 + $0x958] sm:$0xf] %v16739_v1 }
  0xa8   : > { %11040 = vmatprep.mubr.bf16.mxu0 %v19282_v34  ;;  %v19297_v0 = vld [vmem:[#allocation2 + $0x334] ss:$196 sps:$4 sm:$0xff]   ;;  %v16734_v3 = vpack.c.bf16 %v14492_v2, %v14492_v2 }
  0xa9   : > { %11000 = vmatmul.mubr.bf16.gmra.mxu1 %v19276_v14  ;;  %v16719_v14 = vpack.c.bf16 %v14461_v10, %v14461_v10  ;;  %v14463_v34 = vld [vmem:[%s20403_s20 + $0x92] sm:$0xff]  ;;  %v14436_v10 = vld [vmem:[%s20403_s20 + $0xc9] sm:$0xff] }
  0xaa   : > { %11137 = vmatprep.mubr.bf16.mxu1 %v19287_v44  ;;  %1437 = vst [vmem:[#allocation2 + $0x584] sm:$0xf] %v16734_v3  ;;  %v16721_v37 = vpack.c.bf16 %v14463_v34, %v14463_v34  ;;  %v16737_v44 = vpack.c.bf16 %v14495_v42, %v14495_v42  ;;  %v14498_v3 = vld [vmem:[%s20403_s20 + $0xb3] sm:$0xff]  ;;  %v16710_v15 = vpack.c.bf16 %v14436_v10, %v14436_v10  ;;  %v19357_v34 = vld [vmem:[%s23618_s1 + $0x3c8] sm:$0xff]   ;;  %v14552_v10 = vld [vmem:[%s20403_s20 + $0x3d] sm:$0xff] }
  0xab   : > { %1342 = vst [vmem:[#allocation2 + $0x644] sm:$0xf] %v16719_v14  ;;  %v16709_v14 = vpack.c.bf16 %v14435_v9, %v14435_v9  ;;  %v14551_v9 = vld [vmem:[%s20403_s20 + $0x35] sm:$0xff] }
  0xac   : > { %1344 = vst [vmem:[#allocation2 + $0x7cc] sm:$0xf] %v16721_v37  ;;  %1440 = vst [vmem:[#allocation2 + $0x7d0] sm:$0xf] %v16737_v44 }
  0xad   : > { %1252 = vst [vmem:[#allocation2 + $0xad8] sm:$0xf] %v16709_v14  ;;  %1253 = vst [vmem:[#allocation2 + $0xb9c] sm:$0xf] %v16710_v15 }
  0xae   : > { %1925 = vst [vmem:[#allocation2 + $0x96c] sm:$0xf] %v16709_v14  ;;  %1926 = vst [vmem:[#allocation2 + $0xa30] sm:$0xf] %v16710_v15  ;;  %v16761_v15 = vpack.c.bf16 %v14551_v9, %v14551_v9 }
  0xaf   : > { %11041 = vmatmul.mubr.bf16.vlgmr.msra.gmra.mxu0 %v19280_v31  ;;  %v16705_v31 = vpack.c.bf16 %v14431_v28, %v14431_v28  ;;  %v14532_v28 = vld [vmem:[%s20403_s20 + $0xcc] sm:$0xff] }
  0xb0   : > { %17736 = vmatpush3.bf16.msra.mxu0 %v19288_v27  ;;  %11048 = vmatprep.mubr.bf16.mxu0 %v19289_v48  ;;  %v19323_v27 = vld [vmem:[%s23618_s1 + $0x3f0] sm:$0xff]   ;;  %v19333_v48 = vld [vmem:[%s23618_s1 + $0x3e8] sm:$0xff]   ;;  %1624 = vst [vmem:[#allocation2 + $0x1b8] sm:$0xf] %v16761_v15 }
  0xb1   : > { %17737 = vmatprep.subr.bf16.mxu0 %v19292_v32  ;;  %11138 = vmatmul.mubr.bf16.vlgmr.msra.gmra.mxu1 %v19285_v43  ;;  %v16706_v32 = vpack.c.bf16 %v14432_v29, %v14432_v29  ;;  %v19312_v33 = vld [vmem:[#allocation2 + $0x4c0] ss:$196 sps:$4 sm:$0xff]   ;;  %1248 = vst [vmem:[#allocation2 + $0x7c8] sm:$0xf] %v16705_v31  ;;  %1921 = vst [vmem:[#allocation2 + $0x65c] sm:$0xf] %v16705_v31  ;;  %v16758_v31 = vpack.c.bf16 %v14532_v28, %v14532_v28 }
  0xb2   : > { %11145 = vmatprep.mubr.bf16.mxu1 %v19293_v53  ;;  %v19313_v30 = vld [vmem:[#allocation2 + $0x644] ss:$196 sps:$4 sm:$0xff]   ;;  %17800 = vmatpush3.bf16.msra.mxu1 %v19322_v26  ;;  %v14496_v43 = vld [vmem:[%s20403_s20 + $0x9b] sm:$0xff] }
  0xb3   : > { %17801 = vmatprep.subr.bf16.mxu1 %v19323_v27  ;;  %1249 = vst [vmem:[#allocation2 + $0x88c] sm:$0xf] %v16706_v32  ;;  %1922 = vst [vmem:[#allocation2 + $0x720] sm:$0xf] %v16706_v32  ;;  %v14465_v53 = vld [vmem:[%s20403_s20 + $0xaa] sm:$0xff]  ;;  %v19355_v32 = vld [vmem:[%s23618_s1 + $0x300] sm:$0xff]  }
  0xb4   : > { %17738 = vmatpush3.bf16.msra.mxu0 %v19295_v40  ;;  %v19326_v40 = vld [vmem:[%s23618_s1 + $0x3b0] sm:$0xff]   ;;  %v16723_v57 = vpack.c.bf16 %v14465_v53, %v14465_v53  ;;  %v14531_v27 = vld [vmem:[%s20403_s20 + $0xc4] sm:$0xff]  ;;  %1541 = vst [vmem:[#allocation2 + $0xba8] sm:$0xf] %v16758_v31  ;;  %v19368_v28 = vld [vmem:[%s23618_s1 + $0x438] sm:$0xff]  }
  0xb5   : > { %17739 = vmatprep.subr.bf16.mxu0 %v19300_v45  ;;  %v16738_v45 = vpack.c.bf16 %v14496_v43, %v14496_v43  ;;  %v19324_v54 = vld [vmem:[#allocation2 + $0x7cc] ss:$196 sps:$4 sm:$0xff]  }
  0xb6   : > { %17802 = vmatpush3.bf16.msra.mxu1 %v19326_v40  ;;  %1346 = vst [vmem:[#allocation2 + $0x954] sm:$0xf] %v16723_v57  ;;  %v14500_v26 = vld [vmem:[%s20403_s20 + $0xcb] sm:$0xff]  ;;  %v14549_v40 = vld [vmem:[%s20403_s20 + $0x1d] sm:$0xff] }
  0xb7   : > { %11049 = vmatmul.mubr.bf16.gmra.mxu0 %v19291_v50  ;;  %1441 = vst [vmem:[#allocation2 + $0x894] sm:$0xf] %v16738_v45  ;;  %17803 = vmatprep.subr.bf16.mxu1 %v19333_v48  ;;  %v19335_v50 = vld [vmem:[%s23618_s1 + $0x3e0] sm:$0xff]   ;;  %v16742_v29 = vpack.c.bf16 %v14500_v26, %v14500_v26  ;;  %v19351_v45 = vld [vmem:[#allocation2 + $0xad8] ss:$196 sps:$4 sm:$0xff]  }
  0xb8   : > { %17740 = vmatpush3.bf16.msra.mxu0 %v19303_v51  ;;  %11056 = vmatprep.mubr.bf16.mxu0 %v19297_v0  ;;  %v14433_v51 = vld [vmem:[%s20403_s20 + $0xa9] sm:$0xff]  ;;  %v19329_v0 = vld [vmem:[#allocation2 + $0x7d4] ss:$196 sps:$4 sm:$0xff]  }
  0xb9   : > { %17741 = vmatprep.subr.bf16.mxu0 %v19308_v62  ;;  %11146 = vmatmul.mubr.bf16.gmra.mxu1 %v19296_v55  ;;  %v16707_v55 = vpack.c.bf16 %v14433_v51, %v14433_v51  ;;  %v19340_v62 = vld [vmem:[%s23618_s1 + $0x348] sm:$0xff]   ;;  %1445 = vst [vmem:[#allocation2 + $0xba4] sm:$0xf] %v16742_v29  ;;  %v19364_v57 = vld [vmem:[%s23618_s1 + $0x478] sm:$0xff]  }
  0xba   : > { %11153 = vmatprep.mubr.bf16.mxu1 %v19301_v7  ;;  %17804 = vmatpush3.bf16.msra.mxu1 %v19334_v49  ;;  %v19327_v58 = vld [vmem:[#allocation2 + $0x7c8] ss:$196 sps:$4 sm:$0xff]   ;;  %v19346_v7 = vld [vmem:[%s23618_s1 + $0x398] sm:$0xff]  }
  0xbb   : > { %17805 = vmatprep.subr.bf16.mxu1 %v19335_v50  ;;  %1250 = vst [vmem:[#allocation2 + $0x950] sm:$0xf] %v16707_v55  ;;  %1923 = vst [vmem:[#allocation2 + $0x7e4] sm:$0xf] %v16707_v55  ;;  %v14581_v50 = vld [vmem:[%s20403_s20 + $0x1e] sm:$0xff]  ;;  %v14582_v51 = vld [vmem:[%s20403_s20 + $0x26] sm:$0xff] }
  0xbc   : > { %17742 = vmatpush3.bf16.msra.mxu0 %v19311_v4  ;;  %v16740_v4 = vpack.c.bf16 %v14498_v3, %v14498_v3  ;;  %v16776_v55 = vpack.c.bf16 %v14582_v51, %v14582_v51 }
  0xbd   : > { %17743 = vmatprep.subr.bf16.mxu0 %v19316_v16  ;;  %v16725_v16 = vpack.c.bf16 %v14467_v11, %v14467_v11  ;;  %v14583_v11 = vld [vmem:[%s20403_s20 + $0x36] sm:$0xff] }
  0xbe   : > { %17806 = vmatpush3.bf16.msra.mxu1 %v19338_v61  ;;  %v19332_v2 = vld [vmem:[#allocation2 + $0x7d0] ss:$196 sps:$4 sm:$0xff]   ;;  %1443 = vst [vmem:[#allocation2 + $0xa1c] sm:$0xf] %v16740_v4  ;;  %1719 = vst [vmem:[#allocation2 + $0xf8] sm:$0xf] %v16776_v55  ;;  %v16777_v18 = vpack.c.bf16 %v14583_v11, %v14583_v11 }
  0xbf   : > { %11057 = vmatmul.mubr.bf16.gmra.mxu0 %v19299_v6  ;;  %v19345_v6 = vld [vmem:[%s23618_s1 + $0x3d8] sm:$0xff]   ;;  %1348 = vst [vmem:[#allocation2 + $0xadc] sm:$0xf] %v16725_v16  ;;  %v16762_v16 = vpack.c.bf16 %v14552_v10, %v14552_v10 }
  0xc0   : > { %17744 = vmatpush3.bf16.msra.mxu0 %v19319_v21  ;;  %11064 = vmatprep.mubr.bf16.mxu0 %v19305_v22  ;;  %v14499_v21 = vld [vmem:[%s20403_s20 + $0xc3] sm:$0xff]  ;;  %1720 = vst [vmem:[#allocation2 + $0x1bc] sm:$0xf] %v16777_v18 }
  0xc1   : > { %11154 = vmatmul.mubr.bf16.gmra.mxu1 %v19304_v12  ;;  %17745 = vmatprep.subr.bf16.mxu0 %v19328_v41  ;;  %v19336_v12 = vld [vmem:[#allocation2 + $0x954] ss:$196 sps:$4 sm:$0xff]   ;;  %v19341_v22 = vld [vmem:[#allocation2 + $0x95c] ss:$196 sps:$4 sm:$0xff]   ;;  %v14550_v41 = vld [vmem:[%s20403_s20 + $0x25] sm:$0xff] }
  0xc2   : > { %11161 = vmatprep.mubr.bf16.mxu1 %v19309_v25  ;;  %17807 = vmatprep.subr.bf16.mxu1 %v19345_v6  ;;  %v19339_v13 = vld [vmem:[#allocation2 + $0x950] ss:$196 sps:$4 sm:$0xff]   ;;  %v20878_v6 = vld [vmem:[%s23619_s2] ss:$0 sm:$0xff]  ;;  %1625 = vst [vmem:[#allocation2 + $0x27c] sm:$0xf] %v16762_v16 }
  0xc3   : > { %17808 = vmatpush3.bf16.msra.mxu1 %v19346_v7  ;;  %v14587_v18 = vld [vmem:[%s20403_s20 + $0x66] sm:$0xff] }
  0xc4   : > { %17746 = vmatpush3.bf16.msra.mxu0 %v19331_v46  ;;  %17809 = vmatprep.subr.bf16.mxu1 %v19347_v8  ;;  %v16759_v46 = vpack.c.bf16 %v14549_v40, %v14549_v40 }
  0xc5   : > { %17747 = vmatprep.subr.bf16.mxu0 %v19340_v62  ;;  %v19344_v23 = vld [vmem:[#allocation2 + $0x958] ss:$196 sps:$4 sm:$0xff]  }
  0xc6   : > { %v19348_v44 = vld [vmem:[#allocation2 + $0xadc] ss:$196 sps:$4 sm:$0xff]   ;;  %1622 = vst [vmem:[#allocation2 + $0x30] sm:$0xf] %v16759_v46 }
  0xc7   : > { %11065 = vmatmul.mubr.bf16.gmra.mxu0 %v19307_v24  ;;  %17810 = vmatpush3.bf16.msra.mxu1 %v19350_v19  ;;  %v16741_v24 = vpack.c.bf16 %v14499_v21, %v14499_v21  ;;  %v16778_v21 = vpack.c.bf16 %v14584_v17, %v14584_v17 }
  0xc8   : > { %11072 = vmatprep.mubr.bf16.mxu0 %v19313_v30  ;;  %17748 = vmatpush3.bf16.msra.mxu0 %v19343_v5  ;;  %v16757_v30 = vpack.c.bf16 %v14531_v27, %v14531_v27 }
  0xc9   : > { %11162 = vmatmul.mubr.bf16.gmra.mxu1 %v19312_v33  ;;  %17749 = vmatprep.subr.bf16.mxu0 %v19352_v20  ;;  %1444 = vst [vmem:[#allocation2 + $0xae0] sm:$0xf] %v16741_v24  ;;  %v14618_v24 = vld [vmem:[%s20403_s20 + $0x50] sm:$0xff]  ;;  %1721 = vst [vmem:[#allocation2 + $0x280] sm:$0xf] %v16778_v21 }
  0xca   : > { %11169 = vmatprep.mubr.bf16.mxu1 %v19317_v36  ;;  %1540 = vst [vmem:[#allocation2 + $0xae4] sm:$0xf] %v16757_v30  ;;  %v19358_v36 = vld [vmem:[%s23618_s1 + $0x388] sm:$0xff]   ;;  %17811 = vmatprep.subr.bf16.mxu1 %v19357_v34  ;;  %v16794_v30 = vpack.c.bf16 %v14618_v24, %v14618_v24  ;;  %v16781_v24 = vpack.c.bf16 %v14587_v18, %v14587_v18 }
  0xcb   : > { %17812 = vmatpush3.bf16.msra.mxu1 %v19358_v36 }
  0xcc   : > { %17750 = vmatpush3.bf16.msra.mxu0 %v19355_v32  ;;  %1820 = vst [vmem:[#allocation2 + $0x284] sm:$0xf] %v16794_v30  ;;  %1724 = vst [vmem:[#allocation2 + $0x4cc] sm:$0xf] %v16781_v24 }
  0xcd   : > { %17863 = vmatprep.subr.bf16.mxu0 %v19364_v57  ;;  %v14619_v57 = vld [vmem:[%s20403_s20 + $0x60] sm:$0xff] }
  0xcf   : > { %11073 = vmatmul.mubr.bf16.gmra.mxu0 %v19315_v39  ;;  %v19359_v39 = vld [vmem:[%s23618_s1 + $0x3c0] sm:$0xff]  }
  0xd0   : > { %11080 = vmatprep.mubr.bf16.mxu0 %v19324_v54  ;;  %17813 = vmatprep.subr.bf16.mxu1 %v19359_v39  ;;  %v16775_v54 = vpack.c.bf16 %v14581_v50, %v14581_v50  ;;  %v19356_v1 = vld [vmem:[#allocation2 + $0xae0] ss:$196 sps:$4 sm:$0xff]   ;;  %v14554_v39 = vld [vmem:[%s20403_s20 + $0x55] sm:$0xff] }
  0xd1   : > { %11170 = vmatmul.mubr.bf16.gmra.mxu1 %v19320_v47  ;;  %v16760_v47 = vpack.c.bf16 %v14550_v41, %v14550_v41  ;;  %v19353_v61 = vld [vmem:[#allocation2 + $0xae4] ss:$196 sps:$4 sm:$0xff]  }
  0xd2   : > { %11177 = vmatprep.mubr.bf16.mxu1 %v19329_v0  ;;  %1718 = vst [vmem:[#allocation2 + $0x34] sm:$0xf] %v16775_v54  ;;  %17814 = vmatpush3.bf16.msra.mxu1 %v19363_v56  ;;  %v19367_v54 = vld [vmem:[#allocation2 + $0x3c] ss:$196 sps:$4 sm:$0xff]  }
  0xd3   : > { %1623 = vst [vmem:[#allocation2 + $0xf4] sm:$0xf] %v16760_v47 }
  0xd7   : > { %11081 = vmatmul.mubr.bf16.gmra.mxu0 %v19327_v58  ;;  %v14615_v58 = vld [vmem:[%s20403_s20 + $0x30] sm:$0xff] }
  0xd8   : > { %11088 = vmatprep.mubr.bf16.mxu0 %v19336_v12  ;;  %v16791_v62 = vpack.c.bf16 %v14615_v58, %v14615_v58  ;;  %v14620_v58 = vld [vmem:[%s20403_s20 + $0x68] sm:$0xff] }
  0xd9   : > { %11178 = vmatmul.mubr.bf16.gmra.mxu1 %v19332_v2  ;;  %v14616_v2 = vld [vmem:[%s20403_s20 + $0x38] sm:$0xff] }
  0xda   : > { %11185 = vmatprep.mubr.bf16.mxu1 %v19341_v22  ;;  %v16792_v5 = vpack.c.bf16 %v14616_v2, %v14616_v2  ;;  %1817 = vst [vmem:[#allocation2 + $0x38] sm:$0xf] %v16791_v62  ;;  %v19360_v32 = vld [vmem:[#allocation2 + $0x30] ss:$196 sps:$4 sm:$0xff]   ;;  %v16795_v62 = vpack.c.bf16 %v14619_v57, %v14619_v57  ;;  %v19369_v2 = vld [vmem:[#allocation2 + $0x1bc] ss:$196 sps:$4 sm:$0xff]  }
  0xdc   : > { %1818 = vst [vmem:[#allocation2 + $0xfc] sm:$0xf] %v16792_v5  ;;  %1821 = vst [vmem:[#allocation2 + $0x348] sm:$0xf] %v16795_v62 }
  0xdf   : > { %11089 = vmatmul.mubr.bf16.gmra.mxu0 %v19339_v13 }
  0xe0   : > { %11096 = vmatprep.mubr.bf16.mxu0 %v19348_v44  ;;  %v14585_v44 = vld [vmem:[%s20403_s20 + $0x4e] sm:$0xff] }
  0xe1   : > { %11186 = vmatmul.mubr.bf16.gmra.mxu1 %v19344_v23  ;;  %v14617_v23 = vld [vmem:[%s20403_s20 + $0x48] sm:$0xff] }
  0xe2   : > { %11193 = vmatprep.mubr.bf16.mxu1 %v19353_v61  ;;  %v16793_v29 = vpack.c.bf16 %v14617_v23, %v14617_v23  ;;  %v19380_v61 = vld [vmem:[%s23618_s1 + $0x468] sm:$0xff]  }
  0xe4   : > { %1819 = vst [vmem:[#allocation2 + $0x1c0] sm:$0xf] %v16793_v29 }
  0xe7   : > { %11097 = vmatmul.mubr.bf16.gmra.mxu0 %v19351_v45  ;;  %v14586_v45 = vld [vmem:[%s20403_s20 + $0x56] sm:$0xff] }
  0xe8   : > { %v16780_v50 = vpack.c.bf16 %v14586_v45, %v14586_v45 }
  0xe9   : > { %11194 = vmatmul.mubr.bf16.gmra.mxu1 %v19356_v1 }
  0xea   : > { %1723 = vst [vmem:[#allocation2 + $0x408] sm:$0xf] %v16780_v50  ;;  %11331 = vmatprep.mubr.bf16.mxu1 %v19367_v54 }
  0xeb   : > { %v19376_v11 = vld [vmem:[#allocation2 + $0x1c0] ss:$196 sps:$4 sm:$0xff]  }
  0xef   : > { %v17367_v25 = vpop.f32.mrf.mxu0 }
  0xf1   : > { %v17368_v33 = vpop.f32.mrf.mxu0  ;;  %v17431_v37 = vpop.f32.mrf.mxu1 }
  0xf2   : > { %v17369_v35 = vadd.f32 %v17368_v33, %v17367_v25  ;;  %v19372_v33 = vld [vmem:[%s23618_s1 + $0x470] sm:$0xff]  }
  0xf3   : > { %v17370_v38 = vpop.f32.mrf.mxu0  ;;  %v17432_v42 = vpop.f32.mrf.mxu1 }
  0xf4   : > { %v17433_v48 = vadd.f32 %v17432_v42, %v17431_v37  ;;  %v10655_v7 = vadd.f32 %v17369_v35, %v20878_v6  ;;  %v19362_v37 = vld [vmem:[#allocation2 + $0x34] ss:$196 sps:$4 sm:$0xff]  }
  0xf5   : > { %v17371_v43 = vpop.f32.mrf.mxu0  ;;  %v17434_v52 = vpop.f32.mrf.mxu1  ;;  %11234 = vmatprep.mubr.bf16.mxu0 %v19362_v37 }
  0xf6   : > { %v17372_v49 = vadd.f32 %v17371_v43, %v17370_v38  ;;  %v20887_v20 = vadd.f32 %v17433_v48, %v10655_v7  ;;  %v14553_v38 = vld [vmem:[%s20403_s20 + $0x4d] sm:$0xff]  ;;  %v16764_v43 = vpack.c.bf16 %v14554_v39, %v14554_v39  ;;  %11235 = vmatmul.mubr.bf16.vlgmr.msra.gmra.mxu0 %v19360_v32  ;;  %v19391_v39 = vld [vmem:[%s23618_s1 + $0x420] sm:$0xff]  }
  0xf7   : > { %v17373_v53 = vpop.f32.mrf.mxu0  ;;  %v17435_v59 = vpop.f32.mrf.mxu1  ;;  %v16763_v42 = vpack.c.bf16 %v14553_v38, %v14553_v38  ;;  %v19375_v48 = vld [vmem:[%s23618_s1 + $0x430] sm:$0xff]   ;;  %17864 = vmatpush3.bf16.msra.mxu0 %v19368_v28  ;;  %11242 = vmatprep.mubr.bf16.mxu0 %v19369_v2  ;;  %v14621_v28 = vld [vmem:[%s20403_s20 + $0x78] sm:$0xff] }
  0xf8   : > { %v17436_v63 = vadd.f32 %v17435_v59, %v17434_v52  ;;  %v10658_v8 = vadd.f32 %v17372_v49, %v20878_v6  ;;  %v16779_v49 = vpack.c.bf16 %v14585_v44, %v14585_v44  ;;  %1627 = vst [vmem:[#allocation2 + $0x404] sm:$0xf] %v16764_v43  ;;  %17865 = vmatprep.subr.bf16.mxu0 %v19372_v33  ;;  %v19381_v43 = vld [vmem:[#allocation2 + $0x34c] ss:$196 sps:$4 sm:$0xff]  }
  0xf9   : > { %v17374_v60 = vpop.f32.mrf.mxu0  ;;  %v17437_v3 = vpop.f32.mrf.mxu1  ;;  %1626 = vst [vmem:[#allocation2 + $0x340] sm:$0xf] %v16763_v42  ;;  %v16797_v32 = vpack.c.bf16 %v14621_v28, %v14621_v28 }
  0xfa   : > { %v17375_v0 = vadd.f32 %v17374_v60, %v17373_v53  ;;  %v20889_v22 = vadd.f32 %v17436_v63, %v10658_v8  ;;  %v19365_v53 = vld [vmem:[#allocation2 + $0x38] ss:$196 sps:$4 sm:$0xff]   ;;  %1722 = vst [vmem:[#allocation2 + $0x344] sm:$0xf] %v16779_v49  ;;  %v16796_v63 = vpack.c.bf16 %v14620_v58, %v14620_v58  ;;  %v19373_v8 = vld [vmem:[#allocation2 + $0x1c4] ss:$196 sps:$4 sm:$0xff]  }
  0xfb   : > { %v17376_v4 = vpop.f32.mrf.mxu0  ;;  %v17438_v13 = vpop.f32.mrf.mxu1  ;;  %11332 = vmatmul.mubr.bf16.vlgmr.msra.gmra.mxu1 %v19365_v53  ;;  %17866 = vmatpush3.bf16.msra.mxu0 %v19375_v48  ;;  %1823 = vst [vmem:[#allocation2 + $0x4d0] sm:$0xf] %v16797_v32  ;;  %v14558_v48 = vld [vmem:[%s20403_s20 + $0x85] sm:$0xff] }
  0xfc   : > { %v10663_v12 = vadd.f32 %v17375_v0, %v20878_v6  ;;  %v17439_v19 = vadd.f32 %v17438_v13, %v17437_v3  ;;  %v19371_v3 = vld [vmem:[#allocation2 + $0x1b8] ss:$196 sps:$4 sm:$0xff]   ;;  %1822 = vst [vmem:[#allocation2 + $0x40c] sm:$0xf] %v16796_v63  ;;  %v14556_v13 = vld [vmem:[%s20403_s20 + $0x6d] sm:$0xff]  ;;  %11339 = vmatprep.mubr.bf16.mxu1 %v19373_v8  ;;  %17867 = vmatprep.subr.bf16.mxu0 %v19380_v61 }
  0xfd   : > { %v17377_v14 = vpop.f32.mrf.mxu0  ;;  %v17440_v26 = vpop.f32.mrf.mxu1  ;;  %v16766_v17 = vpack.c.bf16 %v14556_v13, %v14556_v13  ;;  %v14589_v49 = vld [vmem:[%s20403_s20 + $0x7e] sm:$0xff]  ;;  %v16768_v54 = vpack.c.bf16 %v14558_v48, %v14558_v48 }
  0xfe   : > { %v17378_v25 = vadd.f32 %v17377_v14, %v17376_v4  ;;  %v20896_v31 = vadd.f32 %v17439_v19, %v10663_v12  ;;  %v19383_v4 = vld [vmem:[%s23618_s1 + $0x428] sm:$0xff]   ;;  %11243 = vmatmul.mubr.bf16.gmra.mxu0 %v19371_v3  ;;  %v14624_v61 = vld [vmem:[%s20403_s20 + $0x98] sm:$0xff] }
  0xff   : > { %v17379_v27 = vpop.f32.mrf.mxu0  ;;  %v17441_v35 = vpop.f32.mrf.mxu1  ;;  %v14555_v12 = vld [vmem:[%s20403_s20 + $0x65] sm:$0xff]  ;;  %v14588_v19 = vld [vmem:[%s20403_s20 + $0x6e] sm:$0xff]  ;;  %1629 = vst [vmem:[#allocation2 + $0x58c] sm:$0xf] %v16766_v17  ;;  %17868 = vmatpush3.bf16.msra.mxu0 %v19383_v4  ;;  %1631 = vst [vmem:[#allocation2 + $0x714] sm:$0xf] %v16768_v54  ;;  %v16800_v3 = vpack.c.bf16 %v14624_v61, %v14624_v61 }
 0x100   : > { %v10666_v34 = vadd.f32 %v17378_v25, %v20878_v6  ;;  %v17442_v40 = vadd.f32 %v17441_v35, %v17440_v26  ;;  %v16765_v16 = vpack.c.bf16 %v14555_v12, %v14555_v12  ;;  %v16782_v25 = vpack.c.bf16 %v14588_v19, %v14588_v19  ;;  %v14622_v35 = vld [vmem:[%s20403_s20 + $0x80] sm:$0xff]  ;;  %v19400_v4 = vld [vmem:[%s23618_s1 + $0x418] sm:$0xff]   ;;  %v19408_v54 = vld [vmem:[%s23618_s1 + $0x450] sm:$0xff]  }
 0x101   : > { %v17380_v36 = vpop.f32.mrf.mxu0  ;;  %v17443_v46 = vpop.f32.mrf.mxu1  ;;  %v19377_v30 = vld [vmem:[#allocation2 + $0x344] ss:$196 sps:$4 sm:$0xff]   ;;  %v16798_v38 = vpack.c.bf16 %v14622_v35, %v14622_v35  ;;  %1826 = vst [vmem:[#allocation2 + $0x71c] sm:$0xf] %v16800_v3  ;;  %v19401_v13 = vld [vmem:[%s23618_s1 + $0x4f8] sm:$0xff]  }
 0x102   : > { %v17381_v41 = vadd.f32 %v17380_v36, %v17379_v27  ;;  %v20909_v51 = vadd.f32 %v17442_v40, %v10666_v34  ;;  %v19388_v27 = vld [vmem:[%s23618_s1 + $0x460] sm:$0xff]   ;;  %1628 = vst [vmem:[#allocation2 + $0x4c8] sm:$0xf] %v16765_v16  ;;  %1725 = vst [vmem:[#allocation2 + $0x590] sm:$0xf] %v16782_v25  ;;  %11250 = vmatprep.mubr.bf16.mxu0 %v19377_v30  ;;  %17927 = vmatprep.subr.bf16.mxu1 %v19401_v13  ;;  %v19403_v25 = vld [vmem:[%s23618_s1 + $0x4f0] sm:$0xff]  }
 0x103   : > { %v17382_v47 = vpop.f32.mrf.mxu0  ;;  %v17444_v55 = vpop.f32.mrf.mxu1  ;;  %17869 = vmatprep.subr.bf16.mxu0 %v19388_v27  ;;  %11340 = vmatmul.mubr.bf16.gmra.mxu1 %v19376_v11  ;;  %1824 = vst [vmem:[#allocation2 + $0x594] sm:$0xf] %v16798_v38  ;;  %v19384_v53 = vld [vmem:[#allocation2 + $0x348] ss:$196 sps:$4 sm:$0xff]   ;;  %v19389_v17 = vld [vmem:[#allocation2 + $0x4d4] ss:$196 sps:$4 sm:$0xff]  }
 0x104   : > { %v10671_v52 = vadd.f32 %v17381_v41, %v20878_v6  ;;  %v17445_v59 = vadd.f32 %v17444_v55, %v17443_v46  ;;  %v14557_v41 = vld [vmem:[%s20403_s20 + $0x7d] sm:$0xff]  ;;  %11347 = vmatprep.mubr.bf16.mxu1 %v19381_v43  ;;  %17870 = vmatpush3.bf16.msra.mxu0 %v19391_v39  ;;  %v14590_v55 = vld [vmem:[%s20403_s20 + $0x86] sm:$0xff]  ;;  %v14559_v27 = vld [vmem:[%s20403_s20 + $0x95] sm:$0xff] }
 0x105   : > { %v17383_v56 = vpop.f32.mrf.mxu0  ;;  %v17446_v0 = vpop.f32.mrf.mxu1  ;;  %v16767_v46 = vpack.c.bf16 %v14557_v41, %v14557_v41  ;;  %v16784_v58 = vpack.c.bf16 %v14590_v55, %v14590_v55  ;;  %v14560_v30 = vld [vmem:[%s20403_s20 + $0x9d] sm:$0xff]  ;;  %v16769_v32 = vpack.c.bf16 %v14559_v27, %v14559_v27  ;;  %v14625_v55 = vld [vmem:[%s20403_s20 + $0xa8] sm:$0xff]  ;;  %v14562_v13 = vld [vmem:[%s20403_s20 + $0xb5] sm:$0xff] }
 0x106   : > { %v17384_v60 = vadd.f32 %v17383_v56, %v17382_v47  ;;  %v20920_v5 = vadd.f32 %v17445_v59, %v10671_v52  ;;  %v19379_v47 = vld [vmem:[#allocation2 + $0x340] ss:$196 sps:$4 sm:$0xff]   ;;  %v16783_v56 = vpack.c.bf16 %v14589_v49, %v14589_v49  ;;  %v19396_v59 = vld [vmem:[%s23618_s1 + $0x458] sm:$0xff]   ;;  %v16770_v38 = vpack.c.bf16 %v14560_v30, %v14560_v30  ;;  %v19413_v3 = vld [vmem:[%s23618_s1 + $0x4e8] sm:$0xff]  }
 0x107   : > { %v17385_v1 = vpop.f32.mrf.mxu0  ;;  %v17447_v9 = vpop.f32.mrf.mxu1  ;;  %1630 = vst [vmem:[#allocation2 + $0x650] sm:$0xf] %v16767_v46  ;;  %11251 = vmatmul.mubr.bf16.gmra.mxu0 %v19379_v47  ;;  %1727 = vst [vmem:[#allocation2 + $0x718] sm:$0xf] %v16784_v58  ;;  %17871 = vmatprep.subr.bf16.mxu0 %v19396_v59  ;;  %v14592_v46 = vld [vmem:[%s20403_s20 + $0x9e] sm:$0xff]  ;;  %v14626_v58 = vld [vmem:[%s20403_s20 + $0xb0] sm:$0xff]  ;;  %v16801_v59 = vpack.c.bf16 %v14625_v55, %v14625_v55 }
 0x108   : > { %v10674_v7 = vadd.f32 %v17384_v60, %v20878_v6  ;;  %v17448_v14 = vadd.f32 %v17447_v9, %v17446_v0  ;;  %v14623_v60 = vld [vmem:[%s20403_s20 + $0x90] sm:$0xff]  ;;  %1726 = vst [vmem:[#allocation2 + $0x654] sm:$0xf] %v16783_v56  ;;  %17872 = vmatpush3.bf16.msra.mxu0 %v19400_v4  ;;  %1632 = vst [vmem:[#allocation2 + $0x7d8] sm:$0xf] %v16769_v32 }
 0x109   : > { %v17386_v10 = vpop.f32.mrf.mxu0  ;;  %v17449_v21 = vpop.f32.mrf.mxu1  ;;  %v16799_v2 = vpack.c.bf16 %v14623_v60, %v14623_v60  ;;  %v19387_v16 = vld [vmem:[#allocation2 + $0x4c8] ss:$196 sps:$4 sm:$0xff]   ;;  %2305 = vst [vmem:[#allocation2 + $0x66c] sm:$0xf] %v16769_v32  ;;  %1633 = vst [vmem:[#allocation2 + $0x89c] sm:$0xf] %v16770_v38  ;;  %17873 = vmatprep.subr.bf16.mxu0 %v19408_v54 }
 0x10a   : > { %v17387_v15 = vadd.f32 %v17386_v10, %v17385_v1  ;;  %v20927_v26 = vadd.f32 %v17448_v14, %v10674_v7  ;;  %v19385_v7 = vld [vmem:[#allocation2 + $0x4cc] ss:$196 sps:$4 sm:$0xff]   ;;  %2306 = vst [vmem:[#allocation2 + $0x730] sm:$0xf] %v16770_v38  ;;  %1827 = vst [vmem:[#allocation2 + $0x7e0] sm:$0xf] %v16801_v59 }
 0x10b   : > { %v17388_v23 = vpop.f32.mrf.mxu0  ;;  %v17450_v33 = vpop.f32.mrf.mxu1  ;;  %1825 = vst [vmem:[#allocation2 + $0x658] sm:$0xf] %v16799_v2  ;;  %11258 = vmatprep.mubr.bf16.mxu0 %v19385_v7  ;;  %11348 = vmatmul.mubr.bf16.gmra.mxu1 %v19384_v53  ;;  %v19414_v7 = vld [vmem:[%s23618_s1 + $0x4a8] sm:$0xff]  }
 0x10c   : > { %v10679_v29 = vadd.f32 %v17387_v15, %v20878_v6  ;;  %v17451_v36 = vadd.f32 %v17450_v33, %v17449_v21  ;;  %v19402_v21 = vld [vmem:[%s23618_s1 + $0x4b8] sm:$0xff]   ;;  %11355 = vmatprep.mubr.bf16.mxu1 %v19389_v17 }
 0x10d   : > { %v17389_v34 = vpop.f32.mrf.mxu0  ;;  %v17452_v40 = vpop.f32.mrf.mxu1  ;;  %17928 = vmatpush3.bf16.msra.mxu1 %v19402_v21  ;;  %v14591_v33 = vld [vmem:[%s20403_s20 + $0x96] sm:$0xff] }
 0x10e   : > { %v17390_v37 = vadd.f32 %v17389_v34, %v17388_v23  ;;  %v20939_v44 = vadd.f32 %v17451_v36, %v10679_v29  ;;  %v19392_v36 = vld [vmem:[#allocation2 + $0x4d0] ss:$196 sps:$4 sm:$0xff]   ;;  %17929 = vmatprep.subr.bf16.mxu1 %v19403_v25  ;;  %v16785_v39 = vpack.c.bf16 %v14591_v33, %v14591_v33  ;;  %v19420_v33 = vld [vmem:[%s23618_s1 + $0x448] sm:$0xff]  }
 0x10f   : > { %v17391_v42 = vpop.f32.mrf.mxu0  ;;  %v17453_v50 = vpop.f32.mrf.mxu1  ;;  %11259 = vmatmul.mubr.bf16.gmra.mxu0 %v19387_v16  ;;  %v19393_v49 = vld [vmem:[#allocation2 + $0x650] ss:$196 sps:$4 sm:$0xff]  }
 0x110   : > { %v10682_v45 = vadd.f32 %v17390_v37, %v20878_v6  ;;  %v17454_v57 = vadd.f32 %v17453_v50, %v17452_v40  ;;  %v19395_v37 = vld [vmem:[#allocation2 + $0x654] ss:$196 sps:$4 sm:$0xff]   ;;  %1728 = vst [vmem:[#allocation2 + $0x7dc] sm:$0xf] %v16785_v39  ;;  %v16786_v50 = vpack.c.bf16 %v14592_v46, %v14592_v46  ;;  %v19411_v39 = vld [vmem:[#allocation2 + $0x7e4] ss:$196 sps:$4 sm:$0xff]  }
 0x111   : > { %v17392_v52 = vpop.f32.mrf.mxu0  ;;  %v17455_v63 = vpop.f32.mrf.mxu1  ;;  %11266 = vmatprep.mubr.bf16.mxu0 %v19395_v37  ;;  %v14594_v16 = vld [vmem:[%s20403_s20 + $0xb6] sm:$0xff]  ;;  %v19424_v46 = vld [vmem:[%s23618_s1 + $0x408] sm:$0xff]  }
 0x112   : > { %v17393_v62 = vadd.f32 %v17392_v52, %v17391_v42  ;;  %v20950_v1 = vadd.f32 %v17454_v57, %v10682_v45  ;;  %v19399_v45 = vld [vmem:[#allocation2 + $0x65c] ss:$196 sps:$4 sm:$0xff]   ;;  %v19407_v52 = vld [vmem:[%s23618_s1 + $0x4b0] sm:$0xff]   ;;  %1729 = vst [vmem:[#allocation2 + $0x8a0] sm:$0xf] %v16786_v50 }
 0x113   : > { %v17394_v0 = vpop.f32.mrf.mxu0  ;;  %v17456_v9 = vpop.f32.mrf.mxu1  ;;  %11356 = vmatmul.mubr.bf16.gmra.mxu1 %v19392_v36  ;;  %v14628_v36 = vld [vmem:[%s20403_s20 + $0xc8] sm:$0xff] }
 0x114   : > { %v10687_v8 = vadd.f32 %v17393_v62, %v20878_v6  ;;  %v17457_v11 = vadd.f32 %v17456_v9, %v17455_v63  ;;  %11363 = vmatprep.mubr.bf16.mxu1 %v19399_v45  ;;  %17930 = vmatpush3.bf16.msra.mxu1 %v19407_v52  ;;  %v19397_v62 = vld [vmem:[#allocation2 + $0x658] ss:$196 sps:$4 sm:$0xff]   ;;  %v16802_v63 = vpack.c.bf16 %v14626_v58, %v14626_v58 }
 0x115   : > { %v17395_v10 = vpop.f32.mrf.mxu0  ;;  %v17458_v14 = vpop.f32.mrf.mxu1  ;;  %17931 = vmatprep.subr.bf16.mxu1 %v19413_v3  ;;  %v19426_v52 = vld [vmem:[%s23618_s1 + $0x498] sm:$0xff]   ;;  %v14595_v3 = vld [vmem:[%s20403_s20 + $0xc6] sm:$0xff] }
 0x116   : > { %v17396_v12 = vadd.f32 %v17395_v10, %v17394_v0  ;;  %v20959_v18 = vadd.f32 %v17457_v11, %v10687_v8  ;;  %v19412_v0 = vld [vmem:[%s23618_s1 + $0x410] sm:$0xff]   ;;  %1828 = vst [vmem:[#allocation2 + $0x8a4] sm:$0xf] %v16802_v63  ;;  %v19415_v10 = vld [vmem:[%s23618_s1 + $0x4e0] sm:$0xff]  }
 0x117   : > { %v17397_v15 = vpop.f32.mrf.mxu0  ;;  %v17459_v23 = vpop.f32.mrf.mxu1  ;;  %17874 = vmatpush3.bf16.msra.mxu0 %v19412_v0  ;;  %v14561_v11 = vld [vmem:[%s20403_s20 + $0xad] sm:$0xff] }
 0x118   : > { %v10690_v19 = vadd.f32 %v17396_v12, %v20878_v6  ;;  %v17460_v28 = vadd.f32 %v17459_v23, %v17458_v14  ;;  %11267 = vmatmul.mubr.bf16.gmra.mxu0 %v19393_v49  ;;  %17932 = vmatpush3.bf16.msra.mxu1 %v19414_v7  ;;  %v16771_v14 = vpack.c.bf16 %v14561_v11, %v14561_v11  ;;  %v19431_v11 = vld [vmem:[%s23618_s1 + $0x490] sm:$0xff]  }
 0x119   : > { %v17398_v24 = vpop.f32.mrf.mxu0  ;;  %v17461_v34 = vpop.f32.mrf.mxu1  ;;  %17933 = vmatprep.subr.bf16.mxu1 %v19415_v10  ;;  %v16788_v23 = vpack.c.bf16 %v14594_v16, %v14594_v16  ;;  %17875 = vmatprep.subr.bf16.mxu0 %v19420_v33 }
 0x11a   : > { %v17399_v29 = vadd.f32 %v17398_v24, %v17397_v15  ;;  %v20971_v40 = vadd.f32 %v17460_v28, %v10690_v19  ;;  %v14593_v15 = vld [vmem:[%s20403_s20 + $0xae] sm:$0xff]  ;;  %v16772_v19 = vpack.c.bf16 %v14562_v13, %v14562_v13  ;;  %v19419_v24 = vld [vmem:[%s23618_s1 + $0x4a0] sm:$0xff]   ;;  %v19404_v28 = vld [vmem:[#allocation2 + $0x7d8] ss:$196 sps:$4 sm:$0xff]   ;;  %1634 = vst [vmem:[#allocation2 + $0x960] sm:$0xf] %v16771_v14 }
 0x11b   : > { %v17400_v35 = vpop.f32.mrf.mxu0  ;;  %v17462_v42 = vpop.f32.mrf.mxu1  ;;  %v16787_v21 = vpack.c.bf16 %v14593_v15, %v14593_v15  ;;  %11364 = vmatmul.mubr.bf16.gmra.mxu1 %v19397_v62  ;;  %2307 = vst [vmem:[#allocation2 + $0x7f4] sm:$0xf] %v16771_v14  ;;  %1731 = vst [vmem:[#allocation2 + $0xa28] sm:$0xf] %v16788_v23  ;;  %17876 = vmatpush3.bf16.msra.mxu0 %v19424_v46  ;;  %v14629_v23 = vld [vmem:[%s20403_s20 + $0xd8] sm:$0xff] }
 0x11c   : > { %v10695_v41 = vadd.f32 %v17399_v29, %v20878_v6  ;;  %v17463_v47 = vadd.f32 %v17462_v42, %v17461_v34  ;;  %v19406_v29 = vld [vmem:[#allocation2 + $0x7dc] ss:$196 sps:$4 sm:$0xff]   ;;  %1635 = vst [vmem:[#allocation2 + $0xa24] sm:$0xf] %v16772_v19  ;;  %2308 = vst [vmem:[#allocation2 + $0x8b8] sm:$0xf] %v16772_v19  ;;  %17934 = vmatpush3.bf16.msra.mxu1 %v19419_v24  ;;  %v16804_v42 = vpack.c.bf16 %v14628_v36, %v14628_v36 }
 0x11d   : > { %v17401_v43 = vpop.f32.mrf.mxu0  ;;  %v17464_v53 = vpop.f32.mrf.mxu1  ;;  %1730 = vst [vmem:[#allocation2 + $0x964] sm:$0xf] %v16787_v21  ;;  %11274 = vmatprep.mubr.bf16.mxu0 %v19406_v29  ;;  %v19409_v38 = vld [vmem:[#allocation2 + $0x7e0] ss:$196 sps:$4 sm:$0xff]   ;;  %11371 = vmatprep.mubr.bf16.mxu1 %v19411_v39  ;;  %v16805_v29 = vpack.c.bf16 %v14629_v23, %v14629_v23  ;;  %v19438_v39 = vld [vmem:[%s23618_s1 + $0x488] sm:$0xff]  }
 0x11e   : > { %v17402_v48 = vadd.f32 %v17401_v43, %v17400_v35  ;;  %v20982_v56 = vadd.f32 %v17463_v47, %v10695_v41  ;;  %v14627_v35 = vld [vmem:[%s20403_s20 + $0xc0] sm:$0xff]  ;;  %1830 = vst [vmem:[#allocation2 + $0xa2c] sm:$0xf] %v16804_v42 }
 0x11f   : > { %v17403_v60 = vpop.f32.mrf.mxu0  ;;  %v17465_v61 = vpop.f32.mrf.mxu1  ;;  %v16803_v41 = vpack.c.bf16 %v14627_v35, %v14627_v35  ;;  %v19432_v19 = vld [vmem:[%s23618_s1 + $0x440] sm:$0xff]   ;;  %1831 = vst [vmem:[#allocation2 + $0xaf0] sm:$0xf] %v16805_v29 }
 0x120   : > { %v10698_v57 = vadd.f32 %v17402_v48, %v20878_v6  ;;  %v17466_v2 = vadd.f32 %v17465_v61, %v17464_v53  ;;  %11275 = vmatmul.mubr.bf16.gmra.mxu0 %v19404_v28  ;;  %v19425_v48 = vld [vmem:[%s23618_s1 + $0x4d8] sm:$0xff]   ;;  %v19427_v53 = vld [vmem:[%s23618_s1 + $0x4d0] sm:$0xff]   ;;  %v14630_v24 = vld [vmem:[%s20403_s20 + $0xe0] sm:$0xff]  ;;  %17877 = vmatprep.subr.bf16.mxu0 %v19432_v19 }
 0x121   : > { %v17404_v4 = vpop.f32.mrf.mxu0  ;;  %v17467_v17 = vpop.f32.mrf.mxu1  ;;  %1829 = vst [vmem:[#allocation2 + $0x968] sm:$0xf] %v16803_v41  ;;  %17935 = vmatprep.subr.bf16.mxu1 %v19425_v48  ;;  %v14564_v61 = vld [vmem:[%s20403_s20 + $0xcd] sm:$0xff]  ;;  %v19436_v36 = vld [vmem:[%s23618_s1 + $0x400] sm:$0xff]  }
 0x122   : > { %v20995_v8 = vadd.f32 %v17466_v2, %v10698_v57  ;;  %v17405_v9 = vadd.f32 %v17404_v4, %v17403_v60  ;;  %17936 = vmatpush3.bf16.msra.mxu1 %v19426_v52  ;;  %v14563_v60 = vld [vmem:[%s20403_s20 + $0xc5] sm:$0xff]  ;;  %v16774_v2 = vpack.c.bf16 %v14564_v61, %v14564_v61  ;;  %v14596_v4 = vld [vmem:[%s20403_s20 + $0xce] sm:$0xff]  ;;  %17878 = vmatpush3.bf16.msra.mxu0 %v19436_v36  ;;  %v14680_v46 = vld [vmem:[%s20403_s20 + $0x3a] sm:$0xff] }
 0x123   : > { %v17406_v12 = vpop.f32.mrf.mxu0  ;;  %v17468_v30 = vpop.f32.mrf.mxu1  ;;  %11372 = vmatmul.mubr.bf16.gmra.mxu1 %v19409_v38  ;;  %v19416_v57 = vld [vmem:[#allocation2 + $0x960] ss:$196 sps:$4 sm:$0xff]   ;;  %17937 = vmatprep.subr.bf16.mxu1 %v19427_v53  ;;  %v16773_v0 = vpack.c.bf16 %v14563_v60, %v14563_v60  ;;  %v16790_v10 = vpack.c.bf16 %v14596_v4, %v14596_v4 }
 0x124   : > { %v10703_v25 = vadd.f32 %v17405_v9, %v20878_v6  ;;  %v17469_v34 = vadd.f32 %v17468_v30, %v17467_v17  ;;  %v19418_v59 = vld [vmem:[#allocation2 + $0x964] ss:$196 sps:$4 sm:$0xff]   ;;  %v16789_v9 = vpack.c.bf16 %v14595_v3, %v14595_v3  ;;  %1637 = vst [vmem:[#allocation2 + $0xbac] sm:$0xf] %v16774_v2  ;;  %2310 = vst [vmem:[#allocation2 + $0xa40] sm:$0xf] %v16774_v2 }
 0x125   : > { %v17407_v27 = vpop.f32.mrf.mxu0  ;;  %v17470_v37 = vpop.f32.mrf.mxu1  ;;  %11282 = vmatprep.mubr.bf16.mxu0 %v19418_v59  ;;  %1636 = vst [vmem:[#allocation2 + $0xae8] sm:$0xf] %v16773_v0  ;;  %2309 = vst [vmem:[#allocation2 + $0x97c] sm:$0xf] %v16773_v0  ;;  %v19423_v17 = vld [vmem:[#allocation2 + $0x96c] ss:$196 sps:$4 sm:$0xff]   ;;  %v16806_v30 = vpack.c.bf16 %v14630_v24, %v14630_v24 }
 0x126   : > { %v17408_v32 = vadd.f32 %v17407_v27, %v17406_v12  ;;  %v21013_v43 = vadd.f32 %v17469_v34, %v10703_v25  ;;  %1732 = vst [vmem:[#allocation2 + $0xaec] sm:$0xf] %v16789_v9  ;;  %1733 = vst [vmem:[#allocation2 + $0xbb0] sm:$0xf] %v16790_v10  ;;  %17938 = vmatpush3.bf16.msra.mxu1 %v19431_v11  ;;  %v14661_v25 = vld [vmem:[%s20403_s20 + $0xd9] sm:$0xff]  ;;  %11379 = vmatprep.mubr.bf16.mxu1 %v19423_v17 }
 0x127   : > { %v17471_v47 = vpop.f32.mrf.mxu1  ;;  %v17409_v49 = vpop.f32.mrf.mxu0  ;;  %v16821_v33 = vpack.c.bf16 %v14661_v25, %v14661_v25  ;;  %1832 = vst [vmem:[#allocation2 + $0xbb4] sm:$0xf] %v16806_v30  ;;  %v19439_v42 = vld [vmem:[%s23618_s1 + $0x4c0] sm:$0xff]   ;;  %v19444_v2 = vld [vmem:[%s23618_s1 + $0x578] sm:$0xff]  }
 0x128   : > { %v10706_v45 = vadd.f32 %v17408_v32, %v20878_v6  ;;  %v17472_v50 = vadd.f32 %v17471_v47, %v17470_v37  ;;  %v19421_v14 = vld [vmem:[#allocation2 + $0x968] ss:$196 sps:$4 sm:$0xff]   ;;  %11283 = vmatmul.mubr.bf16.gmra.mxu0 %v19416_v57  ;;  %v14711_v57 = vld [vmem:[%s20403_s20 + $0x33] sm:$0xff]  ;;  %v14744_v9 = vld [vmem:[%s20403_s20 + $0x3c] sm:$0xff]  ;;  %17991 = vmatprep.subr.bf16.mxu0 %v19444_v2 }
 0x129   : > { %v17410_v55 = vpop.f32.mrf.mxu0  ;;  %v17473_v62 = vpop.f32.mrf.mxu1  ;;  %v14662_v32 = vld [vmem:[%s20403_s20 + $0xe1] sm:$0xff]  ;;  %1927 = vst [vmem:[#allocation2 + $0xaf4] sm:$0xf] %v16821_v33  ;;  %v16839_v60 = vpack.c.bf16 %v14711_v57, %v14711_v57  ;;  %v14775_v17 = vld [vmem:[%s20403_s20 + $0x35] sm:$0xff] }
 0x12a   : > { %v21028_v54 = vadd.f32 %v17472_v50, %v10706_v45  ;;  %v17411_v58 = vadd.f32 %v17410_v55, %v17409_v49  ;;  %v16822_v35 = vpack.c.bf16 %v14662_v32, %v14662_v32  ;;  %v14679_v45 = vld [vmem:[%s20403_s20 + $0x32] sm:$0xff]  ;;  %v16824_v50 = vpack.c.bf16 %v14680_v46, %v14680_v46  ;;  %v14776_v19 = vld [vmem:[%s20403_s20 + $0x3d] sm:$0xff] }
 0x12b   : > { %v17412_v63 = vpop.f32.mrf.mxu0  ;;  %v17474_v12 = vpop.f32.mrf.mxu1  ;;  %11380 = vmatmul.mubr.bf16.gmra.mxu1 %v19421_v14  ;;  %v16823_v49 = vpack.c.bf16 %v14679_v45, %v14679_v45  ;;  %2105 = vst [vmem:[#allocation2 + $0x44] sm:$0xf] %v16839_v60  ;;  %v16856_v14 = vpack.c.bf16 %v14744_v9, %v14744_v9  ;;  %v16871_v24 = vpack.c.bf16 %v14775_v17, %v14775_v17  ;;  %v14682_v32 = vld [vmem:[%s20403_s20 + $0x52] sm:$0xff] }
 0x12c   : > { %v10711_v7 = vadd.f32 %v17411_v58, %v20878_v6  ;;  %v17475_v15 = vadd.f32 %v17474_v12, %v17473_v62  ;;  %1928 = vst [vmem:[#allocation2 + $0xbb8] sm:$0xf] %v16822_v35  ;;  %v19428_v48 = vld [vmem:[#allocation2 + $0xae8] ss:$196 sps:$4 sm:$0xff]   ;;  %v14712_v58 = vld [vmem:[%s20403_s20 + $0x3b] sm:$0xff]  ;;  %v16872_v25 = vpack.c.bf16 %v14776_v19, %v14776_v19  ;;  %v14714_v35 = vld [vmem:[%s20403_s20 + $0x53] sm:$0xff] }
 0x12d   : > { %v17413_v13 = vpop.f32.mrf.mxu0  ;;  %v17476_v21 = vpop.f32.mrf.mxu1  ;;  %v19430_v55 = vld [vmem:[#allocation2 + $0xaec] ss:$196 sps:$4 sm:$0xff]   ;;  %2009 = vst [vmem:[#allocation2 + $0x40] sm:$0xf] %v16823_v49  ;;  %2010 = vst [vmem:[#allocation2 + $0x104] sm:$0xf] %v16824_v50  ;;  %v16840_v61 = vpack.c.bf16 %v14712_v58, %v14712_v58 }
 0x12e   : > { %v17414_v16 = vadd.f32 %v17413_v13, %v17412_v63  ;;  %v21044_v27 = vadd.f32 %v17475_v15, %v10711_v7  ;;  %v19443_v62 = vld [vmem:[%s23618_s1 + $0x480] sm:$0xff]   ;;  %11290 = vmatprep.mubr.bf16.mxu0 %v19430_v55  ;;  %v14743_v7 = vld [vmem:[%s20403_s20 + $0x34] sm:$0xff]  ;;  %2202 = vst [vmem:[#allocation2 + $0x10c] sm:$0xf] %v16856_v14  ;;  %2297 = vst [vmem:[#allocation2 + $0x4c] sm:$0xf] %v16871_v24 }
 0x12f   : > { %v17477_v34 = vpop.f32.mrf.mxu1  ;;  %v17495_v38 = vpop.f32.mrf.mxu0  ;;  %2106 = vst [vmem:[#allocation2 + $0x108] sm:$0xf] %v16840_v61  ;;  %v19433_v12 = vld [vmem:[#allocation2 + $0xaf0] ss:$196 sps:$4 sm:$0xff]   ;;  %v16855_v13 = vpack.c.bf16 %v14743_v7, %v14743_v7  ;;  %2298 = vst [vmem:[#allocation2 + $0x110] sm:$0xf] %v16872_v25 }
 0x130   : > { %v10714_v28 = vadd.f32 %v17414_v16, %v20878_v6  ;;  %v17478_v37 = vadd.f32 %v17477_v34, %v17476_v21  ;;  %v19437_v6 = vld [vmem:[%s23618_s1 + $0x4c8] sm:$0xff]   ;;  %11291 = vmatmul.mubr.bf16.gmra.mxu0 %v19428_v48  ;;  %v19448_v45 = vld [vmem:[%s23618_s1 + $0x538] sm:$0xff]   ;;  %v19456_v7 = vld [vmem:[%s23618_s1 + $0x530] sm:$0xff]  }
 0x131   : > { %17939 = vmatprep.subr.bf16.mxu1 %v19437_v6  ;;  %v17496_v47 = vpop.f32.mrf.mxu0  ;;  %v17559_v53 = vpop.f32.mrf.mxu1  ;;  %2201 = vst [vmem:[#allocation2 + $0x48] sm:$0xf] %v16855_v13  ;;  %v14713_v34 = vld [vmem:[%s20403_s20 + $0x4b] sm:$0xff]  ;;  %v14778_v61 = vld [vmem:[%s20403_s20 + $0x55] sm:$0xff] }
 0x132   : > { %v21057_v41 = vadd.f32 %v17478_v37, %v10714_v28  ;;  %17940 = vmatpush3.bf16.msra.mxu1 %v19438_v39  ;;  %v17497_v52 = vadd.f32 %v17496_v47, %v17495_v38  ;;  %v14681_v28 = vld [vmem:[%s20403_s20 + $0x4a] sm:$0xff]  ;;  %v16841_v6 = vpack.c.bf16 %v14713_v34, %v14713_v34  ;;  %v16842_v38 = vpack.c.bf16 %v14714_v35, %v14714_v35  ;;  %v14746_v47 = vld [vmem:[%s20403_s20 + $0x54] sm:$0xff] }
 0x133   : > { %17941 = vmatprep.subr.bf16.mxu1 %v19439_v42  ;;  %v17498_v59 = vpop.f32.mrf.mxu0  ;;  %v17560_v0 = vpop.f32.mrf.mxu1  ;;  %v16825_v33 = vpack.c.bf16 %v14681_v28, %v14681_v28  ;;  %v14745_v46 = vld [vmem:[%s20403_s20 + $0x4c] sm:$0xff]  ;;  %v16858_v55 = vpack.c.bf16 %v14746_v47, %v14746_v47 }
 0x134   : > { %v10849_v63 = vadd.f32 %v17497_v52, %v20887_v20  ;;  %v17561_v3 = vadd.f32 %v17560_v0, %v17559_v53  ;;  %v19435_v20 = vld [vmem:[#allocation2 + $0xaf4] ss:$196 sps:$4 sm:$0xff]   ;;  %v19440_v52 = vld [vmem:[#allocation2 + $0x40] ss:$196 sps:$4 sm:$0xff]   ;;  %2107 = vst [vmem:[#allocation2 + $0x1cc] sm:$0xf] %v16841_v6  ;;  %v16857_v53 = vpack.c.bf16 %v14745_v46, %v14745_v46  ;;  %v16874_v0 = vpack.c.bf16 %v14778_v61, %v14778_v61 }
 0x135   : > { %v17499_v4 = vpop.f32.mrf.mxu0  ;;  %v17562_v11 = vpop.f32.mrf.mxu1  ;;  %11387 = vmatprep.mubr.bf16.mxu1 %v19435_v20  ;;  %2011 = vst [vmem:[#allocation2 + $0x1c8] sm:$0xf] %v16825_v33  ;;  %v14777_v48 = vld [vmem:[%s20403_s20 + $0x4d] sm:$0xff]  ;;  %2108 = vst [vmem:[#allocation2 + $0x290] sm:$0xf] %v16842_v38  ;;  %v14779_v38 = vld [vmem:[%s20403_s20 + $0x65] sm:$0xff] }
 0x136   : > { %17942 = vmatpush3.bf16.msra.mxu1 %v19443_v62  ;;  %v17500_v10 = vadd.f32 %v17499_v4, %v17498_v59  ;;  %v21075_v15 = vadd.f32 %v17561_v3, %v10849_v63  ;;  %v16873_v57 = vpack.c.bf16 %v14777_v48, %v14777_v48  ;;  %v19442_v60 = vld [vmem:[#allocation2 + $0x44] ss:$196 sps:$4 sm:$0xff]   ;;  %2203 = vst [vmem:[#allocation2 + $0x1d0] sm:$0xf] %v16857_v53  ;;  %2204 = vst [vmem:[#allocation2 + $0x294] sm:$0xf] %v16858_v55 }
 0x137   : > { %v17501_v16 = vpop.f32.mrf.mxu0  ;;  %v17563_v23 = vpop.f32.mrf.mxu1  ;;  %11388 = vmatmul.mubr.bf16.gmra.mxu1 %v19433_v12  ;;  %v14683_v3 = vld [vmem:[%s20403_s20 + $0x62] sm:$0xff]  ;;  %11428 = vmatprep.mubr.bf16.mxu0 %v19442_v60  ;;  %v14716_v20 = vld [vmem:[%s20403_s20 + $0x6b] sm:$0xff]  ;;  %2300 = vst [vmem:[#allocation2 + $0x298] sm:$0xf] %v16874_v0  ;;  %v16875_v47 = vpack.c.bf16 %v14779_v38, %v14779_v38  ;;  %v14685_v53 = vld [vmem:[%s20403_s20 + $0x7a] sm:$0xff] }
 0x138   : > { %v10852_v21 = vadd.f32 %v17500_v10, %v20889_v22  ;;  %v17564_v29 = vadd.f32 %v17563_v23, %v17562_v11  ;;  %v16826_v22 = vpack.c.bf16 %v14682_v32, %v14682_v32  ;;  %2299 = vst [vmem:[#allocation2 + $0x1d4] sm:$0xf] %v16873_v57  ;;  %v14684_v10 = vld [vmem:[%s20403_s20 + $0x6a] sm:$0xff]  ;;  %v16827_v11 = vpack.c.bf16 %v14683_v3, %v14683_v3  ;;  %v14686_v55 = vld [vmem:[%s20403_s20 + $0x82] sm:$0xff] }
 0x139   : > { %v17502_v30 = vpop.f32.mrf.mxu0  ;;  %v17565_v37 = vpop.f32.mrf.mxu1  ;;  %v14715_v12 = vld [vmem:[%s20403_s20 + $0x63] sm:$0xff]  ;;  %11429 = vmatmul.mubr.bf16.vlgmr.msra.gmra.mxu0 %v19440_v52  ;;  %v16828_v14 = vpack.c.bf16 %v14684_v10, %v14684_v10  ;;  %v16844_v17 = vpack.c.bf16 %v14716_v20, %v14716_v20  ;;  %v19447_v28 = vld [vmem:[#allocation2 + $0x4c] ss:$196 sps:$4 sm:$0xff]   ;;  %2301 = vst [vmem:[#allocation2 + $0x35c] sm:$0xf] %v16875_v47  ;;  %v16829_v60 = vpack.c.bf16 %v14685_v53, %v14685_v53 }
 0x13a   : > { %v17503_v36 = vadd.f32 %v17502_v30, %v17501_v16  ;;  %v21084_v39 = vadd.f32 %v17564_v29, %v10852_v21  ;;  %2012 = vst [vmem:[#allocation2 + $0x28c] sm:$0xf] %v16826_v22  ;;  %v16843_v16 = vpack.c.bf16 %v14715_v12, %v14715_v12  ;;  %v19460_v21 = vld [vmem:[%s23618_s1 + $0x568] sm:$0xff]   ;;  %17992 = vmatpush3.bf16.msra.mxu0 %v19448_v45  ;;  %2013 = vst [vmem:[#allocation2 + $0x350] sm:$0xf] %v16827_v11 }
 0x13b   : > { %v17504_v42 = vpop.f32.mrf.mxu0  ;;  %v17566_v50 = vpop.f32.mrf.mxu1  ;;  %v19445_v24 = vld [vmem:[#allocation2 + $0x48] ss:$196 sps:$4 sm:$0xff]   ;;  %2014 = vst [vmem:[#allocation2 + $0x414] sm:$0xf] %v16828_v14  ;;  %2110 = vst [vmem:[#allocation2 + $0x418] sm:$0xf] %v16844_v17  ;;  %11525 = vmatprep.mubr.bf16.mxu1 %v19447_v28  ;;  %v16830_v61 = vpack.c.bf16 %v14686_v55, %v14686_v55 }
 0x13c   : > { %v10857_v49 = vadd.f32 %v17503_v36, %v20896_v31  ;;  %v17567_v58 = vadd.f32 %v17566_v50, %v17565_v37  ;;  %v19452_v31 = vld [vmem:[%s23618_s1 + $0x570] sm:$0xff]   ;;  %2109 = vst [vmem:[#allocation2 + $0x354] sm:$0xf] %v16843_v16  ;;  %v14747_v30 = vld [vmem:[%s20403_s20 + $0x64] sm:$0xff]  ;;  %2015 = vst [vmem:[#allocation2 + $0x4d8] sm:$0xf] %v16829_v60 }
 0x13d   : > { %v17505_v59 = vpop.f32.mrf.mxu0  ;;  %v17568_v63 = vpop.f32.mrf.mxu1  ;;  %17993 = vmatprep.subr.bf16.mxu0 %v19452_v31  ;;  %v14748_v32 = vld [vmem:[%s20403_s20 + $0x6c] sm:$0xff]  ;;  %v16859_v35 = vpack.c.bf16 %v14747_v30, %v14747_v30  ;;  %v14718_v31 = vld [vmem:[%s20403_s20 + $0x83] sm:$0xff]  ;;  %2016 = vst [vmem:[#allocation2 + $0x59c] sm:$0xf] %v16830_v61 }
 0x13e   : > { %v17506_v62 = vadd.f32 %v17505_v59, %v17504_v42  ;;  %v21097_v2 = vadd.f32 %v17567_v58, %v10857_v49  ;;  %v16860_v36 = vpack.c.bf16 %v14748_v32, %v14748_v32  ;;  %v19451_v6 = vld [vmem:[#allocation2 + $0x1cc] ss:$196 sps:$4 sm:$0xff]   ;;  %17994 = vmatpush3.bf16.msra.mxu0 %v19456_v7  ;;  %v14749_v16 = vld [vmem:[%s20403_s20 + $0x7c] sm:$0xff]  ;;  %v14750_v17 = vld [vmem:[%s20403_s20 + $0x84] sm:$0xff] }
 0x13f   : > { %v17507_v4 = vpop.f32.mrf.mxu0  ;;  %v17569_v13 = vpop.f32.mrf.mxu1  ;;  %v14780_v42 = vld [vmem:[%s20403_s20 + $0x6d] sm:$0xff]  ;;  %11526 = vmatmul.mubr.bf16.vlgmr.msra.gmra.mxu1 %v19445_v24  ;;  %2205 = vst [vmem:[#allocation2 + $0x358] sm:$0xf] %v16859_v35  ;;  %11436 = vmatprep.mubr.bf16.mxu0 %v19451_v6  ;;  %v16861_v24 = vpack.c.bf16 %v14749_v16, %v14749_v16  ;;  %v14752_v60 = vld [vmem:[%s20403_s20 + $0x9c] sm:$0xff] }
 0x140   : > { %v10860_v9 = vadd.f32 %v17506_v62, %v20909_v51  ;;  %v17570_v19 = vadd.f32 %v17569_v13, %v17568_v63  ;;  %2206 = vst [vmem:[#allocation2 + $0x41c] sm:$0xf] %v16860_v36  ;;  %v16876_v48 = vpack.c.bf16 %v14780_v42, %v14780_v42  ;;  %17995 = vmatprep.subr.bf16.mxu0 %v19460_v21  ;;  %v19455_v58 = vld [vmem:[#allocation2 + $0x1d4] ss:$196 sps:$4 sm:$0xff]   ;;  %v19468_v13 = vld [vmem:[%s23618_s1 + $0x560] sm:$0xff]  }
 0x141   : > { %v17508_v23 = vpop.f32.mrf.mxu0  ;;  %v17571_v25 = vpop.f32.mrf.mxu1  ;;  %v19449_v34 = vld [vmem:[#allocation2 + $0x1c8] ss:$196 sps:$4 sm:$0xff]   ;;  %v14717_v63 = vld [vmem:[%s20403_s20 + $0x7b] sm:$0xff]  ;;  %11533 = vmatprep.mubr.bf16.mxu1 %v19455_v58  ;;  %2207 = vst [vmem:[#allocation2 + $0x4e0] sm:$0xf] %v16861_v24  ;;  %v19483_v24 = vld [vmem:[%s23618_s1 + $0x5f0] sm:$0xff]  }
 0x142   : > { %v17509_v51 = vadd.f32 %v17508_v23, %v17507_v4  ;;  %v21110_v29 = vadd.f32 %v17570_v19, %v10860_v9  ;;  %2302 = vst [vmem:[#allocation2 + $0x420] sm:$0xf] %v16876_v48  ;;  %11437 = vmatmul.mubr.bf16.gmra.mxu0 %v19449_v34  ;;  %v19453_v4 = vld [vmem:[#allocation2 + $0x1d0] ss:$196 sps:$4 sm:$0xff]   ;;  %v16845_v7 = vpack.c.bf16 %v14717_v63, %v14717_v63  ;;  %v14781_v19 = vld [vmem:[%s20403_s20 + $0x7d] sm:$0xff] }
 0x143   : > { %v17510_v33 = vpop.f32.mrf.mxu0  ;;  %v17572_v22 = vpop.f32.mrf.mxu1  ;;  %v16846_v9 = vpack.c.bf16 %v14718_v31, %v14718_v31  ;;  %v19457_v11 = vld [vmem:[#allocation2 + $0x350] ss:$196 sps:$4 sm:$0xff]   ;;  %v16877_v28 = vpack.c.bf16 %v14781_v19, %v14781_v19  ;;  %v19482_v19 = vld [vmem:[%s23618_s1 + $0x5b8] sm:$0xff]  }
 0x144   : > { %v10865_v37 = vadd.f32 %v17509_v51, %v20920_v5  ;;  %v17573_v45 = vadd.f32 %v17572_v22, %v17571_v25  ;;  %v19464_v5 = vld [vmem:[%s23618_s1 + $0x528] sm:$0xff]   ;;  %v19459_v12 = vld [vmem:[#allocation2 + $0x354] ss:$196 sps:$4 sm:$0xff]   ;;  %2111 = vst [vmem:[#allocation2 + $0x4dc] sm:$0xf] %v16845_v7  ;;  %v16862_v51 = vpack.c.bf16 %v14750_v17, %v14750_v17 }
 0x145   : > { %v17511_v46 = vpop.f32.mrf.mxu0  ;;  %v17574_v50 = vpop.f32.mrf.mxu1  ;;  %17996 = vmatpush3.bf16.msra.mxu0 %v19464_v5  ;;  %2112 = vst [vmem:[#allocation2 + $0x5a0] sm:$0xf] %v16846_v9  ;;  %11444 = vmatprep.mubr.bf16.mxu0 %v19459_v12  ;;  %v14782_v25 = vld [vmem:[%s20403_s20 + $0x85] sm:$0xff]  ;;  %2303 = vst [vmem:[#allocation2 + $0x4e4] sm:$0xf] %v16877_v28  ;;  %v14719_v48 = vld [vmem:[%s20403_s20 + $0x93] sm:$0xff] }
 0x146   : > { %v17512_v49 = vadd.f32 %v17511_v46, %v17510_v33  ;;  %v21120_v52 = vadd.f32 %v17573_v45, %v10865_v37  ;;  %17997 = vmatprep.subr.bf16.mxu0 %v19468_v13  ;;  %v16878_v32 = vpack.c.bf16 %v14782_v25, %v14782_v25  ;;  %v19472_v33 = vld [vmem:[%s23618_s1 + $0x520] sm:$0xff]   ;;  %2208 = vst [vmem:[#allocation2 + $0x5a4] sm:$0xf] %v16862_v51  ;;  %v19480_v7 = vld [vmem:[%s23618_s1 + $0x518] sm:$0xff]   ;;  %v14689_v51 = vld [vmem:[%s20403_s20 + $0xaa] sm:$0xff] }
 0x147   : > { %v17513_v57 = vpop.f32.mrf.mxu0  ;;  %v17575_v62 = vpop.f32.mrf.mxu1  ;;  %11534 = vmatmul.mubr.bf16.gmra.mxu1 %v19453_v4  ;;  %v14688_v37 = vld [vmem:[%s20403_s20 + $0x9a] sm:$0xff]  ;;  %v16847_v5 = vpack.c.bf16 %v14719_v48, %v14719_v48  ;;  %v14690_v25 = vld [vmem:[%s20403_s20 + $0xb2] sm:$0xff] }
 0x148   : > { %v10868_v59 = vadd.f32 %v17512_v49, %v20927_v26  ;;  %v17576_v0 = vadd.f32 %v17575_v62, %v17574_v50  ;;  %v16832_v6 = vpack.c.bf16 %v14688_v37, %v14688_v37  ;;  %v19461_v42 = vld [vmem:[#allocation2 + $0x358] ss:$196 sps:$4 sm:$0xff]   ;;  %2304 = vst [vmem:[#allocation2 + $0x5a8] sm:$0xf] %v16878_v32 }
 0x149   : > { %v17514_v3 = vpop.f32.mrf.mxu0  ;;  %v17577_v26 = vpop.f32.mrf.mxu1  ;;  %v19463_v45 = vld [vmem:[#allocation2 + $0x35c] ss:$196 sps:$4 sm:$0xff]   ;;  %17998 = vmatpush3.bf16.msra.mxu0 %v19472_v33  ;;  %2113 = vst [vmem:[#allocation2 + $0x664] sm:$0xf] %v16847_v5  ;;  %v16833_v33 = vpack.c.bf16 %v14689_v51, %v14689_v51  ;;  %v14722_v37 = vld [vmem:[%s20403_s20 + $0xb3] sm:$0xff] }
 0x14a   : > { %v17515_v10 = vadd.f32 %v17514_v3, %v17513_v57  ;;  %v21127_v20 = vadd.f32 %v17576_v0, %v10868_v59  ;;  %v14720_v49 = vld [vmem:[%s20403_s20 + $0x9b] sm:$0xff]  ;;  %11445 = vmatmul.mubr.bf16.gmra.mxu0 %v19457_v11  ;;  %2018 = vst [vmem:[#allocation2 + $0x724] sm:$0xf] %v16832_v6  ;;  %11541 = vmatprep.mubr.bf16.mxu1 %v19463_v45 }
 0x14b   : > { %v17516_v14 = vpop.f32.mrf.mxu0  ;;  %v17578_v23 = vpop.f32.mrf.mxu1  ;;  %v16848_v53 = vpack.c.bf16 %v14720_v49, %v14720_v49  ;;  %v19476_v57 = vld [vmem:[%s23618_s1 + $0x558] sm:$0xff]   ;;  %v16864_v0 = vpack.c.bf16 %v14752_v60, %v14752_v60  ;;  %2019 = vst [vmem:[#allocation2 + $0x7e8] sm:$0xf] %v16833_v33  ;;  %v16850_v45 = vpack.c.bf16 %v14722_v37, %v14722_v37  ;;  %2692 = vst [vmem:[#allocation2 + $0x67c] sm:$0xf] %v16833_v33  ;;  %v19500_v37 = vld [vmem:[%s23618_s1 + $0x548] sm:$0xff]  }
 0x14c   : > { %v10873_v21 = vadd.f32 %v17515_v10, %v20939_v44  ;;  %v17579_v34 = vadd.f32 %v17578_v23, %v17577_v26  ;;  %v14687_v44 = vld [vmem:[%s20403_s20 + $0x92] sm:$0xff]  ;;  %17999 = vmatprep.subr.bf16.mxu0 %v19476_v57  ;;  %v19467_v4 = vld [vmem:[#allocation2 + $0x4dc] ss:$196 sps:$4 sm:$0xff]  }
 0x14d   : > { %v17517_v30 = vpop.f32.mrf.mxu0  ;;  %v17580_v36 = vpop.f32.mrf.mxu1  ;;  %v16831_v22 = vpack.c.bf16 %v14687_v44, %v14687_v44  ;;  %v14751_v59 = vld [vmem:[%s20403_s20 + $0x94] sm:$0xff]  ;;  %2114 = vst [vmem:[#allocation2 + $0x728] sm:$0xf] %v16848_v53  ;;  %2210 = vst [vmem:[#allocation2 + $0x72c] sm:$0xf] %v16864_v0  ;;  %11452 = vmatprep.mubr.bf16.mxu0 %v19467_v4  ;;  %18000 = vmatpush3.bf16.msra.mxu0 %v19480_v7  ;;  %v14721_v44 = vld [vmem:[%s20403_s20 + $0xab] sm:$0xff] }
 0x14e   : > { %v17518_v35 = vadd.f32 %v17517_v30, %v17516_v14  ;;  %v21142_v46 = vadd.f32 %v17579_v34, %v10873_v21  ;;  %v16863_v31 = vpack.c.bf16 %v14751_v59, %v14751_v59  ;;  %v19481_v26 = vld [vmem:[%s23618_s1 + $0x5f8] sm:$0xff]   ;;  %v19469_v32 = vld [vmem:[#allocation2 + $0x4e0] ss:$196 sps:$4 sm:$0xff]   ;;  %v16834_v34 = vpack.c.bf16 %v14690_v25, %v14690_v25  ;;  %v19479_v49 = vld [vmem:[#allocation2 + $0x66c] ss:$196 sps:$4 sm:$0xff]  }
 0x14f   : > { %v17519_v38 = vpop.f32.mrf.mxu0  ;;  %v17581_v50 = vpop.f32.mrf.mxu1  ;;  %2017 = vst [vmem:[#allocation2 + $0x660] sm:$0xf] %v16831_v22  ;;  %11542 = vmatmul.mubr.bf16.gmra.mxu1 %v19461_v42  ;;  %v19471_v16 = vld [vmem:[#allocation2 + $0x4e4] ss:$196 sps:$4 sm:$0xff]   ;;  %18055 = vmatprep.subr.bf16.mxu1 %v19481_v26  ;;  %v16849_v42 = vpack.c.bf16 %v14721_v44, %v14721_v44  ;;  %2116 = vst [vmem:[#allocation2 + $0x8b0] sm:$0xf] %v16850_v45 }
 0x150   : > { %v10876_v47 = vadd.f32 %v17518_v35, %v20950_v1  ;;  %v17582_v55 = vadd.f32 %v17581_v50, %v17580_v36  ;;  %v19465_v1 = vld [vmem:[#allocation2 + $0x4d8] ss:$196 sps:$4 sm:$0xff]   ;;  %2209 = vst [vmem:[#allocation2 + $0x668] sm:$0xf] %v16863_v31  ;;  %11549 = vmatprep.mubr.bf16.mxu1 %v19471_v16  ;;  %18056 = vmatpush3.bf16.msra.mxu1 %v19482_v19  ;;  %2020 = vst [vmem:[#allocation2 + $0x8ac] sm:$0xf] %v16834_v34 }
 0x151   : > { %v17520_v58 = vpop.f32.mrf.mxu0  ;;  %v17583_v62 = vpop.f32.mrf.mxu1  ;;  %18057 = vmatprep.subr.bf16.mxu1 %v19483_v24  ;;  %2693 = vst [vmem:[#allocation2 + $0x740] sm:$0xf] %v16834_v34  ;;  %2115 = vst [vmem:[#allocation2 + $0x7ec] sm:$0xf] %v16849_v42  ;;  %v19487_v53 = vld [vmem:[%s23618_s1 + $0x5b0] sm:$0xff]   ;;  %v19493_v7 = vld [vmem:[%s23618_s1 + $0x5e8] sm:$0xff]  }
 0x152   : > { %v17521_v61 = vadd.f32 %v17520_v58, %v17519_v38  ;;  %v21152_v63 = vadd.f32 %v17582_v55, %v10876_v47  ;;  %11453 = vmatmul.mubr.bf16.gmra.mxu0 %v19465_v1  ;;  %v14753_v58 = vld [vmem:[%s20403_s20 + $0xac] sm:$0xff]  ;;  %v14754_v59 = vld [vmem:[%s20403_s20 + $0xb4] sm:$0xff]  ;;  %v14691_v16 = vld [vmem:[%s20403_s20 + $0xc2] sm:$0xff] }
 0x153   : > { %v17522_v3 = vpop.f32.mrf.mxu0  ;;  %v17584_v10 = vpop.f32.mrf.mxu1  ;;  %v16865_v1 = vpack.c.bf16 %v14753_v58, %v14753_v58  ;;  %v16866_v31 = vpack.c.bf16 %v14754_v59, %v14754_v59  ;;  %v19492_v0 = vld [vmem:[%s23618_s1 + $0x510] sm:$0xff]   ;;  %v19494_v26 = vld [vmem:[%s23618_s1 + $0x5a8] sm:$0xff]   ;;  %v16835_v51 = vpack.c.bf16 %v14691_v16, %v14691_v16  ;;  %v19506_v59 = vld [vmem:[%s23618_s1 + $0x598] sm:$0xff]  }
 0x154   : > { %v10881_v9 = vadd.f32 %v17521_v61, %v20959_v18  ;;  %v17585_v11 = vadd.f32 %v17584_v10, %v17583_v62  ;;  %18058 = vmatpush3.bf16.msra.mxu1 %v19487_v53  ;;  %v14723_v19 = vld [vmem:[%s20403_s20 + $0xc3] sm:$0xff]  ;;  %v14724_v34 = vld [vmem:[%s20403_s20 + $0xcb] sm:$0xff] }
 0x155   : > { %v17523_v12 = vpop.f32.mrf.mxu0  ;;  %v17586_v14 = vpop.f32.mrf.mxu1  ;;  %2211 = vst [vmem:[#allocation2 + $0x7f0] sm:$0xf] %v16865_v1  ;;  %2212 = vst [vmem:[#allocation2 + $0x8b4] sm:$0xf] %v16866_v31  ;;  %18059 = vmatprep.subr.bf16.mxu1 %v19493_v7  ;;  %v19507_v1 = vld [vmem:[%s23618_s1 + $0x5d0] sm:$0xff]   ;;  %v14726_v16 = vld [vmem:[%s20403_s20 + $0xe3] sm:$0xff] }
 0x156   : > { %v17524_v13 = vadd.f32 %v17523_v12, %v17522_v3  ;;  %v21161_v17 = vadd.f32 %v17585_v11, %v10881_v9  ;;  %v19473_v38 = vld [vmem:[#allocation2 + $0x660] ss:$196 sps:$4 sm:$0xff]   ;;  %2021 = vst [vmem:[#allocation2 + $0x970] sm:$0xf] %v16835_v51  ;;  %2694 = vst [vmem:[#allocation2 + $0x804] sm:$0xf] %v16835_v51 }
 0x157   : > { %v17525_v18 = vpop.f32.mrf.mxu0  ;;  %v17587_v23 = vpop.f32.mrf.mxu1  ;;  %11550 = vmatmul.mubr.bf16.gmra.mxu1 %v19469_v32  ;;  %v19477_v62 = vld [vmem:[#allocation2 + $0x668] ss:$196 sps:$4 sm:$0xff]   ;;  %v19495_v12 = vld [vmem:[%s23618_s1 + $0x5e0] sm:$0xff]  }
 0x158   : > { %v10884_v21 = vadd.f32 %v17524_v13, %v20971_v40  ;;  %v17588_v28 = vadd.f32 %v17587_v23, %v17586_v14  ;;  %v19475_v40 = vld [vmem:[#allocation2 + $0x664] ss:$196 sps:$4 sm:$0xff]   ;;  %11557 = vmatprep.mubr.bf16.mxu1 %v19479_v49  ;;  %18060 = vmatpush3.bf16.msra.mxu1 %v19494_v26  ;;  %v19486_v33 = vld [vmem:[#allocation2 + $0x7ec] ss:$196 sps:$4 sm:$0xff]   ;;  %v14757_v51 = vld [vmem:[%s20403_s20 + $0xdc] sm:$0xff] }
 0x159   : > { %v17526_v30 = vpop.f32.mrf.mxu0  ;;  %v17589_v36 = vpop.f32.mrf.mxu1  ;;  %11460 = vmatprep.mubr.bf16.mxu0 %v19475_v40  ;;  %v19484_v24 = vld [vmem:[#allocation2 + $0x7e8] ss:$196 sps:$4 sm:$0xff]   ;;  %18061 = vmatprep.subr.bf16.mxu1 %v19495_v12  ;;  %v16852_v40 = vpack.c.bf16 %v14724_v34, %v14724_v34 }
 0x15a   : > { %v17527_v35 = vadd.f32 %v17526_v30, %v17525_v18  ;;  %v21174_v22 = vadd.f32 %v17588_v28, %v10884_v21  ;;  %11461 = vmatmul.mubr.bf16.gmra.mxu0 %v19473_v38  ;;  %v14692_v18 = vld [vmem:[%s20403_s20 + $0xca] sm:$0xff]  ;;  %v16851_v28 = vpack.c.bf16 %v14723_v19, %v14723_v19 }
 0x15b   : > { %v17528_v6 = vpop.f32.mrf.mxu0  ;;  %v17590_v48 = vpop.f32.mrf.mxu1  ;;  %v16836_v25 = vpack.c.bf16 %v14692_v18, %v14692_v18  ;;  %11468 = vmatprep.mubr.bf16.mxu0 %v19486_v33  ;;  %2118 = vst [vmem:[#allocation2 + $0xa38] sm:$0xf] %v16852_v40  ;;  %v16869_v33 = vpack.c.bf16 %v14757_v51, %v14757_v51  ;;  %v14790_v40 = vld [vmem:[%s20403_s20 + $0xe5] sm:$0xff] }
 0x15c   : > { %v10889_v47 = vadd.f32 %v17527_v35, %v20982_v56  ;;  %v17591_v50 = vadd.f32 %v17590_v48, %v17589_v36  ;;  %v19488_v56 = vld [vmem:[%s23618_s1 + $0x550] sm:$0xff]   ;;  %2117 = vst [vmem:[#allocation2 + $0x974] sm:$0xf] %v16851_v28 }
 0x15d   : > { %v17529_v5 = vpop.f32.mrf.mxu0  ;;  %v17592_v57 = vpop.f32.mrf.mxu1  ;;  %18001 = vmatprep.subr.bf16.mxu0 %v19488_v56  ;;  %2022 = vst [vmem:[#allocation2 + $0xa34] sm:$0xf] %v16836_v25  ;;  %2695 = vst [vmem:[#allocation2 + $0x8c8] sm:$0xf] %v16836_v25  ;;  %v19489_v45 = vld [vmem:[#allocation2 + $0x7f0] ss:$196 sps:$4 sm:$0xff]  }
 0x15e   : > { %v17530_v55 = vadd.f32 %v17529_v5, %v17528_v6  ;;  %v21185_v60 = vadd.f32 %v17591_v50, %v10889_v47  ;;  %18002 = vmatpush3.bf16.msra.mxu0 %v19492_v0  ;;  %v14755_v6 = vld [vmem:[%s20403_s20 + $0xc4] sm:$0xff]  ;;  %v19491_v50 = vld [vmem:[#allocation2 + $0x7f4] ss:$196 sps:$4 sm:$0xff]   ;;  %v14756_v5 = vld [vmem:[%s20403_s20 + $0xcc] sm:$0xff]  ;;  %2215 = vst [vmem:[#allocation2 + $0xb00] sm:$0xf] %v16869_v33 }
 0x15f   : > { %v17531_v61 = vpop.f32.mrf.mxu0  ;;  %v17593_v4 = vpop.f32.mrf.mxu1  ;;  %11558 = vmatmul.mubr.bf16.gmra.mxu1 %v19477_v62  ;;  %v16867_v47 = vpack.c.bf16 %v14755_v6, %v14755_v6  ;;  %18003 = vmatprep.subr.bf16.mxu0 %v19500_v37  ;;  %v16868_v53 = vpack.c.bf16 %v14756_v5, %v14756_v5  ;;  %v19505_v56 = vld [vmem:[%s23618_s1 + $0x5d8] sm:$0xff]  }
 0x160   : > { %v10892_v3 = vadd.f32 %v17530_v55, %v20995_v8  ;;  %v17594_v9 = vadd.f32 %v17593_v4, %v17592_v57  ;;  %v19504_v55 = vld [vmem:[%s23618_s1 + $0x508] sm:$0xff]   ;;  %11565 = vmatprep.mubr.bf16.mxu1 %v19491_v50  ;;  %v14693_v0 = vld [vmem:[%s20403_s20 + $0xda] sm:$0xff] }
 0x161   : > { %v17532_v10 = vpop.f32.mrf.mxu0  ;;  %v17595_v11 = vpop.f32.mrf.mxu1  ;;  %2213 = vst [vmem:[#allocation2 + $0x978] sm:$0xf] %v16867_v47  ;;  %2214 = vst [vmem:[#allocation2 + $0xa3c] sm:$0xf] %v16868_v53  ;;  %v14725_v4 = vld [vmem:[%s20403_s20 + $0xdb] sm:$0xff] }
 0x162   : > { %v17533_v8 = vadd.f32 %v17532_v10, %v17531_v61  ;;  %v21200_v13 = vadd.f32 %v17594_v9, %v10892_v3  ;;  %11469 = vmatmul.mubr.bf16.gmra.mxu0 %v19484_v24  ;;  %v14694_v3 = vld [vmem:[%s20403_s20 + $0xe2] sm:$0xff]  ;;  %v16853_v12 = vpack.c.bf16 %v14725_v4, %v14725_v4  ;;  %v14842_v4 = vld [vmem:[%s20403_s20 + $0x50] sm:$0xff] }
 0x163   : > { %v17534_v14 = vpop.f32.mrf.mxu0  ;;  %v17596_v23 = vpop.f32.mrf.mxu1  ;;  %18004 = vmatpush3.bf16.msra.mxu0 %v19504_v55  ;;  %v19498_v26 = vld [vmem:[#allocation2 + $0x974] ss:$196 sps:$4 sm:$0xff]   ;;  %v19512_v24 = vld [vmem:[%s23618_s1 + $0x540] sm:$0xff]  }
 0x164   : > { %v10897_v21 = vadd.f32 %v17533_v8, %v21013_v43  ;;  %v17597_v30 = vadd.f32 %v17596_v23, %v17595_v11  ;;  %v19499_v43 = vld [vmem:[%s23618_s1 + $0x5a0] sm:$0xff]   ;;  %v19496_v10 = vld [vmem:[#allocation2 + $0x970] ss:$196 sps:$4 sm:$0xff]   ;;  %v16837_v8 = vpack.c.bf16 %v14693_v0, %v14693_v0  ;;  %v16838_v11 = vpack.c.bf16 %v14694_v3, %v14694_v3  ;;  %11476 = vmatprep.mubr.bf16.mxu0 %v19498_v26  ;;  %v14841_v3 = vld [vmem:[%s20403_s20 + $0x48] sm:$0xff] }
 0x165   : > { %v17535_v32 = vpop.f32.mrf.mxu0  ;;  %v17598_v36 = vpop.f32.mrf.mxu1  ;;  %18062 = vmatpush3.bf16.msra.mxu1 %v19499_v43  ;;  %2119 = vst [vmem:[#allocation2 + $0xafc] sm:$0xf] %v16853_v12  ;;  %18005 = vmatprep.subr.bf16.mxu0 %v19512_v24  ;;  %v19519_v53 = vld [vmem:[%s23618_s1 + $0x5c0] sm:$0xff]   ;;  %v14807_v55 = vld [vmem:[%s20403_s20 + $0x36] sm:$0xff]  ;;  %v16904_v26 = vpack.c.bf16 %v14842_v4, %v14842_v4 }
 0x166   : > { %v17536_v35 = vadd.f32 %v17535_v32, %v17534_v14  ;;  %v21210_v44 = vadd.f32 %v17597_v30, %v10897_v21  ;;  %18063 = vmatprep.subr.bf16.mxu1 %v19505_v56  ;;  %2023 = vst [vmem:[#allocation2 + $0xaf8] sm:$0xf] %v16837_v8  ;;  %2024 = vst [vmem:[#allocation2 + $0xbbc] sm:$0xf] %v16838_v11  ;;  %v19511_v21 = vld [vmem:[%s23618_s1 + $0x590] sm:$0xff]   ;;  %v19524_v12 = vld [vmem:[%s23618_s1 + $0x678] sm:$0xff]  }
 0x167   : > { %v17599_v42 = vpop.f32.mrf.mxu1  ;;  %v17537_v48 = vpop.f32.mrf.mxu0  ;;  %11566 = vmatmul.mubr.bf16.gmra.mxu1 %v19489_v45  ;;  %2696 = vst [vmem:[#allocation2 + $0x98c] sm:$0xf] %v16837_v8  ;;  %2697 = vst [vmem:[#allocation2 + $0xa50] sm:$0xf] %v16838_v11  ;;  %v19503_v32 = vld [vmem:[#allocation2 + $0x97c] ss:$196 sps:$4 sm:$0xff]  }
 0x168   : > { %v10900_v38 = vadd.f32 %v17536_v35, %v21028_v54  ;;  %v17600_v49 = vadd.f32 %v17599_v42, %v17598_v36  ;;  %v19501_v30 = vld [vmem:[#allocation2 + $0x978] ss:$196 sps:$4 sm:$0xff]   ;;  %v14758_v35 = vld [vmem:[%s20403_s20 + $0xe4] sm:$0xff]  ;;  %11573 = vmatprep.mubr.bf16.mxu1 %v19503_v32  ;;  %2493 = vst [vmem:[#allocation2 + $0x118] sm:$0xf] %v16904_v26 }
 0x169   : > { %v17538_v54 = vpop.f32.mrf.mxu0  ;;  %v17601_v61 = vpop.f32.mrf.mxu1  ;;  %18064 = vmatpush3.bf16.msra.mxu1 %v19506_v59  ;;  %v14789_v36 = vld [vmem:[%s20403_s20 + $0xdd] sm:$0xff]  ;;  %v16870_v37 = vpack.c.bf16 %v14758_v35, %v14758_v35  ;;  %v19517_v45 = vld [vmem:[%s23618_s1 + $0x5c8] sm:$0xff]  }
 0x16a   : > { %v21221_v57 = vadd.f32 %v17600_v49, %v10900_v38  ;;  %v17539_v58 = vadd.f32 %v17538_v54, %v17537_v48  ;;  %18065 = vmatprep.subr.bf16.mxu1 %v19507_v1  ;;  %11477 = vmatmul.mubr.bf16.gmra.mxu0 %v19496_v10  ;;  %v16885_v6 = vpack.c.bf16 %v14789_v36, %v14789_v36  ;;  %v19518_v48 = vld [vmem:[%s23618_s1 + $0x588] sm:$0xff]   ;;  %v14808_v54 = vld [vmem:[%s20403_s20 + $0x3e] sm:$0xff] }
 0x16b   : > { %v17540_v62 = vpop.f32.mrf.mxu0  ;;  %v17602_v7 = vpop.f32.mrf.mxu1  ;;  %v16886_v38 = vpack.c.bf16 %v14790_v40, %v14790_v40  ;;  %2216 = vst [vmem:[#allocation2 + $0xbc4] sm:$0xf] %v16870_v37  ;;  %v16888_v1 = vpack.c.bf16 %v14808_v54, %v14808_v54  ;;  %v16903_v10 = vpack.c.bf16 %v14841_v3, %v14841_v3  ;;  %v14810_v37 = vld [vmem:[%s20403_s20 + $0x56] sm:$0xff] }
 0x16c   : > { %v10905_v31 = vadd.f32 %v17539_v58, %v21044_v27  ;;  %v17603_v14 = vadd.f32 %v17602_v7, %v17601_v61  ;;  %v16854_v27 = vpack.c.bf16 %v14726_v16, %v14726_v16  ;;  %2311 = vst [vmem:[#allocation2 + $0xb04] sm:$0xf] %v16885_v6 }
 0x16d   : > { %v17541_v9 = vpop.f32.mrf.mxu0  ;;  %v17604_v19 = vpop.f32.mrf.mxu1  ;;  %18066 = vmatpush3.bf16.msra.mxu1 %v19511_v21  ;;  %2312 = vst [vmem:[#allocation2 + $0xbc8] sm:$0xf] %v16886_v38  ;;  %v19508_v59 = vld [vmem:[#allocation2 + $0xaf8] ss:$196 sps:$4 sm:$0xff]   ;;  %2394 = vst [vmem:[#allocation2 + $0x114] sm:$0xf] %v16888_v1 }
 0x16e   : > { %v17542_v18 = vadd.f32 %v17541_v9, %v17540_v62  ;;  %v21240_v23 = vadd.f32 %v17603_v14, %v10905_v31  ;;  %2120 = vst [vmem:[#allocation2 + $0xbc0] sm:$0xf] %v16854_v27  ;;  %18067 = vmatprep.subr.bf16.mxu1 %v19517_v45  ;;  %v16887_v62 = vpack.c.bf16 %v14807_v55, %v14807_v55  ;;  %v14873_v14 = vld [vmem:[%s20403_s20 + $0x49] sm:$0xff]  ;;  %2492 = vst [vmem:[#allocation2 + $0x54] sm:$0xf] %v16903_v10  ;;  %v14875_v55 = vld [vmem:[%s20403_s20 + $0x61] sm:$0xff] }
 0x16f   : > { %v17605_v28 = vpop.f32.mrf.mxu1  ;;  %v17623_v43 = vpop.f32.mrf.mxu0  ;;  %11574 = vmatmul.mubr.bf16.gmra.mxu1 %v19501_v30  ;;  %v16919_v27 = vpack.c.bf16 %v14873_v14, %v14873_v14  ;;  %v16890_v45 = vpack.c.bf16 %v14810_v37, %v14810_v37  ;;  %v14811_v14 = vld [vmem:[%s20403_s20 + $0x66] sm:$0xff] }
 0x170   : > { %v10908_v25 = vadd.f32 %v17542_v18, %v21057_v41  ;;  %v17606_v34 = vadd.f32 %v17605_v28, %v17604_v19  ;;  %v19516_v41 = vld [vmem:[%s23618_s1 + $0x500] sm:$0xff]   ;;  %2393 = vst [vmem:[#allocation2 + $0x50] sm:$0xf] %v16887_v62  ;;  %v14905_v28 = vld [vmem:[%s20403_s20 + $0x4a] sm:$0xff] }
 0x171   : > { %v17624_v47 = vpop.f32.mrf.mxu0  ;;  %18006 = vmatpush3.bf16.msra.mxu0 %v19516_v41  ;;  %v17687_v50 = vpop.f32.mrf.mxu1  ;;  %18068 = vmatpush3.bf16.msra.mxu1 %v19518_v48  ;;  %2588 = vst [vmem:[#allocation2 + $0x58] sm:$0xf] %v16919_v27  ;;  %v14844_v48 = vld [vmem:[%s20403_s20 + $0x68] sm:$0xff]  ;;  %2396 = vst [vmem:[#allocation2 + $0x29c] sm:$0xf] %v16890_v45  ;;  %v16891_v27 = vpack.c.bf16 %v14811_v14, %v14811_v14 }
 0x172   : > { %v21253_v42 = vadd.f32 %v17606_v34, %v10908_v25  ;;  %v17625_v49 = vadd.f32 %v17624_v47, %v17623_v43  ;;  %18069 = vmatprep.subr.bf16.mxu1 %v19519_v53  ;;  %v19513_v19 = vld [vmem:[#allocation2 + $0xb00] ss:$196 sps:$4 sm:$0xff]   ;;  %18119 = vmatprep.subr.bf16.mxu0 %v19524_v12  ;;  %v14874_v25 = vld [vmem:[%s20403_s20 + $0x51] sm:$0xff]  ;;  %v16935_v34 = vpack.c.bf16 %v14905_v28, %v14905_v28 }
 0x173   : > { %v17626_v5 = vpop.f32.mrf.mxu0  ;;  %v17688_v58 = vpop.f32.mrf.mxu1  ;;  %v16920_v33 = vpack.c.bf16 %v14874_v25, %v14874_v25  ;;  %v14809_v43 = vld [vmem:[%s20403_s20 + $0x4e] sm:$0xff]  ;;  %v14843_v47 = vld [vmem:[%s20403_s20 + $0x60] sm:$0xff]  ;;  %v16906_v53 = vpack.c.bf16 %v14844_v48, %v14844_v48  ;;  %2397 = vst [vmem:[#allocation2 + $0x360] sm:$0xf] %v16891_v27 }
 0x174   : > { %v11043_v56 = vadd.f32 %v17625_v49, %v21075_v15  ;;  %v17689_v31 = vadd.f32 %v17688_v58, %v17687_v50  ;;  %v19523_v15 = vld [vmem:[%s23618_s1 + $0x580] sm:$0xff]   ;;  %2684 = vst [vmem:[#allocation2 + $0x5c] sm:$0xf] %v16935_v34  ;;  %v16889_v41 = vpack.c.bf16 %v14809_v43, %v14809_v43  ;;  %v14876_v58 = vld [vmem:[%s20403_s20 + $0x69] sm:$0xff] }
 0x175   : > { %v19510_v61 = vld [vmem:[#allocation2 + $0xafc] ss:$196 sps:$4 sm:$0xff]   ;;  %v17627_v0 = vpop.f32.mrf.mxu0  ;;  %v17690_v9 = vpop.f32.mrf.mxu1  ;;  %18070 = vmatpush3.bf16.msra.mxu1 %v19523_v15  ;;  %v19515_v51 = vld [vmem:[#allocation2 + $0xb04] ss:$196 sps:$4 sm:$0xff]   ;;  %2589 = vst [vmem:[#allocation2 + $0x11c] sm:$0xf] %v16920_v33  ;;  %v16922_v3 = vpack.c.bf16 %v14876_v58, %v14876_v58 }
 0x176   : > { %v17628_v7 = vadd.f32 %v17627_v0, %v17626_v5  ;;  %11484 = vmatprep.mubr.bf16.mxu0 %v19510_v61  ;;  %v21272_v8 = vadd.f32 %v17689_v31, %v11043_v56  ;;  %11581 = vmatprep.mubr.bf16.mxu1 %v19515_v51  ;;  %v16905_v5 = vpack.c.bf16 %v14843_v47, %v14843_v47  ;;  %v14907_v61 = vld [vmem:[%s20403_s20 + $0x62] sm:$0xff]  ;;  %v14908_v62 = vld [vmem:[%s20403_s20 + $0x6a] sm:$0xff]  ;;  %v19522_v26 = vld [vmem:[#allocation2 + $0x54] ss:$196 sps:$4 sm:$0xff]  }
 0x177   : > { %v17629_v11 = vpop.f32.mrf.mxu0  ;;  %11485 = vmatmul.mubr.bf16.gmra.mxu0 %v19508_v59  ;;  %v17691_v18 = vpop.f32.mrf.mxu1  ;;  %11582 = vmatmul.mubr.bf16.gmra.mxu1 %v19513_v19  ;;  %2395 = vst [vmem:[#allocation2 + $0x1d8] sm:$0xf] %v16889_v41  ;;  %v16921_v59 = vpack.c.bf16 %v14875_v55, %v14875_v55  ;;  %v19520_v0 = vld [vmem:[#allocation2 + $0x50] ss:$196 sps:$4 sm:$0xff]   ;;  %2495 = vst [vmem:[#allocation2 + $0x2a0] sm:$0xf] %v16906_v53  ;;  %v16937_v4 = vpack.c.bf16 %v14907_v61, %v14907_v61 }
 0x178   : > { %v11046_v16 = vadd.f32 %v17628_v7, %v21084_v39  ;;  %v17692_v21 = vadd.f32 %v17691_v18, %v17690_v9  ;;  %v14906_v39 = vld [vmem:[%s20403_s20 + $0x52] sm:$0xff]  ;;  %2494 = vst [vmem:[#allocation2 + $0x1dc] sm:$0xf] %v16905_v5  ;;  %v16938_v7 = vpack.c.bf16 %v14908_v62, %v14908_v62  ;;  %2591 = vst [vmem:[#allocation2 + $0x2a4] sm:$0xf] %v16922_v3  ;;  %11622 = vmatprep.mubr.bf16.mxu0 %v19522_v26  ;;  %v14846_v51 = vld [vmem:[%s20403_s20 + $0x80] sm:$0xff] }
 0x179   : > { %v17630_v24 = vpop.f32.mrf.mxu0  ;;  %v17693_v32 = vpop.f32.mrf.mxu1  ;;  %v16936_v40 = vpack.c.bf16 %v14906_v39, %v14906_v39  ;;  %2590 = vst [vmem:[#allocation2 + $0x1e0] sm:$0xf] %v16921_v59  ;;  %v19532_v12 = vld [vmem:[%s23618_s1 + $0x670] sm:$0xff]   ;;  %2686 = vst [vmem:[#allocation2 + $0x1e4] sm:$0xf] %v16937_v4  ;;  %v19540_v33 = vld [vmem:[%s23618_s1 + $0x668] sm:$0xff]  }
 0x17a   : > { %v17631_v30 = vadd.f32 %v17630_v24, %v17629_v11  ;;  %v21282_v35 = vadd.f32 %v17692_v21, %v11046_v16  ;;  %2687 = vst [vmem:[#allocation2 + $0x2a8] sm:$0xf] %v16938_v7  ;;  %v14812_v16 = vld [vmem:[%s20403_s20 + $0x6e] sm:$0xff]  ;;  %v14845_v24 = vld [vmem:[%s20403_s20 + $0x78] sm:$0xff]  ;;  %v14814_v7 = vld [vmem:[%s20403_s20 + $0x86] sm:$0xff] }
 0x17b   : > { %v17632_v36 = vpop.f32.mrf.mxu0  ;;  %v17694_v38 = vpop.f32.mrf.mxu1  ;;  %2685 = vst [vmem:[#allocation2 + $0x120] sm:$0xf] %v16936_v40  ;;  %v16892_v21 = vpack.c.bf16 %v14812_v16, %v14812_v16  ;;  %v14909_v41 = vld [vmem:[%s20403_s20 + $0x7a] sm:$0xff] }
 0x17c   : > { %v11051_v6 = vadd.f32 %v17631_v30, %v21097_v2  ;;  %v17695_v49 = vadd.f32 %v17694_v38, %v17693_v32  ;;  %v19528_v2 = vld [vmem:[%s23618_s1 + $0x638] sm:$0xff]   ;;  %v16907_v30 = vpack.c.bf16 %v14845_v24, %v14845_v24  ;;  %v16908_v32 = vpack.c.bf16 %v14846_v51, %v14846_v51  ;;  %v14878_v38 = vld [vmem:[%s20403_s20 + $0x81] sm:$0xff] }
 0x17d   : > { %v17633_v50 = vpop.f32.mrf.mxu0  ;;  %v17696_v56 = vpop.f32.mrf.mxu1  ;;  %2398 = vst [vmem:[#allocation2 + $0x424] sm:$0xf] %v16892_v21  ;;  %v14813_v4 = vld [vmem:[%s20403_s20 + $0x7e] sm:$0xff] }
 0x17e   : > { %v17634_v54 = vadd.f32 %v17633_v50, %v17632_v36  ;;  %v21296_v1 = vadd.f32 %v17695_v49, %v11051_v6  ;;  %v19525_v36 = vld [vmem:[#allocation2 + $0x58] ss:$196 sps:$4 sm:$0xff]   ;;  %2496 = vst [vmem:[#allocation2 + $0x364] sm:$0xf] %v16907_v30  ;;  %2497 = vst [vmem:[#allocation2 + $0x428] sm:$0xf] %v16908_v32  ;;  %v16924_v49 = vpack.c.bf16 %v14878_v38, %v14878_v38 }
 0x17f   : > { %v17635_v31 = vpop.f32.mrf.mxu0  ;;  %v17697_v10 = vpop.f32.mrf.mxu1  ;;  %11623 = vmatmul.mubr.bf16.vlgmr.msra.gmra.mxu0 %v19520_v0  ;;  %v14877_v6 = vld [vmem:[%s20403_s20 + $0x79] sm:$0xff]  ;;  %v16939_v50 = vpack.c.bf16 %v14909_v41, %v14909_v41 }
 0x180   : > { %v11054_v9 = vadd.f32 %v17634_v54, %v21110_v29  ;;  %v17698_v15 = vadd.f32 %v17697_v10, %v17696_v56  ;;  %v19536_v29 = vld [vmem:[%s23618_s1 + $0x630] sm:$0xff]   ;;  %18120 = vmatpush3.bf16.msra.mxu0 %v19528_v2  ;;  %v19529_v48 = vld [vmem:[#allocation2 + $0x1d8] ss:$196 sps:$4 sm:$0xff]   ;;  %v14910_v54 = vld [vmem:[%s20403_s20 + $0x82] sm:$0xff]  ;;  %2593 = vst [vmem:[#allocation2 + $0x42c] sm:$0xf] %v16924_v49 }
 0x181   : > { %v17636_v11 = vpop.f32.mrf.mxu0  ;;  %v17699_v19 = vpop.f32.mrf.mxu1  ;;  %18121 = vmatprep.subr.bf16.mxu0 %v19532_v12  ;;  %v19531_v55 = vld [vmem:[#allocation2 + $0x1dc] ss:$196 sps:$4 sm:$0xff]   ;;  %v16940_v58 = vpack.c.bf16 %v14910_v54, %v14910_v54  ;;  %2688 = vst [vmem:[#allocation2 + $0x36c] sm:$0xf] %v16939_v50 }
 0x182   : > { %v17637_v18 = vadd.f32 %v17636_v11, %v17635_v31  ;;  %v21309_v25 = vadd.f32 %v17698_v15, %v11054_v9  ;;  %v19527_v40 = vld [vmem:[#allocation2 + $0x5c] ss:$196 sps:$4 sm:$0xff]   ;;  %11630 = vmatprep.mubr.bf16.mxu0 %v19531_v55  ;;  %v19535_v31 = vld [vmem:[#allocation2 + $0x1e4] ss:$196 sps:$4 sm:$0xff]   ;;  %v14847_v9 = vld [vmem:[%s20403_s20 + $0x90] sm:$0xff]  ;;  %v16893_v15 = vpack.c.bf16 %v14813_v4, %v14813_v4  ;;  %v16894_v11 = vpack.c.bf16 %v14814_v7, %v14814_v7 }
 0x183   : > { %v17638_v28 = vpop.f32.mrf.mxu0  ;;  %v17700_v34 = vpop.f32.mrf.mxu1  ;;  %11719 = vmatprep.mubr.bf16.mxu1 %v19527_v40  ;;  %v19533_v62 = vld [vmem:[#allocation2 + $0x1e0] ss:$196 sps:$4 sm:$0xff]   ;;  %2689 = vst [vmem:[#allocation2 + $0x430] sm:$0xf] %v16940_v58  ;;  %v14848_v12 = vld [vmem:[%s20403_s20 + $0x98] sm:$0xff]  ;;  %v16909_v14 = vpack.c.bf16 %v14847_v9, %v14847_v9  ;;  %v14849_v58 = vld [vmem:[%s20403_s20 + $0xa8] sm:$0xff] }
 0x184   : > { %v11059_v39 = vadd.f32 %v17637_v18, %v21120_v52  ;;  %v17701_v43 = vadd.f32 %v17700_v34, %v17699_v19  ;;  %v16923_v52 = vpack.c.bf16 %v14877_v6, %v14877_v6  ;;  %11720 = vmatmul.mubr.bf16.vlgmr.msra.gmra.mxu1 %v19525_v36  ;;  %18122 = vmatpush3.bf16.msra.mxu0 %v19536_v29  ;;  %v19537_v21 = vld [vmem:[#allocation2 + $0x360] ss:$196 sps:$4 sm:$0xff]   ;;  %v14882_v7 = vld [vmem:[%s20403_s20 + $0xb1] sm:$0xff] }
 0x185   : > { %v17639_v37 = vpop.f32.mrf.mxu0  ;;  %v17702_v47 = vpop.f32.mrf.mxu1  ;;  %18123 = vmatprep.subr.bf16.mxu0 %v19540_v33  ;;  %11727 = vmatprep.mubr.bf16.mxu1 %v19535_v31  ;;  %v16910_v18 = vpack.c.bf16 %v14848_v12, %v14848_v12  ;;  %v19539_v24 = vld [vmem:[#allocation2 + $0x364] ss:$196 sps:$4 sm:$0xff]   ;;  %2399 = vst [vmem:[#allocation2 + $0x4e8] sm:$0xf] %v16893_v15  ;;  %2400 = vst [vmem:[#allocation2 + $0x5ac] sm:$0xf] %v16894_v11 }
 0x186   : > { %v17640_v45 = vadd.f32 %v17639_v37, %v17638_v28  ;;  %v21318_v5 = vadd.f32 %v17701_v43, %v11059_v39  ;;  %2592 = vst [vmem:[#allocation2 + $0x368] sm:$0xf] %v16923_v52  ;;  %2498 = vst [vmem:[#allocation2 + $0x4ec] sm:$0xf] %v16909_v14  ;;  %v19548_v51 = vld [vmem:[%s23618_s1 + $0x660] sm:$0xff]   ;;  %v14879_v28 = vld [vmem:[%s20403_s20 + $0x91] sm:$0xff]  ;;  %v16928_v14 = vpack.c.bf16 %v14882_v7, %v14882_v7 }
 0x187   : > { %v17641_v53 = vpop.f32.mrf.mxu0  ;;  %v17703_v2 = vpop.f32.mrf.mxu1  ;;  %11631 = vmatmul.mubr.bf16.gmra.mxu0 %v19529_v48  ;;  %2499 = vst [vmem:[#allocation2 + $0x5b0] sm:$0xf] %v16910_v18  ;;  %v14880_v33 = vld [vmem:[%s20403_s20 + $0x99] sm:$0xff]  ;;  %v16925_v39 = vpack.c.bf16 %v14879_v28, %v14879_v28  ;;  %v14883_v7 = vld [vmem:[%s20403_s20 + $0xc1] sm:$0xff] }
 0x188   : > { %v11062_v56 = vadd.f32 %v17640_v45, %v21127_v20  ;;  %v17704_v59 = vadd.f32 %v17703_v2, %v17702_v47  ;;  %v19544_v20 = vld [vmem:[%s23618_s1 + $0x628] sm:$0xff]   ;;  %v14912_v34 = vld [vmem:[%s20403_s20 + $0x9a] sm:$0xff]  ;;  %11638 = vmatprep.mubr.bf16.mxu0 %v19539_v24  ;;  %v16926_v43 = vpack.c.bf16 %v14880_v33, %v14880_v33  ;;  %2597 = vst [vmem:[#allocation2 + $0x73c] sm:$0xf] %v16928_v14 }
 0x189   : > { %v17642_v61 = vpop.f32.mrf.mxu0  ;;  %v17705_v3 = vpop.f32.mrf.mxu1  ;;  %18124 = vmatpush3.bf16.msra.mxu0 %v19544_v20  ;;  %v16942_v6 = vpack.c.bf16 %v14912_v34, %v14912_v34  ;;  %2594 = vst [vmem:[#allocation2 + $0x4f0] sm:$0xf] %v16925_v39  ;;  %v19552_v41 = vld [vmem:[%s23618_s1 + $0x620] sm:$0xff]   ;;  %v14815_v47 = vld [vmem:[%s20403_s20 + $0x96] sm:$0xff] }
 0x18a   : > { %v17643_v0 = vadd.f32 %v17642_v61, %v17641_v53  ;;  %v21328_v10 = vadd.f32 %v17704_v59, %v11062_v56  ;;  %18125 = vmatprep.subr.bf16.mxu0 %v19548_v51  ;;  %v14816_v48 = vld [vmem:[%s20403_s20 + $0x9e] sm:$0xff]  ;;  %v19543_v53 = vld [vmem:[#allocation2 + $0x36c] ss:$196 sps:$4 sm:$0xff]   ;;  %2595 = vst [vmem:[#allocation2 + $0x5b4] sm:$0xf] %v16926_v43  ;;  %v16895_v55 = vpack.c.bf16 %v14815_v47, %v14815_v47 }
 0x18b   : > { %v17644_v26 = vpop.f32.mrf.mxu0  ;;  %v17706_v16 = vpop.f32.mrf.mxu1  ;;  %2691 = vst [vmem:[#allocation2 + $0x5b8] sm:$0xf] %v16942_v6  ;;  %v16896_v54 = vpack.c.bf16 %v14816_v48, %v14816_v48  ;;  %v14850_v59 = vld [vmem:[%s20403_s20 + $0xb0] sm:$0xff]  ;;  %v19556_v20 = vld [vmem:[%s23618_s1 + $0x658] sm:$0xff]   ;;  %v14851_v6 = vld [vmem:[%s20403_s20 + $0xc0] sm:$0xff] }
 0x18c   : > { %v11067_v19 = vadd.f32 %v17643_v0, %v21142_v46  ;;  %v17707_v29 = vadd.f32 %v17706_v16, %v17705_v3  ;;  %v14911_v46 = vld [vmem:[%s20403_s20 + $0x92] sm:$0xff]  ;;  %11728 = vmatmul.mubr.bf16.gmra.mxu1 %v19533_v62  ;;  %2401 = vst [vmem:[#allocation2 + $0x670] sm:$0xf] %v16895_v55  ;;  %v16911_v62 = vpack.c.bf16 %v14849_v58, %v14849_v58  ;;  %v14881_v0 = vld [vmem:[%s20403_s20 + $0xa9] sm:$0xff] }
 0x18d   : > { %v17645_v27 = vpop.f32.mrf.mxu0  ;;  %v17708_v32 = vpop.f32.mrf.mxu1  ;;  %v16941_v37 = vpack.c.bf16 %v14911_v46, %v14911_v46  ;;  %v19541_v50 = vld [vmem:[#allocation2 + $0x368] ss:$196 sps:$4 sm:$0xff]   ;;  %18126 = vmatpush3.bf16.msra.mxu0 %v19552_v41  ;;  %11735 = vmatprep.mubr.bf16.mxu1 %v19543_v53  ;;  %2402 = vst [vmem:[#allocation2 + $0x734] sm:$0xf] %v16896_v54  ;;  %v16912_v31 = vpack.c.bf16 %v14850_v59, %v14850_v59  ;;  %v19562_v33 = vld [vmem:[%s23618_s1 + $0x6b8] sm:$0xff]  }
 0x18e   : > { %v17646_v30 = vadd.f32 %v17645_v27, %v17644_v26  ;;  %v21339_v36 = vadd.f32 %v17707_v29, %v11067_v19  ;;  %v16927_v9 = vpack.c.bf16 %v14881_v0, %v14881_v0  ;;  %v19545_v11 = vld [vmem:[#allocation2 + $0x4e8] ss:$196 sps:$4 sm:$0xff]   ;;  %2500 = vst [vmem:[#allocation2 + $0x674] sm:$0xf] %v16911_v62  ;;  %18127 = vmatprep.subr.bf16.mxu0 %v19556_v20  ;;  %v19560_v19 = vld [vmem:[%s23618_s1 + $0x618] sm:$0xff]   ;;  %v19568_v20 = vld [vmem:[%s23618_s1 + $0x650] sm:$0xff]  }
 0x18f   : > { %v17647_v40 = vpop.f32.mrf.mxu0  ;;  %v17709_v38 = vpop.f32.mrf.mxu1  ;;  %2690 = vst [vmem:[#allocation2 + $0x4f4] sm:$0xf] %v16941_v37  ;;  %11639 = vmatmul.mubr.bf16.gmra.mxu0 %v19537_v21  ;;  %v19547_v12 = vld [vmem:[#allocation2 + $0x4ec] ss:$196 sps:$4 sm:$0xff]   ;;  %2501 = vst [vmem:[#allocation2 + $0x738] sm:$0xf] %v16912_v31  ;;  %v16913_v48 = vpack.c.bf16 %v14851_v6, %v14851_v6 }
 0x190   : > { %v11070_v45 = vadd.f32 %v17646_v30, %v21152_v63  ;;  %v17710_v52 = vadd.f32 %v17709_v38, %v17708_v32  ;;  %2596 = vst [vmem:[#allocation2 + $0x678] sm:$0xf] %v16927_v9  ;;  %11646 = vmatprep.mubr.bf16.mxu0 %v19547_v12  ;;  %v19561_v27 = vld [vmem:[%s23618_s1 + $0x6f8] sm:$0xff]   ;;  %v14817_v43 = vld [vmem:[%s20403_s20 + $0xae] sm:$0xff] }
 0x191   : > { %v17648_v49 = vpop.f32.mrf.mxu0  ;;  %v17711_v2 = vpop.f32.mrf.mxu1  ;;  %18128 = vmatpush3.bf16.msra.mxu0 %v19560_v19  ;;  %v19549_v30 = vld [vmem:[#allocation2 + $0x4f0] ss:$196 sps:$4 sm:$0xff]   ;;  %18183 = vmatprep.subr.bf16.mxu1 %v19561_v27  ;;  %v14852_v53 = vld [vmem:[%s20403_s20 + $0xc8] sm:$0xff]  ;;  %2502 = vst [vmem:[#allocation2 + $0x7fc] sm:$0xf] %v16913_v48 }
 0x192   : > { %v17649_v56 = vadd.f32 %v17648_v49, %v17647_v40  ;;  %v21349_v63 = vadd.f32 %v17710_v52, %v11070_v45  ;;  %v14818_v37 = vld [vmem:[%s20403_s20 + $0xb6] sm:$0xff]  ;;  %18184 = vmatpush3.bf16.msra.mxu1 %v19562_v33  ;;  %v16897_v45 = vpack.c.bf16 %v14817_v43, %v14817_v43  ;;  %v16914_v58 = vpack.c.bf16 %v14852_v53, %v14852_v53  ;;  %v14884_v9 = vld [vmem:[%s20403_s20 + $0xc9] sm:$0xff]  ;;  %v14886_v53 = vld [vmem:[%s20403_s20 + $0xe1] sm:$0xff] }
 0x193   : > { %v17650_v61 = vpop.f32.mrf.mxu0  ;;  %v17712_v4 = vpop.f32.mrf.mxu1  ;;  %v16898_v47 = vpack.c.bf16 %v14818_v37, %v14818_v37  ;;  %18129 = vmatprep.subr.bf16.mxu0 %v19568_v20  ;;  %v16930_v12 = vpack.c.bf16 %v14884_v9, %v14884_v9  ;;  %v19574_v27 = vld [vmem:[%s23618_s1 + $0x6a8] sm:$0xff]   ;;  %v14853_v33 = vld [vmem:[%s20403_s20 + $0xd8] sm:$0xff] }
 0x194   : > { %v11075_v3 = vadd.f32 %v17649_v56, %v21161_v17  ;;  %v17713_v26 = vadd.f32 %v17712_v4, %v17711_v2  ;;  %11736 = vmatmul.mubr.bf16.gmra.mxu1 %v19541_v50  ;;  %v19553_v56 = vld [vmem:[#allocation2 + $0x670] ss:$196 sps:$4 sm:$0xff]   ;;  %v19559_v2 = vld [vmem:[#allocation2 + $0x67c] ss:$196 sps:$4 sm:$0xff]   ;;  %2403 = vst [vmem:[#allocation2 + $0x7f8] sm:$0xf] %v16897_v45  ;;  %v16915_v37 = vpack.c.bf16 %v14853_v33, %v14853_v33 }
 0x195   : > { %v17651_v15 = vpop.f32.mrf.mxu0  ;;  %v17714_v18 = vpop.f32.mrf.mxu1  ;;  %2404 = vst [vmem:[#allocation2 + $0x8bc] sm:$0xf] %v16898_v47  ;;  %3076 = vst [vmem:[#allocation2 + $0x68c] sm:$0xf] %v16897_v45 }
 0x196   : > { %v17652_v16 = vadd.f32 %v17651_v15, %v17650_v61  ;;  %v21360_v29 = vadd.f32 %v17713_v26, %v11075_v3  ;;  %v19551_v32 = vld [vmem:[#allocation2 + $0x4f4] ss:$196 sps:$4 sm:$0xff]   ;;  %3077 = vst [vmem:[#allocation2 + $0x750] sm:$0xf] %v16898_v47  ;;  %2503 = vst [vmem:[#allocation2 + $0x8c0] sm:$0xf] %v16914_v58 }
 0x197   : > { %v17653_v17 = vpop.f32.mrf.mxu0  ;;  %v17715_v24 = vpop.f32.mrf.mxu1  ;;  %11647 = vmatmul.mubr.bf16.gmra.mxu0 %v19545_v11  ;;  %11743 = vmatprep.mubr.bf16.mxu1 %v19551_v32  ;;  %v19555_v50 = vld [vmem:[#allocation2 + $0x674] ss:$196 sps:$4 sm:$0xff]   ;;  %v16929_v11 = vpack.c.bf16 %v14883_v7, %v14883_v7  ;;  %2599 = vst [vmem:[#allocation2 + $0x8c4] sm:$0xf] %v16930_v12  ;;  %2504 = vst [vmem:[#allocation2 + $0x984] sm:$0xf] %v16915_v37 }
 0x198   : > { %v11078_v21 = vadd.f32 %v17652_v16, %v21174_v22  ;;  %v17716_v51 = vadd.f32 %v17715_v24, %v17714_v18  ;;  %v19563_v22 = vld [vmem:[%s23618_s1 + $0x6f0] sm:$0xff]   ;;  %11654 = vmatprep.mubr.bf16.mxu0 %v19555_v50  ;;  %v19557_v4 = vld [vmem:[#allocation2 + $0x678] ss:$196 sps:$4 sm:$0xff]   ;;  %v19573_v18 = vld [vmem:[%s23618_s1 + $0x6e8] sm:$0xff]  }
 0x199   : > { %v17654_v28 = vpop.f32.mrf.mxu0  ;;  %v17717_v46 = vpop.f32.mrf.mxu1  ;;  %18185 = vmatprep.subr.bf16.mxu1 %v19563_v22  ;;  %v19567_v61 = vld [vmem:[%s23618_s1 + $0x6b0] sm:$0xff]   ;;  %2598 = vst [vmem:[#allocation2 + $0x800] sm:$0xf] %v16929_v11  ;;  %v14885_v50 = vld [vmem:[%s20403_s20 + $0xd9] sm:$0xff]  ;;  %v14822_v12 = vld [vmem:[%s20403_s20 + $0xe6] sm:$0xff] }
 0x19a   : > { %v17655_v39 = vadd.f32 %v17654_v28, %v17653_v17  ;;  %v21372_v34 = vadd.f32 %v17716_v51, %v11078_v21  ;;  %18186 = vmatpush3.bf16.msra.mxu1 %v19567_v61  ;;  %v19575_v51 = vld [vmem:[%s23618_s1 + $0x6e0] sm:$0xff]   ;;  %v14820_v32 = vld [vmem:[%s20403_s20 + $0xce] sm:$0xff]  ;;  %v19586_v7 = vld [vmem:[%s23618_s1 + $0x698] sm:$0xff]  }
 0x19b   : > { %v17656_v40 = vpop.f32.mrf.mxu0  ;;  %v17718_v41 = vpop.f32.mrf.mxu1  ;;  %18187 = vmatprep.subr.bf16.mxu1 %v19573_v18  ;;  %v16900_v43 = vpack.c.bf16 %v14820_v32, %v14820_v32  ;;  %v14856_v18 = vld [vmem:[%s20403_s20 + $0xf8] sm:$0xff] }
 0x19c   : > { %v11083_v38 = vadd.f32 %v17655_v39, %v21185_v60  ;;  %v17719_v52 = vadd.f32 %v17718_v41, %v17717_v46  ;;  %11744 = vmatmul.mubr.bf16.gmra.mxu1 %v19549_v30  ;;  %v19564_v46 = vld [vmem:[#allocation2 + $0x7f8] ss:$196 sps:$4 sm:$0xff]  }
 0x19d   : > { %v17657_v49 = vpop.f32.mrf.mxu0  ;;  %v17720_v54 = vpop.f32.mrf.mxu1  ;;  %11751 = vmatprep.mubr.bf16.mxu1 %v19559_v2  ;;  %v19566_v22 = vld [vmem:[#allocation2 + $0x7fc] ss:$196 sps:$4 sm:$0xff]   ;;  %2406 = vst [vmem:[#allocation2 + $0xa44] sm:$0xf] %v16900_v43  ;;  %3079 = vst [vmem:[#allocation2 + $0x8d8] sm:$0xf] %v16900_v43  ;;  %v16932_v2 = vpack.c.bf16 %v14886_v53, %v14886_v53 }
 0x19e   : > { %v17658_v55 = vadd.f32 %v17657_v49, %v17656_v40  ;;  %v21379_v59 = vadd.f32 %v17719_v52, %v11083_v38  ;;  %18188 = vmatpush3.bf16.msra.mxu1 %v19574_v27  ;;  %v14854_v38 = vld [vmem:[%s20403_s20 + $0xe0] sm:$0xff]  ;;  %v19580_v49 = vld [vmem:[%s23618_s1 + $0x648] sm:$0xff]   ;;  %v14887_v43 = vld [vmem:[%s20403_s20 + $0xf1] sm:$0xff] }
 0x19f   : > { %v17659_v60 = vpop.f32.mrf.mxu0  ;;  %v17721_v31 = vpop.f32.mrf.mxu1  ;;  %11655 = vmatmul.mubr.bf16.gmra.mxu0 %v19553_v56  ;;  %18189 = vmatprep.subr.bf16.mxu1 %v19575_v51  ;;  %v16916_v48 = vpack.c.bf16 %v14854_v38, %v14854_v38  ;;  %v19579_v52 = vld [vmem:[%s23618_s1 + $0x6a0] sm:$0xff]   ;;  %v16931_v56 = vpack.c.bf16 %v14885_v50, %v14885_v50  ;;  %2601 = vst [vmem:[#allocation2 + $0xa4c] sm:$0xf] %v16932_v2 }
 0x1a0   : > { %v11086_v62 = vadd.f32 %v17658_v55, %v21200_v13  ;;  %v17722_v0 = vadd.f32 %v17721_v31, %v17720_v54  ;;  %v19572_v13 = vld [vmem:[%s23618_s1 + $0x610] sm:$0xff]   ;;  %11662 = vmatprep.mubr.bf16.mxu0 %v19566_v22  ;;  %v19569_v54 = vld [vmem:[#allocation2 + $0x800] ss:$196 sps:$4 sm:$0xff]   ;;  %v19584_v31 = vld [vmem:[%s23618_s1 + $0x608] sm:$0xff]   ;;  %v16933_v38 = vpack.c.bf16 %v14887_v43, %v14887_v43 }
 0x1a1   : > { %v17660_v3 = vpop.f32.mrf.mxu0  ;;  %v17723_v15 = vpop.f32.mrf.mxu1  ;;  %18130 = vmatpush3.bf16.msra.mxu0 %v19572_v13  ;;  %2505 = vst [vmem:[#allocation2 + $0xa48] sm:$0xf] %v16916_v48  ;;  %2600 = vst [vmem:[#allocation2 + $0x988] sm:$0xf] %v16931_v56  ;;  %v14888_v37 = vld [vmem:[%s20403_s20 + $0xf9] sm:$0xff] }
 0x1a2   : > { %v17661_v26 = vadd.f32 %v17660_v3, %v17659_v60  ;;  %v21393_v14 = vadd.f32 %v17722_v0, %v11086_v62  ;;  %18190 = vmatpush3.bf16.msra.mxu1 %v19579_v52  ;;  %v19571_v60 = vld [vmem:[#allocation2 + $0x804] ss:$196 sps:$4 sm:$0xff]   ;;  %18131 = vmatprep.subr.bf16.mxu0 %v19580_v49  ;;  %v19585_v0 = vld [vmem:[%s23618_s1 + $0x6d8] sm:$0xff]   ;;  %2602 = vst [vmem:[#allocation2 + $0xb10] sm:$0xf] %v16933_v38 }
 0x1a3   : > { %v17662_v16 = vpop.f32.mrf.mxu0  ;;  %v17724_v17 = vpop.f32.mrf.mxu1  ;;  %18191 = vmatprep.subr.bf16.mxu1 %v19585_v0  ;;  %v19596_v53 = vld [vmem:[%s23618_s1 + $0x600] sm:$0xff]   ;;  %v15034_v38 = vld [vmem:[%s20403_s20 + $0x56] sm:$0xff] }
 0x1a4   : > { %v11091_v19 = vadd.f32 %v17661_v26, %v21210_v44  ;;  %v17725_v21 = vadd.f32 %v17724_v17, %v17723_v15  ;;  %v14819_v44 = vld [vmem:[%s20403_s20 + $0xc6] sm:$0xff]  ;;  %11752 = vmatmul.mubr.bf16.gmra.mxu1 %v19557_v4  ;;  %v14821_v15 = vld [vmem:[%s20403_s20 + $0xde] sm:$0xff] }
 0x1a5   : > { %v17663_v24 = vpop.f32.mrf.mxu0  ;;  %v17726_v30 = vpop.f32.mrf.mxu1  ;;  %v16899_v40 = vpack.c.bf16 %v14819_v44, %v14819_v44  ;;  %11759 = vmatprep.mubr.bf16.mxu1 %v19571_v60  ;;  %18132 = vmatpush3.bf16.msra.mxu0 %v19584_v31  ;;  %v16901_v13 = vpack.c.bf16 %v14821_v15, %v14821_v15  ;;  %v19591_v44 = vld [vmem:[%s23618_s1 + $0x690] sm:$0xff]  }
 0x1a6   : > { %v17664_v28 = vadd.f32 %v17663_v24, %v17662_v16  ;;  %v21408_v39 = vadd.f32 %v17725_v21, %v11091_v19  ;;  %18192 = vmatpush3.bf16.msra.mxu1 %v19586_v7  ;;  %v14855_v16 = vld [vmem:[%s20403_s20 + $0xf0] sm:$0xff]  ;;  %v16902_v24 = vpack.c.bf16 %v14822_v12, %v14822_v12 }
 0x1a7   : > { %v17727_v6 = vpop.f32.mrf.mxu1  ;;  %v17665_v45 = vpop.f32.mrf.mxu0  ;;  %2405 = vst [vmem:[#allocation2 + $0x980] sm:$0xf] %v16899_v40  ;;  %3078 = vst [vmem:[#allocation2 + $0x814] sm:$0xf] %v16899_v40  ;;  %11663 = vmatmul.mubr.bf16.gmra.mxu0 %v19564_v46  ;;  %v16917_v51 = vpack.c.bf16 %v14855_v16, %v14855_v16  ;;  %v19583_v46 = vld [vmem:[#allocation2 + $0x98c] ss:$196 sps:$4 sm:$0xff]  }
 0x1a8   : > { %v11094_v41 = vadd.f32 %v17664_v28, %v21221_v57  ;;  %v17728_v47 = vadd.f32 %v17727_v6, %v17726_v30  ;;  %v19578_v21 = vld [vmem:[#allocation2 + $0x984] ss:$196 sps:$4 sm:$0xff]   ;;  %v16918_v28 = vpack.c.bf16 %v14856_v18, %v14856_v18  ;;  %2407 = vst [vmem:[#allocation2 + $0xb08] sm:$0xf] %v16901_v13  ;;  %3080 = vst [vmem:[#allocation2 + $0x99c] sm:$0xf] %v16901_v13 }
 0x1a9   : > { %v17666_v55 = vpop.f32.mrf.mxu0  ;;  %v17729_v61 = vpop.f32.mrf.mxu1  ;;  %11670 = vmatprep.mubr.bf16.mxu0 %v19578_v21  ;;  %v19581_v33 = vld [vmem:[#allocation2 + $0x988] ss:$196 sps:$4 sm:$0xff]   ;;  %2408 = vst [vmem:[#allocation2 + $0xbcc] sm:$0xf] %v16902_v24  ;;  %2506 = vst [vmem:[#allocation2 + $0xb0c] sm:$0xf] %v16917_v51 }
 0x1aa   : > { %v21420_v57 = vadd.f32 %v17728_v47, %v11094_v41  ;;  %v17667_v58 = vadd.f32 %v17666_v55, %v17665_v45  ;;  %2507 = vst [vmem:[#allocation2 + $0xbd0] sm:$0xf] %v16918_v28  ;;  %3081 = vst [vmem:[#allocation2 + $0xa60] sm:$0xf] %v16902_v24  ;;  %v19592_v40 = vld [vmem:[%s23618_s1 + $0x640] sm:$0xff]   ;;  %v16934_v41 = vpack.c.bf16 %v14888_v37, %v14888_v37  ;;  %v14919_v45 = vld [vmem:[%s20403_s20 + $0xf2] sm:$0xff] }
 0x1ab   : > { %v17668_v62 = vpop.f32.mrf.mxu0  ;;  %v17730_v3 = vpop.f32.mrf.mxu1  ;;  %v14920_v47 = vld [vmem:[%s20403_s20 + $0xfa] sm:$0xff]  ;;  %18133 = vmatprep.subr.bf16.mxu0 %v19592_v40  ;;  %v16949_v49 = vpack.c.bf16 %v14919_v45, %v14919_v45  ;;  %v14937_v7 = vld [vmem:[%s20403_s20 + $0x4b] sm:$0xff] }
 0x1ac   : > { %v11099_v20 = vadd.f32 %v17667_v58, %v21240_v23  ;;  %11760 = vmatmul.mubr.bf16.gmra.mxu1 %v19569_v54  ;;  %v17731_v9 = vadd.f32 %v17730_v3, %v17729_v61  ;;  %v19587_v23 = vld [vmem:[%s23618_s1 + $0x6d0] sm:$0xff]   ;;  %v16950_v50 = vpack.c.bf16 %v14920_v47, %v14920_v47  ;;  %2603 = vst [vmem:[#allocation2 + $0xbd4] sm:$0xf] %v16934_v41  ;;  %v19597_v54 = vld [vmem:[%s23618_s1 + $0x6c8] sm:$0xff]  }
 0x1ad   : > { %v17669_v4 = vpop.f32.mrf.mxu0  ;;  %v17732_v11 = vpop.f32.mrf.mxu1  ;;  %18193 = vmatprep.subr.bf16.mxu1 %v19587_v23  ;;  %11767 = vmatprep.mubr.bf16.mxu1 %v19583_v46  ;;  %2698 = vst [vmem:[#allocation2 + $0xb14] sm:$0xf] %v16949_v49  ;;  %v19598_v58 = vld [vmem:[%s23618_s1 + $0x688] sm:$0xff]   ;;  %v14970_v13 = vld [vmem:[%s20403_s20 + $0x54] sm:$0xff] }
 0x1ae   : > { %v17670_v26 = vadd.f32 %v17669_v4, %v17668_v62  ;;  %v21439_v19 = vadd.f32 %v17731_v9, %v11099_v20  ;;  %v19576_v27 = vld [vmem:[#allocation2 + $0x980] ss:$196 sps:$4 sm:$0xff]   ;;  %18194 = vmatpush3.bf16.msra.mxu1 %v19591_v44  ;;  %2699 = vst [vmem:[#allocation2 + $0xbd8] sm:$0xf] %v16950_v50  ;;  %18134 = vmatpush3.bf16.msra.mxu0 %v19596_v53  ;;  %v14938_v9 = vld [vmem:[%s20403_s20 + $0x53] sm:$0xff] }
 0x1af   : > { %v17733_v30 = vpop.f32.mrf.mxu1  ;;  %11671 = vmatmul.mubr.bf16.gmra.mxu0 %v19576_v27  ;;  %18195 = vmatprep.subr.bf16.mxu1 %v19597_v54  ;;  %v16952_v12 = vpack.c.bf16 %v14938_v9, %v14938_v9  ;;  %v19603_v27 = vld [vmem:[%s23618_s1 + $0x680] sm:$0xff]   ;;  %v15001_v28 = vld [vmem:[%s20403_s20 + $0x4d] sm:$0xff] }
 0x1b0   : > { %v11102_v17 = vadd.f32 %v17670_v26, %v21253_v42  ;;  %v17734_v32 = vadd.f32 %v17733_v30, %v17732_v11  ;;  %v19588_v62 = vld [vmem:[#allocation2 + $0xb08] ss:$196 sps:$4 sm:$0xff]   ;;  %v16951_v11 = vpack.c.bf16 %v14937_v7, %v14937_v7  ;;  %v15002_v30 = vld [vmem:[%s20403_s20 + $0x55] sm:$0xff] }
 0x1b1   : > { %v19590_v0 = vld [vmem:[#allocation2 + $0xb0c] ss:$196 sps:$4 sm:$0xff]   ;;  %2781 = vst [vmem:[#allocation2 + $0x124] sm:$0xf] %v16952_v12  ;;  %v14939_v50 = vld [vmem:[%s20403_s20 + $0x63] sm:$0xff] }
 0x1b2   : > { %v21445_v22 = vadd.f32 %v17734_v32, %v11102_v17  ;;  %18196 = vmatpush3.bf16.msra.mxu1 %v19598_v58  ;;  %v14969_v26 = vld [vmem:[%s20403_s20 + $0x4c] sm:$0xff]  ;;  %11678 = vmatprep.mubr.bf16.mxu0 %v19590_v0  ;;  %v16968_v17 = vpack.c.bf16 %v14970_v13, %v14970_v13  ;;  %2780 = vst [vmem:[#allocation2 + $0x60] sm:$0xf] %v16951_v11  ;;  %v14971_v53 = vld [vmem:[%s20403_s20 + $0x64] sm:$0xff] }
 0x1b3   : > { %v16967_v16 = vpack.c.bf16 %v14969_v26, %v14969_v26  ;;  %v19593_v32 = vld [vmem:[#allocation2 + $0xb10] ss:$196 sps:$4 sm:$0xff]   ;;  %v15003_v0 = vld [vmem:[%s20403_s20 + $0x65] sm:$0xff] }
 0x1b4   : > { %11768 = vmatmul.mubr.bf16.gmra.mxu1 %v19581_v33  ;;  %2877 = vst [vmem:[#allocation2 + $0x128] sm:$0xf] %v16968_v17  ;;  %v16983_v33 = vpack.c.bf16 %v15001_v28, %v15001_v28  ;;  %v14972_v58 = vld [vmem:[%s20403_s20 + $0x6c] sm:$0xff]  ;;  %v16985_v9 = vpack.c.bf16 %v15003_v0, %v15003_v0  ;;  %v14941_v28 = vld [vmem:[%s20403_s20 + $0x7b] sm:$0xff] }
 0x1b5   : > { %2876 = vst [vmem:[#allocation2 + $0x64] sm:$0xf] %v16967_v16  ;;  %v19595_v37 = vld [vmem:[#allocation2 + $0xb14] ss:$196 sps:$4 sm:$0xff]  }
 0x1b6   : > { %v17751_v42 = vpop.f32.mrf.mxu0  ;;  %2972 = vst [vmem:[#allocation2 + $0x68] sm:$0xf] %v16983_v33  ;;  %11775 = vmatprep.mubr.bf16.mxu1 %v19595_v37  ;;  %2974 = vst [vmem:[#allocation2 + $0x1f0] sm:$0xf] %v16985_v9 }
 0x1b7   : > { %11679 = vmatmul.mubr.bf16.gmra.mxu0 %v19588_v62 }
 0x1b8   : > { %v17752_v6 = vpop.f32.mrf.mxu0 }
 0x1b9   : > { %v17753_v48 = vadd.f32 %v17752_v6, %v17751_v42  ;;  %v16984_v42 = vpack.c.bf16 %v15002_v30, %v15002_v30  ;;  %v15033_v6 = vld [vmem:[%s20403_s20 + $0x4e] sm:$0xff]  ;;  %v14942_v30 = vld [vmem:[%s20403_s20 + $0x83] sm:$0xff] }
 0x1ba   : > { %v17754_v55 = vpop.f32.mrf.mxu0  ;;  %v16999_v47 = vpack.c.bf16 %v15033_v6, %v15033_v6 }
 0x1bb   : > { %v17815_v52 = vpop.f32.mrf.mxu1  ;;  %v11237_v56 = vadd.f32 %v17753_v48, %v21272_v8  ;;  %v19599_v8 = vld [vmem:[%s23618_s1 + $0x6c0] sm:$0xff]   ;;  %2973 = vst [vmem:[#allocation2 + $0x12c] sm:$0xf] %v16984_v42  ;;  %v17000_v48 = vpack.c.bf16 %v15034_v38, %v15034_v38  ;;  %v16955_v42 = vpack.c.bf16 %v14941_v28, %v14941_v28 }
 0x1bc   : > { %v17755_v61 = vpop.f32.mrf.mxu0  ;;  %18197 = vmatprep.subr.bf16.mxu1 %v19599_v8  ;;  %11776 = vmatmul.mubr.bf16.gmra.mxu1 %v19593_v32  ;;  %3068 = vst [vmem:[#allocation2 + $0x6c] sm:$0xf] %v16999_v47  ;;  %v15004_v8 = vld [vmem:[%s20403_s20 + $0x6d] sm:$0xff]  ;;  %v19602_v13 = vld [vmem:[#allocation2 + $0x64] ss:$196 sps:$4 sm:$0xff]  }
 0x1bd   : > { %v17816_v2 = vpop.f32.mrf.mxu1  ;;  %v17756_v31 = vadd.f32 %v17755_v61, %v17754_v55  ;;  %18198 = vmatpush3.bf16.msra.mxu1 %v19603_v27  ;;  %3069 = vst [vmem:[#allocation2 + $0x130] sm:$0xf] %v17000_v48  ;;  %v16986_v26 = vpack.c.bf16 %v15004_v8, %v15004_v8  ;;  %11816 = vmatprep.mubr.bf16.mxu0 %v19602_v13  ;;  %2784 = vst [vmem:[#allocation2 + $0x370] sm:$0xf] %v16955_v42 }
 0x1be   : > { %v17817_v60 = vadd.f32 %v17816_v2, %v17815_v52  ;;  %v17757_v4 = vpop.f32.mrf.mxu0 }
 0x1bf   : > { %v17818_v20 = vpop.f32.mrf.mxu1  ;;  %v11240_v23 = vadd.f32 %v17756_v31, %v21282_v35  ;;  %v19604_v35 = vld [vmem:[%s23618_s1 + $0x778] sm:$0xff]   ;;  %2975 = vst [vmem:[#allocation2 + $0x2b4] sm:$0xf] %v16986_v26 }
 0x1c0   : > { %v21467_v3 = vadd.f32 %v17817_v60, %v11237_v56  ;;  %v17758_v18 = vpop.f32.mrf.mxu0  ;;  %18247 = vmatprep.subr.bf16.mxu0 %v19604_v35  ;;  %v16953_v56 = vpack.c.bf16 %v14939_v50, %v14939_v50  ;;  %v16969_v60 = vpack.c.bf16 %v14971_v53, %v14971_v53  ;;  %v19608_v31 = vld [vmem:[%s23618_s1 + $0x738] sm:$0xff]   ;;  %v19616_v35 = vld [vmem:[%s23618_s1 + $0x730] sm:$0xff]   ;;  %v15006_v53 = vld [vmem:[%s20403_s20 + $0x85] sm:$0xff] }
 0x1c1   : > { %v17819_v15 = vpop.f32.mrf.mxu1  ;;  %v17759_v24 = vadd.f32 %v17758_v18, %v17757_v4 }
 0x1c2   : > { %v17820_v21 = vadd.f32 %v17819_v15, %v17818_v20  ;;  %v17760_v44 = vpop.f32.mrf.mxu0  ;;  %v16970_v20 = vpack.c.bf16 %v14972_v58, %v14972_v58  ;;  %2782 = vst [vmem:[#allocation2 + $0x1e8] sm:$0xf] %v16953_v56  ;;  %2878 = vst [vmem:[#allocation2 + $0x1ec] sm:$0xf] %v16969_v60  ;;  %v15036_v15 = vld [vmem:[%s20403_s20 + $0x6e] sm:$0xff]  ;;  %v15037_v56 = vld [vmem:[%s20403_s20 + $0x7e] sm:$0xff] }
 0x1c3   : > { %v17821_v51 = vpop.f32.mrf.mxu1  ;;  %v11245_v40 = vadd.f32 %v17759_v24, %v21296_v1  ;;  %v14940_v1 = vld [vmem:[%s20403_s20 + $0x6b] sm:$0xff]  ;;  %v17002_v18 = vpack.c.bf16 %v15036_v15, %v15036_v15 }
 0x1c4   : > { %v21482_v46 = vadd.f32 %v17820_v21, %v11240_v23  ;;  %v17761_v45 = vpop.f32.mrf.mxu0  ;;  %v16954_v2 = vpack.c.bf16 %v14940_v1, %v14940_v1  ;;  %v15035_v23 = vld [vmem:[%s20403_s20 + $0x66] sm:$0xff]  ;;  %2879 = vst [vmem:[#allocation2 + $0x2b0] sm:$0xf] %v16970_v20  ;;  %v19612_v21 = vld [vmem:[%s23618_s1 + $0x770] sm:$0xff]  }
 0x1c5   : > { %v17822_v43 = vpop.f32.mrf.mxu1  ;;  %v17762_v52 = vadd.f32 %v17761_v45, %v17760_v44  ;;  %v17001_v16 = vpack.c.bf16 %v15035_v23, %v15035_v23  ;;  %3071 = vst [vmem:[#allocation2 + $0x2b8] sm:$0xf] %v17002_v18  ;;  %v14973_v44 = vld [vmem:[%s20403_s20 + $0x7c] sm:$0xff]  ;;  %v19605_v38 = vld [vmem:[#allocation2 + $0x68] ss:$196 sps:$4 sm:$0xff]  }
 0x1c6   : > { %v17823_v41 = vadd.f32 %v17822_v43, %v17821_v51  ;;  %2783 = vst [vmem:[#allocation2 + $0x2ac] sm:$0xf] %v16954_v2  ;;  %v14974_v43 = vld [vmem:[%s20403_s20 + $0x84] sm:$0xff]  ;;  %v16971_v37 = vpack.c.bf16 %v14973_v44, %v14973_v44  ;;  %v19607_v48 = vld [vmem:[#allocation2 + $0x6c] ss:$196 sps:$4 sm:$0xff]  }
 0x1c7   : > { %v17824_v49 = vpop.f32.mrf.mxu1  ;;  %v17763_v54 = vpop.f32.mrf.mxu0  ;;  %v11248_v61 = vadd.f32 %v17762_v52, %v21309_v25  ;;  %v19600_v25 = vld [vmem:[#allocation2 + $0x60] ss:$196 sps:$4 sm:$0xff]   ;;  %3070 = vst [vmem:[#allocation2 + $0x1f4] sm:$0xf] %v17001_v16  ;;  %v19620_v52 = vld [vmem:[%s23618_s1 + $0x768] sm:$0xff]   ;;  %11913 = vmatprep.mubr.bf16.mxu1 %v19607_v48  ;;  %v15039_v48 = vld [vmem:[%s20403_s20 + $0x96] sm:$0xff] }
 0x1c8   : > { %v21490_v55 = vadd.f32 %v17823_v41, %v11245_v40  ;;  %11817 = vmatmul.mubr.bf16.vlgmr.msra.gmra.mxu0 %v19600_v25  ;;  %v16956_v40 = vpack.c.bf16 %v14942_v30, %v14942_v30  ;;  %v16972_v41 = vpack.c.bf16 %v14974_v43, %v14974_v43  ;;  %2880 = vst [vmem:[#allocation2 + $0x374] sm:$0xf] %v16971_v37  ;;  %v19613_v23 = vld [vmem:[#allocation2 + $0x1f0] ss:$196 sps:$4 sm:$0xff]   ;;  %v14944_v16 = vld [vmem:[%s20403_s20 + $0x9b] sm:$0xff] }
 0x1c9   : > { %v17825_v62 = vpop.f32.mrf.mxu1  ;;  %v17764_v7 = vpop.f32.mrf.mxu0  ;;  %18248 = vmatpush3.bf16.msra.mxu0 %v19608_v31  ;;  %v17003_v31 = vpack.c.bf16 %v15037_v56, %v15037_v56  ;;  %11914 = vmatmul.mubr.bf16.vlgmr.msra.gmra.mxu1 %v19605_v38  ;;  %v19628_v43 = vld [vmem:[%s23618_s1 + $0x760] sm:$0xff]   ;;  %v15007_v37 = vld [vmem:[%s20403_s20 + $0x95] sm:$0xff] }
 0x1ca   : > { %v17826_v4 = vadd.f32 %v17825_v62, %v17824_v49  ;;  %v17765_v11 = vadd.f32 %v17764_v7, %v17763_v54  ;;  %18249 = vmatprep.subr.bf16.mxu0 %v19612_v21  ;;  %2785 = vst [vmem:[#allocation2 + $0x434] sm:$0xf] %v16956_v40  ;;  %v15005_v49 = vld [vmem:[%s20403_s20 + $0x7d] sm:$0xff]  ;;  %2881 = vst [vmem:[#allocation2 + $0x438] sm:$0xf] %v16972_v41  ;;  %v16988_v62 = vpack.c.bf16 %v15006_v53, %v15006_v53 }
 0x1cb   : > { %v17827_v12 = vpop.f32.mrf.mxu1  ;;  %v17766_v27 = vpop.f32.mrf.mxu0  ;;  %v16987_v54 = vpack.c.bf16 %v15005_v49, %v15005_v49  ;;  %3072 = vst [vmem:[#allocation2 + $0x37c] sm:$0xf] %v17003_v31  ;;  %v14976_v21 = vld [vmem:[%s20403_s20 + $0x9c] sm:$0xff]  ;;  %v16989_v41 = vpack.c.bf16 %v15007_v37, %v15007_v37 }
 0x1cc   : > { %v21501_v17 = vadd.f32 %v17826_v4, %v11248_v61  ;;  %v11253_v24 = vadd.f32 %v17765_v11, %v21318_v5  ;;  %v19611_v61 = vld [vmem:[#allocation2 + $0x1ec] ss:$196 sps:$4 sm:$0xff]   ;;  %2977 = vst [vmem:[#allocation2 + $0x43c] sm:$0xf] %v16988_v62  ;;  %v16974_v28 = vpack.c.bf16 %v14976_v21, %v14976_v21  ;;  %v19632_v53 = vld [vmem:[%s23618_s1 + $0x720] sm:$0xff]  }
 0x1cd   : > { %v17828_v51 = vpop.f32.mrf.mxu1  ;;  %v17767_v33 = vpop.f32.mrf.mxu0  ;;  %v19609_v60 = vld [vmem:[#allocation2 + $0x1e8] ss:$196 sps:$4 sm:$0xff]   ;;  %18250 = vmatpush3.bf16.msra.mxu0 %v19616_v35  ;;  %2976 = vst [vmem:[#allocation2 + $0x378] sm:$0xf] %v16987_v54  ;;  %11824 = vmatprep.mubr.bf16.mxu0 %v19611_v61  ;;  %2978 = vst [vmem:[#allocation2 + $0x500] sm:$0xf] %v16989_v41 }
 0x1ce   : > { %v17829_v32 = vadd.f32 %v17828_v51, %v17827_v12  ;;  %v17768_v5 = vadd.f32 %v17767_v33, %v17766_v27  ;;  %18251 = vmatprep.subr.bf16.mxu0 %v19620_v52  ;;  %v19615_v15 = vld [vmem:[#allocation2 + $0x1f4] ss:$196 sps:$4 sm:$0xff]   ;;  %v19624_v11 = vld [vmem:[%s23618_s1 + $0x728] sm:$0xff]   ;;  %2883 = vst [vmem:[#allocation2 + $0x5c0] sm:$0xf] %v16974_v28 }
 0x1cf   : > { %v17830_v6 = vpop.f32.mrf.mxu1  ;;  %v17769_v47 = vpop.f32.mrf.mxu0  ;;  %v14943_v12 = vld [vmem:[%s20403_s20 + $0x93] sm:$0xff]  ;;  %11921 = vmatprep.mubr.bf16.mxu1 %v19615_v15 }
 0x1d0   : > { %v21514_v45 = vadd.f32 %v17829_v32, %v11253_v24  ;;  %v11256_v50 = vadd.f32 %v17768_v5, %v21328_v10  ;;  %v15038_v10 = vld [vmem:[%s20403_s20 + $0x86] sm:$0xff]  ;;  %11825 = vmatmul.mubr.bf16.gmra.mxu0 %v19609_v60  ;;  %v16957_v18 = vpack.c.bf16 %v14943_v12, %v14943_v12  ;;  %v14975_v27 = vld [vmem:[%s20403_s20 + $0x94] sm:$0xff]  ;;  %v15008_v5 = vld [vmem:[%s20403_s20 + $0x9d] sm:$0xff] }
 0x1d1   : > { %v17831_v1 = vpop.f32.mrf.mxu1  ;;  %v17770_v58 = vpop.f32.mrf.mxu0  ;;  %v17004_v7 = vpack.c.bf16 %v15038_v10, %v15038_v10  ;;  %18252 = vmatpush3.bf16.msra.mxu0 %v19624_v11  ;;  %v16973_v35 = vpack.c.bf16 %v14975_v27, %v14975_v27  ;;  %v19617_v44 = vld [vmem:[#allocation2 + $0x370] ss:$196 sps:$4 sm:$0xff]   ;;  %11922 = vmatmul.mubr.bf16.gmra.mxu1 %v19613_v23  ;;  %v19636_v11 = vld [vmem:[%s23618_s1 + $0x758] sm:$0xff]  }
 0x1d2   : > { %v17832_v2 = vadd.f32 %v17831_v1, %v17830_v6  ;;  %v17771_v20 = vadd.f32 %v17770_v58, %v17769_v47  ;;  %v19619_v32 = vld [vmem:[#allocation2 + $0x374] ss:$196 sps:$4 sm:$0xff]   ;;  %2786 = vst [vmem:[#allocation2 + $0x4f8] sm:$0xf] %v16957_v18  ;;  %v16990_v47 = vpack.c.bf16 %v15008_v5, %v15008_v5  ;;  %18253 = vmatprep.subr.bf16.mxu0 %v19628_v43  ;;  %v14977_v60 = vld [vmem:[%s20403_s20 + $0xac] sm:$0xff] }
 0x1d3   : > { %v17833_v0 = vpop.f32.mrf.mxu1  ;;  %v17772_v4 = vpop.f32.mrf.mxu0  ;;  %3073 = vst [vmem:[#allocation2 + $0x440] sm:$0xf] %v17004_v7  ;;  %2882 = vst [vmem:[#allocation2 + $0x4fc] sm:$0xf] %v16973_v35  ;;  %11832 = vmatprep.mubr.bf16.mxu0 %v19619_v32  ;;  %v14946_v58 = vld [vmem:[%s20403_s20 + $0xb3] sm:$0xff] }
 0x1d4   : > { %v21524_v8 = vadd.f32 %v17832_v2, %v11256_v50  ;;  %v11261_v9 = vadd.f32 %v17771_v20, %v21339_v36  ;;  %v16958_v36 = vpack.c.bf16 %v14944_v16, %v14944_v16  ;;  %v17005_v50 = vpack.c.bf16 %v15039_v48, %v15039_v48  ;;  %2979 = vst [vmem:[#allocation2 + $0x5c4] sm:$0xf] %v16990_v47  ;;  %v14945_v2 = vld [vmem:[%s20403_s20 + $0xab] sm:$0xff]  ;;  %v19621_v31 = vld [vmem:[#allocation2 + $0x378] ss:$196 sps:$4 sm:$0xff]  }
 0x1d5   : > { %v17834_v26 = vpop.f32.mrf.mxu1  ;;  %v17773_v13 = vpop.f32.mrf.mxu0  ;;  %18254 = vmatpush3.bf16.msra.mxu0 %v19632_v53  ;;  %v16960_v10 = vpack.c.bf16 %v14946_v58, %v14946_v58  ;;  %v15009_v12 = vld [vmem:[%s20403_s20 + $0xad] sm:$0xff] }
 0x1d6   : > { %v17835_v25 = vadd.f32 %v17834_v26, %v17833_v0  ;;  %v17774_v24 = vadd.f32 %v17773_v13, %v17772_v4  ;;  %2787 = vst [vmem:[#allocation2 + $0x5bc] sm:$0xf] %v16958_v36  ;;  %3074 = vst [vmem:[#allocation2 + $0x504] sm:$0xf] %v17005_v50  ;;  %v16959_v0 = vpack.c.bf16 %v14945_v2, %v14945_v2  ;;  %v14978_v26 = vld [vmem:[%s20403_s20 + $0xb4] sm:$0xff]  ;;  %18255 = vmatprep.subr.bf16.mxu0 %v19636_v11  ;;  %v14979_v50 = vld [vmem:[%s20403_s20 + $0xc4] sm:$0xff] }
 0x1d7   : > { %v17836_v51 = vpop.f32.mrf.mxu1  ;;  %v16975_v4 = vpack.c.bf16 %v14977_v60, %v14977_v60  ;;  %2789 = vst [vmem:[#allocation2 + $0x744] sm:$0xf] %v16960_v10  ;;  %v16991_v27 = vpack.c.bf16 %v15009_v12, %v15009_v12  ;;  %v19643_v48 = vld [vmem:[%s23618_s1 + $0x7f0] sm:$0xff]   ;;  %v16977_v60 = vpack.c.bf16 %v14979_v50, %v14979_v50  ;;  %v15011_v11 = vld [vmem:[%s20403_s20 + $0xc5] sm:$0xff] }
 0x1d8   : > { %v17775_v30 = vpop.f32.mrf.mxu0  ;;  %v21534_v33 = vadd.f32 %v17835_v25, %v11261_v9  ;;  %v11264_v42 = vadd.f32 %v17774_v24, %v21349_v63  ;;  %v15040_v63 = vld [vmem:[%s20403_s20 + $0x9e] sm:$0xff]  ;;  %11833 = vmatmul.mubr.bf16.gmra.mxu0 %v19617_v44  ;;  %2788 = vst [vmem:[#allocation2 + $0x680] sm:$0xf] %v16959_v0  ;;  %v15010_v25 = vld [vmem:[%s20403_s20 + $0xb5] sm:$0xff]  ;;  %v19639_v10 = vld [vmem:[#allocation2 + $0x68c] ss:$196 sps:$4 sm:$0xff]  }
 0x1d9   : > { %v17837_v40 = vpop.f32.mrf.mxu1  ;;  %v17006_v1 = vpack.c.bf16 %v15040_v63, %v15040_v63  ;;  %2884 = vst [vmem:[#allocation2 + $0x684] sm:$0xf] %v16975_v4  ;;  %v16992_v21 = vpack.c.bf16 %v15010_v25, %v15010_v25  ;;  %2980 = vst [vmem:[#allocation2 + $0x688] sm:$0xf] %v16991_v27  ;;  %v14980_v4 = vld [vmem:[%s20403_s20 + $0xcc] sm:$0xff]  ;;  %v16993_v27 = vpack.c.bf16 %v15011_v11, %v15011_v11 }
 0x1da   : > { %v17838_v6 = vadd.f32 %v17837_v40, %v17836_v51  ;;  %v17776_v38 = vpop.f32.mrf.mxu0  ;;  %v19623_v20 = vld [vmem:[#allocation2 + $0x37c] ss:$196 sps:$4 sm:$0xff]   ;;  %2886 = vst [vmem:[#allocation2 + $0x80c] sm:$0xf] %v16977_v60  ;;  %v15014_v60 = vld [vmem:[%s20403_s20 + $0xe5] sm:$0xff] }
 0x1db   : > { %v17777_v52 = vadd.f32 %v17776_v38, %v17775_v30  ;;  %v17839_v49 = vpop.f32.mrf.mxu1  ;;  %3075 = vst [vmem:[#allocation2 + $0x5c8] sm:$0xf] %v17006_v1  ;;  %11929 = vmatprep.mubr.bf16.mxu1 %v19623_v20  ;;  %v19627_v36 = vld [vmem:[#allocation2 + $0x4fc] ss:$196 sps:$4 sm:$0xff]   ;;  %2981 = vst [vmem:[#allocation2 + $0x74c] sm:$0xf] %v16992_v21 }
 0x1dc   : > { %v21547_v54 = vadd.f32 %v17838_v6, %v11264_v42  ;;  %v17778_v56 = vpop.f32.mrf.mxu0  ;;  %v19640_v30 = vld [vmem:[%s23618_s1 + $0x718] sm:$0xff]   ;;  %11930 = vmatmul.mubr.bf16.gmra.mxu1 %v19621_v31  ;;  %11840 = vmatprep.mubr.bf16.mxu0 %v19627_v36  ;;  %v19629_v5 = vld [vmem:[#allocation2 + $0x500] ss:$196 sps:$4 sm:$0xff]   ;;  %v19652_v36 = vld [vmem:[%s23618_s1 + $0x710] sm:$0xff]   ;;  %2982 = vst [vmem:[#allocation2 + $0x810] sm:$0xf] %v16993_v27 }
 0x1dd   : > { %v11269_v61 = vadd.f32 %v17777_v52, %v21360_v29  ;;  %v17840_v62 = vpop.f32.mrf.mxu1  ;;  %v16976_v29 = vpack.c.bf16 %v14978_v26, %v14978_v26  ;;  %v19625_v18 = vld [vmem:[#allocation2 + $0x4f8] ss:$196 sps:$4 sm:$0xff]   ;;  %18256 = vmatpush3.bf16.msra.mxu0 %v19640_v30  ;;  %v16978_v26 = vpack.c.bf16 %v14980_v4, %v14980_v4 }
 0x1de   : > { %v17841_v7 = vadd.f32 %v17840_v62, %v17839_v49  ;;  %v17779_v9 = vpop.f32.mrf.mxu0  ;;  %v19642_v38 = vld [vmem:[%s23618_s1 + $0x7b8] sm:$0xff]   ;;  %v14948_v49 = vld [vmem:[%s20403_s20 + $0xcb] sm:$0xff] }
 0x1df   : > { %v17780_v23 = vadd.f32 %v17779_v9, %v17778_v56  ;;  %v17842_v15 = vpop.f32.mrf.mxu1  ;;  %2885 = vst [vmem:[#allocation2 + $0x748] sm:$0xf] %v16976_v29  ;;  %v16962_v58 = vpack.c.bf16 %v14948_v49, %v14948_v49  ;;  %v19633_v31 = vld [vmem:[#allocation2 + $0x680] ss:$196 sps:$4 sm:$0xff]   ;;  %v19648_v29 = vld [vmem:[%s23618_s1 + $0x750] sm:$0xff]  }
 0x1e0   : > { %v21559_v13 = vadd.f32 %v17841_v7, %v11269_v61  ;;  %v17781_v16 = vpop.f32.mrf.mxu0  ;;  %11841 = vmatmul.mubr.bf16.gmra.mxu0 %v19625_v18  ;;  %2887 = vst [vmem:[#allocation2 + $0x8d0] sm:$0xf] %v16978_v26  ;;  %v15012_v18 = vld [vmem:[%s20403_s20 + $0xcd] sm:$0xff]  ;;  %18257 = vmatprep.subr.bf16.mxu0 %v19648_v29 }
 0x1e1   : > { %v11272_v24 = vadd.f32 %v17780_v23, %v21372_v34  ;;  %v17843_v51 = vpop.f32.mrf.mxu1  ;;  %v19641_v34 = vld [vmem:[%s23618_s1 + $0x7f8] sm:$0xff]   ;;  %2791 = vst [vmem:[#allocation2 + $0x8cc] sm:$0xf] %v16962_v58  ;;  %3464 = vst [vmem:[#allocation2 + $0x760] sm:$0xf] %v16962_v58  ;;  %18258 = vmatpush3.bf16.msra.mxu0 %v19652_v36 }
 0x1e2   : > { %v17844_v35 = vadd.f32 %v17843_v51, %v17842_v15  ;;  %v17782_v28 = vpop.f32.mrf.mxu0  ;;  %v19631_v6 = vld [vmem:[#allocation2 + $0x504] ss:$196 sps:$4 sm:$0xff]   ;;  %18311 = vmatprep.subr.bf16.mxu1 %v19641_v34  ;;  %v16994_v51 = vpack.c.bf16 %v15012_v18, %v15012_v18 }
 0x1e3   : > { %v17783_v44 = vadd.f32 %v17782_v28, %v17781_v16  ;;  %v17845_v32 = vpop.f32.mrf.mxu1  ;;  %11937 = vmatprep.mubr.bf16.mxu1 %v19631_v6  ;;  %18312 = vmatpush3.bf16.msra.mxu1 %v19642_v38  ;;  %v19637_v16 = vld [vmem:[#allocation2 + $0x688] ss:$196 sps:$4 sm:$0xff]   ;;  %v14981_v38 = vld [vmem:[%s20403_s20 + $0xdc] sm:$0xff] }
 0x1e4   : > { %v21568_v42 = vadd.f32 %v17844_v35, %v11272_v24  ;;  %v17784_v40 = vpop.f32.mrf.mxu0  ;;  %18313 = vmatprep.subr.bf16.mxu1 %v19643_v48  ;;  %11938 = vmatmul.mubr.bf16.gmra.mxu1 %v19629_v5  ;;  %2983 = vst [vmem:[#allocation2 + $0x8d4] sm:$0xf] %v16994_v51  ;;  %v14950_v5 = vld [vmem:[%s20403_s20 + $0xe3] sm:$0xff]  ;;  %v14952_v51 = vld [vmem:[%s20403_s20 + $0xfb] sm:$0xff] }
 0x1e5   : > { %v11277_v43 = vadd.f32 %v17783_v44, %v21379_v59  ;;  %v17846_v37 = vpop.f32.mrf.mxu1  ;;  %v14947_v59 = vld [vmem:[%s20403_s20 + $0xc3] sm:$0xff]  ;;  %11945 = vmatprep.mubr.bf16.mxu1 %v19639_v10  ;;  %v16964_v48 = vpack.c.bf16 %v14950_v5, %v14950_v5  ;;  %v16996_v10 = vpack.c.bf16 %v15014_v60, %v15014_v60 }
 0x1e6   : > { %v17847_v41 = vadd.f32 %v17846_v37, %v17845_v32  ;;  %v17785_v47 = vpop.f32.mrf.mxu0  ;;  %v19635_v56 = vld [vmem:[#allocation2 + $0x684] ss:$196 sps:$4 sm:$0xff]   ;;  %v16961_v2 = vpack.c.bf16 %v14947_v59, %v14947_v59 }
 0x1e7   : > { %v17786_v63 = vadd.f32 %v17785_v47, %v17784_v40  ;;  %v17848_v52 = vpop.f32.mrf.mxu1  ;;  %11848 = vmatprep.mubr.bf16.mxu0 %v19635_v56  ;;  %v19654_v44 = vld [vmem:[%s23618_s1 + $0x7a8] sm:$0xff]   ;;  %v19655_v40 = vld [vmem:[%s23618_s1 + $0x7e0] sm:$0xff]   ;;  %2793 = vst [vmem:[#allocation2 + $0xa54] sm:$0xf] %v16964_v48  ;;  %3466 = vst [vmem:[#allocation2 + $0x8e8] sm:$0xf] %v16964_v48 }
 0x1e8   : > { %v21580_v1 = vadd.f32 %v17847_v41, %v11277_v43  ;;  %v17787_v53 = vpop.f32.mrf.mxu0  ;;  %2790 = vst [vmem:[#allocation2 + $0x808] sm:$0xf] %v16961_v2  ;;  %3463 = vst [vmem:[#allocation2 + $0x69c] sm:$0xf] %v16961_v2  ;;  %11849 = vmatmul.mubr.bf16.gmra.mxu0 %v19633_v31  ;;  %v14949_v43 = vld [vmem:[%s20403_s20 + $0xdb] sm:$0xff]  ;;  %v14982_v41 = vld [vmem:[%s20403_s20 + $0xe4] sm:$0xff] }
 0x1e9   : > { %v11280_v61 = vadd.f32 %v17786_v63, %v21393_v14  ;;  %v17849_v62 = vpop.f32.mrf.mxu1  ;;  %v19647_v14 = vld [vmem:[%s23618_s1 + $0x7b0] sm:$0xff]   ;;  %v16963_v6 = vpack.c.bf16 %v14949_v43, %v14949_v43  ;;  %v16979_v63 = vpack.c.bf16 %v14981_v38, %v14981_v38  ;;  %v19660_v56 = vld [vmem:[%s23618_s1 + $0x748] sm:$0xff]   ;;  %v15013_v58 = vld [vmem:[%s20403_s20 + $0xdd] sm:$0xff]  ;;  %2985 = vst [vmem:[#allocation2 + $0xa5c] sm:$0xf] %v16996_v10 }
 0x1ea   : > { %v17850_v20 = vadd.f32 %v17849_v62, %v17848_v52  ;;  %v17788_v0 = vpop.f32.mrf.mxu0  ;;  %18314 = vmatpush3.bf16.msra.mxu1 %v19647_v14  ;;  %v16980_v52 = vpack.c.bf16 %v14982_v41, %v14982_v41  ;;  %v19646_v49 = vld [vmem:[#allocation2 + $0x80c] ss:$196 sps:$4 sm:$0xff]   ;;  %18259 = vmatprep.subr.bf16.mxu0 %v19660_v56  ;;  %v19665_v14 = vld [vmem:[%s23618_s1 + $0x7d8] sm:$0xff]   ;;  %v19672_v41 = vld [vmem:[%s23618_s1 + $0x740] sm:$0xff]  }
 0x1eb   : > { %v17789_v7 = vadd.f32 %v17788_v0, %v17787_v53  ;;  %v17851_v9 = vpop.f32.mrf.mxu1  ;;  %2792 = vst [vmem:[#allocation2 + $0x990] sm:$0xf] %v16963_v6  ;;  %3465 = vst [vmem:[#allocation2 + $0x824] sm:$0xf] %v16963_v6  ;;  %11856 = vmatprep.mubr.bf16.mxu0 %v19646_v49  ;;  %v19649_v31 = vld [vmem:[#allocation2 + $0x810] ss:$196 sps:$4 sm:$0xff]   ;;  %v16995_v0 = vpack.c.bf16 %v15013_v58, %v15013_v58 }
 0x1ec   : > { %v21587_v23 = vadd.f32 %v17850_v20, %v11280_v61  ;;  %v17790_v15 = vpop.f32.mrf.mxu0  ;;  %11946 = vmatmul.mubr.bf16.gmra.mxu1 %v19637_v16  ;;  %2888 = vst [vmem:[#allocation2 + $0x994] sm:$0xf] %v16979_v63  ;;  %2889 = vst [vmem:[#allocation2 + $0xa58] sm:$0xf] %v16980_v52  ;;  %v19651_v20 = vld [vmem:[#allocation2 + $0x814] ss:$196 sps:$4 sm:$0xff]  }
 0x1ed   : > { %v11285_v12 = vadd.f32 %v17789_v7, %v21408_v39  ;;  %v17852_v25 = vpop.f32.mrf.mxu1  ;;  %v19653_v39 = vld [vmem:[%s23618_s1 + $0x7e8] sm:$0xff]   ;;  %11953 = vmatprep.mubr.bf16.mxu1 %v19651_v20  ;;  %2984 = vst [vmem:[#allocation2 + $0x998] sm:$0xf] %v16995_v0  ;;  %v19663_v38 = vld [vmem:[#allocation2 + $0x99c] ss:$196 sps:$4 sm:$0xff]  }
 0x1ee   : > { %v17853_v21 = vadd.f32 %v17852_v25, %v17851_v9  ;;  %v17791_v24 = vpop.f32.mrf.mxu0  ;;  %18315 = vmatprep.subr.bf16.mxu1 %v19653_v39  ;;  %v19664_v7 = vld [vmem:[%s23618_s1 + $0x708] sm:$0xff]   ;;  %v16966_v39 = vpack.c.bf16 %v14952_v51, %v14952_v51  ;;  %v15015_v48 = vld [vmem:[%s20403_s20 + $0xf5] sm:$0xff]  ;;  %v15016_v63 = vld [vmem:[%s20403_s20 + $0xfd] sm:$0xff] }
 0x1ef   : > { %v17792_v35 = vadd.f32 %v17791_v24, %v17790_v15  ;;  %v17854_v28 = vpop.f32.mrf.mxu1  ;;  %18316 = vmatpush3.bf16.msra.mxu1 %v19654_v44  ;;  %v19644_v59 = vld [vmem:[#allocation2 + $0x808] ss:$196 sps:$4 sm:$0xff]   ;;  %18260 = vmatpush3.bf16.msra.mxu0 %v19664_v7  ;;  %v14951_v24 = vld [vmem:[%s20403_s20 + $0xf3] sm:$0xff]  ;;  %v16997_v49 = vpack.c.bf16 %v15015_v48, %v15015_v48  ;;  %v15048_v56 = vld [vmem:[%s20403_s20 + $0xfe] sm:$0xff] }
 0x1f0   : > { %v21601_v30 = vadd.f32 %v17853_v21, %v11285_v12  ;;  %v17793_v47 = vpop.f32.mrf.mxu0  ;;  %18317 = vmatprep.subr.bf16.mxu1 %v19655_v40  ;;  %11857 = vmatmul.mubr.bf16.gmra.mxu0 %v19644_v59  ;;  %v19667_v12 = vld [vmem:[%s23618_s1 + $0x7d0] sm:$0xff]   ;;  %2795 = vst [vmem:[#allocation2 + $0xbdc] sm:$0xf] %v16966_v39  ;;  %3468 = vst [vmem:[#allocation2 + $0xa70] sm:$0xf] %v16966_v39  ;;  %v17014_v60 = vpack.c.bf16 %v15048_v56, %v15048_v56  ;;  %v19678_v10 = vld [vmem:[%s23618_s1 + $0x788] sm:$0xff]  }
 0x1f1   : > { %v11288_v32 = vadd.f32 %v17792_v35, %v21420_v57  ;;  %v17855_v34 = vpop.f32.mrf.mxu1  ;;  %v19659_v57 = vld [vmem:[%s23618_s1 + $0x7a0] sm:$0xff]   ;;  %v14983_v44 = vld [vmem:[%s20403_s20 + $0xf4] sm:$0xff]  ;;  %18261 = vmatprep.subr.bf16.mxu0 %v19672_v41  ;;  %2986 = vst [vmem:[#allocation2 + $0xb20] sm:$0xf] %v16997_v49 }
 0x1f2   : > { %v17856_v37 = vadd.f32 %v17855_v34, %v17854_v28  ;;  %v17794_v53 = vpop.f32.mrf.mxu0  ;;  %v19656_v18 = vld [vmem:[#allocation2 + $0x990] ss:$196 sps:$4 sm:$0xff]   ;;  %v16965_v28 = vpack.c.bf16 %v14951_v24, %v14951_v24  ;;  %v16981_v34 = vpack.c.bf16 %v14983_v44, %v14983_v44  ;;  %3083 = vst [vmem:[#allocation2 + $0xbe8] sm:$0xf] %v17014_v60 }
 0x1f3   : > { %v17795_v2 = vadd.f32 %v17794_v53, %v17793_v47  ;;  %18318 = vmatpush3.bf16.msra.mxu1 %v19659_v57  ;;  %v19658_v21 = vld [vmem:[#allocation2 + $0x994] ss:$196 sps:$4 sm:$0xff]   ;;  %v16998_v53 = vpack.c.bf16 %v15016_v63, %v15016_v63 }
 0x1f4   : > { %v21617_v50 = vadd.f32 %v17856_v37, %v11288_v32  ;;  %v17796_v62 = vpop.f32.mrf.mxu0  ;;  %11954 = vmatmul.mubr.bf16.gmra.mxu1 %v19649_v31  ;;  %18319 = vmatprep.subr.bf16.mxu1 %v19665_v14  ;;  %v14984_v32 = vld [vmem:[%s20403_s20 + $0xfc] sm:$0xff]  ;;  %2794 = vst [vmem:[#allocation2 + $0xb18] sm:$0xf] %v16965_v28  ;;  %3467 = vst [vmem:[#allocation2 + $0x9ac] sm:$0xf] %v16965_v28  ;;  %v15068_v14 = vld [vmem:[%s20403_s20 + $0x68] sm:$0xff] }
 0x1f5   : > { %v11293_v4 = vadd.f32 %v17795_v2, %v21439_v19  ;;  %v19666_v19 = vld [vmem:[%s23618_s1 + $0x798] sm:$0xff]   ;;  %11864 = vmatprep.mubr.bf16.mxu0 %v19658_v21  ;;  %v16982_v40 = vpack.c.bf16 %v14984_v32, %v14984_v32  ;;  %2890 = vst [vmem:[#allocation2 + $0xb1c] sm:$0xf] %v16981_v34  ;;  %11961 = vmatprep.mubr.bf16.mxu1 %v19663_v38  ;;  %2987 = vst [vmem:[#allocation2 + $0xbe4] sm:$0xf] %v16998_v53  ;;  %v15100_v21 = vld [vmem:[%s20403_s20 + $0x69] sm:$0xff] }
 0x1f6   : > { %v17797_v26 = vpop.f32.mrf.mxu0  ;;  %v19661_v5 = vld [vmem:[#allocation2 + $0x998] ss:$196 sps:$4 sm:$0xff]   ;;  %v19683_v28 = vld [vmem:[%s23618_s1 + $0x780] sm:$0xff]  }
 0x1f7   : > { %v17857_v61 = vpop.f32.mrf.mxu1  ;;  %v17798_v29 = vadd.f32 %v17797_v26, %v17796_v62  ;;  %18320 = vmatpush3.bf16.msra.mxu1 %v19666_v19  ;;  %2891 = vst [vmem:[#allocation2 + $0xbe0] sm:$0xf] %v16982_v40  ;;  %v15047_v52 = vld [vmem:[%s20403_s20 + $0xf6] sm:$0xff]  ;;  %v15067_v26 = vld [vmem:[%s20403_s20 + $0x60] sm:$0xff] }
 0x1f8   : > { %18321 = vmatprep.subr.bf16.mxu1 %v19667_v12  ;;  %11865 = vmatmul.mubr.bf16.gmra.mxu0 %v19656_v18  ;;  %v17013_v2 = vpack.c.bf16 %v15047_v52, %v15047_v52  ;;  %v17016_v12 = vpack.c.bf16 %v15068_v14, %v15068_v14  ;;  %v19684_v32 = vld [vmem:[%s23618_s1 + $0x878] sm:$0xff]   ;;  %v15163_v52 = vld [vmem:[%s20403_s20 + $0x63] sm:$0xff] }
 0x1f9   : > { %v17858_v9 = vpop.f32.mrf.mxu1  ;;  %v11296_v16 = vadd.f32 %v17798_v29, %v21445_v22  ;;  %v17879_v35 = vpop.f32.mrf.mxu0  ;;  %v19671_v22 = vld [vmem:[%s23618_s1 + $0x790] sm:$0xff]   ;;  %v17063_v53 = vpack.c.bf16 %v15163_v52, %v15163_v52  ;;  %v15133_v14 = vld [vmem:[%s20403_s20 + $0x7a] sm:$0xff]  ;;  %v19700_v52 = vld [vmem:[%s23618_s1 + $0x868] sm:$0xff]  }
 0x1fa   : > { %v17859_v15 = vadd.f32 %v17858_v9, %v17857_v61  ;;  %v19676_v61 = vld [vmem:[%s23618_s1 + $0x700] sm:$0xff]   ;;  %3082 = vst [vmem:[#allocation2 + $0xb24] sm:$0xf] %v17013_v2  ;;  %3168 = vst [vmem:[#allocation2 + $0x134] sm:$0xf] %v17016_v12  ;;  %v15069_v2 = vld [vmem:[%s20403_s20 + $0x78] sm:$0xff] }
 0x1fb   : > { %v17860_v11 = vpop.f32.mrf.mxu1  ;;  %v17880_v37 = vpop.f32.mrf.mxu0  ;;  %18322 = vmatpush3.bf16.msra.mxu1 %v19671_v22  ;;  %18262 = vmatpush3.bf16.msra.mxu0 %v19676_v61  ;;  %v19679_v9 = vld [vmem:[%s23618_s1 + $0x7c0] sm:$0xff]   ;;  %v19668_v19 = vld [vmem:[#allocation2 + $0xb18] ss:$196 sps:$4 sm:$0xff]   ;;  %3455 = vst [vmem:[#allocation2 + $0x7c] sm:$0xf] %v17063_v53 }
 0x1fc   : > { %v21637_v25 = vadd.f32 %v17859_v15, %v11293_v4  ;;  %v17881_v6 = vadd.f32 %v17880_v37, %v17879_v35  ;;  %11962 = vmatmul.mubr.bf16.gmra.mxu1 %v19661_v5  ;;  %v17032_v35 = vpack.c.bf16 %v15100_v21, %v15100_v21  ;;  %v15131_v22 = vld [vmem:[%s20403_s20 + $0x62] sm:$0xff]  ;;  %v15132_v37 = vld [vmem:[%s20403_s20 + $0x6a] sm:$0xff]  ;;  %18375 = vmatprep.subr.bf16.mxu0 %v19684_v32 }
 0x1fd   : > { %v17861_v27 = vpop.f32.mrf.mxu1  ;;  %v17882_v47 = vpop.f32.mrf.mxu0  ;;  %v17047_v41 = vpack.c.bf16 %v15131_v22, %v15131_v22  ;;  %v15070_v61 = vld [vmem:[%s20403_s20 + $0x80] sm:$0xff]  ;;  %v19696_v22 = vld [vmem:[%s23618_s1 + $0x830] sm:$0xff]  }
 0x1fe   : > { %v17862_v36 = vadd.f32 %v17861_v27, %v17860_v11  ;;  %v11431_v57 = vadd.f32 %v17881_v6, %v21467_v3  ;;  %v19677_v3 = vld [vmem:[%s23618_s1 + $0x7c8] sm:$0xff]   ;;  %v17015_v11 = vpack.c.bf16 %v15067_v26, %v15067_v26  ;;  %3264 = vst [vmem:[#allocation2 + $0x138] sm:$0xf] %v17032_v35  ;;  %v19688_v26 = vld [vmem:[%s23618_s1 + $0x838] sm:$0xff]  }
 0x1ff   : > { %v17943_v59 = vpop.f32.mrf.mxu1  ;;  %v17883_v58 = vpop.f32.mrf.mxu0  ;;  %18323 = vmatprep.subr.bf16.mxu1 %v19677_v3  ;;  %v15099_v27 = vld [vmem:[%s20403_s20 + $0x61] sm:$0xff]  ;;  %3359 = vst [vmem:[#allocation2 + $0x78] sm:$0xf] %v17047_v41 }
 0x200   : > { %v21647_v43 = vadd.f32 %v17862_v36, %v11296_v16  ;;  %v17884_v31 = vadd.f32 %v17883_v58, %v17882_v47  ;;  %18324 = vmatpush3.bf16.msra.mxu1 %v19678_v10  ;;  %3167 = vst [vmem:[#allocation2 + $0x70] sm:$0xf] %v17015_v11  ;;  %v17031_v36 = vpack.c.bf16 %v15099_v27, %v15099_v27  ;;  %v15102_v3 = vld [vmem:[%s20403_s20 + $0x81] sm:$0xff] }
 0x201   : > { %v17944_v62 = vpop.f32.mrf.mxu1  ;;  %18325 = vmatprep.subr.bf16.mxu1 %v19679_v9  ;;  %v19675_v38 = vld [vmem:[#allocation2 + $0xb24] ss:$196 sps:$4 sm:$0xff]   ;;  %v17048_v47 = vpack.c.bf16 %v15132_v37, %v15132_v37  ;;  %v15072_v37 = vld [vmem:[%s20403_s20 + $0x98] sm:$0xff] }
 0x202   : > { %v17945_v20 = vadd.f32 %v17944_v62, %v17943_v59  ;;  %v17885_v0 = vpop.f32.mrf.mxu0  ;;  %v11434_v4 = vadd.f32 %v17884_v31, %v21482_v46  ;;  %v19670_v46 = vld [vmem:[#allocation2 + $0xb1c] ss:$196 sps:$4 sm:$0xff]   ;;  %3263 = vst [vmem:[#allocation2 + $0x74] sm:$0xf] %v17031_v36  ;;  %11969 = vmatprep.mubr.bf16.mxu1 %v19675_v38  ;;  %v17017_v62 = vpack.c.bf16 %v15069_v2, %v15069_v2  ;;  %v15135_v2 = vld [vmem:[%s20403_s20 + $0x92] sm:$0xff] }
 0x203   : > { %v17946_v7 = vpop.f32.mrf.mxu1  ;;  %11872 = vmatprep.mubr.bf16.mxu0 %v19670_v46  ;;  %3360 = vst [vmem:[#allocation2 + $0x13c] sm:$0xf] %v17048_v47  ;;  %v15101_v31 = vld [vmem:[%s20403_s20 + $0x79] sm:$0xff]  ;;  %v15166_v36 = vld [vmem:[%s20403_s20 + $0x83] sm:$0xff]  ;;  %v17020_v47 = vpack.c.bf16 %v15072_v37, %v15072_v37 }
 0x204   : > { %v21672_v15 = vadd.f32 %v17945_v20, %v11431_v57  ;;  %v17886_v29 = vpop.f32.mrf.mxu0  ;;  %11873 = vmatmul.mubr.bf16.gmra.mxu0 %v19668_v19  ;;  %18326 = vmatpush3.bf16.msra.mxu1 %v19683_v28  ;;  %v15164_v57 = vld [vmem:[%s20403_s20 + $0x6b] sm:$0xff]  ;;  %v17033_v10 = vpack.c.bf16 %v15101_v31, %v15101_v31  ;;  %3169 = vst [vmem:[#allocation2 + $0x1f8] sm:$0xf] %v17017_v62  ;;  %v15165_v19 = vld [vmem:[%s20403_s20 + $0x7b] sm:$0xff] }
 0x205   : > { %v17947_v16 = vpop.f32.mrf.mxu1  ;;  %v17887_v18 = vadd.f32 %v17886_v29, %v17885_v0  ;;  %v17064_v56 = vpack.c.bf16 %v15164_v57, %v15164_v57  ;;  %v17018_v0 = vpack.c.bf16 %v15070_v61, %v15070_v61  ;;  %v15134_v29 = vld [vmem:[%s20403_s20 + $0x82] sm:$0xff]  ;;  %v17065_v27 = vpack.c.bf16 %v15165_v19, %v15165_v19  ;;  %3172 = vst [vmem:[#allocation2 + $0x444] sm:$0xf] %v17020_v47  ;;  %v15137_v47 = vld [vmem:[%s20403_s20 + $0xaa] sm:$0xff] }
 0x206   : > { %v17948_v24 = vadd.f32 %v17947_v16, %v17946_v7  ;;  %v17888_v51 = vpop.f32.mrf.mxu0  ;;  %3265 = vst [vmem:[#allocation2 + $0x1fc] sm:$0xf] %v17033_v10  ;;  %v17050_v46 = vpack.c.bf16 %v15134_v29, %v15134_v29 }
 0x207   : > { %v11439_v39 = vadd.f32 %v17887_v18, %v21490_v55  ;;  %v17949_v44 = vpop.f32.mrf.mxu1  ;;  %v19673_v55 = vld [vmem:[#allocation2 + $0xb20] ss:$196 sps:$4 sm:$0xff]   ;;  %3456 = vst [vmem:[#allocation2 + $0x140] sm:$0xf] %v17064_v56  ;;  %v19680_v16 = vld [vmem:[#allocation2 + $0x70] ss:$196 sps:$4 sm:$0xff]   ;;  %v17049_v18 = vpack.c.bf16 %v15133_v14, %v15133_v14 }
 0x208   : > { %v21683_v34 = vadd.f32 %v17948_v24, %v11434_v4  ;;  %v17889_v40 = vpop.f32.mrf.mxu0  ;;  %11970 = vmatmul.mubr.bf16.gmra.mxu1 %v19673_v55  ;;  %v17034_v4 = vpack.c.bf16 %v15102_v3, %v15102_v3  ;;  %3170 = vst [vmem:[#allocation2 + $0x2bc] sm:$0xf] %v17018_v0  ;;  %3362 = vst [vmem:[#allocation2 + $0x2c4] sm:$0xf] %v17050_v46  ;;  %v15104_v55 = vld [vmem:[%s20403_s20 + $0x99] sm:$0xff]  ;;  %v17051_v3 = vpack.c.bf16 %v15135_v2, %v15135_v2 }
 0x209   : > { %v17950_v5 = vpop.f32.mrf.mxu1  ;;  %v17890_v6 = vadd.f32 %v17889_v40, %v17888_v51  ;;  %v19682_v51 = vld [vmem:[#allocation2 + $0x74] ss:$196 sps:$4 sm:$0xff]   ;;  %3361 = vst [vmem:[#allocation2 + $0x200] sm:$0xf] %v17049_v18  ;;  %3457 = vst [vmem:[#allocation2 + $0x204] sm:$0xf] %v17065_v27 }
 0x20a   : > { %v17951_v48 = vadd.f32 %v17950_v5, %v17949_v44  ;;  %v17891_v63 = vpop.f32.mrf.mxu0  ;;  %3266 = vst [vmem:[#allocation2 + $0x2c0] sm:$0xf] %v17034_v4  ;;  %v15071_v44 = vld [vmem:[%s20403_s20 + $0x90] sm:$0xff]  ;;  %12010 = vmatprep.mubr.bf16.mxu0 %v19682_v51  ;;  %3363 = vst [vmem:[#allocation2 + $0x388] sm:$0xf] %v17051_v3 }
 0x20b   : > { %v11442_v59 = vadd.f32 %v17890_v6, %v21501_v17  ;;  %v17952_v49 = vpop.f32.mrf.mxu1  ;;  %v17019_v5 = vpack.c.bf16 %v15071_v44, %v15071_v44  ;;  %v15103_v6 = vld [vmem:[%s20403_s20 + $0x91] sm:$0xff] }
 0x20c   : > { %v21691_v58 = vadd.f32 %v17951_v48, %v11439_v39  ;;  %v17892_v60 = vpop.f32.mrf.mxu0  ;;  %v17066_v39 = vpack.c.bf16 %v15166_v36, %v15166_v36  ;;  %12011 = vmatmul.mubr.bf16.vlgmr.msra.gmra.mxu0 %v19680_v16  ;;  %v17035_v48 = vpack.c.bf16 %v15103_v6, %v15103_v6  ;;  %v15167_v4 = vld [vmem:[%s20403_s20 + $0x93] sm:$0xff] }
 0x20d   : > { %v17953_v20 = vpop.f32.mrf.mxu1  ;;  %v17893_v17 = vadd.f32 %v17892_v60, %v17891_v63  ;;  %v17036_v63 = vpack.c.bf16 %v15104_v55, %v15104_v55  ;;  %18376 = vmatpush3.bf16.msra.mxu0 %v19688_v26  ;;  %3171 = vst [vmem:[#allocation2 + $0x380] sm:$0xf] %v17019_v5  ;;  %v15136_v60 = vld [vmem:[%s20403_s20 + $0x9a] sm:$0xff]  ;;  %v17067_v14 = vpack.c.bf16 %v15167_v4, %v15167_v4  ;;  %v15074_v16 = vld [vmem:[%s20403_s20 + $0xb0] sm:$0xff] }
 0x20e   : > { %v17954_v7 = vadd.f32 %v17953_v20, %v17952_v49  ;;  %v17894_v9 = vpop.f32.mrf.mxu0  ;;  %3458 = vst [vmem:[#allocation2 + $0x2c8] sm:$0xf] %v17066_v39  ;;  %v19685_v49 = vld [vmem:[#allocation2 + $0x78] ss:$196 sps:$4 sm:$0xff]   ;;  %3267 = vst [vmem:[#allocation2 + $0x384] sm:$0xf] %v17035_v48  ;;  %v17052_v20 = vpack.c.bf16 %v15136_v60, %v15136_v60  ;;  %v17022_v51 = vpack.c.bf16 %v15074_v16, %v15074_v16 }
 0x20f   : > { %v11447_v11 = vadd.f32 %v17893_v17, %v21514_v45  ;;  %v17955_v12 = vpop.f32.mrf.mxu1  ;;  %v19692_v45 = vld [vmem:[%s23618_s1 + $0x870] sm:$0xff]   ;;  %v19687_v56 = vld [vmem:[#allocation2 + $0x7c] ss:$196 sps:$4 sm:$0xff]   ;;  %3268 = vst [vmem:[#allocation2 + $0x448] sm:$0xf] %v17036_v63 }
 0x210   : > { %v21703_v21 = vadd.f32 %v17954_v7, %v11442_v59  ;;  %v17895_v24 = vpop.f32.mrf.mxu0  ;;  %18377 = vmatprep.subr.bf16.mxu0 %v19692_v45  ;;  %v19689_v31 = vld [vmem:[#allocation2 + $0x1f8] ss:$196 sps:$4 sm:$0xff]   ;;  %12107 = vmatprep.mubr.bf16.mxu1 %v19687_v56  ;;  %3364 = vst [vmem:[#allocation2 + $0x44c] sm:$0xf] %v17052_v20  ;;  %3459 = vst [vmem:[#allocation2 + $0x38c] sm:$0xf] %v17067_v14 }
 0x211   : > { %v17956_v35 = vpop.f32.mrf.mxu1  ;;  %v17896_v28 = vadd.f32 %v17895_v24, %v17894_v9  ;;  %v19691_v10 = vld [vmem:[#allocation2 + $0x1fc] ss:$196 sps:$4 sm:$0xff]   ;;  %12108 = vmatmul.mubr.bf16.vlgmr.msra.gmra.mxu1 %v19685_v49  ;;  %18378 = vmatpush3.bf16.msra.mxu0 %v19696_v22  ;;  %v15106_v45 = vld [vmem:[%s20403_s20 + $0xb1] sm:$0xff]  ;;  %3174 = vst [vmem:[#allocation2 + $0x5cc] sm:$0xf] %v17022_v51  ;;  %v17053_v49 = vpack.c.bf16 %v15137_v47, %v15137_v47 }
 0x212   : > { %v17957_v32 = vadd.f32 %v17956_v35, %v17955_v12  ;;  %v17897_v40 = vpop.f32.mrf.mxu0  ;;  %v15168_v7 = vld [vmem:[%s20403_s20 + $0x9b] sm:$0xff]  ;;  %12018 = vmatprep.mubr.bf16.mxu0 %v19691_v10  ;;  %18379 = vmatprep.subr.bf16.mxu0 %v19700_v52  ;;  %v15073_v12 = vld [vmem:[%s20403_s20 + $0xa8] sm:$0xff]  ;;  %v17038_v22 = vpack.c.bf16 %v15106_v45, %v15106_v45  ;;  %v15138_v48 = vld [vmem:[%s20403_s20 + $0xb2] sm:$0xff] }
 0x213   : > { %v11450_v38 = vadd.f32 %v17896_v28, %v21524_v8  ;;  %v17958_v41 = vpop.f32.mrf.mxu1  ;;  %v17068_v29 = vpack.c.bf16 %v15168_v7, %v15168_v7  ;;  %v17021_v24 = vpack.c.bf16 %v15073_v12, %v15073_v12  ;;  %v15105_v28 = vld [vmem:[%s20403_s20 + $0xa9] sm:$0xff]  ;;  %v19708_v55 = vld [vmem:[%s23618_s1 + $0x860] sm:$0xff]   ;;  %3365 = vst [vmem:[#allocation2 + $0x510] sm:$0xf] %v17053_v49  ;;  %v19716_v16 = vld [vmem:[%s23618_s1 + $0x858] sm:$0xff]  }
 0x214   : > { %v21720_v57 = vadd.f32 %v17957_v32, %v11447_v11  ;;  %v17898_v59 = vpop.f32.mrf.mxu0  ;;  %12019 = vmatmul.mubr.bf16.gmra.mxu0 %v19689_v31  ;;  %v19693_v32 = vld [vmem:[#allocation2 + $0x200] ss:$196 sps:$4 sm:$0xff]   ;;  %3270 = vst [vmem:[#allocation2 + $0x5d0] sm:$0xf] %v17038_v22  ;;  %v15169_v63 = vld [vmem:[%s20403_s20 + $0xab] sm:$0xff]  ;;  %v19722_v47 = vld [vmem:[%s23618_s1 + $0x8b8] sm:$0xff]  }
 0x215   : > { %v17959_v53 = vpop.f32.mrf.mxu1  ;;  %v17899_v8 = vadd.f32 %v17898_v59, %v17897_v40  ;;  %v19695_v27 = vld [vmem:[#allocation2 + $0x204] ss:$196 sps:$4 sm:$0xff]   ;;  %3460 = vst [vmem:[#allocation2 + $0x450] sm:$0xf] %v17068_v29  ;;  %3173 = vst [vmem:[#allocation2 + $0x508] sm:$0xf] %v17021_v24  ;;  %v17037_v40 = vpack.c.bf16 %v15105_v28, %v15105_v28  ;;  %v17069_v56 = vpack.c.bf16 %v15169_v63, %v15169_v63 }
 0x216   : > { %v17960_v61 = vadd.f32 %v17959_v53, %v17958_v41  ;;  %v17900_v62 = vpop.f32.mrf.mxu0  ;;  %12115 = vmatprep.mubr.bf16.mxu1 %v19695_v27  ;;  %v19699_v6 = vld [vmem:[#allocation2 + $0x384] ss:$196 sps:$4 sm:$0xff]   ;;  %v17054_v53 = vpack.c.bf16 %v15138_v48, %v15138_v48 }
 0x217   : > { %v11455_v17 = vadd.f32 %v17899_v8, %v21534_v33  ;;  %v17961_v0 = vpop.f32.mrf.mxu1  ;;  %v19704_v33 = vld [vmem:[%s23618_s1 + $0x828] sm:$0xff]   ;;  %3269 = vst [vmem:[#allocation2 + $0x50c] sm:$0xf] %v17037_v40  ;;  %12026 = vmatprep.mubr.bf16.mxu0 %v19699_v6  ;;  %v15170_v8 = vld [vmem:[%s20403_s20 + $0xb3] sm:$0xff]  ;;  %3461 = vst [vmem:[#allocation2 + $0x514] sm:$0xf] %v17069_v56 }
 0x218   : > { %v21727_v9 = vadd.f32 %v17960_v61, %v11450_v38  ;;  %v17901_v26 = vpop.f32.mrf.mxu0  ;;  %18380 = vmatpush3.bf16.msra.mxu0 %v19704_v33  ;;  %v17070_v60 = vpack.c.bf16 %v15170_v8, %v15170_v8  ;;  %v19712_v61 = vld [vmem:[%s23618_s1 + $0x820] sm:$0xff]   ;;  %v15076_v31 = vld [vmem:[%s20403_s20 + $0xc8] sm:$0xff]  ;;  %3366 = vst [vmem:[#allocation2 + $0x5d4] sm:$0xf] %v17054_v53  ;;  %v19720_v40 = vld [vmem:[%s23618_s1 + $0x818] sm:$0xff]  }
 0x219   : > { %v17962_v19 = vpop.f32.mrf.mxu1  ;;  %v17902_v11 = vadd.f32 %v17901_v26, %v17900_v62  ;;  %18381 = vmatprep.subr.bf16.mxu0 %v19708_v55  ;;  %12116 = vmatmul.mubr.bf16.gmra.mxu1 %v19693_v32  ;;  %v15075_v62 = vld [vmem:[%s20403_s20 + $0xc0] sm:$0xff]  ;;  %v19701_v7 = vld [vmem:[#allocation2 + $0x388] ss:$196 sps:$4 sm:$0xff]  }
 0x21a   : > { %v17963_v18 = vadd.f32 %v17962_v19, %v17961_v0  ;;  %v17903_v46 = vpop.f32.mrf.mxu0  ;;  %v17024_v0 = vpack.c.bf16 %v15076_v31, %v15076_v31  ;;  %3462 = vst [vmem:[#allocation2 + $0x5d8] sm:$0xf] %v17070_v60  ;;  %v15107_v14 = vld [vmem:[%s20403_s20 + $0xc1] sm:$0xff]  ;;  %v15108_v29 = vld [vmem:[%s20403_s20 + $0xc9] sm:$0xff] }
 0x21b   : > { %v11458_v36 = vadd.f32 %v17902_v11, %v21547_v54  ;;  %v17964_v35 = vpop.f32.mrf.mxu1  ;;  %v19697_v54 = vld [vmem:[#allocation2 + $0x380] ss:$196 sps:$4 sm:$0xff]   ;;  %v17039_v33 = vpack.c.bf16 %v15107_v14, %v15107_v14  ;;  %v17040_v12 = vpack.c.bf16 %v15108_v29, %v15108_v29  ;;  %v15140_v24 = vld [vmem:[%s20403_s20 + $0xca] sm:$0xff] }
 0x21c   : > { %v21737_v39 = vadd.f32 %v17963_v18, %v11455_v17  ;;  %v17904_v44 = vpop.f32.mrf.mxu0  ;;  %v17023_v17 = vpack.c.bf16 %v15075_v62, %v15075_v62  ;;  %v19703_v26 = vld [vmem:[#allocation2 + $0x38c] ss:$196 sps:$4 sm:$0xff]   ;;  %18382 = vmatpush3.bf16.msra.mxu0 %v19712_v61  ;;  %3176 = vst [vmem:[#allocation2 + $0x754] sm:$0xf] %v17024_v0  ;;  %v15139_v27 = vld [vmem:[%s20403_s20 + $0xc2] sm:$0xff]  ;;  %v17056_v28 = vpack.c.bf16 %v15140_v24, %v15140_v24  ;;  %v15109_v62 = vld [vmem:[%s20403_s20 + $0xd9] sm:$0xff] }
 0x21d   : > { %v17965_v37 = vpop.f32.mrf.mxu1  ;;  %v17905_v5 = vadd.f32 %v17904_v44, %v17903_v46  ;;  %12027 = vmatmul.mubr.bf16.gmra.mxu0 %v19697_v54  ;;  %12123 = vmatprep.mubr.bf16.mxu1 %v19703_v26  ;;  %3271 = vst [vmem:[#allocation2 + $0x694] sm:$0xf] %v17039_v33  ;;  %3272 = vst [vmem:[#allocation2 + $0x758] sm:$0xf] %v17040_v12  ;;  %v15078_v49 = vld [vmem:[%s20403_s20 + $0xe0] sm:$0xff]  ;;  %v17041_v0 = vpack.c.bf16 %v15109_v62, %v15109_v62  ;;  %v19728_v33 = vld [vmem:[%s23618_s1 + $0x850] sm:$0xff]  }
 0x21e   : > { %v17966_v38 = vadd.f32 %v17965_v37, %v17964_v35  ;;  %v17906_v41 = vpop.f32.mrf.mxu0  ;;  %3175 = vst [vmem:[#allocation2 + $0x690] sm:$0xf] %v17023_v17  ;;  %v19705_v35 = vld [vmem:[#allocation2 + $0x508] ss:$196 sps:$4 sm:$0xff]   ;;  %18383 = vmatprep.subr.bf16.mxu0 %v19716_v16  ;;  %3368 = vst [vmem:[#allocation2 + $0x75c] sm:$0xf] %v17056_v28  ;;  %v17026_v60 = vpack.c.bf16 %v15078_v49, %v15078_v49 }
 0x21f   : > { %v11463_v52 = vadd.f32 %v17905_v5, %v21559_v13  ;;  %v17967_v59 = vpop.f32.mrf.mxu1  ;;  %v19707_v32 = vld [vmem:[#allocation2 + $0x50c] ss:$196 sps:$4 sm:$0xff]   ;;  %v19721_v5 = vld [vmem:[%s23618_s1 + $0x8f8] sm:$0xff]   ;;  %v15110_v31 = vld [vmem:[%s20403_s20 + $0xe1] sm:$0xff]  ;;  %3273 = vst [vmem:[#allocation2 + $0x81c] sm:$0xf] %v17041_v0 }
 0x220   : > { %v17907_v2 = vpop.f32.mrf.mxu0  ;;  %v21752_v3 = vadd.f32 %v17966_v38, %v11458_v36  ;;  %12034 = vmatprep.mubr.bf16.mxu0 %v19707_v32  ;;  %18384 = vmatpush3.bf16.msra.mxu0 %v19720_v40  ;;  %v19709_v56 = vld [vmem:[#allocation2 + $0x510] ss:$196 sps:$4 sm:$0xff]   ;;  %3178 = vst [vmem:[#allocation2 + $0x8dc] sm:$0xf] %v17026_v60  ;;  %3851 = vst [vmem:[#allocation2 + $0x770] sm:$0xf] %v17026_v60 }
 0x221   : > { %v17968_v13 = vpop.f32.mrf.mxu1  ;;  %v17908_v20 = vadd.f32 %v17907_v2, %v17906_v41  ;;  %12124 = vmatmul.mubr.bf16.gmra.mxu1 %v19701_v7  ;;  %v19711_v41 = vld [vmem:[#allocation2 + $0x514] ss:$196 sps:$4 sm:$0xff]   ;;  %18439 = vmatprep.subr.bf16.mxu1 %v19721_v5  ;;  %v19719_v7 = vld [vmem:[#allocation2 + $0x69c] ss:$196 sps:$4 sm:$0xff]   ;;  %v19733_v28 = vld [vmem:[%s23618_s1 + $0x8e8] sm:$0xff]  }
 0x222   : > { %v17969_v10 = vadd.f32 %v17968_v13, %v17967_v59  ;;  %v17909_v4 = vpop.f32.mrf.mxu0  ;;  %12131 = vmatprep.mubr.bf16.mxu1 %v19711_v41  ;;  %v15077_v59 = vld [vmem:[%s20403_s20 + $0xd8] sm:$0xff]  ;;  %18440 = vmatpush3.bf16.msra.mxu1 %v19722_v47  ;;  %v15142_v16 = vld [vmem:[%s20403_s20 + $0xe2] sm:$0xff]  ;;  %v15079_v5 = vld [vmem:[%s20403_s20 + $0xf0] sm:$0xff] }
 0x223   : > { %v11466_v19 = vadd.f32 %v17908_v20, %v21568_v42  ;;  %v17970_v11 = vpop.f32.mrf.mxu1  ;;  %v17055_v42 = vpack.c.bf16 %v15139_v27, %v15139_v27  ;;  %v17025_v2 = vpack.c.bf16 %v15077_v59, %v15077_v59  ;;  %v15141_v12 = vld [vmem:[%s20403_s20 + $0xda] sm:$0xff]  ;;  %18385 = vmatprep.subr.bf16.mxu0 %v19728_v33  ;;  %v17027_v47 = vpack.c.bf16 %v15079_v5, %v15079_v5  ;;  %v19740_v60 = vld [vmem:[%s23618_s1 + $0x848] sm:$0xff]  }
 0x224   : > { %v21760_v18 = vadd.f32 %v17969_v10, %v11463_v52  ;;  %v17910_v46 = vpop.f32.mrf.mxu0  ;;  %v19723_v52 = vld [vmem:[%s23618_s1 + $0x8f0] sm:$0xff]   ;;  %v17042_v10 = vpack.c.bf16 %v15110_v31, %v15110_v31  ;;  %v15144_v0 = vld [vmem:[%s20403_s20 + $0xfa] sm:$0xff] }
 0x225   : > { %v17971_v51 = vpop.f32.mrf.mxu1  ;;  %v17911_v36 = vadd.f32 %v17910_v46, %v17909_v4  ;;  %3367 = vst [vmem:[#allocation2 + $0x698] sm:$0xf] %v17055_v42  ;;  %12035 = vmatmul.mubr.bf16.gmra.mxu0 %v19705_v35  ;;  %18441 = vmatprep.subr.bf16.mxu1 %v19723_v52  ;;  %v19713_v17 = vld [vmem:[#allocation2 + $0x690] ss:$196 sps:$4 sm:$0xff]   ;;  %3177 = vst [vmem:[#allocation2 + $0x818] sm:$0xf] %v17025_v2 }
 0x226   : > { %v17972_v45 = vadd.f32 %v17971_v51, %v17970_v11  ;;  %v17912_v44 = vpop.f32.mrf.mxu0  ;;  %3850 = vst [vmem:[#allocation2 + $0x6ac] sm:$0xf] %v17025_v2  ;;  %3274 = vst [vmem:[#allocation2 + $0x8e0] sm:$0xf] %v17042_v10  ;;  %v17057_v51 = vpack.c.bf16 %v15141_v12, %v15141_v12  ;;  %v19732_v35 = vld [vmem:[%s23618_s1 + $0x810] sm:$0xff]   ;;  %v15112_v52 = vld [vmem:[%s20403_s20 + $0xf9] sm:$0xff] }
 0x227   : > { %v11471_v22 = vadd.f32 %v17911_v36, %v21580_v1  ;;  %v17973_v37 = vpop.f32.mrf.mxu1  ;;  %v17058_v36 = vpack.c.bf16 %v15142_v16, %v15142_v16  ;;  %18386 = vmatpush3.bf16.msra.mxu0 %v19732_v35  ;;  %3179 = vst [vmem:[#allocation2 + $0x9a0] sm:$0xf] %v17027_v47  ;;  %3852 = vst [vmem:[#allocation2 + $0x834] sm:$0xf] %v17027_v47  ;;  %v19747_v16 = vld [vmem:[%s23618_s1 + $0x8d0] sm:$0xff]  }
 0x228   : > { %v21771_v54 = vadd.f32 %v17972_v45, %v11466_v19  ;;  %v17913_v6 = vpop.f32.mrf.mxu0  ;;  %v19727_v19 = vld [vmem:[%s23618_s1 + $0x8b0] sm:$0xff]   ;;  %3369 = vst [vmem:[#allocation2 + $0x820] sm:$0xf] %v17057_v51  ;;  %18387 = vmatprep.subr.bf16.mxu0 %v19740_v60 }
 0x229   : > { %v17974_v55 = vpop.f32.mrf.mxu1  ;;  %v17914_v38 = vadd.f32 %v17913_v6, %v17912_v44  ;;  %12132 = vmatmul.mubr.bf16.gmra.mxu1 %v19709_v56  ;;  %3370 = vst [vmem:[#allocation2 + $0x8e4] sm:$0xf] %v17058_v36  ;;  %v19734_v44 = vld [vmem:[%s23618_s1 + $0x8a8] sm:$0xff]   ;;  %v15080_v6 = vld [vmem:[%s20403_s20 + $0xf8] sm:$0xff]  ;;  %v19739_v56 = vld [vmem:[%s23618_s1 + $0x8a0] sm:$0xff]  }
 0x22a   : > { %v17975_v1 = vadd.f32 %v17974_v55, %v17973_v37  ;;  %v17915_v8 = vpop.f32.mrf.mxu0  ;;  %12139 = vmatprep.mubr.bf16.mxu1 %v19719_v7  ;;  %18442 = vmatpush3.bf16.msra.mxu1 %v19727_v19  ;;  %v15111_v55 = vld [vmem:[%s20403_s20 + $0xf1] sm:$0xff]  ;;  %v19744_v7 = vld [vmem:[%s23618_s1 + $0x808] sm:$0xff]  }
 0x22b   : > { %v11474_v48 = vadd.f32 %v17914_v38, %v21587_v23  ;;  %v17976_v63 = vpop.f32.mrf.mxu1  ;;  %v19715_v23 = vld [vmem:[#allocation2 + $0x694] ss:$196 sps:$4 sm:$0xff]   ;;  %18443 = vmatprep.subr.bf16.mxu1 %v19733_v28  ;;  %18388 = vmatpush3.bf16.msra.mxu0 %v19744_v7  ;;  %v15113_v51 = vld [vmem:[%s20403_s20 + $0x109] sm:$0xff] }
 0x22c   : > { %v21782_v53 = vadd.f32 %v17975_v1, %v11471_v22  ;;  %v17916_v20 = vpop.f32.mrf.mxu0  ;;  %12042 = vmatprep.mubr.bf16.mxu0 %v19715_v23  ;;  %v19717_v24 = vld [vmem:[#allocation2 + $0x698] ss:$196 sps:$4 sm:$0xff]   ;;  %v19735_v22 = vld [vmem:[%s23618_s1 + $0x8e0] sm:$0xff]   ;;  %v17045_v28 = vpack.c.bf16 %v15113_v51, %v15113_v51  ;;  %v19743_v47 = vld [vmem:[#allocation2 + $0x9ac] ss:$196 sps:$4 sm:$0xff]  }
 0x22d   : > { %v17977_v61 = vpop.f32.mrf.mxu1  ;;  %v17917_v4 = vadd.f32 %v17916_v20, %v17915_v8  ;;  %12043 = vmatmul.mubr.bf16.gmra.mxu0 %v19713_v17  ;;  %v19724_v1 = vld [vmem:[#allocation2 + $0x818] ss:$196 sps:$4 sm:$0xff]   ;;  %v17044_v8 = vpack.c.bf16 %v15112_v52, %v15112_v52  ;;  %v19731_v17 = vld [vmem:[#allocation2 + $0x824] ss:$196 sps:$4 sm:$0xff]  }
 0x22e   : > { %v17978_v13 = vadd.f32 %v17977_v61, %v17976_v63  ;;  %v17918_v29 = vpop.f32.mrf.mxu0  ;;  %18444 = vmatpush3.bf16.msra.mxu1 %v19734_v44  ;;  %v17043_v63 = vpack.c.bf16 %v15111_v55, %v15111_v55  ;;  %v15143_v61 = vld [vmem:[%s20403_s20 + $0xf2] sm:$0xff]  ;;  %3277 = vst [vmem:[#allocation2 + $0xb2c] sm:$0xf] %v17045_v28  ;;  %v19752_v55 = vld [vmem:[%s23618_s1 + $0x840] sm:$0xff]  }
 0x22f   : > { %v17979_v14 = vpop.f32.mrf.mxu1  ;;  %v11479_v11 = vadd.f32 %v17917_v4, %v21601_v30  ;;  %18445 = vmatprep.subr.bf16.mxu1 %v19735_v22  ;;  %3276 = vst [vmem:[#allocation2 + $0xa68] sm:$0xf] %v17044_v8  ;;  %v17059_v31 = vpack.c.bf16 %v15143_v61, %v15143_v61  ;;  %v17060_v4 = vpack.c.bf16 %v15144_v0, %v15144_v0  ;;  %v15146_v52 = vld [vmem:[%s20403_s20 + $0x112] sm:$0xff]  ;;  %v19763_v28 = vld [vmem:[%s23618_s1 + $0x880] sm:$0xff]  }
 0x230   : > { %v21786_v26 = vadd.f32 %v17978_v13, %v11474_v48  ;;  %v17919_v27 = vpop.f32.mrf.mxu0  ;;  %v17028_v48 = vpack.c.bf16 %v15080_v6, %v15080_v6  ;;  %3275 = vst [vmem:[#allocation2 + $0x9a4] sm:$0xf] %v17043_v63  ;;  %v19729_v62 = vld [vmem:[#allocation2 + $0x820] ss:$196 sps:$4 sm:$0xff]   ;;  %18389 = vmatprep.subr.bf16.mxu0 %v19752_v55  ;;  %v15178_v8 = vld [vmem:[%s20403_s20 + $0x113] sm:$0xff] }
 0x231   : > { %v17980_v46 = vpop.f32.mrf.mxu1  ;;  %v17920_v30 = vadd.f32 %v17919_v27, %v17918_v29  ;;  %12140 = vmatmul.mubr.bf16.gmra.mxu1 %v19717_v24  ;;  %3371 = vst [vmem:[#allocation2 + $0x9a8] sm:$0xf] %v17059_v31  ;;  %3372 = vst [vmem:[#allocation2 + $0xa6c] sm:$0xf] %v17060_v4  ;;  %v15081_v27 = vld [vmem:[%s20403_s20 + $0x108] sm:$0xff]  ;;  %v15082_v24 = vld [vmem:[%s20403_s20 + $0x110] sm:$0xff]  ;;  %v17078_v61 = vpack.c.bf16 %v15178_v8, %v15178_v8 }
 0x232   : > { %v17981_v42 = vadd.f32 %v17980_v46, %v17979_v14  ;;  %3180 = vst [vmem:[#allocation2 + $0xa64] sm:$0xf] %v17028_v48  ;;  %3853 = vst [vmem:[#allocation2 + $0x8f8] sm:$0xf] %v17028_v48  ;;  %18446 = vmatpush3.bf16.msra.mxu1 %v19739_v56  ;;  %12147 = vmatprep.mubr.bf16.mxu1 %v19731_v17  ;;  %v19758_v17 = vld [vmem:[%s23618_s1 + $0x888] sm:$0xff]  }
 0x233   : > { %v17982_v45 = vpop.f32.mrf.mxu1  ;;  %v11482_v40 = vadd.f32 %v17920_v30, %v21617_v50  ;;  %v19726_v50 = vld [vmem:[#allocation2 + $0x81c] ss:$196 sps:$4 sm:$0xff]   ;;  %v17029_v30 = vpack.c.bf16 %v15081_v27, %v15081_v27  ;;  %3470 = vst [vmem:[#allocation2 + $0xbf8] sm:$0xf] %v17078_v61 }
 0x234   : > { %v21806_v32 = vadd.f32 %v17981_v42, %v11479_v11  ;;  %12050 = vmatprep.mubr.bf16.mxu0 %v19726_v50  ;;  %v19746_v11 = vld [vmem:[%s23618_s1 + $0x898] sm:$0xff]  }
 0x235   : > { %v17983_v37 = vpop.f32.mrf.mxu1  ;;  %12051 = vmatmul.mubr.bf16.gmra.mxu0 %v19724_v1  ;;  %3181 = vst [vmem:[#allocation2 + $0xb28] sm:$0xf] %v17029_v30  ;;  %3854 = vst [vmem:[#allocation2 + $0x9bc] sm:$0xf] %v17029_v30  ;;  %v15197_v61 = vld [vmem:[%s20403_s20 + $0x7c] sm:$0xff] }
 0x236   : > { %v17984_v41 = vadd.f32 %v17983_v37, %v17982_v45  ;;  %v19751_v37 = vld [vmem:[%s23618_s1 + $0x890] sm:$0xff]  }
 0x237   : > { %v17921_v38 = vpop.f32.mrf.mxu0  ;;  %v17985_v20 = vpop.f32.mrf.mxu1  ;;  %v19738_v42 = vld [vmem:[#allocation2 + $0x9a4] ss:$196 sps:$4 sm:$0xff]  }
 0x238   : > { %v21816_v59 = vadd.f32 %v17984_v41, %v11482_v40  ;;  %v15114_v40 = vld [vmem:[%s20403_s20 + $0x111] sm:$0xff]  ;;  %12058 = vmatprep.mubr.bf16.mxu0 %v19738_v42  ;;  %v19741_v1 = vld [vmem:[#allocation2 + $0x9a8] ss:$196 sps:$4 sm:$0xff]  }
 0x239   : > { %v17922_v49 = vpop.f32.mrf.mxu0  ;;  %v17986_v14 = vpop.f32.mrf.mxu1  ;;  %12148 = vmatmul.mubr.bf16.gmra.mxu1 %v19729_v62  ;;  %v19736_v35 = vld [vmem:[#allocation2 + $0x9a0] ss:$196 sps:$4 sm:$0xff]   ;;  %v17046_v22 = vpack.c.bf16 %v15114_v40, %v15114_v40  ;;  %v19764_v40 = vld [vmem:[%s23618_s1 + $0x978] sm:$0xff]  }
 0x23a   : > { %v17923_v2 = vadd.f32 %v17922_v49, %v17921_v38  ;;  %v17987_v19 = vadd.f32 %v17986_v14, %v17985_v20  ;;  %v15145_v38 = vld [vmem:[%s20403_s20 + $0x10a] sm:$0xff]  ;;  %12155 = vmatprep.mubr.bf16.mxu1 %v19743_v47  ;;  %v19759_v14 = vld [vmem:[%s23618_s1 + $0x8c0] sm:$0xff]  }
 0x23b   : > { %v17924_v23 = vpop.f32.mrf.mxu0  ;;  %v17988_v12 = vpop.f32.mrf.mxu1  ;;  %3278 = vst [vmem:[#allocation2 + $0xbf0] sm:$0xf] %v17046_v22  ;;  %v17061_v48 = vpack.c.bf16 %v15145_v38, %v15145_v38  ;;  %v15177_v49 = vld [vmem:[%s20403_s20 + $0x10b] sm:$0xff] }
 0x23c   : > { %v11487_v13 = vadd.f32 %v17923_v2, %v21637_v25  ;;  %v19745_v25 = vld [vmem:[%s23618_s1 + $0x8d8] sm:$0xff]   ;;  %v17062_v2 = vpack.c.bf16 %v15146_v52, %v15146_v52  ;;  %v17077_v60 = vpack.c.bf16 %v15177_v49, %v15177_v49  ;;  %v15259_v22 = vld [vmem:[%s20403_s20 + $0x66] sm:$0xff]  ;;  %v15260_v47 = vld [vmem:[%s20403_s20 + $0x6e] sm:$0xff] }
 0x23d   : > { %v17925_v10 = vpop.f32.mrf.mxu0  ;;  %18447 = vmatprep.subr.bf16.mxu1 %v19745_v25  ;;  %v17989_v36 = vpop.f32.mrf.mxu1  ;;  %12059 = vmatmul.mubr.bf16.gmra.mxu0 %v19736_v35  ;;  %3373 = vst [vmem:[#allocation2 + $0xb30] sm:$0xf] %v17061_v48  ;;  %v15196_v25 = vld [vmem:[%s20403_s20 + $0x6c] sm:$0xff]  ;;  %v17111_v38 = vpack.c.bf16 %v15259_v22, %v15259_v22  ;;  %v15293_v48 = vld [vmem:[%s20403_s20 + $0x78] sm:$0xff]  ;;  %v17112_v52 = vpack.c.bf16 %v15260_v47, %v15260_v47  ;;  %v15294_v49 = vld [vmem:[%s20403_s20 + $0x80] sm:$0xff] }
 0x23e   : > { %v17926_v29 = vadd.f32 %v17925_v10, %v17924_v23  ;;  %v21840_v46 = vadd.f32 %v17987_v19, %v11487_v13  ;;  %18448 = vmatpush3.bf16.msra.mxu1 %v19746_v11  ;;  %v17990_v45 = vadd.f32 %v17989_v36, %v17988_v12  ;;  %v19756_v23 = vld [vmem:[%s23618_s1 + $0x800] sm:$0xff]   ;;  %v19757_v13 = vld [vmem:[%s23618_s1 + $0x8c8] sm:$0xff]   ;;  %3374 = vst [vmem:[#allocation2 + $0xbf4] sm:$0xf] %v17062_v2  ;;  %3469 = vst [vmem:[#allocation2 + $0xb34] sm:$0xf] %v17077_v60 }
 0x23f   : > { %18449 = vmatprep.subr.bf16.mxu1 %v19747_v16  ;;  %v18007_v44 = vpop.f32.mrf.mxu0  ;;  %18390 = vmatpush3.bf16.msra.mxu0 %v19756_v23  ;;  %v17080_v27 = vpack.c.bf16 %v15196_v25, %v15196_v25  ;;  %v15227_v36 = vld [vmem:[%s20403_s20 + $0x65] sm:$0xff]  ;;  %v15228_v35 = vld [vmem:[%s20403_s20 + $0x6d] sm:$0xff]  ;;  %3743 = vst [vmem:[#allocation2 + $0x88] sm:$0xf] %v17111_v38  ;;  %v17127_v8 = vpack.c.bf16 %v15293_v48, %v15293_v48  ;;  %3744 = vst [vmem:[#allocation2 + $0x14c] sm:$0xf] %v17112_v52 }
 0x240   : > { %v11490_v33 = vadd.f32 %v17926_v29, %v21647_v43  ;;  %v17030_v43 = vpack.c.bf16 %v15082_v24, %v15082_v24  ;;  %v15195_v29 = vld [vmem:[%s20403_s20 + $0x64] sm:$0xff]  ;;  %v17095_v30 = vpack.c.bf16 %v15227_v36, %v15227_v36  ;;  %18503 = vmatprep.subr.bf16.mxu0 %v19764_v40  ;;  %v17128_v60 = vpack.c.bf16 %v15294_v49, %v15294_v49  ;;  %v15199_v40 = vld [vmem:[%s20403_s20 + $0x94] sm:$0xff]  ;;  %v15200_v22 = vld [vmem:[%s20403_s20 + $0x9c] sm:$0xff] }
 0x241   : > { %v18008_v6 = vpop.f32.mrf.mxu0  ;;  %12156 = vmatmul.mubr.bf16.gmra.mxu1 %v19741_v1  ;;  %v17079_v16 = vpack.c.bf16 %v15195_v29, %v15195_v29  ;;  %3552 = vst [vmem:[#allocation2 + $0x144] sm:$0xf] %v17080_v27  ;;  %v15198_v23 = vld [vmem:[%s20403_s20 + $0x84] sm:$0xff]  ;;  %3842 = vst [vmem:[#allocation2 + $0x8c] sm:$0xf] %v17127_v8  ;;  %v17083_v38 = vpack.c.bf16 %v15199_v40, %v15199_v40 }
 0x242   : > { %3182 = vst [vmem:[#allocation2 + $0xbec] sm:$0xf] %v17030_v43  ;;  %v21849_v5 = vadd.f32 %v17990_v45, %v11490_v33  ;;  %3855 = vst [vmem:[#allocation2 + $0xa80] sm:$0xf] %v17030_v43  ;;  %v18009_v41 = vadd.f32 %v18008_v6, %v18007_v44  ;;  %18450 = vmatpush3.bf16.msra.mxu1 %v19751_v37  ;;  %v19750_v12 = vld [vmem:[#allocation2 + $0xb2c] ss:$196 sps:$4 sm:$0xff]   ;;  %v17096_v43 = vpack.c.bf16 %v15228_v35, %v15228_v35 }
 0x243   : > { %v18010_v50 = vpop.f32.mrf.mxu0  ;;  %18451 = vmatprep.subr.bf16.mxu1 %v19757_v13  ;;  %12066 = vmatprep.mubr.bf16.mxu0 %v19750_v12  ;;  %3551 = vst [vmem:[#allocation2 + $0x80] sm:$0xf] %v17079_v16  ;;  %3647 = vst [vmem:[#allocation2 + $0x84] sm:$0xf] %v17095_v30  ;;  %v17081_v13 = vpack.c.bf16 %v15197_v61, %v15197_v61  ;;  %v15295_v12 = vld [vmem:[%s20403_s20 + $0x90] sm:$0xff]  ;;  %v15296_v16 = vld [vmem:[%s20403_s20 + $0x98] sm:$0xff] }
 0x244   : > { %v18071_v63 = vpop.f32.mrf.mxu1  ;;  %v11625_v56 = vadd.f32 %v18009_v41, %v21672_v15  ;;  %3648 = vst [vmem:[#allocation2 + $0x148] sm:$0xf] %v17096_v43  ;;  %3843 = vst [vmem:[#allocation2 + $0x150] sm:$0xf] %v17128_v60  ;;  %v17129_v35 = vpack.c.bf16 %v15295_v12, %v15295_v12  ;;  %v19780_v52 = vld [vmem:[%s23618_s1 + $0x968] sm:$0xff]  }
 0x245   : > { %v18011_v31 = vpop.f32.mrf.mxu0  ;;  %v19753_v55 = vld [vmem:[#allocation2 + $0xb30] ss:$196 sps:$4 sm:$0xff]   ;;  %3553 = vst [vmem:[#allocation2 + $0x208] sm:$0xf] %v17081_v13  ;;  %3555 = vst [vmem:[#allocation2 + $0x390] sm:$0xf] %v17083_v38 }
 0x246   : > { %v18072_v62 = vpop.f32.mrf.mxu1  ;;  %v18012_v15 = vadd.f32 %v18011_v31, %v18010_v50  ;;  %18452 = vmatpush3.bf16.msra.mxu1 %v19758_v17  ;;  %v15230_v17 = vld [vmem:[%s20403_s20 + $0x85] sm:$0xff]  ;;  %3844 = vst [vmem:[#allocation2 + $0x214] sm:$0xf] %v17129_v35 }
 0x247   : > { %v18073_v20 = vadd.f32 %v18072_v62, %v18071_v63  ;;  %v18013_v10 = vpop.f32.mrf.mxu0  ;;  %18453 = vmatprep.subr.bf16.mxu1 %v19759_v14  ;;  %v15261_v14 = vld [vmem:[%s20403_s20 + $0x7e] sm:$0xff]  ;;  %v15201_v35 = vld [vmem:[%s20403_s20 + $0xac] sm:$0xff] }
 0x248   : > { %v18074_v0 = vpop.f32.mrf.mxu1  ;;  %v11628_v7 = vadd.f32 %v18012_v15, %v21683_v34  ;;  %v15229_v15 = vld [vmem:[%s20403_s20 + $0x7d] sm:$0xff] }
 0x249   : > { %v21868_v4 = vadd.f32 %v18073_v20, %v11625_v56  ;;  %v18014_v11 = vpop.f32.mrf.mxu0  ;;  %v19748_v33 = vld [vmem:[#allocation2 + $0xb28] ss:$196 sps:$4 sm:$0xff]   ;;  %v17082_v20 = vpack.c.bf16 %v15198_v23, %v15198_v23 }
 0x24a   : > { %v18075_v19 = vpop.f32.mrf.mxu1  ;;  %v18015_v51 = vadd.f32 %v18014_v11, %v18013_v10  ;;  %12067 = vmatmul.mubr.bf16.gmra.mxu0 %v19748_v33  ;;  %18454 = vmatpush3.bf16.msra.mxu1 %v19763_v28  ;;  %v15262_v11 = vld [vmem:[%s20403_s20 + $0x86] sm:$0xff]  ;;  %v17113_v33 = vpack.c.bf16 %v15261_v14, %v15261_v14  ;;  %v15298_v14 = vld [vmem:[%s20403_s20 + $0xb0] sm:$0xff] }
 0x24b   : > { %v18076_v24 = vadd.f32 %v18075_v19, %v18074_v0  ;;  %v18016_v42 = vpop.f32.mrf.mxu0  ;;  %v19768_v19 = vld [vmem:[%s23618_s1 + $0x938] sm:$0xff]   ;;  %3554 = vst [vmem:[#allocation2 + $0x2cc] sm:$0xf] %v17082_v20  ;;  %v17114_v36 = vpack.c.bf16 %v15262_v11, %v15262_v11  ;;  %v19762_v43 = vld [vmem:[#allocation2 + $0x84] ss:$196 sps:$4 sm:$0xff]   ;;  %v17132_v11 = vpack.c.bf16 %v15298_v14, %v15298_v14 }
 0x24c   : > { %v18077_v34 = vpop.f32.mrf.mxu1  ;;  %v11633_v44 = vadd.f32 %v18015_v51, %v21691_v58  ;;  %v19755_v58 = vld [vmem:[#allocation2 + $0xb34] ss:$196 sps:$4 sm:$0xff]   ;;  %v19760_v51 = vld [vmem:[#allocation2 + $0x80] ss:$196 sps:$4 sm:$0xff]   ;;  %3745 = vst [vmem:[#allocation2 + $0x210] sm:$0xf] %v17113_v33  ;;  %12204 = vmatprep.mubr.bf16.mxu0 %v19762_v43 }
 0x24d   : > { %v21881_v45 = vadd.f32 %v18076_v24, %v11628_v7  ;;  %v18017_v6 = vpop.f32.mrf.mxu0  ;;  %12163 = vmatprep.mubr.bf16.mxu1 %v19755_v58  ;;  %v17098_v7 = vpack.c.bf16 %v15230_v17, %v15230_v17  ;;  %3746 = vst [vmem:[#allocation2 + $0x2d4] sm:$0xf] %v17114_v36  ;;  %v15232_v58 = vld [vmem:[%s20403_s20 + $0x9d] sm:$0xff]  ;;  %v19767_v60 = vld [vmem:[#allocation2 + $0x8c] ss:$196 sps:$4 sm:$0xff]  }
 0x24e   : > { %v18078_v37 = vpop.f32.mrf.mxu1  ;;  %v18018_v1 = vadd.f32 %v18017_v6, %v18016_v42  ;;  %12164 = vmatmul.mubr.bf16.gmra.mxu1 %v19753_v55  ;;  %v19776_v55 = vld [vmem:[%s23618_s1 + $0x930] sm:$0xff]   ;;  %3847 = vst [vmem:[#allocation2 + $0x460] sm:$0xf] %v17132_v11 }
 0x24f   : > { %v18079_v41 = vadd.f32 %v18078_v37, %v18077_v34  ;;  %v18019_v50 = vpop.f32.mrf.mxu0  ;;  %3650 = vst [vmem:[#allocation2 + $0x2d0] sm:$0xf] %v17098_v7  ;;  %v17130_v34 = vpack.c.bf16 %v15296_v16, %v15296_v16  ;;  %12301 = vmatprep.mubr.bf16.mxu1 %v19767_v60  ;;  %v15236_v11 = vld [vmem:[%s20403_s20 + $0xcd] sm:$0xff] }
 0x250   : > { %v18080_v63 = vpop.f32.mrf.mxu1  ;;  %v11636_v2 = vadd.f32 %v18018_v1, %v21703_v21  ;;  %v17097_v21 = vpack.c.bf16 %v15229_v15, %v15229_v15  ;;  %v15231_v1 = vld [vmem:[%s20403_s20 + $0x95] sm:$0xff] }
 0x251   : > { %v21891_v56 = vadd.f32 %v18079_v41, %v11633_v44  ;;  %v18020_v31 = vpop.f32.mrf.mxu0  ;;  %3845 = vst [vmem:[#allocation2 + $0x2d8] sm:$0xf] %v17130_v34  ;;  %v17084_v41 = vpack.c.bf16 %v15200_v22, %v15200_v22  ;;  %v15202_v34 = vld [vmem:[%s20403_s20 + $0xb4] sm:$0xff] }
 0x252   : > { %v18081_v62 = vpop.f32.mrf.mxu1  ;;  %v18021_v10 = vadd.f32 %v18020_v31, %v18019_v50  ;;  %3649 = vst [vmem:[#allocation2 + $0x20c] sm:$0xf] %v17097_v21  ;;  %12205 = vmatmul.mubr.bf16.vlgmr.msra.gmra.mxu0 %v19760_v51  ;;  %v17100_v50 = vpack.c.bf16 %v15232_v58, %v15232_v58  ;;  %v15297_v31 = vld [vmem:[%s20403_s20 + $0xa8] sm:$0xff] }
 0x253   : > { %v18082_v0 = vadd.f32 %v18081_v62, %v18080_v63  ;;  %v18022_v25 = vpop.f32.mrf.mxu0  ;;  %v17099_v63 = vpack.c.bf16 %v15231_v1, %v15231_v1  ;;  %18504 = vmatpush3.bf16.msra.mxu0 %v19768_v19  ;;  %3556 = vst [vmem:[#allocation2 + $0x454] sm:$0xf] %v17084_v41  ;;  %v15264_v62 = vld [vmem:[%s20403_s20 + $0x9e] sm:$0xff]  ;;  %v19769_v15 = vld [vmem:[#allocation2 + $0x208] ss:$196 sps:$4 sm:$0xff]  }
 0x254   : > { %v18083_v29 = vpop.f32.mrf.mxu1  ;;  %v11641_v24 = vadd.f32 %v18021_v10, %v21720_v57  ;;  %v19772_v57 = vld [vmem:[%s23618_s1 + $0x970] sm:$0xff]   ;;  %3652 = vst [vmem:[#allocation2 + $0x458] sm:$0xf] %v17100_v50  ;;  %v17131_v10 = vpack.c.bf16 %v15297_v31, %v15297_v31 }
 0x255   : > { %v21905_v27 = vadd.f32 %v18082_v0, %v11636_v2  ;;  %v18023_v30 = vpop.f32.mrf.mxu0  ;;  %v19765_v2 = vld [vmem:[#allocation2 + $0x88] ss:$196 sps:$4 sm:$0xff]   ;;  %18505 = vmatprep.subr.bf16.mxu0 %v19772_v57  ;;  %3651 = vst [vmem:[#allocation2 + $0x394] sm:$0xf] %v17099_v63  ;;  %v17116_v0 = vpack.c.bf16 %v15264_v62, %v15264_v62  ;;  %v19773_v16 = vld [vmem:[#allocation2 + $0x210] ss:$196 sps:$4 sm:$0xff]  }
 0x256   : > { %v18084_v42 = vpop.f32.mrf.mxu1  ;;  %v18024_v44 = vadd.f32 %v18023_v30, %v18022_v25  ;;  %12302 = vmatmul.mubr.bf16.vlgmr.msra.gmra.mxu1 %v19765_v2  ;;  %3846 = vst [vmem:[#allocation2 + $0x39c] sm:$0xf] %v17131_v10  ;;  %v15234_v57 = vld [vmem:[%s20403_s20 + $0xb5] sm:$0xff] }
 0x257   : > { %v18085_v28 = vadd.f32 %v18084_v42, %v18083_v29  ;;  %v18025_v6 = vpop.f32.mrf.mxu0  ;;  %18506 = vmatpush3.bf16.msra.mxu0 %v19776_v55  ;;  %3748 = vst [vmem:[#allocation2 + $0x45c] sm:$0xf] %v17116_v0  ;;  %v15233_v42 = vld [vmem:[%s20403_s20 + $0xad] sm:$0xff]  ;;  %v15266_v50 = vld [vmem:[%s20403_s20 + $0xb6] sm:$0xff] }
 0x258   : > { %v18086_v37 = vpop.f32.mrf.mxu1  ;;  %v11644_v48 = vadd.f32 %v18024_v44, %v21727_v9  ;;  %v15263_v9 = vld [vmem:[%s20403_s20 + $0x96] sm:$0xff]  ;;  %18507 = vmatprep.subr.bf16.mxu0 %v19780_v52  ;;  %v17086_v44 = vpack.c.bf16 %v15202_v34, %v15202_v34  ;;  %v17101_v40 = vpack.c.bf16 %v15233_v42, %v15233_v42  ;;  %v15265_v58 = vld [vmem:[%s20403_s20 + $0xae] sm:$0xff] }
 0x259   : > { %v21918_v47 = vadd.f32 %v18085_v28, %v11641_v24  ;;  %v18026_v8 = vpop.f32.mrf.mxu0  ;;  %v17115_v17 = vpack.c.bf16 %v15263_v9, %v15263_v9  ;;  %v19771_v7 = vld [vmem:[#allocation2 + $0x20c] ss:$196 sps:$4 sm:$0xff]   ;;  %v19775_v24 = vld [vmem:[#allocation2 + $0x214] ss:$196 sps:$4 sm:$0xff]   ;;  %v17085_v28 = vpack.c.bf16 %v15201_v35, %v15201_v35  ;;  %v17117_v52 = vpack.c.bf16 %v15265_v58, %v15265_v58 }
 0x25a   : > { %v18087_v49 = vpop.f32.mrf.mxu1  ;;  %v18027_v23 = vadd.f32 %v18026_v8, %v18025_v6  ;;  %12212 = vmatprep.mubr.bf16.mxu0 %v19771_v7  ;;  %12309 = vmatprep.mubr.bf16.mxu1 %v19775_v24  ;;  %v17102_v6 = vpack.c.bf16 %v15234_v57, %v15234_v57  ;;  %v19777_v41 = vld [vmem:[#allocation2 + $0x390] ss:$196 sps:$4 sm:$0xff]   ;;  %3558 = vst [vmem:[#allocation2 + $0x5dc] sm:$0xf] %v17086_v44  ;;  %3653 = vst [vmem:[#allocation2 + $0x51c] sm:$0xf] %v17101_v40 }
 0x25b   : > { %v18088_v61 = vadd.f32 %v18087_v49, %v18086_v37  ;;  %v18028_v20 = vpop.f32.mrf.mxu0  ;;  %3747 = vst [vmem:[#allocation2 + $0x398] sm:$0xf] %v17115_v17  ;;  %12213 = vmatmul.mubr.bf16.gmra.mxu0 %v19769_v15  ;;  %3557 = vst [vmem:[#allocation2 + $0x518] sm:$0xf] %v17085_v28  ;;  %v15299_v49 = vld [vmem:[%s20403_s20 + $0xc0] sm:$0xff]  ;;  %v15300_v8 = vld [vmem:[%s20403_s20 + $0xc8] sm:$0xff]  ;;  %v17104_v24 = vpack.c.bf16 %v15236_v11, %v15236_v11 }
 0x25c   : > { %v18089_v13 = vpop.f32.mrf.mxu1  ;;  %v11649_v29 = vadd.f32 %v18027_v23, %v21737_v39  ;;  %v19784_v39 = vld [vmem:[%s23618_s1 + $0x928] sm:$0xff]   ;;  %v19779_v1 = vld [vmem:[#allocation2 + $0x394] ss:$196 sps:$4 sm:$0xff]   ;;  %3654 = vst [vmem:[#allocation2 + $0x5e0] sm:$0xf] %v17102_v6  ;;  %v17133_v23 = vpack.c.bf16 %v15299_v49, %v15299_v49  ;;  %v17134_v9 = vpack.c.bf16 %v15300_v8, %v15300_v8 }
 0x25d   : > { %v21927_v21 = vadd.f32 %v18088_v61, %v11644_v48  ;;  %v18029_v19 = vpop.f32.mrf.mxu0  ;;  %18508 = vmatpush3.bf16.msra.mxu0 %v19784_v39  ;;  %12220 = vmatprep.mubr.bf16.mxu0 %v19779_v1  ;;  %v17118_v61 = vpack.c.bf16 %v15266_v50, %v15266_v50  ;;  %3749 = vst [vmem:[#allocation2 + $0x520] sm:$0xf] %v17117_v52  ;;  %v15204_v15 = vld [vmem:[%s20403_s20 + $0xcc] sm:$0xff]  ;;  %v19783_v10 = vld [vmem:[#allocation2 + $0x39c] ss:$196 sps:$4 sm:$0xff]  }
 0x25e   : > { %v18090_v25 = vpop.f32.mrf.mxu1  ;;  %v18030_v12 = vadd.f32 %v18029_v19, %v18028_v20  ;;  %12310 = vmatmul.mubr.bf16.gmra.mxu1 %v19773_v16  ;;  %v15203_v20 = vld [vmem:[%s20403_s20 + $0xc4] sm:$0xff]  ;;  %3848 = vst [vmem:[#allocation2 + $0x524] sm:$0xf] %v17133_v23  ;;  %3849 = vst [vmem:[#allocation2 + $0x5e8] sm:$0xf] %v17134_v9  ;;  %v17088_v14 = vpack.c.bf16 %v15204_v15, %v15204_v15  ;;  %v19796_v39 = vld [vmem:[%s23618_s1 + $0x958] sm:$0xff]  }
 0x25f   : > { %v18091_v33 = vadd.f32 %v18090_v25, %v18089_v13  ;;  %v18031_v36 = vpop.f32.mrf.mxu0  ;;  %v19792_v13 = vld [vmem:[%s23618_s1 + $0x920] sm:$0xff]   ;;  %3750 = vst [vmem:[#allocation2 + $0x5e4] sm:$0xf] %v17118_v61  ;;  %v17087_v7 = vpack.c.bf16 %v15203_v20, %v15203_v20  ;;  %12317 = vmatprep.mubr.bf16.mxu1 %v19783_v10  ;;  %v15268_v34 = vld [vmem:[%s20403_s20 + $0xce] sm:$0xff]  ;;  %3656 = vst [vmem:[#allocation2 + $0x768] sm:$0xf] %v17104_v24 }
 0x260   : > { %v18092_v51 = vpop.f32.mrf.mxu1  ;;  %v11652_v43 = vadd.f32 %v18030_v12, %v21752_v3  ;;  %v19788_v3 = vld [vmem:[%s23618_s1 + $0x960] sm:$0xff]   ;;  %3560 = vst [vmem:[#allocation2 + $0x764] sm:$0xf] %v17088_v14  ;;  %v19803_v52 = vld [vmem:[%s23618_s1 + $0x9f0] sm:$0xff]  }
 0x261   : > { %v21937_v30 = vadd.f32 %v18091_v33, %v11649_v29  ;;  %v18032_v37 = vpop.f32.mrf.mxu0  ;;  %18509 = vmatprep.subr.bf16.mxu0 %v19788_v3  ;;  %v15235_v19 = vld [vmem:[%s20403_s20 + $0xc5] sm:$0xff]  ;;  %3559 = vst [vmem:[#allocation2 + $0x6a0] sm:$0xf] %v17087_v7  ;;  %v15237_v23 = vld [vmem:[%s20403_s20 + $0xdd] sm:$0xff] }
 0x262   : > { %v18093_v22 = vpop.f32.mrf.mxu1  ;;  %v18033_v38 = vadd.f32 %v18032_v37, %v18031_v36  ;;  %18510 = vmatpush3.bf16.msra.mxu0 %v19792_v13  ;;  %v17103_v16 = vpack.c.bf16 %v15235_v19, %v15235_v19  ;;  %v19785_v44 = vld [vmem:[#allocation2 + $0x518] ss:$196 sps:$4 sm:$0xff]   ;;  %v15206_v61 = vld [vmem:[%s20403_s20 + $0xe4] sm:$0xff]  ;;  %v17105_v20 = vpack.c.bf16 %v15237_v23, %v15237_v23  ;;  %v19799_v7 = vld [vmem:[#allocation2 + $0x6ac] ss:$196 sps:$4 sm:$0xff]  }
 0x263   : > { %v18094_v55 = vadd.f32 %v18093_v22, %v18092_v51  ;;  %v18034_v63 = vpop.f32.mrf.mxu0  ;;  %12221 = vmatmul.mubr.bf16.gmra.mxu0 %v19777_v41  ;;  %v15267_v51 = vld [vmem:[%s20403_s20 + $0xc6] sm:$0xff]  ;;  %v19787_v57 = vld [vmem:[#allocation2 + $0x51c] ss:$196 sps:$4 sm:$0xff]   ;;  %18511 = vmatprep.subr.bf16.mxu0 %v19796_v39  ;;  %v17090_v13 = vpack.c.bf16 %v15206_v61, %v15206_v61  ;;  %v19807_v19 = vld [vmem:[%s23618_s1 + $0x9b0] sm:$0xff]  }
 0x264   : > { %v18095_v48 = vpop.f32.mrf.mxu1  ;;  %v11657_v60 = vadd.f32 %v18033_v38, %v21760_v18  ;;  %v19781_v18 = vld [vmem:[#allocation2 + $0x398] ss:$196 sps:$4 sm:$0xff]   ;;  %v17119_v42 = vpack.c.bf16 %v15267_v51, %v15267_v51  ;;  %3655 = vst [vmem:[#allocation2 + $0x6a4] sm:$0xf] %v17103_v16  ;;  %12228 = vmatprep.mubr.bf16.mxu0 %v19787_v57  ;;  %3657 = vst [vmem:[#allocation2 + $0x82c] sm:$0xf] %v17105_v20 }
 0x265   : > { %v21948_v2 = vadd.f32 %v18094_v55, %v11652_v43  ;;  %v18035_v31 = vpop.f32.mrf.mxu0  ;;  %v19800_v37 = vld [vmem:[%s23618_s1 + $0x918] sm:$0xff]   ;;  %3562 = vst [vmem:[#allocation2 + $0x8ec] sm:$0xf] %v17090_v13  ;;  %4235 = vst [vmem:[#allocation2 + $0x780] sm:$0xf] %v17090_v13 }
 0x266   : > { %v18096_v62 = vpop.f32.mrf.mxu1  ;;  %v18036_v0 = vadd.f32 %v18035_v31, %v18034_v63  ;;  %3751 = vst [vmem:[#allocation2 + $0x6a8] sm:$0xf] %v17119_v42  ;;  %12318 = vmatmul.mubr.bf16.gmra.mxu1 %v19781_v18  ;;  %v19801_v38 = vld [vmem:[%s23618_s1 + $0x9f8] sm:$0xff]   ;;  %18512 = vmatpush3.bf16.msra.mxu0 %v19800_v37  ;;  %v19791_v63 = vld [vmem:[#allocation2 + $0x524] ss:$196 sps:$4 sm:$0xff]  }
 0x267   : > { %v18097_v17 = vadd.f32 %v18096_v62, %v18095_v48  ;;  %v18037_v25 = vpop.f32.mrf.mxu0  ;;  %v19789_v48 = vld [vmem:[#allocation2 + $0x520] ss:$196 sps:$4 sm:$0xff]   ;;  %18567 = vmatprep.subr.bf16.mxu1 %v19801_v38  ;;  %12325 = vmatprep.mubr.bf16.mxu1 %v19791_v63  ;;  %v15271_v13 = vld [vmem:[%s20403_s20 + $0xf6] sm:$0xff] }
 0x268   : > { %v18098_v29 = vpop.f32.mrf.mxu1  ;;  %v11660_v12 = vadd.f32 %v18036_v0, %v21771_v54  ;;  %v17120_v54 = vpack.c.bf16 %v15268_v34, %v15268_v34  ;;  %v15238_v0 = vld [vmem:[%s20403_s20 + $0xe5] sm:$0xff] }
 0x269   : > { %v21958_v33 = vadd.f32 %v18097_v17, %v11657_v60  ;;  %v18038_v35 = vpop.f32.mrf.mxu0  ;;  %v15205_v60 = vld [vmem:[%s20403_s20 + $0xdc] sm:$0xff] }
 0x26a   : > { %v18099_v36 = vpop.f32.mrf.mxu1  ;;  %v18039_v28 = vadd.f32 %v18038_v35, %v18037_v25  ;;  %3752 = vst [vmem:[#allocation2 + $0x76c] sm:$0xf] %v17120_v54  ;;  %v17089_v31 = vpack.c.bf16 %v15205_v60, %v15205_v60  ;;  %v19793_v10 = vld [vmem:[#allocation2 + $0x6a0] ss:$196 sps:$4 sm:$0xff]  }
 0x26b   : > { %v18100_v43 = vadd.f32 %v18099_v36, %v18098_v29  ;;  %v18040_v22 = vpop.f32.mrf.mxu0  ;;  %12229 = vmatmul.mubr.bf16.gmra.mxu0 %v19785_v44  ;;  %v19795_v17 = vld [vmem:[#allocation2 + $0x6a4] ss:$196 sps:$4 sm:$0xff]  }
 0x26c   : > { %v18101_v40 = vpop.f32.mrf.mxu1  ;;  %v11665_v55 = vadd.f32 %v18039_v28, %v21782_v53  ;;  %v19802_v53 = vld [vmem:[%s23618_s1 + $0x9b8] sm:$0xff]   ;;  %3561 = vst [vmem:[#allocation2 + $0x828] sm:$0xf] %v17089_v31  ;;  %4234 = vst [vmem:[#allocation2 + $0x6bc] sm:$0xf] %v17089_v31  ;;  %12236 = vmatprep.mubr.bf16.mxu0 %v19795_v17  ;;  %v15270_v36 = vld [vmem:[%s20403_s20 + $0xe6] sm:$0xff] }
 0x26d   : > { %v21969_v6 = vadd.f32 %v18100_v43, %v11660_v12  ;;  %v18041_v1 = vpop.f32.mrf.mxu0  ;;  %18568 = vmatpush3.bf16.msra.mxu1 %v19802_v53  ;;  %v19808_v12 = vld [vmem:[%s23618_s1 + $0x950] sm:$0xff]   ;;  %v15269_v51 = vld [vmem:[%s20403_s20 + $0xde] sm:$0xff]  ;;  %v17122_v43 = vpack.c.bf16 %v15270_v36, %v15270_v36  ;;  %v19820_v31 = vld [vmem:[%s23618_s1 + $0x948] sm:$0xff]  }
 0x26e   : > { %v18102_v41 = vpop.f32.mrf.mxu1  ;;  %v18042_v58 = vadd.f32 %v18041_v1, %v18040_v22  ;;  %18569 = vmatprep.subr.bf16.mxu1 %v19803_v52  ;;  %12326 = vmatmul.mubr.bf16.gmra.mxu1 %v19789_v48  ;;  %v17121_v42 = vpack.c.bf16 %v15269_v51, %v15269_v51  ;;  %v19812_v28 = vld [vmem:[%s23618_s1 + $0x910] sm:$0xff]   ;;  %v15272_v20 = vld [vmem:[%s20403_s20 + $0xfe] sm:$0xff] }
 0x26f   : > { %v18103_v3 = vadd.f32 %v18102_v41, %v18101_v40  ;;  %v18043_v9 = vpop.f32.mrf.mxu0  ;;  %12333 = vmatprep.mubr.bf16.mxu1 %v19799_v7  ;;  %18513 = vmatprep.subr.bf16.mxu0 %v19808_v12  ;;  %3754 = vst [vmem:[#allocation2 + $0x8f4] sm:$0xf] %v17122_v43  ;;  %v19814_v40 = vld [vmem:[%s23618_s1 + $0x9a8] sm:$0xff]   ;;  %v15207_v1 = vld [vmem:[%s20403_s20 + $0xf4] sm:$0xff] }
 0x270   : > { %v18104_v50 = vpop.f32.mrf.mxu1  ;;  %v11668_v8 = vadd.f32 %v18042_v58, %v21786_v26  ;;  %v17106_v26 = vpack.c.bf16 %v15238_v0, %v15238_v0  ;;  %3753 = vst [vmem:[#allocation2 + $0x830] sm:$0xf] %v17121_v42  ;;  %18514 = vmatpush3.bf16.msra.mxu0 %v19812_v28  ;;  %v15239_v58 = vld [vmem:[%s20403_s20 + $0xf5] sm:$0xff]  ;;  %v17091_v53 = vpack.c.bf16 %v15207_v1, %v15207_v1  ;;  %v15209_v51 = vld [vmem:[%s20403_s20 + $0x10c] sm:$0xff] }
 0x271   : > { %v21981_v49 = vadd.f32 %v18103_v3, %v11665_v55  ;;  %v18044_v18 = vpop.f32.mrf.mxu0  ;;  %v19797_v39 = vld [vmem:[#allocation2 + $0x6a8] ss:$196 sps:$4 sm:$0xff]   ;;  %18570 = vmatpush3.bf16.msra.mxu1 %v19807_v19  ;;  %v19815_v55 = vld [vmem:[%s23618_s1 + $0x9e0] sm:$0xff]   ;;  %v17123_v0 = vpack.c.bf16 %v15271_v13, %v15271_v13  ;;  %18515 = vmatprep.subr.bf16.mxu0 %v19820_v31  ;;  %v19825_v19 = vld [vmem:[%s23618_s1 + $0x9d8] sm:$0xff]  }
 0x272   : > { %v18105_v62 = vpop.f32.mrf.mxu1  ;;  %v18045_v29 = vadd.f32 %v18044_v18, %v18043_v9  ;;  %3658 = vst [vmem:[#allocation2 + $0x8f0] sm:$0xf] %v17106_v26  ;;  %v15208_v3 = vld [vmem:[%s20403_s20 + $0xfc] sm:$0xff]  ;;  %3563 = vst [vmem:[#allocation2 + $0x9b0] sm:$0xf] %v17091_v53  ;;  %v17124_v18 = vpack.c.bf16 %v15272_v20, %v15272_v20  ;;  %v15241_v42 = vld [vmem:[%s20403_s20 + $0x10d] sm:$0xff] }
 0x273   : > { %v18106_v15 = vadd.f32 %v18105_v62, %v18104_v50  ;;  %v18046_v11 = vpop.f32.mrf.mxu0  ;;  %12237 = vmatmul.mubr.bf16.gmra.mxu0 %v19793_v10  ;;  %v19804_v48 = vld [vmem:[#allocation2 + $0x828] ss:$196 sps:$4 sm:$0xff]   ;;  %v17092_v50 = vpack.c.bf16 %v15208_v3, %v15208_v3  ;;  %v19819_v9 = vld [vmem:[%s23618_s1 + $0x9a0] sm:$0xff]   ;;  %4236 = vst [vmem:[#allocation2 + $0x844] sm:$0xf] %v17091_v53 }
 0x274   : > { %v18107_v25 = vpop.f32.mrf.mxu1  ;;  %v11673_v16 = vadd.f32 %v18045_v29, %v21806_v32  ;;  %v19813_v32 = vld [vmem:[%s23618_s1 + $0x9e8] sm:$0xff]   ;;  %v19811_v26 = vld [vmem:[#allocation2 + $0x834] ss:$196 sps:$4 sm:$0xff]   ;;  %3755 = vst [vmem:[#allocation2 + $0x9b8] sm:$0xf] %v17123_v0  ;;  %v19836_v20 = vld [vmem:[%s23618_s1 + $0x900] sm:$0xff]  }
 0x275   : > { %v21988_v14 = vadd.f32 %v18106_v15, %v11668_v8  ;;  %v18047_v34 = vpop.f32.mrf.mxu0  ;;  %18571 = vmatprep.subr.bf16.mxu1 %v19813_v32  ;;  %v15240_v8 = vld [vmem:[%s20403_s20 + $0xfd] sm:$0xff]  ;;  %3564 = vst [vmem:[#allocation2 + $0xa74] sm:$0xf] %v17092_v50  ;;  %4237 = vst [vmem:[#allocation2 + $0x908] sm:$0xf] %v17092_v50  ;;  %v15273_v53 = vld [vmem:[%s20403_s20 + $0x10e] sm:$0xff] }
 0x276   : > { %v18108_v24 = vpop.f32.mrf.mxu1  ;;  %v18048_v44 = vadd.f32 %v18047_v34, %v18046_v11  ;;  %18572 = vmatpush3.bf16.msra.mxu1 %v19814_v40  ;;  %v17108_v23 = vpack.c.bf16 %v15240_v8, %v15240_v8  ;;  %3756 = vst [vmem:[#allocation2 + $0xa7c] sm:$0xf] %v17124_v18  ;;  %v17093_v34 = vpack.c.bf16 %v15209_v51, %v15209_v51  ;;  %v15274_v50 = vld [vmem:[%s20403_s20 + $0x116] sm:$0xff] }
 0x277   : > { %v18109_v35 = vadd.f32 %v18108_v24, %v18107_v25  ;;  %v18049_v38 = vpop.f32.mrf.mxu0  ;;  %12334 = vmatmul.mubr.bf16.gmra.mxu1 %v19797_v39  ;;  %18573 = vmatprep.subr.bf16.mxu1 %v19815_v55  ;;  %v19809_v17 = vld [vmem:[#allocation2 + $0x830] ss:$196 sps:$4 sm:$0xff]   ;;  %v19824_v25 = vld [vmem:[%s23618_s1 + $0x908] sm:$0xff]   ;;  %v17109_v40 = vpack.c.bf16 %v15241_v42, %v15241_v42  ;;  %v17125_v8 = vpack.c.bf16 %v15273_v53, %v15273_v53  ;;  %v15357_v51 = vld [vmem:[%s20403_s20 + $0x7a] sm:$0xff] }
 0x278   : > { %v18110_v57 = vpop.f32.mrf.mxu1  ;;  %v11676_v22 = vadd.f32 %v18048_v44, %v21816_v59  ;;  %v17107_v59 = vpack.c.bf16 %v15239_v58, %v15239_v58  ;;  %3660 = vst [vmem:[#allocation2 + $0xa78] sm:$0xf] %v17108_v23  ;;  %12341 = vmatprep.mubr.bf16.mxu1 %v19811_v26  ;;  %18516 = vmatpush3.bf16.msra.mxu0 %v19824_v25  ;;  %v19827_v39 = vld [vmem:[%s23618_s1 + $0x9d0] sm:$0xff]   ;;  %3565 = vst [vmem:[#allocation2 + $0xb38] sm:$0xf] %v17093_v34  ;;  %v15307_v23 = vld [vmem:[%s20403_s20 + $0x120] sm:$0xff] }
 0x279   : > { %v22005_v54 = vadd.f32 %v18109_v35, %v11673_v16  ;;  %v19806_v63 = vld [vmem:[#allocation2 + $0x82c] ss:$196 sps:$4 sm:$0xff]   ;;  %v18050_v52 = vpop.f32.mrf.mxu0  ;;  %v19826_v16 = vld [vmem:[%s23618_s1 + $0x998] sm:$0xff]   ;;  %4238 = vst [vmem:[#allocation2 + $0x9cc] sm:$0xf] %v17093_v34  ;;  %v17141_v31 = vpack.c.bf16 %v15307_v23, %v15307_v23 }
 0x27a   : > { %v18111_v37 = vpop.f32.mrf.mxu1  ;;  %v18051_v61 = vadd.f32 %v18050_v52, %v18049_v38  ;;  %12244 = vmatprep.mubr.bf16.mxu0 %v19806_v63  ;;  %3659 = vst [vmem:[#allocation2 + $0x9b4] sm:$0xf] %v17107_v59  ;;  %18574 = vmatpush3.bf16.msra.mxu1 %v19819_v9  ;;  %v15210_v35 = vld [vmem:[%s20403_s20 + $0x114] sm:$0xff]  ;;  %3661 = vst [vmem:[#allocation2 + $0xb3c] sm:$0xf] %v17109_v40  ;;  %v19832_v63 = vld [vmem:[%s23618_s1 + $0x940] sm:$0xff]  }
 0x27b   : > { %v18112_v41 = vadd.f32 %v18111_v37, %v18110_v57  ;;  %v18052_v62 = vpop.f32.mrf.mxu0  ;;  %12245 = vmatmul.mubr.bf16.gmra.mxu0 %v19804_v48  ;;  %18575 = vmatprep.subr.bf16.mxu1 %v19825_v19  ;;  %v17094_v32 = vpack.c.bf16 %v15210_v35, %v15210_v35  ;;  %v19831_v55 = vld [vmem:[%s23618_s1 + $0x990] sm:$0xff]   ;;  %v19823_v58 = vld [vmem:[#allocation2 + $0x9bc] ss:$196 sps:$4 sm:$0xff]   ;;  %v15308_v9 = vld [vmem:[%s20403_s20 + $0x128] sm:$0xff]  ;;  %3757 = vst [vmem:[#allocation2 + $0xb40] sm:$0xf] %v17125_v8 }
 0x27c   : > { %v11681_v15 = vadd.f32 %v18051_v61, %v21840_v46  ;;  %v18113_v10 = vpop.f32.mrf.mxu1  ;;  %v19816_v44 = vld [vmem:[#allocation2 + $0x9b0] ss:$196 sps:$4 sm:$0xff]   ;;  %v17126_v61 = vpack.c.bf16 %v15274_v50, %v15274_v50  ;;  %18517 = vmatprep.subr.bf16.mxu0 %v19832_v63  ;;  %v17142_v13 = vpack.c.bf16 %v15308_v9, %v15308_v9  ;;  %3856 = vst [vmem:[#allocation2 + $0xb44] sm:$0xf] %v17141_v31 }
 0x27d   : > { %v22018_v60 = vadd.f32 %v18112_v41, %v11676_v22  ;;  %v18053_v7 = vpop.f32.mrf.mxu0  ;;  %v19821_v41 = vld [vmem:[#allocation2 + $0x9b8] ss:$196 sps:$4 sm:$0xff]   ;;  %3566 = vst [vmem:[#allocation2 + $0xbfc] sm:$0xf] %v17094_v32  ;;  %4239 = vst [vmem:[#allocation2 + $0xa90] sm:$0xf] %v17094_v32  ;;  %18518 = vmatpush3.bf16.msra.mxu0 %v19836_v20 }
 0x27e   : > { %v18054_v29 = vadd.f32 %v18053_v7, %v18052_v62  ;;  %v18114_v46 = vpop.f32.mrf.mxu1  ;;  %18576 = vmatpush3.bf16.msra.mxu1 %v19826_v16  ;;  %3758 = vst [vmem:[#allocation2 + $0xc04] sm:$0xf] %v17126_v61  ;;  %3857 = vst [vmem:[#allocation2 + $0xc08] sm:$0xf] %v17142_v13  ;;  %v15327_v13 = vld [vmem:[%s20403_s20 + $0x91] sm:$0xff]  ;;  %v15328_v20 = vld [vmem:[%s20403_s20 + $0x99] sm:$0xff] }
 0x27f   : > { %v18115_v11 = vadd.f32 %v18114_v46, %v18113_v10  ;;  %12342 = vmatmul.mubr.bf16.gmra.mxu1 %v19809_v17  ;;  %18577 = vmatprep.subr.bf16.mxu1 %v19827_v39  ;;  %v19838_v10 = vld [vmem:[%s23618_s1 + $0x988] sm:$0xff]  }
 0x280   : > { %v11684_v12 = vadd.f32 %v18054_v29, %v21849_v5  ;;  %v18116_v24 = vpop.f32.mrf.mxu1  ;;  %v15242_v5 = vld [vmem:[%s20403_s20 + $0x115] sm:$0xff]  ;;  %12349 = vmatprep.mubr.bf16.mxu1 %v19823_v58  ;;  %v15326_v39 = vld [vmem:[%s20403_s20 + $0x81] sm:$0xff] }
 0x281   : > { %v22043_v36 = vadd.f32 %v18115_v11, %v11681_v15  ;;  %v19818_v57 = vld [vmem:[#allocation2 + $0x9b4] ss:$196 sps:$4 sm:$0xff]   ;;  %v17110_v22 = vpack.c.bf16 %v15242_v5, %v15242_v5  ;;  %v19839_v11 = vld [vmem:[%s23618_s1 + $0x9c0] sm:$0xff]   ;;  %v17144_v42 = vpack.c.bf16 %v15326_v39, %v15326_v39 }
 0x282   : > { %v18117_v43 = vpop.f32.mrf.mxu1  ;;  %12252 = vmatprep.mubr.bf16.mxu0 %v19818_v57  ;;  %18578 = vmatpush3.bf16.msra.mxu1 %v19831_v55  ;;  %v15358_v5 = vld [vmem:[%s20403_s20 + $0x82] sm:$0xff] }
 0x283   : > { %v18118_v37 = vadd.f32 %v18117_v43, %v18116_v24  ;;  %3662 = vst [vmem:[#allocation2 + $0xc00] sm:$0xf] %v17110_v22  ;;  %12253 = vmatmul.mubr.bf16.gmra.mxu0 %v19816_v44  ;;  %v15325_v24 = vld [vmem:[%s20403_s20 + $0x79] sm:$0xff]  ;;  %v17159_v43 = vpack.c.bf16 %v15357_v51, %v15357_v51  ;;  %v17160_v44 = vpack.c.bf16 %v15358_v5, %v15358_v5  ;;  %3939 = vst [vmem:[#allocation2 + $0x154] sm:$0xf] %v17144_v42 }
 0x284   : > { %v19828_v29 = vld [vmem:[#allocation2 + $0xb38] ss:$196 sps:$4 sm:$0xff]   ;;  %v17143_v34 = vpack.c.bf16 %v15325_v24, %v15325_v24  ;;  %v19843_v57 = vld [vmem:[%s23618_s1 + $0x980] sm:$0xff]  }
 0x285   : > { %v22051_v1 = vadd.f32 %v18118_v37, %v11684_v12  ;;  %4034 = vst [vmem:[#allocation2 + $0x94] sm:$0xf] %v17159_v43  ;;  %v19844_v37 = vld [vmem:[%s23618_s1 + $0xa78] sm:$0xff]   ;;  %v19833_v58 = vld [vmem:[#allocation2 + $0xb40] ss:$196 sps:$4 sm:$0xff]  }
 0x286   : > { %3938 = vst [vmem:[#allocation2 + $0x90] sm:$0xf] %v17143_v34  ;;  %v15389_v55 = vld [vmem:[%s20403_s20 + $0x7b] sm:$0xff]  ;;  %4035 = vst [vmem:[#allocation2 + $0x158] sm:$0xf] %v17160_v44  ;;  %18631 = vmatprep.subr.bf16.mxu0 %v19844_v37  ;;  %v19856_v37 = vld [vmem:[%s23618_s1 + $0xa30] sm:$0xff]  }
 0x287   : > { %12350 = vmatmul.mubr.bf16.gmra.mxu1 %v19821_v41  ;;  %v19835_v50 = vld [vmem:[#allocation2 + $0xb44] ss:$196 sps:$4 sm:$0xff]   ;;  %v15423_v51 = vld [vmem:[%s20403_s20 + $0x94] sm:$0xff] }
 0x288   : > { %v18135_v28 = vpop.f32.mrf.mxu0  ;;  %12357 = vmatprep.mubr.bf16.mxu1 %v19835_v50  ;;  %v17193_v43 = vpack.c.bf16 %v15423_v51, %v15423_v51 }
 0x289   : > { %v18199_v52 = vpop.f32.mrf.mxu1 }
 0x28a   : > { %v18136_v38 = vpop.f32.mrf.mxu0  ;;  %v19830_v19 = vld [vmem:[#allocation2 + $0xb3c] ss:$196 sps:$4 sm:$0xff]   ;;  %4228 = vst [vmem:[#allocation2 + $0x224] sm:$0xf] %v17193_v43  ;;  %v15332_v43 = vld [vmem:[%s20403_s20 + $0xc9] sm:$0xff] }
 0x28b   : > { %v18137_v3 = vadd.f32 %v18136_v38, %v18135_v28  ;;  %v18200_v15 = vpop.f32.mrf.mxu1  ;;  %12260 = vmatprep.mubr.bf16.mxu0 %v19830_v19  ;;  %v15390_v38 = vld [vmem:[%s20403_s20 + $0x83] sm:$0xff]  ;;  %v15391_v19 = vld [vmem:[%s20403_s20 + $0x93] sm:$0xff] }
 0x28c   : > { %v18138_v48 = vpop.f32.mrf.mxu0  ;;  %v18201_v0 = vadd.f32 %v18200_v15, %v18199_v52  ;;  %12261 = vmatmul.mubr.bf16.gmra.mxu0 %v19828_v29  ;;  %v17176_v63 = vpack.c.bf16 %v15390_v38, %v15390_v38  ;;  %v15422_v52 = vld [vmem:[%s20403_s20 + $0x84] sm:$0xff]  ;;  %v15359_v15 = vld [vmem:[%s20403_s20 + $0x92] sm:$0xff]  ;;  %v17177_v24 = vpack.c.bf16 %v15391_v19, %v15391_v19 }
 0x28d   : > { %v11819_v59 = vadd.f32 %v18137_v3, %v21868_v4  ;;  %v19837_v4 = vld [vmem:[%s23618_s1 + $0x9c8] sm:$0xff]   ;;  %v18202_v26 = vpop.f32.mrf.mxu1  ;;  %v17192_v9 = vpack.c.bf16 %v15422_v52, %v15422_v52  ;;  %v19848_v29 = vld [vmem:[%s23618_s1 + $0xa38] sm:$0xff]   ;;  %v19840_v42 = vld [vmem:[#allocation2 + $0x90] ss:$196 sps:$4 sm:$0xff]  }
 0x28e   : > { %v18139_v62 = vpop.f32.mrf.mxu0  ;;  %18579 = vmatprep.subr.bf16.mxu1 %v19837_v4  ;;  %4131 = vst [vmem:[#allocation2 + $0x15c] sm:$0xf] %v17176_v63  ;;  %v19842_v5 = vld [vmem:[#allocation2 + $0x94] ss:$196 sps:$4 sm:$0xff]   ;;  %4132 = vst [vmem:[#allocation2 + $0x220] sm:$0xf] %v17177_v24 }
 0x28f   : > { %v18140_v17 = vadd.f32 %v18139_v62, %v18138_v48  ;;  %v22071_v25 = vadd.f32 %v18201_v0, %v11819_v59  ;;  %18580 = vmatpush3.bf16.msra.mxu1 %v19838_v10  ;;  %v18203_v12 = vpop.f32.mrf.mxu1  ;;  %v17175_v48 = vpack.c.bf16 %v15389_v55, %v15389_v55  ;;  %v15421_v59 = vld [vmem:[%s20403_s20 + $0x7c] sm:$0xff]  ;;  %4227 = vst [vmem:[#allocation2 + $0x160] sm:$0xf] %v17192_v9  ;;  %v15329_v55 = vld [vmem:[%s20403_s20 + $0xa9] sm:$0xff]  ;;  %v15330_v38 = vld [vmem:[%s20403_s20 + $0xb1] sm:$0xff] }
 0x290   : > { %v18141_v18 = vpop.f32.mrf.mxu0  ;;  %v18204_v35 = vadd.f32 %v18203_v12, %v18202_v26  ;;  %18581 = vmatprep.subr.bf16.mxu1 %v19839_v11  ;;  %v17191_v23 = vpack.c.bf16 %v15421_v59, %v15421_v59  ;;  %12358 = vmatmul.mubr.bf16.gmra.mxu1 %v19833_v58  ;;  %v17146_v0 = vpack.c.bf16 %v15328_v20, %v15328_v20  ;;  %v15392_v11 = vld [vmem:[%s20403_s20 + $0x9b] sm:$0xff] }
 0x291   : > { %v11822_v7 = vadd.f32 %v18140_v17, %v21881_v45  ;;  %v18205_v28 = vpop.f32.mrf.mxu1  ;;  %4130 = vst [vmem:[#allocation2 + $0x98] sm:$0xf] %v17175_v48  ;;  %v17161_v10 = vpack.c.bf16 %v15359_v15, %v15359_v15  ;;  %v17178_v39 = vpack.c.bf16 %v15392_v11, %v15392_v11  ;;  %12398 = vmatprep.mubr.bf16.mxu0 %v19842_v5  ;;  %v15394_v15 = vld [vmem:[%s20403_s20 + $0xb3] sm:$0xff] }
 0x292   : > { %v18142_v46 = vpop.f32.mrf.mxu0  ;;  %4226 = vst [vmem:[#allocation2 + $0x9c] sm:$0xf] %v17191_v23  ;;  %3941 = vst [vmem:[#allocation2 + $0x2dc] sm:$0xf] %v17146_v0  ;;  %v17147_v48 = vpack.c.bf16 %v15329_v55, %v15329_v55  ;;  %v17148_v63 = vpack.c.bf16 %v15330_v38, %v15330_v38  ;;  %v15426_v19 = vld [vmem:[%s20403_s20 + $0xb4] sm:$0xff] }
 0x293   : > { %v18143_v16 = vadd.f32 %v18142_v46, %v18141_v18  ;;  %v22083_v32 = vadd.f32 %v18204_v35, %v11822_v7  ;;  %v18206_v41 = vpop.f32.mrf.mxu1  ;;  %18582 = vmatpush3.bf16.msra.mxu1 %v19843_v57  ;;  %v15360_v18 = vld [vmem:[%s20403_s20 + $0x9a] sm:$0xff]  ;;  %4036 = vst [vmem:[#allocation2 + $0x21c] sm:$0xf] %v17161_v10  ;;  %v19852_v57 = vld [vmem:[%s23618_s1 + $0xa70] sm:$0xff]   ;;  %4133 = vst [vmem:[#allocation2 + $0x2e4] sm:$0xf] %v17178_v39 }
 0x294   : > { %v18144_v45 = vpop.f32.mrf.mxu0  ;;  %v17162_v46 = vpack.c.bf16 %v15360_v18, %v15360_v18  ;;  %v15424_v35 = vld [vmem:[%s20403_s20 + $0x9c] sm:$0xff]  ;;  %12399 = vmatmul.mubr.bf16.vlgmr.msra.gmra.mxu0 %v19840_v42  ;;  %3942 = vst [vmem:[#allocation2 + $0x3a0] sm:$0xf] %v17147_v48  ;;  %3943 = vst [vmem:[#allocation2 + $0x464] sm:$0xf] %v17148_v63 }
 0x295   : > { %v11827_v40 = vadd.f32 %v18143_v16, %v21891_v56  ;;  %v18207_v56 = vadd.f32 %v18206_v41, %v18205_v28  ;;  %v18208_v61 = vpop.f32.mrf.mxu1  ;;  %v17194_v28 = vpack.c.bf16 %v15424_v35, %v15424_v35  ;;  %v15361_v41 = vld [vmem:[%s20403_s20 + $0xaa] sm:$0xff]  ;;  %18632 = vmatpush3.bf16.msra.mxu0 %v19848_v29  ;;  %v19868_v63 = vld [vmem:[%s23618_s1 + $0xa60] sm:$0xff]  }
 0x296   : > { %v18145_v22 = vpop.f32.mrf.mxu0  ;;  %4037 = vst [vmem:[#allocation2 + $0x2e0] sm:$0xf] %v17162_v46  ;;  %18633 = vmatprep.subr.bf16.mxu0 %v19852_v57  ;;  %v19864_v35 = vld [vmem:[%s23618_s1 + $0xa28] sm:$0xff]  }
 0x297   : > { %v18146_v3 = vadd.f32 %v18145_v22, %v18144_v45  ;;  %v22094_v62 = vadd.f32 %v18207_v56, %v11827_v40  ;;  %v18209_v17 = vpop.f32.mrf.mxu1  ;;  %4229 = vst [vmem:[#allocation2 + $0x2e8] sm:$0xf] %v17194_v28  ;;  %v15362_v56 = vld [vmem:[%s20403_s20 + $0xb2] sm:$0xff] }
 0x298   : > { %v18147_v53 = vpop.f32.mrf.mxu0  ;;  %v18210_v7 = vadd.f32 %v18209_v17, %v18208_v61  ;;  %v19845_v52 = vld [vmem:[#allocation2 + $0x98] ss:$196 sps:$4 sm:$0xff]  }
 0x299   : > { %v11830_v8 = vadd.f32 %v18146_v3, %v21905_v27  ;;  %v17145_v27 = vpack.c.bf16 %v15327_v13, %v15327_v13  ;;  %v19847_v9 = vld [vmem:[#allocation2 + $0x9c] ss:$196 sps:$4 sm:$0xff]   ;;  %18634 = vmatpush3.bf16.msra.mxu0 %v19856_v37 }
 0x29a   : > { %v18148_v31 = vpop.f32.mrf.mxu0  ;;  %12495 = vmatprep.mubr.bf16.mxu1 %v19847_v9  ;;  %v19853_v39 = vld [vmem:[#allocation2 + $0x220] ss:$196 sps:$4 sm:$0xff]  }
 0x29b   : > { %v18149_v4 = vadd.f32 %v18148_v31, %v18147_v53  ;;  %3940 = vst [vmem:[#allocation2 + $0x218] sm:$0xf] %v17145_v27  ;;  %v22108_v45 = vadd.f32 %v18210_v7, %v11830_v8  ;;  %v17163_v53 = vpack.c.bf16 %v15361_v41, %v15361_v41  ;;  %v17164_v8 = vpack.c.bf16 %v15362_v56, %v15362_v56  ;;  %v15393_v31 = vld [vmem:[%s20403_s20 + $0xab] sm:$0xff]  ;;  %v19857_v41 = vld [vmem:[#allocation2 + $0x3a0] ss:$196 sps:$4 sm:$0xff]  }
 0x29c   : > { %v18150_v26 = vpop.f32.mrf.mxu0  ;;  %v18211_v16 = vpop.f32.mrf.mxu1  ;;  %v17179_v17 = vpack.c.bf16 %v15393_v31, %v15393_v31  ;;  %v17180_v7 = vpack.c.bf16 %v15394_v15, %v15394_v15  ;;  %12496 = vmatmul.mubr.bf16.vlgmr.msra.gmra.mxu1 %v19845_v52  ;;  %v15395_v56 = vld [vmem:[%s20403_s20 + $0xc3] sm:$0xff] }
 0x29d   : > { %v11835_v12 = vadd.f32 %v18149_v4, %v21918_v47  ;;  %4038 = vst [vmem:[#allocation2 + $0x3a4] sm:$0xf] %v17163_v53  ;;  %4039 = vst [vmem:[#allocation2 + $0x468] sm:$0xf] %v17164_v8  ;;  %v15425_v4 = vld [vmem:[%s20403_s20 + $0xac] sm:$0xff]  ;;  %v17181_v52 = vpack.c.bf16 %v15395_v56, %v15395_v56  ;;  %v19872_v15 = vld [vmem:[%s23618_s1 + $0xa20] sm:$0xff]  }
 0x29e   : > { %v18151_v34 = vpop.f32.mrf.mxu0  ;;  %v18212_v47 = vpop.f32.mrf.mxu1  ;;  %v19851_v10 = vld [vmem:[#allocation2 + $0x21c] ss:$196 sps:$4 sm:$0xff]   ;;  %4134 = vst [vmem:[#allocation2 + $0x3a8] sm:$0xf] %v17179_v17  ;;  %4135 = vst [vmem:[#allocation2 + $0x46c] sm:$0xf] %v17180_v7 }
 0x29f   : > { %v18152_v44 = vadd.f32 %v18151_v34, %v18150_v26  ;;  %v18213_v40 = vadd.f32 %v18212_v47, %v18211_v16  ;;  %v17195_v26 = vpack.c.bf16 %v15425_v4, %v15425_v4  ;;  %12406 = vmatprep.mubr.bf16.mxu0 %v19851_v10  ;;  %v19855_v51 = vld [vmem:[#allocation2 + $0x224] ss:$196 sps:$4 sm:$0xff]   ;;  %4136 = vst [vmem:[#allocation2 + $0x530] sm:$0xf] %v17181_v52  ;;  %v19883_v52 = vld [vmem:[%s23618_s1 + $0xaf0] sm:$0xff]  }
 0x2a0   : > { %v18153_v22 = vpop.f32.mrf.mxu0  ;;  %v18214_v58 = vpop.f32.mrf.mxu1  ;;  %v15331_v34 = vld [vmem:[%s20403_s20 + $0xc1] sm:$0xff]  ;;  %12503 = vmatprep.mubr.bf16.mxu1 %v19855_v51  ;;  %v15396_v53 = vld [vmem:[%s20403_s20 + $0xcb] sm:$0xff]  ;;  %v19876_v51 = vld [vmem:[%s23618_s1 + $0xa58] sm:$0xff]  }
 0x2a1   : > { %v11838_v3 = vadd.f32 %v18152_v44, %v21927_v21  ;;  %v22121_v50 = vadd.f32 %v18213_v40, %v11835_v12  ;;  %v19860_v21 = vld [vmem:[%s23618_s1 + $0xa68] sm:$0xff]   ;;  %4230 = vst [vmem:[#allocation2 + $0x3ac] sm:$0xf] %v17195_v26  ;;  %v17149_v28 = vpack.c.bf16 %v15331_v34, %v15331_v34  ;;  %v17182_v8 = vpack.c.bf16 %v15396_v53, %v15396_v53 }
 0x2a2   : > { %v18154_v59 = vpop.f32.mrf.mxu0  ;;  %v18215_v61 = vpop.f32.mrf.mxu1  ;;  %v19849_v18 = vld [vmem:[#allocation2 + $0x218] ss:$196 sps:$4 sm:$0xff]   ;;  %18635 = vmatprep.subr.bf16.mxu0 %v19860_v21  ;;  %v15363_v47 = vld [vmem:[%s20403_s20 + $0xc2] sm:$0xff]  ;;  %v15364_v44 = vld [vmem:[%s20403_s20 + $0xca] sm:$0xff] }
 0x2a3   : > { %v18155_v23 = vadd.f32 %v18154_v59, %v18153_v22  ;;  %v18216_v13 = vadd.f32 %v18215_v61, %v18214_v58  ;;  %12407 = vmatmul.mubr.bf16.gmra.mxu0 %v19849_v18  ;;  %v17150_v22 = vpack.c.bf16 %v15332_v43, %v15332_v43  ;;  %v17165_v37 = vpack.c.bf16 %v15363_v47, %v15363_v47  ;;  %v15427_v61 = vld [vmem:[%s20403_s20 + $0xc4] sm:$0xff]  ;;  %v15365_v18 = vld [vmem:[%s20403_s20 + $0xda] sm:$0xff] }
 0x2a4   : > { %v18156_v20 = vpop.f32.mrf.mxu0  ;;  %v18217_v0 = vpop.f32.mrf.mxu1  ;;  %18636 = vmatpush3.bf16.msra.mxu0 %v19864_v35  ;;  %v17166_v55 = vpack.c.bf16 %v15364_v44, %v15364_v44  ;;  %3944 = vst [vmem:[#allocation2 + $0x528] sm:$0xf] %v17149_v28  ;;  %12504 = vmatmul.mubr.bf16.gmra.mxu1 %v19853_v39  ;;  %4137 = vst [vmem:[#allocation2 + $0x5f4] sm:$0xf] %v17182_v8  ;;  %v15397_v35 = vld [vmem:[%s20403_s20 + $0xdb] sm:$0xff]  ;;  %v15398_v34 = vld [vmem:[%s20403_s20 + $0xe3] sm:$0xff] }
 0x2a5   : > { %v11843_v27 = vadd.f32 %v18155_v23, %v21937_v30  ;;  %v22130_v29 = vadd.f32 %v18216_v13, %v11838_v3  ;;  %v17196_v30 = vpack.c.bf16 %v15426_v19, %v15426_v19  ;;  %3945 = vst [vmem:[#allocation2 + $0x5ec] sm:$0xf] %v17150_v22  ;;  %4040 = vst [vmem:[#allocation2 + $0x52c] sm:$0xf] %v17165_v37  ;;  %v15428_v23 = vld [vmem:[%s20403_s20 + $0xcc] sm:$0xff]  ;;  %18637 = vmatprep.subr.bf16.mxu0 %v19868_v63 }
 0x2a6   : > { %v18157_v46 = vpop.f32.mrf.mxu0  ;;  %v18218_v11 = vpop.f32.mrf.mxu1  ;;  %4041 = vst [vmem:[#allocation2 + $0x5f0] sm:$0xf] %v17166_v55  ;;  %v17197_v13 = vpack.c.bf16 %v15427_v61, %v15427_v61  ;;  %v19861_v7 = vld [vmem:[#allocation2 + $0x3a8] ss:$196 sps:$4 sm:$0xff]   ;;  %v17167_v19 = vpack.c.bf16 %v15365_v18, %v15365_v18  ;;  %v17183_v43 = vpack.c.bf16 %v15397_v35, %v15397_v35  ;;  %v17184_v28 = vpack.c.bf16 %v15398_v34, %v15398_v34  ;;  %v19880_v55 = vld [vmem:[%s23618_s1 + $0xa18] sm:$0xff]  }
 0x2a7   : > { %v18158_v12 = vadd.f32 %v18157_v46, %v18156_v20  ;;  %v18219_v16 = vadd.f32 %v18218_v11, %v18217_v0  ;;  %4231 = vst [vmem:[#allocation2 + $0x470] sm:$0xf] %v17196_v30  ;;  %v17198_v20 = vpack.c.bf16 %v15428_v23, %v15428_v23  ;;  %v15334_v0 = vld [vmem:[%s20403_s20 + $0xe1] sm:$0xff] }
 0x2a8   : > { %v18159_v24 = vpop.f32.mrf.mxu0  ;;  %v18220_v5 = vpop.f32.mrf.mxu1  ;;  %4232 = vst [vmem:[#allocation2 + $0x534] sm:$0xf] %v17197_v13  ;;  %18638 = vmatpush3.bf16.msra.mxu0 %v19872_v15  ;;  %v17152_v46 = vpack.c.bf16 %v15334_v0, %v15334_v0  ;;  %4042 = vst [vmem:[#allocation2 + $0x6b4] sm:$0xf] %v17167_v19  ;;  %v15367_v13 = vld [vmem:[%s20403_s20 + $0xf2] sm:$0xff] }
 0x2a9   : > { %v11846_v42 = vadd.f32 %v18158_v12, %v21948_v2  ;;  %v22141_v57 = vadd.f32 %v18219_v16, %v11843_v27  ;;  %v19859_v2 = vld [vmem:[#allocation2 + $0x3a4] ss:$196 sps:$4 sm:$0xff]   ;;  %v15333_v27 = vld [vmem:[%s20403_s20 + $0xd9] sm:$0xff]  ;;  %4233 = vst [vmem:[#allocation2 + $0x5f8] sm:$0xf] %v17198_v20  ;;  %18639 = vmatprep.subr.bf16.mxu0 %v19876_v51 }
 0x2aa   : > { %v18160_v40 = vpop.f32.mrf.mxu0  ;;  %v18221_v38 = vpop.f32.mrf.mxu1  ;;  %12414 = vmatprep.mubr.bf16.mxu0 %v19859_v2  ;;  %v17151_v26 = vpack.c.bf16 %v15333_v27, %v15333_v27  ;;  %v15366_v16 = vld [vmem:[%s20403_s20 + $0xe2] sm:$0xff]  ;;  %3947 = vst [vmem:[#allocation2 + $0x774] sm:$0xf] %v17152_v46  ;;  %4138 = vst [vmem:[#allocation2 + $0x6b8] sm:$0xf] %v17183_v43  ;;  %v19881_v2 = vld [vmem:[%s23618_s1 + $0xaf8] sm:$0xff]   ;;  %v17169_v27 = vpack.c.bf16 %v15367_v13, %v15367_v13 }
 0x2ab   : > { %v18222_v3 = vadd.f32 %v18221_v38, %v18220_v5  ;;  %v18161_v58 = vadd.f32 %v18160_v40, %v18159_v24  ;;  %12415 = vmatmul.mubr.bf16.gmra.mxu0 %v19857_v41  ;;  %v17168_v39 = vpack.c.bf16 %v15366_v16, %v15366_v16  ;;  %4139 = vst [vmem:[#allocation2 + $0x77c] sm:$0xf] %v17184_v28  ;;  %v19869_v56 = vld [vmem:[#allocation2 + $0x530] ss:$196 sps:$4 sm:$0xff]   ;;  %v19900_v13 = vld [vmem:[%s23618_s1 + $0xa48] sm:$0xff]  }
 0x2ac   : > { %v18162_v48 = vpop.f32.mrf.mxu0  ;;  %v18223_v59 = vpop.f32.mrf.mxu1  ;;  %3946 = vst [vmem:[#allocation2 + $0x6b0] sm:$0xf] %v17151_v26  ;;  %18640 = vmatpush3.bf16.msra.mxu0 %v19880_v55  ;;  %18695 = vmatprep.subr.bf16.mxu1 %v19881_v2  ;;  %4044 = vst [vmem:[#allocation2 + $0x83c] sm:$0xf] %v17169_v27  ;;  %v19888_v16 = vld [vmem:[%s23618_s1 + $0xa50] sm:$0xff]  }
 0x2ad   : > { %v22150_v9 = vadd.f32 %v18222_v3, %v11846_v42  ;;  %v11851_v21 = vadd.f32 %v18161_v58, %v21958_v33  ;;  %v19867_v40 = vld [vmem:[#allocation2 + $0x52c] ss:$196 sps:$4 sm:$0xff]   ;;  %4043 = vst [vmem:[#allocation2 + $0x778] sm:$0xf] %v17168_v39  ;;  %18641 = vmatprep.subr.bf16.mxu0 %v19888_v16 }
 0x2ae   : > { %v18163_v31 = vpop.f32.mrf.mxu0  ;;  %v18224_v17 = vpop.f32.mrf.mxu1  ;;  %v19863_v33 = vld [vmem:[#allocation2 + $0x3ac] ss:$196 sps:$4 sm:$0xff]   ;;  %12422 = vmatprep.mubr.bf16.mxu0 %v19867_v40 }
 0x2af   : > { %v18164_v4 = vadd.f32 %v18163_v31, %v18162_v48  ;;  %v18225_v10 = vadd.f32 %v18224_v17, %v18223_v59  ;;  %12511 = vmatprep.mubr.bf16.mxu1 %v19863_v33  ;;  %v15336_v31 = vld [vmem:[%s20403_s20 + $0xf9] sm:$0xff]  ;;  %v15337_v2 = vld [vmem:[%s20403_s20 + $0x109] sm:$0xff] }
 0x2b0   : > { %v18226_v12 = vpop.f32.mrf.mxu1  ;;  %v18165_v30 = vpop.f32.mrf.mxu0  ;;  %12512 = vmatmul.mubr.bf16.gmra.mxu1 %v19861_v7  ;;  %v19871_v53 = vld [vmem:[#allocation2 + $0x534] ss:$196 sps:$4 sm:$0xff]   ;;  %v19879_v33 = vld [vmem:[#allocation2 + $0x6bc] ss:$196 sps:$4 sm:$0xff]  }
 0x2b1   : > { %v11854_v11 = vadd.f32 %v18164_v4, %v21969_v6  ;;  %v22161_v24 = vadd.f32 %v18225_v10, %v11851_v21  ;;  %v19865_v6 = vld [vmem:[#allocation2 + $0x528] ss:$196 sps:$4 sm:$0xff]   ;;  %12519 = vmatprep.mubr.bf16.mxu1 %v19871_v53  ;;  %v15335_v21 = vld [vmem:[%s20403_s20 + $0xf1] sm:$0xff]  ;;  %v17154_v4 = vpack.c.bf16 %v15336_v31, %v15336_v31 }
 0x2b2   : > { %v18227_v42 = vpop.f32.mrf.mxu1  ;;  %v18166_v5 = vpop.f32.mrf.mxu0  ;;  %v17153_v17 = vpack.c.bf16 %v15335_v21, %v15335_v21  ;;  %v15399_v39 = vld [vmem:[%s20403_s20 + $0xf3] sm:$0xff] }
 0x2b3   : > { %v18228_v47 = vadd.f32 %v18227_v42, %v18226_v12  ;;  %v18167_v44 = vadd.f32 %v18166_v5, %v18165_v30  ;;  %12423 = vmatmul.mubr.bf16.gmra.mxu0 %v19865_v6  ;;  %v19873_v10 = vld [vmem:[#allocation2 + $0x6b0] ss:$196 sps:$4 sm:$0xff]   ;;  %3949 = vst [vmem:[#allocation2 + $0x8fc] sm:$0xf] %v17154_v4  ;;  %4622 = vst [vmem:[#allocation2 + $0x790] sm:$0xf] %v17154_v4  ;;  %v17185_v5 = vpack.c.bf16 %v15399_v39, %v15399_v39 }
 0x2b4   : > { %v18229_v22 = vpop.f32.mrf.mxu1  ;;  %v18168_v37 = vpop.f32.mrf.mxu0  ;;  %v19875_v15 = vld [vmem:[#allocation2 + $0x6b4] ss:$196 sps:$4 sm:$0xff]   ;;  %3948 = vst [vmem:[#allocation2 + $0x838] sm:$0xf] %v17153_v17  ;;  %4621 = vst [vmem:[#allocation2 + $0x6cc] sm:$0xf] %v17153_v17 }
 0x2b5   : > { %v22171_v38 = vadd.f32 %v18228_v47, %v11854_v11  ;;  %v11859_v41 = vadd.f32 %v18167_v44, %v21981_v49  ;;  %v19882_v49 = vld [vmem:[%s23618_s1 + $0xab8] sm:$0xff]   ;;  %12430 = vmatprep.mubr.bf16.mxu0 %v19875_v15  ;;  %v19887_v12 = vld [vmem:[%s23618_s1 + $0xab0] sm:$0xff]   ;;  %4140 = vst [vmem:[#allocation2 + $0x840] sm:$0xf] %v17185_v5  ;;  %v19893_v44 = vld [vmem:[%s23618_s1 + $0xae8] sm:$0xff]  }
 0x2b6   : > { %v18230_v3 = vpop.f32.mrf.mxu1  ;;  %v18169_v58 = vpop.f32.mrf.mxu0  ;;  %18696 = vmatpush3.bf16.msra.mxu1 %v19882_v49  ;;  %v19877_v34 = vld [vmem:[#allocation2 + $0x6b8] ss:$196 sps:$4 sm:$0xff]   ;;  %v15401_v15 = vld [vmem:[%s20403_s20 + $0x10b] sm:$0xff] }
 0x2b7   : > { %v18231_v48 = vadd.f32 %v18230_v3, %v18229_v22  ;;  %v18170_v63 = vadd.f32 %v18169_v58, %v18168_v37  ;;  %18697 = vmatprep.subr.bf16.mxu1 %v19883_v52  ;;  %v15400_v42 = vld [vmem:[%s20403_s20 + $0xfb] sm:$0xff]  ;;  %v19894_v37 = vld [vmem:[%s23618_s1 + $0xaa8] sm:$0xff]   ;;  %v15338_v58 = vld [vmem:[%s20403_s20 + $0x111] sm:$0xff] }
 0x2b8   : > { %v18232_v59 = vpop.f32.mrf.mxu1  ;;  %v18171_v23 = vpop.f32.mrf.mxu0  ;;  %12520 = vmatmul.mubr.bf16.gmra.mxu1 %v19869_v56  ;;  %v17186_v28 = vpack.c.bf16 %v15400_v42, %v15400_v42  ;;  %v15370_v56 = vld [vmem:[%s20403_s20 + $0x112] sm:$0xff]  ;;  %v17156_v53 = vpack.c.bf16 %v15338_v58, %v15338_v58  ;;  %v19899_v52 = vld [vmem:[%s23618_s1 + $0xaa0] sm:$0xff]  }
 0x2b9   : > { %v22183_v8 = vadd.f32 %v18231_v48, %v11859_v41  ;;  %v11862_v61 = vadd.f32 %v18170_v63, %v21988_v14  ;;  %v15368_v14 = vld [vmem:[%s20403_s20 + $0xfa] sm:$0xff]  ;;  %12527 = vmatprep.mubr.bf16.mxu1 %v19879_v33  ;;  %v17155_v48 = vpack.c.bf16 %v15337_v2, %v15337_v2  ;;  %v15369_v63 = vld [vmem:[%s20403_s20 + $0x10a] sm:$0xff] }
 0x2ba   : > { %v18233_v20 = vpop.f32.mrf.mxu1  ;;  %v18172_v18 = vpop.f32.mrf.mxu0  ;;  %v17170_v11 = vpack.c.bf16 %v15368_v14, %v15368_v14  ;;  %18698 = vmatpush3.bf16.msra.mxu1 %v19887_v12  ;;  %4141 = vst [vmem:[#allocation2 + $0x904] sm:$0xf] %v17186_v28  ;;  %v19895_v41 = vld [vmem:[%s23618_s1 + $0xae0] sm:$0xff]   ;;  %v17171_v49 = vpack.c.bf16 %v15369_v63, %v15369_v63  ;;  %3951 = vst [vmem:[#allocation2 + $0xa84] sm:$0xf] %v17156_v53  ;;  %v15402_v17 = vld [vmem:[%s20403_s20 + $0x113] sm:$0xff] }
 0x2bb   : > { %v18234_v0 = vadd.f32 %v18233_v20, %v18232_v59  ;;  %v18173_v7 = vadd.f32 %v18172_v18, %v18171_v23  ;;  %12431 = vmatmul.mubr.bf16.gmra.mxu0 %v19873_v10  ;;  %18699 = vmatprep.subr.bf16.mxu1 %v19893_v44  ;;  %v17172_v59 = vpack.c.bf16 %v15370_v56, %v15370_v56  ;;  %v19891_v18 = vld [vmem:[#allocation2 + $0x844] ss:$196 sps:$4 sm:$0xff]   ;;  %v19907_v39 = vld [vmem:[%s23618_s1 + $0xad0] sm:$0xff]  }
 0x2bc   : > { %v18235_v46 = vpop.f32.mrf.mxu1  ;;  %v18174_v19 = vpop.f32.mrf.mxu0  ;;  %4045 = vst [vmem:[#allocation2 + $0x900] sm:$0xf] %v17170_v11  ;;  %3950 = vst [vmem:[#allocation2 + $0x9c0] sm:$0xf] %v17155_v48  ;;  %v17187_v10 = vpack.c.bf16 %v15401_v15, %v15401_v15  ;;  %v19904_v14 = vld [vmem:[%s23618_s1 + $0xa08] sm:$0xff]   ;;  %v19905_v11 = vld [vmem:[%s23618_s1 + $0xad8] sm:$0xff]  }
 0x2bd   : > { %v22190_v26 = vadd.f32 %v18234_v0, %v11862_v61  ;;  %v11867_v30 = vadd.f32 %v18173_v7, %v22005_v54  ;;  %v19892_v54 = vld [vmem:[%s23618_s1 + $0xa10] sm:$0xff]   ;;  %v19884_v61 = vld [vmem:[#allocation2 + $0x838] ss:$196 sps:$4 sm:$0xff]   ;;  %4623 = vst [vmem:[#allocation2 + $0x854] sm:$0xf] %v17155_v48  ;;  %v17188_v7 = vpack.c.bf16 %v15402_v17, %v15402_v17  ;;  %v19912_v56 = vld [vmem:[%s23618_s1 + $0xa40] sm:$0xff]  }
 0x2be   : > { %v18236_v51 = vpop.f32.mrf.mxu1  ;;  %v18175_v35 = vpop.f32.mrf.mxu0  ;;  %18642 = vmatpush3.bf16.msra.mxu0 %v19892_v54  ;;  %18700 = vmatpush3.bf16.msra.mxu1 %v19894_v37  ;;  %4046 = vst [vmem:[#allocation2 + $0x9c4] sm:$0xf] %v17171_v49  ;;  %4047 = vst [vmem:[#allocation2 + $0xa88] sm:$0xf] %v17172_v59  ;;  %v15372_v37 = vld [vmem:[%s20403_s20 + $0x12a] sm:$0xff] }
 0x2bf   : > { %v18237_v6 = vadd.f32 %v18236_v51, %v18235_v46  ;;  %v18176_v43 = vadd.f32 %v18175_v35, %v18174_v19  ;;  %18701 = vmatprep.subr.bf16.mxu1 %v19895_v41  ;;  %4624 = vst [vmem:[#allocation2 + $0x918] sm:$0xf] %v17156_v53  ;;  %18643 = vmatprep.subr.bf16.mxu0 %v19900_v13  ;;  %4142 = vst [vmem:[#allocation2 + $0x9c8] sm:$0xf] %v17187_v10  ;;  %v19903_v63 = vld [vmem:[#allocation2 + $0x9cc] ss:$196 sps:$4 sm:$0xff]  }
 0x2c0   : > { %v18238_v47 = vpop.f32.mrf.mxu1  ;;  %12528 = vmatmul.mubr.bf16.gmra.mxu1 %v19877_v34  ;;  %4143 = vst [vmem:[#allocation2 + $0xa8c] sm:$0xf] %v17188_v7  ;;  %v17174_v41 = vpack.c.bf16 %v15372_v37, %v15372_v37  ;;  %v15403_v53 = vld [vmem:[%s20403_s20 + $0x123] sm:$0xff]  ;;  %v15404_v49 = vld [vmem:[%s20403_s20 + $0x12b] sm:$0xff]  ;;  %v19924_v37 = vld [vmem:[%s23618_s1 + $0xb78] sm:$0xff]  }
 0x2c1   : > { %v22207_v40 = vadd.f32 %v18237_v6, %v11867_v30  ;;  %v11870_v22 = vadd.f32 %v18176_v43, %v22018_v60  ;;  %v19889_v0 = vld [vmem:[#allocation2 + $0x840] ss:$196 sps:$4 sm:$0xff]   ;;  %12535 = vmatprep.mubr.bf16.mxu1 %v19891_v18  ;;  %v15340_v43 = vld [vmem:[%s20403_s20 + $0x129] sm:$0xff] }
 0x2c2   : > { %v18239_v55 = vpop.f32.mrf.mxu1  ;;  %18702 = vmatpush3.bf16.msra.mxu1 %v19899_v52  ;;  %18644 = vmatpush3.bf16.msra.mxu0 %v19904_v14  ;;  %v15339_v6 = vld [vmem:[%s20403_s20 + $0x121] sm:$0xff]  ;;  %v17158_v44 = vpack.c.bf16 %v15340_v43, %v15340_v43  ;;  %4049 = vst [vmem:[#allocation2 + $0xc10] sm:$0xf] %v17174_v41  ;;  %v15436_v13 = vld [vmem:[%s20403_s20 + $0x12c] sm:$0xff] }
 0x2c3   : > { %v18240_v3 = vadd.f32 %v18239_v55, %v18238_v47  ;;  %v19886_v23 = vld [vmem:[#allocation2 + $0x83c] ss:$196 sps:$4 sm:$0xff]   ;;  %18703 = vmatprep.subr.bf16.mxu1 %v19905_v11  ;;  %v17157_v47 = vpack.c.bf16 %v15339_v6, %v15339_v6  ;;  %v15435_v59 = vld [vmem:[%s20403_s20 + $0x124] sm:$0xff]  ;;  %18645 = vmatprep.subr.bf16.mxu0 %v19912_v56  ;;  %v17206_v17 = vpack.c.bf16 %v15436_v13, %v15436_v13 }
 0x2c4   : > { %v18177_v60 = vpop.f32.mrf.mxu0  ;;  %12438 = vmatprep.mubr.bf16.mxu0 %v19886_v23  ;;  %v19896_v34 = vld [vmem:[#allocation2 + $0x9c0] ss:$196 sps:$4 sm:$0xff]   ;;  %3953 = vst [vmem:[#allocation2 + $0xc0c] sm:$0xf] %v17158_v44  ;;  %4626 = vst [vmem:[#allocation2 + $0xaa0] sm:$0xf] %v17158_v44  ;;  %v17189_v23 = vpack.c.bf16 %v15403_v53, %v15403_v53 }
 0x2c5   : > { %v22223_v21 = vadd.f32 %v18240_v3, %v11870_v22  ;;  %12439 = vmatmul.mubr.bf16.gmra.mxu0 %v19884_v61  ;;  %v19898_v5 = vld [vmem:[#allocation2 + $0x9c4] ss:$196 sps:$4 sm:$0xff]   ;;  %3952 = vst [vmem:[#allocation2 + $0xb48] sm:$0xf] %v17157_v47  ;;  %4625 = vst [vmem:[#allocation2 + $0x9dc] sm:$0xf] %v17157_v47 }
 0x2c6   : > { %v18178_v31 = vpop.f32.mrf.mxu0  ;;  %v15371_v22 = vld [vmem:[%s20403_s20 + $0x122] sm:$0xff]  ;;  %12446 = vmatprep.mubr.bf16.mxu0 %v19898_v5  ;;  %4144 = vst [vmem:[#allocation2 + $0xb50] sm:$0xf] %v17189_v23  ;;  %4241 = vst [vmem:[#allocation2 + $0xc18] sm:$0xf] %v17206_v17 }
 0x2c7   : > { %v18179_v20 = vadd.f32 %v18178_v31, %v18177_v60  ;;  %v17173_v55 = vpack.c.bf16 %v15371_v22, %v15371_v22  ;;  %v19901_v58 = vld [vmem:[#allocation2 + $0x9c8] ss:$196 sps:$4 sm:$0xff]   ;;  %v17190_v31 = vpack.c.bf16 %v15404_v49, %v15404_v49  ;;  %v19923_v47 = vld [vmem:[%s23618_s1 + $0xa80] sm:$0xff]  }
 0x2c8   : > { %v18241_v4 = vpop.f32.mrf.mxu1  ;;  %v18180_v27 = vpop.f32.mrf.mxu0  ;;  %12536 = vmatmul.mubr.bf16.gmra.mxu1 %v19889_v0  ;;  %v19918_v7 = vld [vmem:[%s23618_s1 + $0xa88] sm:$0xff]  }
 0x2c9   : > { %v11875_v33 = vadd.f32 %v18179_v20, %v22043_v36  ;;  %v19906_v36 = vld [vmem:[%s23618_s1 + $0xa98] sm:$0xff]   ;;  %4048 = vst [vmem:[#allocation2 + $0xb4c] sm:$0xf] %v17173_v55  ;;  %12543 = vmatprep.mubr.bf16.mxu1 %v19903_v63  ;;  %v17205_v20 = vpack.c.bf16 %v15435_v59, %v15435_v59  ;;  %4145 = vst [vmem:[#allocation2 + $0xc14] sm:$0xf] %v17190_v31  ;;  %v15454_v11 = vld [vmem:[%s20403_s20 + $0x85] sm:$0xff] }
 0x2ca   : > { %v18242_v46 = vpop.f32.mrf.mxu1  ;;  %v18181_v19 = vpop.f32.mrf.mxu0  ;;  %18704 = vmatpush3.bf16.msra.mxu1 %v19906_v36  ;;  %v15486_v5 = vld [vmem:[%s20403_s20 + $0x86] sm:$0xff]  ;;  %v15551_v59 = vld [vmem:[%s20403_s20 + $0x91] sm:$0xff] }
 0x2cb   : > { %v18243_v12 = vadd.f32 %v18242_v46, %v18241_v4  ;;  %v18182_v30 = vadd.f32 %v18181_v19, %v18180_v27  ;;  %18705 = vmatprep.subr.bf16.mxu1 %v19907_v39  ;;  %v19916_v4 = vld [vmem:[%s23618_s1 + $0xa00] sm:$0xff]   ;;  %4240 = vst [vmem:[#allocation2 + $0xb54] sm:$0xf] %v17205_v20  ;;  %v17208_v39 = vpack.c.bf16 %v15454_v11, %v15454_v11  ;;  %v15455_v20 = vld [vmem:[%s20403_s20 + $0x95] sm:$0xff]  ;;  %v15521_v11 = vld [vmem:[%s20403_s20 + $0xa8] sm:$0xff] }
 0x2cc   : > { %v18244_v16 = vpop.f32.mrf.mxu1  ;;  %v18263_v54 = vpop.f32.mrf.mxu0  ;;  %18646 = vmatpush3.bf16.msra.mxu0 %v19916_v4  ;;  %v19919_v46 = vld [vmem:[%s23618_s1 + $0xac0] sm:$0xff]   ;;  %v19908_v36 = vld [vmem:[#allocation2 + $0xb48] ss:$196 sps:$4 sm:$0xff]   ;;  %v17255_v31 = vpack.c.bf16 %v15551_v59, %v15551_v59 }
 0x2cd   : > { %v22243_v51 = vadd.f32 %v18243_v12, %v11875_v33  ;;  %v11878_v35 = vadd.f32 %v18182_v30, %v22051_v1  ;;  %v19911_v1 = vld [vmem:[%s23618_s1 + $0xa90] sm:$0xff]   ;;  %12447 = vmatmul.mubr.bf16.gmra.mxu0 %v19896_v34  ;;  %v15453_v19 = vld [vmem:[%s20403_s20 + $0x7d] sm:$0xff]  ;;  %4323 = vst [vmem:[#allocation2 + $0x164] sm:$0xf] %v17208_v39  ;;  %18759 = vmatprep.subr.bf16.mxu0 %v19924_v37  ;;  %v19940_v59 = vld [vmem:[%s23618_s1 + $0xb68] sm:$0xff]  }
 0x2ce   : > { %v18245_v42 = vpop.f32.mrf.mxu1  ;;  %v18264_v3 = vpop.f32.mrf.mxu0  ;;  %18706 = vmatpush3.bf16.msra.mxu1 %v19911_v1  ;;  %v15519_v1 = vld [vmem:[%s20403_s20 + $0x90] sm:$0xff]  ;;  %v15456_v4 = vld [vmem:[%s20403_s20 + $0x9d] sm:$0xff]  ;;  %4613 = vst [vmem:[#allocation2 + $0xac] sm:$0xf] %v17255_v31 }
 0x2cf   : > { %v18246_v28 = vadd.f32 %v18245_v42, %v18244_v16  ;;  %v18265_v48 = vadd.f32 %v18264_v3, %v18263_v54  ;;  %v17207_v16 = vpack.c.bf16 %v15453_v19, %v15453_v19  ;;  %v15485_v42 = vld [vmem:[%s20403_s20 + $0x7e] sm:$0xff]  ;;  %v17224_v54 = vpack.c.bf16 %v15486_v5, %v15486_v5 }
 0x2d0   : > { %v18266_v60 = vpop.f32.mrf.mxu0  ;;  %12544 = vmatmul.mubr.bf16.gmra.mxu1 %v19901_v58  ;;  %v15520_v3 = vld [vmem:[%s20403_s20 + $0x98] sm:$0xff]  ;;  %v17239_v56 = vpack.c.bf16 %v15519_v1, %v15519_v1  ;;  %v19936_v1 = vld [vmem:[%s23618_s1 + $0xb30] sm:$0xff]  }
 0x2d1   : > { %v22253_v2 = vadd.f32 %v18246_v28, %v11878_v35  ;;  %v12013_v52 = vadd.f32 %v18265_v48, %v22071_v25  ;;  %v18327_v61 = vpop.f32.mrf.mxu1  ;;  %v19917_v25 = vld [vmem:[%s23618_s1 + $0xac8] sm:$0xff]   ;;  %4322 = vst [vmem:[#allocation2 + $0xa0] sm:$0xf] %v17207_v16  ;;  %v17223_v28 = vpack.c.bf16 %v15485_v42, %v15485_v42  ;;  %4419 = vst [vmem:[#allocation2 + $0x168] sm:$0xf] %v17224_v54  ;;  %v19928_v19 = vld [vmem:[%s23618_s1 + $0xb38] sm:$0xff]  }
 0x2d2   : > { %v18267_v15 = vpop.f32.mrf.mxu0  ;;  %18707 = vmatprep.subr.bf16.mxu1 %v19917_v25  ;;  %v19915_v63 = vld [vmem:[#allocation2 + $0xb54] ss:$196 sps:$4 sm:$0xff]   ;;  %4517 = vst [vmem:[#allocation2 + $0xa8] sm:$0xf] %v17239_v56  ;;  %v15488_v25 = vld [vmem:[%s20403_s20 + $0x9e] sm:$0xff] }
 0x2d3   : > { %v18328_v27 = vpop.f32.mrf.mxu1  ;;  %v18268_v0 = vadd.f32 %v18267_v15, %v18266_v60  ;;  %18708 = vmatpush3.bf16.msra.mxu1 %v19918_v7  ;;  %4418 = vst [vmem:[#allocation2 + $0xa4] sm:$0xf] %v17223_v28  ;;  %v17240_v60 = vpack.c.bf16 %v15520_v3, %v15520_v3  ;;  %12551 = vmatprep.mubr.bf16.mxu1 %v19915_v63  ;;  %v15554_v28 = vld [vmem:[%s20403_s20 + $0xb1] sm:$0xff] }
 0x2d4   : > { %v18329_v18 = vadd.f32 %v18328_v27, %v18327_v61  ;;  %v18269_v10 = vpop.f32.mrf.mxu0  ;;  %18709 = vmatprep.subr.bf16.mxu1 %v19919_v46  ;;  %v17209_v27 = vpack.c.bf16 %v15455_v20, %v15455_v20  ;;  %v15458_v3 = vld [vmem:[%s20403_s20 + $0xb5] sm:$0xff]  ;;  %v15523_v20 = vld [vmem:[%s20403_s20 + $0xc0] sm:$0xff] }
 0x2d5   : > { %v12016_v33 = vadd.f32 %v18268_v0, %v22083_v32  ;;  %v18330_v14 = vpop.f32.mrf.mxu1  ;;  %v19910_v32 = vld [vmem:[#allocation2 + $0xb4c] ss:$196 sps:$4 sm:$0xff]   ;;  %4518 = vst [vmem:[#allocation2 + $0x16c] sm:$0xf] %v17240_v60  ;;  %v15487_v0 = vld [vmem:[%s20403_s20 + $0x96] sm:$0xff]  ;;  %v17212_v60 = vpack.c.bf16 %v15458_v3, %v15458_v3 }
 0x2d6   : > { %v22278_v12 = vadd.f32 %v18329_v18, %v12013_v52  ;;  %v18270_v30 = vpop.f32.mrf.mxu0  ;;  %12454 = vmatprep.mubr.bf16.mxu0 %v19910_v32  ;;  %v15552_v52 = vld [vmem:[%s20403_s20 + $0x99] sm:$0xff]  ;;  %v17225_v7 = vpack.c.bf16 %v15487_v0, %v15487_v0  ;;  %4324 = vst [vmem:[#allocation2 + $0x228] sm:$0xf] %v17209_v27 }
 0x2d7   : > { %v18331_v35 = vpop.f32.mrf.mxu1  ;;  %v18271_v34 = vadd.f32 %v18270_v30, %v18269_v10  ;;  %12455 = vmatmul.mubr.bf16.gmra.mxu0 %v19908_v36  ;;  %18710 = vmatpush3.bf16.msra.mxu1 %v19923_v47  ;;  %v17256_v13 = vpack.c.bf16 %v15552_v52, %v15552_v52  ;;  %v17210_v10 = vpack.c.bf16 %v15456_v4, %v15456_v4  ;;  %v15522_v30 = vld [vmem:[%s20403_s20 + $0xb0] sm:$0xff] }
 0x2d8   : > { %v18332_v6 = vadd.f32 %v18331_v35, %v18330_v14  ;;  %v18272_v43 = vpop.f32.mrf.mxu0  ;;  %v15553_v36 = vld [vmem:[%s20403_s20 + $0xa9] sm:$0xff]  ;;  %v19920_v35 = vld [vmem:[#allocation2 + $0xa0] ss:$196 sps:$4 sm:$0xff]   ;;  %4420 = vst [vmem:[#allocation2 + $0x22c] sm:$0xf] %v17225_v7  ;;  %v17242_v32 = vpack.c.bf16 %v15522_v30, %v15522_v30 }
 0x2d9   : > { %v12021_v44 = vadd.f32 %v18271_v34, %v22094_v62  ;;  %v18333_v22 = vpop.f32.mrf.mxu1  ;;  %v19913_v62 = vld [vmem:[#allocation2 + $0xb50] ss:$196 sps:$4 sm:$0xff]   ;;  %4614 = vst [vmem:[#allocation2 + $0x170] sm:$0xf] %v17256_v13  ;;  %4325 = vst [vmem:[#allocation2 + $0x2ec] sm:$0xf] %v17210_v10  ;;  %v17241_v34 = vpack.c.bf16 %v15521_v11, %v15521_v11  ;;  %v17257_v42 = vpack.c.bf16 %v15553_v36, %v15553_v36 }
 0x2da   : > { %v22289_v55 = vadd.f32 %v18332_v6, %v12016_v33  ;;  %v18273_v41 = vpop.f32.mrf.mxu0  ;;  %12552 = vmatmul.mubr.bf16.gmra.mxu1 %v19913_v62  ;;  %v17226_v33 = vpack.c.bf16 %v15488_v25, %v15488_v25  ;;  %4520 = vst [vmem:[#allocation2 + $0x2f4] sm:$0xf] %v17242_v32  ;;  %v15490_v62 = vld [vmem:[%s20403_s20 + $0xb6] sm:$0xff]  ;;  %4327 = vst [vmem:[#allocation2 + $0x474] sm:$0xf] %v17212_v60  ;;  %v17243_v25 = vpack.c.bf16 %v15523_v20, %v15523_v20 }
 0x2db   : > { %v18334_v58 = vpop.f32.mrf.mxu1  ;;  %v18274_v48 = vadd.f32 %v18273_v41, %v18272_v43  ;;  %v19922_v43 = vld [vmem:[#allocation2 + $0xa4] ss:$196 sps:$4 sm:$0xff]   ;;  %4519 = vst [vmem:[#allocation2 + $0x230] sm:$0xf] %v17241_v34  ;;  %4615 = vst [vmem:[#allocation2 + $0x234] sm:$0xf] %v17257_v42 }
 0x2dc   : > { %v18335_v53 = vadd.f32 %v18334_v58, %v18333_v22  ;;  %4421 = vst [vmem:[#allocation2 + $0x2f0] sm:$0xf] %v17226_v33  ;;  %v15457_v22 = vld [vmem:[%s20403_s20 + $0xad] sm:$0xff]  ;;  %12592 = vmatprep.mubr.bf16.mxu0 %v19922_v43  ;;  %v15555_v33 = vld [vmem:[%s20403_s20 + $0xc1] sm:$0xff]  ;;  %4521 = vst [vmem:[#allocation2 + $0x3b8] sm:$0xf] %v17243_v25 }
 0x2dd   : > { %v18275_v49 = vpop.f32.mrf.mxu0  ;;  %v12024_v61 = vadd.f32 %v18274_v48, %v22108_v45  ;;  %v18336_v23 = vpop.f32.mrf.mxu1  ;;  %v17211_v58 = vpack.c.bf16 %v15457_v22, %v15457_v22  ;;  %v15489_v48 = vld [vmem:[%s20403_s20 + $0xae] sm:$0xff]  ;;  %v17259_v11 = vpack.c.bf16 %v15555_v33, %v15555_v33  ;;  %v15525_v60 = vld [vmem:[%s20403_s20 + $0xd8] sm:$0xff] }
 0x2de   : > { %v22297_v15 = vadd.f32 %v18335_v53, %v12021_v44  ;;  %v17258_v44 = vpack.c.bf16 %v15554_v28, %v15554_v28  ;;  %v17227_v53 = vpack.c.bf16 %v15489_v48, %v15489_v48 }
 0x2df   : > { %v18276_v17 = vpop.f32.mrf.mxu0  ;;  %v18337_v18 = vpop.f32.mrf.mxu1  ;;  %12593 = vmatmul.mubr.bf16.vlgmr.msra.gmra.mxu0 %v19920_v35  ;;  %4326 = vst [vmem:[#allocation2 + $0x3b0] sm:$0xf] %v17211_v58  ;;  %v15460_v35 = vld [vmem:[%s20403_s20 + $0xcd] sm:$0xff]  ;;  %4617 = vst [vmem:[#allocation2 + $0x3bc] sm:$0xf] %v17259_v11  ;;  %v15493_v11 = vld [vmem:[%s20403_s20 + $0xde] sm:$0xff] }
 0x2e0   : > { %v18277_v45 = vadd.f32 %v18276_v17, %v18275_v49  ;;  %v18338_v14 = vadd.f32 %v18337_v18, %v18336_v23  ;;  %4616 = vst [vmem:[#allocation2 + $0x2f8] sm:$0xf] %v17258_v44  ;;  %v17228_v49 = vpack.c.bf16 %v15490_v62, %v15490_v62  ;;  %v19925_v23 = vld [vmem:[#allocation2 + $0xa8] ss:$196 sps:$4 sm:$0xff]   ;;  %18760 = vmatpush3.bf16.msra.mxu0 %v19928_v19  ;;  %4422 = vst [vmem:[#allocation2 + $0x3b4] sm:$0xf] %v17227_v53 }
 0x2e1   : > { %v18278_v46 = vpop.f32.mrf.mxu0  ;;  %v18339_v39 = vpop.f32.mrf.mxu1  ;;  %v19927_v13 = vld [vmem:[#allocation2 + $0xac] ss:$196 sps:$4 sm:$0xff]   ;;  %v17214_v43 = vpack.c.bf16 %v15460_v35, %v15460_v35  ;;  %v19948_v62 = vld [vmem:[%s23618_s1 + $0xb60] sm:$0xff]   ;;  %v19956_v35 = vld [vmem:[%s23618_s1 + $0xb58] sm:$0xff]  }
 0x2e2   : > { %v12029_v16 = vadd.f32 %v18277_v45, %v22121_v50  ;;  %v22309_v5 = vadd.f32 %v18338_v14, %v12024_v61  ;;  %v19932_v50 = vld [vmem:[%s23618_s1 + $0xb70] sm:$0xff]   ;;  %4423 = vst [vmem:[#allocation2 + $0x478] sm:$0xf] %v17228_v49  ;;  %v15524_v17 = vld [vmem:[%s20403_s20 + $0xc8] sm:$0xff]  ;;  %12689 = vmatprep.mubr.bf16.mxu1 %v19927_v13  ;;  %v15526_v53 = vld [vmem:[%s20403_s20 + $0xe0] sm:$0xff] }
 0x2e3   : > { %v18279_v6 = vpop.f32.mrf.mxu0  ;;  %v18340_v54 = vpop.f32.mrf.mxu1  ;;  %18761 = vmatprep.subr.bf16.mxu0 %v19932_v50  ;;  %v19929_v0 = vld [vmem:[#allocation2 + $0x228] ss:$196 sps:$4 sm:$0xff]   ;;  %v17244_v18 = vpack.c.bf16 %v15524_v17, %v15524_v17  ;;  %12690 = vmatmul.mubr.bf16.vlgmr.msra.gmra.mxu1 %v19925_v23  ;;  %4329 = vst [vmem:[#allocation2 + $0x5fc] sm:$0xf] %v17214_v43  ;;  %5002 = vst [vmem:[#allocation2 + $0x490] sm:$0xf] %v17214_v43  ;;  %v17245_v23 = vpack.c.bf16 %v15525_v60, %v15525_v60 }
 0x2e4   : > { %v18280_v47 = vadd.f32 %v18279_v6, %v18278_v46  ;;  %v18341_v37 = vadd.f32 %v18340_v54, %v18339_v39  ;;  %v19931_v7 = vld [vmem:[#allocation2 + $0x22c] ss:$196 sps:$4 sm:$0xff]   ;;  %18762 = vmatpush3.bf16.msra.mxu0 %v19936_v1  ;;  %v15557_v49 = vld [vmem:[%s20403_s20 + $0xd9] sm:$0xff] }
 0x2e5   : > { %v18281_v41 = vpop.f32.mrf.mxu0  ;;  %v18342_v56 = vpop.f32.mrf.mxu1  ;;  %v15556_v14 = vld [vmem:[%s20403_s20 + $0xc9] sm:$0xff]  ;;  %4522 = vst [vmem:[#allocation2 + $0x47c] sm:$0xf] %v17244_v18  ;;  %12600 = vmatprep.mubr.bf16.mxu0 %v19931_v7  ;;  %18763 = vmatprep.subr.bf16.mxu0 %v19940_v59  ;;  %v17261_v13 = vpack.c.bf16 %v15557_v49, %v15557_v49  ;;  %4523 = vst [vmem:[#allocation2 + $0x540] sm:$0xf] %v17245_v23  ;;  %v19962_v60 = vld [vmem:[%s23618_s1 + $0xbb8] sm:$0xff]  }
 0x2e6   : > { %v12032_v63 = vadd.f32 %v18280_v47, %v22130_v29  ;;  %v22326_v52 = vadd.f32 %v18341_v37, %v12029_v16  ;;  %v17260_v30 = vpack.c.bf16 %v15556_v14, %v15556_v14  ;;  %v15459_v39 = vld [vmem:[%s20403_s20 + $0xc5] sm:$0xff]  ;;  %v15492_v50 = vld [vmem:[%s20403_s20 + $0xce] sm:$0xff]  ;;  %v15464_v23 = vld [vmem:[%s20403_s20 + $0xfd] sm:$0xff] }
 0x2e7   : > { %v18282_v61 = vpop.f32.mrf.mxu0  ;;  %v18343_v31 = vpop.f32.mrf.mxu1  ;;  %v19935_v42 = vld [vmem:[#allocation2 + $0x234] ss:$196 sps:$4 sm:$0xff]   ;;  %v17213_v6 = vpack.c.bf16 %v15459_v39, %v15459_v39  ;;  %12601 = vmatmul.mubr.bf16.gmra.mxu0 %v19929_v0  ;;  %v15491_v47 = vld [vmem:[%s20403_s20 + $0xc6] sm:$0xff]  ;;  %v17230_v1 = vpack.c.bf16 %v15492_v50, %v15492_v50  ;;  %4619 = vst [vmem:[#allocation2 + $0x544] sm:$0xf] %v17261_v13 }
 0x2e8   : > { %v18283_v29 = vadd.f32 %v18282_v61, %v18281_v41  ;;  %v18344_v4 = vadd.f32 %v18343_v31, %v18342_v56  ;;  %4618 = vst [vmem:[#allocation2 + $0x480] sm:$0xf] %v17260_v30  ;;  %v19933_v37 = vld [vmem:[#allocation2 + $0x230] ss:$196 sps:$4 sm:$0xff]   ;;  %12697 = vmatprep.mubr.bf16.mxu1 %v19935_v42  ;;  %v17229_v41 = vpack.c.bf16 %v15491_v47, %v15491_v47  ;;  %v15462_v0 = vld [vmem:[%s20403_s20 + $0xe5] sm:$0xff] }
 0x2e9   : > { %v18284_v27 = vpop.f32.mrf.mxu0  ;;  %v18345_v10 = vpop.f32.mrf.mxu1  ;;  %4328 = vst [vmem:[#allocation2 + $0x538] sm:$0xf] %v17213_v6  ;;  %5001 = vst [vmem:[#allocation2 + $0x3cc] sm:$0xf] %v17213_v6  ;;  %v19939_v48 = vld [vmem:[#allocation2 + $0x3b4] ss:$196 sps:$4 sm:$0xff]   ;;  %v17246_v31 = vpack.c.bf16 %v15526_v53, %v15526_v53 }
 0x2ea   : > { %v12037_v45 = vadd.f32 %v18283_v29, %v22141_v57  ;;  %v22333_v46 = vadd.f32 %v18344_v4, %v12032_v63  ;;  %v19944_v57 = vld [vmem:[%s23618_s1 + $0xb28] sm:$0xff]   ;;  %4424 = vst [vmem:[#allocation2 + $0x53c] sm:$0xf] %v17229_v41  ;;  %4425 = vst [vmem:[#allocation2 + $0x600] sm:$0xf] %v17230_v1  ;;  %12608 = vmatprep.mubr.bf16.mxu0 %v19939_v48  ;;  %v19952_v4 = vld [vmem:[%s23618_s1 + $0xb20] sm:$0xff]  }
 0x2eb   : > { %v18285_v19 = vpop.f32.mrf.mxu0  ;;  %v18346_v36 = vpop.f32.mrf.mxu1  ;;  %18764 = vmatpush3.bf16.msra.mxu0 %v19944_v57  ;;  %v15558_v29 = vld [vmem:[%s20403_s20 + $0xe1] sm:$0xff]  ;;  %12698 = vmatmul.mubr.bf16.gmra.mxu1 %v19933_v37  ;;  %4524 = vst [vmem:[#allocation2 + $0x604] sm:$0xf] %v17246_v31  ;;  %v17231_v57 = vpack.c.bf16 %v15493_v11, %v15493_v11  ;;  %v15527_v42 = vld [vmem:[%s20403_s20 + $0xf0] sm:$0xff]  ;;  %v15528_v6 = vld [vmem:[%s20403_s20 + $0xf8] sm:$0xff] }
 0x2ec   : > { %v18286_v16 = vadd.f32 %v18285_v19, %v18284_v27  ;;  %v18347_v34 = vadd.f32 %v18346_v36, %v18345_v10  ;;  %18765 = vmatprep.subr.bf16.mxu0 %v19948_v62  ;;  %v17262_v17 = vpack.c.bf16 %v15558_v29, %v15558_v29  ;;  %v15461_v27 = vld [vmem:[%s20403_s20 + $0xdd] sm:$0xff]  ;;  %v17216_v10 = vpack.c.bf16 %v15462_v0, %v15462_v0  ;;  %v15494_v30 = vld [vmem:[%s20403_s20 + $0xe6] sm:$0xff] }
 0x2ed   : > { %v18287_v32 = vpop.f32.mrf.mxu0  ;;  %v18348_v54 = vpop.f32.mrf.mxu1  ;;  %v19941_v14 = vld [vmem:[#allocation2 + $0x3b8] ss:$196 sps:$4 sm:$0xff]   ;;  %v17232_v39 = vpack.c.bf16 %v15494_v30, %v15494_v30  ;;  %4426 = vst [vmem:[#allocation2 + $0x6c4] sm:$0xf] %v17231_v57  ;;  %v17248_v47 = vpack.c.bf16 %v15528_v6, %v15528_v6  ;;  %v19968_v57 = vld [vmem:[%s23618_s1 + $0xb50] sm:$0xff]  }
 0x2ee   : > { %v12040_v28 = vadd.f32 %v18286_v16, %v22150_v9  ;;  %v22343_v44 = vadd.f32 %v18347_v34, %v12037_v45  ;;  %v19937_v9 = vld [vmem:[#allocation2 + $0x3b0] ss:$196 sps:$4 sm:$0xff]   ;;  %v17215_v45 = vpack.c.bf16 %v15461_v27, %v15461_v27  ;;  %4620 = vst [vmem:[#allocation2 + $0x608] sm:$0xf] %v17262_v17  ;;  %4331 = vst [vmem:[#allocation2 + $0x784] sm:$0xf] %v17216_v10 }
 0x2ef   : > { %v18288_v22 = vpop.f32.mrf.mxu0  ;;  %v18349_v3 = vpop.f32.mrf.mxu1  ;;  %v19943_v19 = vld [vmem:[#allocation2 + $0x3bc] ss:$196 sps:$4 sm:$0xff]   ;;  %18766 = vmatpush3.bf16.msra.mxu0 %v19952_v4  ;;  %5004 = vst [vmem:[#allocation2 + $0x618] sm:$0xf] %v17216_v10  ;;  %4427 = vst [vmem:[#allocation2 + $0x788] sm:$0xf] %v17232_v39  ;;  %v17218_v17 = vpack.c.bf16 %v15464_v23, %v15464_v23 }
 0x2f0   : > { %v18289_v58 = vadd.f32 %v18288_v22, %v18287_v32  ;;  %v18350_v63 = vadd.f32 %v18349_v3, %v18348_v54  ;;  %12609 = vmatmul.mubr.bf16.gmra.mxu0 %v19937_v9  ;;  %4330 = vst [vmem:[#allocation2 + $0x6c0] sm:$0xf] %v17215_v45  ;;  %5003 = vst [vmem:[#allocation2 + $0x554] sm:$0xf] %v17215_v45  ;;  %12705 = vmatprep.mubr.bf16.mxu1 %v19943_v19  ;;  %v19960_v41 = vld [vmem:[%s23618_s1 + $0xb18] sm:$0xff]   ;;  %v15529_v39 = vld [vmem:[%s20403_s20 + $0x108] sm:$0xff] }
 0x2f1   : > { %v18290_v56 = vpop.f32.mrf.mxu0  ;;  %v18351_v61 = vpop.f32.mrf.mxu1  ;;  %18767 = vmatprep.subr.bf16.mxu0 %v19956_v35  ;;  %v17247_v54 = vpack.c.bf16 %v15527_v42, %v15527_v42  ;;  %v19947_v37 = vld [vmem:[#allocation2 + $0x53c] ss:$196 sps:$4 sm:$0xff]   ;;  %4526 = vst [vmem:[#allocation2 + $0x78c] sm:$0xf] %v17248_v47  ;;  %4333 = vst [vmem:[#allocation2 + $0x90c] sm:$0xf] %v17218_v17 }
 0x2f2   : > { %v12045_v59 = vadd.f32 %v18289_v58, %v22161_v24  ;;  %v22358_v25 = vadd.f32 %v18350_v63, %v12040_v28  ;;  %v19945_v28 = vld [vmem:[#allocation2 + $0x538] ss:$196 sps:$4 sm:$0xff]   ;;  %12616 = vmatprep.mubr.bf16.mxu0 %v19947_v37  ;;  %v19949_v13 = vld [vmem:[#allocation2 + $0x540] ss:$196 sps:$4 sm:$0xff]   ;;  %5006 = vst [vmem:[#allocation2 + $0x7a0] sm:$0xf] %v17218_v17 }
 0x2f3   : > { %v18291_v20 = vpop.f32.mrf.mxu0  ;;  %v18352_v24 = vpop.f32.mrf.mxu1  ;;  %4525 = vst [vmem:[#allocation2 + $0x6c8] sm:$0xf] %v17247_v54  ;;  %v19961_v58 = vld [vmem:[%s23618_s1 + $0xbf8] sm:$0xff]   ;;  %12706 = vmatmul.mubr.bf16.gmra.mxu1 %v19941_v14  ;;  %18768 = vmatpush3.bf16.msra.mxu0 %v19960_v41  ;;  %v19959_v14 = vld [vmem:[#allocation2 + $0x6cc] ss:$196 sps:$4 sm:$0xff]  }
 0x2f4   : > { %v18292_v18 = vadd.f32 %v18291_v20, %v18290_v56  ;;  %v18353_v7 = vadd.f32 %v18352_v24, %v18351_v61  ;;  %18823 = vmatprep.subr.bf16.mxu1 %v19961_v58  ;;  %v15463_v61 = vld [vmem:[%s20403_s20 + $0xf5] sm:$0xff]  ;;  %v15496_v0 = vld [vmem:[%s20403_s20 + $0xfe] sm:$0xff]  ;;  %18769 = vmatprep.subr.bf16.mxu0 %v19968_v57  ;;  %v19973_v47 = vld [vmem:[%s23618_s1 + $0xbe8] sm:$0xff]  }
 0x2f5   : > { %v18293_v33 = vpop.f32.mrf.mxu0  ;;  %v18354_v16 = vpop.f32.mrf.mxu1  ;;  %v19951_v56 = vld [vmem:[#allocation2 + $0x544] ss:$196 sps:$4 sm:$0xff]   ;;  %18824 = vmatpush3.bf16.msra.mxu1 %v19962_v60  ;;  %v17217_v20 = vpack.c.bf16 %v15463_v61, %v15463_v61  ;;  %v15495_v27 = vld [vmem:[%s20403_s20 + $0xf6] sm:$0xff]  ;;  %v15465_v58 = vld [vmem:[%s20403_s20 + $0x10d] sm:$0xff] }
 0x2f6   : > { %v12048_v36 = vadd.f32 %v18292_v18, %v22171_v38  ;;  %v22366_v34 = vadd.f32 %v18353_v7, %v12045_v59  ;;  %12713 = vmatprep.mubr.bf16.mxu1 %v19951_v56  ;;  %v19963_v59 = vld [vmem:[%s23618_s1 + $0xbf0] sm:$0xff]   ;;  %v17233_v10 = vpack.c.bf16 %v15495_v27, %v15495_v27  ;;  %v17234_v7 = vpack.c.bf16 %v15496_v0, %v15496_v0  ;;  %v19980_v17 = vld [vmem:[%s23618_s1 + $0xb48] sm:$0xff]  }
 0x2f7   : > { %v18294_v32 = vpop.f32.mrf.mxu0  ;;  %v18355_v43 = vpop.f32.mrf.mxu1  ;;  %18825 = vmatprep.subr.bf16.mxu1 %v19963_v59  ;;  %v19953_v45 = vld [vmem:[#allocation2 + $0x6c0] ss:$196 sps:$4 sm:$0xff]   ;;  %4332 = vst [vmem:[#allocation2 + $0x848] sm:$0xf] %v17217_v20  ;;  %5005 = vst [vmem:[#allocation2 + $0x6dc] sm:$0xf] %v17217_v20  ;;  %v17219_v60 = vpack.c.bf16 %v15465_v58, %v15465_v58 }
 0x2f8   : > { %v18295_v38 = vadd.f32 %v18294_v32, %v18293_v33  ;;  %v18356_v50 = vadd.f32 %v18355_v43, %v18354_v16  ;;  %12617 = vmatmul.mubr.bf16.gmra.mxu0 %v19945_v28  ;;  %4428 = vst [vmem:[#allocation2 + $0x84c] sm:$0xf] %v17233_v10  ;;  %4429 = vst [vmem:[#allocation2 + $0x910] sm:$0xf] %v17234_v7  ;;  %v15530_v35 = vld [vmem:[%s20403_s20 + $0x110] sm:$0xff]  ;;  %v17249_v43 = vpack.c.bf16 %v15529_v39, %v15529_v39  ;;  %v15532_v10 = vld [vmem:[%s20403_s20 + $0x128] sm:$0xff] }
 0x2f9   : > { %v18296_v22 = vpop.f32.mrf.mxu0  ;;  %v18357_v3 = vpop.f32.mrf.mxu1  ;;  %v19972_v28 = vld [vmem:[%s23618_s1 + $0xb10] sm:$0xff]   ;;  %4334 = vst [vmem:[#allocation2 + $0x9d0] sm:$0xf] %v17219_v60  ;;  %5007 = vst [vmem:[#allocation2 + $0x864] sm:$0xf] %v17219_v60 }
 0x2fa   : > { %v12053_v1 = vadd.f32 %v18295_v38, %v22183_v8  ;;  %v22377_v9 = vadd.f32 %v18356_v50, %v12048_v36  ;;  %v19967_v36 = vld [vmem:[%s23618_s1 + $0xbb0] sm:$0xff]   ;;  %v19957_v6 = vld [vmem:[#allocation2 + $0x6c8] ss:$196 sps:$4 sm:$0xff]   ;;  %v17250_v38 = vpack.c.bf16 %v15530_v35, %v15530_v35  ;;  %4527 = vst [vmem:[#allocation2 + $0x850] sm:$0xf] %v17249_v43  ;;  %18770 = vmatpush3.bf16.msra.mxu0 %v19972_v28 }
 0x2fb   : > { %v18297_v48 = vpop.f32.mrf.mxu0  ;;  %v18358_v62 = vpop.f32.mrf.mxu1  ;;  %12714 = vmatmul.mubr.bf16.gmra.mxu1 %v19949_v13  ;;  %v15498_v59 = vld [vmem:[%s20403_s20 + $0x116] sm:$0xff]  ;;  %v19979_v13 = vld [vmem:[%s23618_s1 + $0xba0] sm:$0xff]   ;;  %18771 = vmatprep.subr.bf16.mxu0 %v19980_v17 }
 0x2fc   : > { %v18298_v63 = vadd.f32 %v18297_v48, %v18296_v22  ;;  %v18359_v8 = vadd.f32 %v18358_v62, %v18357_v3  ;;  %12721 = vmatprep.mubr.bf16.mxu1 %v19959_v14  ;;  %18826 = vmatpush3.bf16.msra.mxu1 %v19967_v36  ;;  %4528 = vst [vmem:[#allocation2 + $0x914] sm:$0xf] %v17250_v38  ;;  %v19974_v22 = vld [vmem:[%s23618_s1 + $0xba8] sm:$0xff]   ;;  %v15466_v48 = vld [vmem:[%s20403_s20 + $0x115] sm:$0xff] }
 0x2fd   : > { %v18360_v49 = vpop.f32.mrf.mxu1  ;;  %v18299_v29 = vpop.f32.mrf.mxu0  ;;  %18827 = vmatprep.subr.bf16.mxu1 %v19973_v47  ;;  %v15497_v62 = vld [vmem:[%s20403_s20 + $0x10e] sm:$0xff]  ;;  %v15499_v43 = vld [vmem:[%s20403_s20 + $0x126] sm:$0xff]  ;;  %v19983_v60 = vld [vmem:[#allocation2 + $0x9dc] ss:$196 sps:$4 sm:$0xff]  }
 0x2fe   : > { %v12056_v53 = vadd.f32 %v18298_v63, %v22190_v26  ;;  %v22388_v31 = vadd.f32 %v18359_v8, %v12053_v1  ;;  %v19955_v26 = vld [vmem:[#allocation2 + $0x6c4] ss:$196 sps:$4 sm:$0xff]   ;;  %v19987_v35 = vld [vmem:[%s23618_s1 + $0xbd0] sm:$0xff]   ;;  %v17237_v47 = vpack.c.bf16 %v15499_v43, %v15499_v43 }
 0x2ff   : > { %v18361_v4 = vpop.f32.mrf.mxu1  ;;  %v18300_v18 = vpop.f32.mrf.mxu0  ;;  %12624 = vmatprep.mubr.bf16.mxu0 %v19955_v26  ;;  %v19975_v1 = vld [vmem:[%s23618_s1 + $0xbe0] sm:$0xff]   ;;  %v19964_v8 = vld [vmem:[#allocation2 + $0x848] ss:$196 sps:$4 sm:$0xff]  }
 0x300   : > { %v18362_v24 = vadd.f32 %v18361_v4, %v18360_v49  ;;  %v18301_v33 = vadd.f32 %v18300_v18, %v18299_v29  ;;  %12625 = vmatmul.mubr.bf16.gmra.mxu0 %v19953_v45  ;;  %18828 = vmatpush3.bf16.msra.mxu1 %v19974_v22  ;;  %v17235_v49 = vpack.c.bf16 %v15497_v62, %v15497_v62  ;;  %v15531_v4 = vld [vmem:[%s20403_s20 + $0x120] sm:$0xff]  ;;  %v19971_v45 = vld [vmem:[#allocation2 + $0x854] ss:$196 sps:$4 sm:$0xff]   ;;  %v19984_v14 = vld [vmem:[%s23618_s1 + $0xb08] sm:$0xff]  }
 0x301   : > { %v18363_v11 = vpop.f32.mrf.mxu1  ;;  %v18302_v30 = vpop.f32.mrf.mxu0  ;;  %18829 = vmatprep.subr.bf16.mxu1 %v19975_v1  ;;  %v17236_v29 = vpack.c.bf16 %v15498_v59, %v15498_v59  ;;  %v17251_v0 = vpack.c.bf16 %v15531_v4, %v15531_v4  ;;  %18772 = vmatpush3.bf16.msra.mxu0 %v19984_v14  ;;  %4432 = vst [vmem:[#allocation2 + $0xb5c] sm:$0xf] %v17237_v47  ;;  %v19992_v62 = vld [vmem:[%s23618_s1 + $0xb40] sm:$0xff]  }
 0x302   : > { %v22392_v19 = vadd.f32 %v18362_v24, %v12056_v53  ;;  %v12061_v16 = vadd.f32 %v18301_v33, %v22207_v40  ;;  %v17220_v53 = vpack.c.bf16 %v15466_v48, %v15466_v48  ;;  %4430 = vst [vmem:[#allocation2 + $0x9d4] sm:$0xf] %v17235_v49  ;;  %v17252_v33 = vpack.c.bf16 %v15532_v10, %v15532_v10  ;;  %v15534_v59 = vld [vmem:[%s20403_s20 + $0x140] sm:$0xff] }
 0x303   : > { %v18364_v32 = vpop.f32.mrf.mxu1  ;;  %v18303_v42 = vpop.f32.mrf.mxu0  ;;  %12722 = vmatmul.mubr.bf16.gmra.mxu1 %v19957_v6  ;;  %v19969_v27 = vld [vmem:[#allocation2 + $0x850] ss:$196 sps:$4 sm:$0xff]   ;;  %4431 = vst [vmem:[#allocation2 + $0xa98] sm:$0xf] %v17236_v29  ;;  %4529 = vst [vmem:[#allocation2 + $0x9d8] sm:$0xf] %v17251_v0  ;;  %18773 = vmatprep.subr.bf16.mxu0 %v19992_v62 }
 0x304   : > { %v18365_v54 = vadd.f32 %v18364_v32, %v18363_v11  ;;  %v18304_v40 = vadd.f32 %v18303_v42, %v18302_v30  ;;  %4335 = vst [vmem:[#allocation2 + $0xa94] sm:$0xf] %v17220_v53  ;;  %5008 = vst [vmem:[#allocation2 + $0x928] sm:$0xf] %v17220_v53  ;;  %18830 = vmatpush3.bf16.msra.mxu1 %v19979_v13  ;;  %12729 = vmatprep.mubr.bf16.mxu1 %v19971_v45  ;;  %v15467_v42 = vld [vmem:[%s20403_s20 + $0x125] sm:$0xff]  ;;  %v15468_v6 = vld [vmem:[%s20403_s20 + $0x12d] sm:$0xff] }
 0x305   : > { %v18366_v50 = vpop.f32.mrf.mxu1  ;;  %4530 = vst [vmem:[#allocation2 + $0xa9c] sm:$0xf] %v17252_v33  ;;  %v15566_v29 = vld [vmem:[%s20403_s20 + $0x141] sm:$0xff] }
 0x306   : > { %v22412_v37 = vadd.f32 %v18365_v54, %v12061_v16  ;;  %v12064_v41 = vadd.f32 %v18304_v40, %v22223_v21  ;;  %v19966_v21 = vld [vmem:[#allocation2 + $0x84c] ss:$196 sps:$4 sm:$0xff]   ;;  %v19986_v16 = vld [vmem:[%s23618_s1 + $0xb98] sm:$0xff]   ;;  %v17221_v40 = vpack.c.bf16 %v15467_v42, %v15467_v42  ;;  %v17270_v4 = vpack.c.bf16 %v15566_v29, %v15566_v29  ;;  %v20003_v47 = vld [vmem:[%s23618_s1 + $0xb80] sm:$0xff]  }
 0x307   : > { %v18367_v3 = vpop.f32.mrf.mxu1  ;;  %12632 = vmatprep.mubr.bf16.mxu0 %v19966_v21  ;;  %v19998_v45 = vld [vmem:[%s23618_s1 + $0xb88] sm:$0xff]  }
 0x308   : > { %v18368_v56 = vadd.f32 %v18367_v3, %v18366_v50  ;;  %12633 = vmatmul.mubr.bf16.gmra.mxu0 %v19964_v8  ;;  %4336 = vst [vmem:[#allocation2 + $0xb58] sm:$0xf] %v17221_v40  ;;  %v19991_v3 = vld [vmem:[%s23618_s1 + $0xb90] sm:$0xff]   ;;  %5009 = vst [vmem:[#allocation2 + $0x9ec] sm:$0xf] %v17221_v40 }
 0x309   : > { %4628 = vst [vmem:[#allocation2 + $0xc28] sm:$0xf] %v17270_v4 }
 0x30a   : > { %v18305_v63 = vpop.f32.mrf.mxu0  ;;  %v22422_v61 = vadd.f32 %v18368_v56, %v12064_v41  ;;  %v19978_v54 = vld [vmem:[#allocation2 + $0x9d4] ss:$196 sps:$4 sm:$0xff]  }
 0x30b   : > { %12730 = vmatmul.mubr.bf16.gmra.mxu1 %v19969_v27  ;;  %v19976_v28 = vld [vmem:[#allocation2 + $0x9d0] ss:$196 sps:$4 sm:$0xff]   ;;  %12640 = vmatprep.mubr.bf16.mxu0 %v19978_v54 }
 0x30c   : > { %v18306_v23 = vpop.f32.mrf.mxu0  ;;  %v15500_v41 = vld [vmem:[%s20403_s20 + $0x12e] sm:$0xff]  ;;  %v19981_v8 = vld [vmem:[#allocation2 + $0x9d8] ss:$196 sps:$4 sm:$0xff]   ;;  %12737 = vmatprep.mubr.bf16.mxu1 %v19983_v60 }
 0x30d   : > { %v18307_v20 = vadd.f32 %v18306_v23, %v18305_v63  ;;  %v17238_v1 = vpack.c.bf16 %v15500_v41, %v15500_v41  ;;  %v15533_v63 = vld [vmem:[%s20403_s20 + $0x138] sm:$0xff] }
 0x30e   : > { %v18308_v26 = vpop.f32.mrf.mxu0  ;;  %v18369_v18 = vpop.f32.mrf.mxu1  ;;  %v17253_v53 = vpack.c.bf16 %v15533_v63, %v15533_v63  ;;  %v15565_v23 = vld [vmem:[%s20403_s20 + $0x139] sm:$0xff] }
 0x30f   : > { %v12069_v24 = vadd.f32 %v18307_v20, %v22243_v51  ;;  %v19985_v51 = vld [vmem:[%s23618_s1 + $0xbd8] sm:$0xff]   ;;  %4433 = vst [vmem:[#allocation2 + $0xc20] sm:$0xf] %v17238_v1  ;;  %v17254_v20 = vpack.c.bf16 %v15534_v59, %v15534_v59  ;;  %v17269_v17 = vpack.c.bf16 %v15565_v23, %v15565_v23 }
 0x310   : > { %v18309_v7 = vpop.f32.mrf.mxu0  ;;  %v18370_v11 = vpop.f32.mrf.mxu1  ;;  %18831 = vmatprep.subr.bf16.mxu1 %v19985_v51  ;;  %12641 = vmatmul.mubr.bf16.gmra.mxu0 %v19976_v28  ;;  %4531 = vst [vmem:[#allocation2 + $0xb60] sm:$0xf] %v17253_v53  ;;  %v15584_v51 = vld [vmem:[%s20403_s20 + $0x9a] sm:$0xff] }
 0x311   : > { %v18310_v30 = vadd.f32 %v18309_v7, %v18308_v26  ;;  %v18371_v36 = vadd.f32 %v18370_v11, %v18369_v18  ;;  %18832 = vmatpush3.bf16.msra.mxu1 %v19986_v16  ;;  %v19996_v26 = vld [vmem:[%s23618_s1 + $0xb00] sm:$0xff]   ;;  %4532 = vst [vmem:[#allocation2 + $0xc24] sm:$0xf] %v17254_v20  ;;  %4627 = vst [vmem:[#allocation2 + $0xb64] sm:$0xf] %v17269_v17  ;;  %v17272_v42 = vpack.c.bf16 %v15584_v51, %v15584_v51  ;;  %v22493_v41 = vld [vmem:[%s23618_s1 + $0xc38] sm:$0xff]  }
 0x312   : > { %v18372_v39 = vpop.f32.mrf.mxu1  ;;  %18833 = vmatprep.subr.bf16.mxu1 %v19987_v35  ;;  %v18391_v22 = vpop.f32.mrf.mxu0  ;;  %18774 = vmatpush3.bf16.msra.mxu0 %v19996_v26  ;;  %v19999_v11 = vld [vmem:[%s23618_s1 + $0xbc0] sm:$0xff]   ;;  %v15647_v1 = vld [vmem:[%s20403_s20 + $0x94] sm:$0xff] }
 0x313   : > { %v12072_v57 = vadd.f32 %v18310_v30, %v22253_v2  ;;  %v22446_v32 = vadd.f32 %v18371_v36, %v12069_v24  ;;  %v17222_v2 = vpack.c.bf16 %v15468_v6, %v15468_v6  ;;  %12738 = vmatmul.mubr.bf16.gmra.mxu1 %v19981_v8  ;;  %v19997_v24 = vld [vmem:[%s23618_s1 + $0xbc8] sm:$0xff]   ;;  %v15583_v30 = vld [vmem:[%s20403_s20 + $0x92] sm:$0xff]  ;;  %v15616_v28 = vld [vmem:[%s20403_s20 + $0x9b] sm:$0xff]  ;;  %4710 = vst [vmem:[#allocation2 + $0x174] sm:$0xf] %v17272_v42 }
 0x314   : > { %v18373_v38 = vpop.f32.mrf.mxu1  ;;  %v18392_v48 = vpop.f32.mrf.mxu0  ;;  %v17271_v35 = vpack.c.bf16 %v15583_v30, %v15583_v30  ;;  %v17303_v63 = vpack.c.bf16 %v15647_v1, %v15647_v1  ;;  %18935 = vmatprep.subr.bf16.mxu0 %v22493_v41  ;;  %v15648_v60 = vld [vmem:[%s20403_s20 + $0x9c] sm:$0xff]  ;;  %v15586_v20 = vld [vmem:[%s20403_s20 + $0xb2] sm:$0xff] }
 0x315   : > { %v18374_v50 = vadd.f32 %v18373_v38, %v18372_v39  ;;  %4337 = vst [vmem:[#allocation2 + $0xc1c] sm:$0xf] %v17222_v2  ;;  %5010 = vst [vmem:[#allocation2 + $0xab0] sm:$0xf] %v17222_v2  ;;  %v18393_v56 = vadd.f32 %v18392_v48, %v18391_v22  ;;  %18834 = vmatpush3.bf16.msra.mxu1 %v19991_v3  ;;  %v15615_v38 = vld [vmem:[%s20403_s20 + $0x93] sm:$0xff]  ;;  %v17288_v2 = vpack.c.bf16 %v15616_v28, %v15616_v28  ;;  %v15680_v23 = vld [vmem:[%s20403_s20 + $0x9d] sm:$0xff] }
 0x316   : > { %v18455_v49 = vpop.f32.mrf.mxu1  ;;  %v18394_v21 = vpop.f32.mrf.mxu0  ;;  %18835 = vmatprep.subr.bf16.mxu1 %v19997_v24  ;;  %v19990_v39 = vld [vmem:[#allocation2 + $0xb5c] ss:$196 sps:$4 sm:$0xff]   ;;  %4709 = vst [vmem:[#allocation2 + $0xb0] sm:$0xf] %v17271_v35  ;;  %v17287_v40 = vpack.c.bf16 %v15615_v38, %v15615_v38  ;;  %v17304_v59 = vpack.c.bf16 %v15648_v60, %v15648_v60  ;;  %4901 = vst [vmem:[#allocation2 + $0xb8] sm:$0xf] %v17303_v63  ;;  %v17320_v26 = vpack.c.bf16 %v15680_v23, %v15680_v23 }
 0x317   : > { %v22455_v58 = vadd.f32 %v18374_v50, %v12072_v57  ;;  %v12207_v13 = vadd.f32 %v18393_v56, %v22278_v12  ;;  %12648 = vmatprep.mubr.bf16.mxu0 %v19990_v39  ;;  %4806 = vst [vmem:[#allocation2 + $0x178] sm:$0xf] %v17288_v2  ;;  %v15679_v53 = vld [vmem:[%s20403_s20 + $0x95] sm:$0xff]  ;;  %v15617_v24 = vld [vmem:[%s20403_s20 + $0xab] sm:$0xff]  ;;  %v15619_v28 = vld [vmem:[%s20403_s20 + $0xc3] sm:$0xff] }
 0x318   : > { %v18456_v27 = vpop.f32.mrf.mxu1  ;;  %v18395_v0 = vpop.f32.mrf.mxu0  ;;  %v19993_v62 = vld [vmem:[#allocation2 + $0xb60] ss:$196 sps:$4 sm:$0xff]   ;;  %4805 = vst [vmem:[#allocation2 + $0xb4] sm:$0xf] %v17287_v40  ;;  %v17319_v29 = vpack.c.bf16 %v15679_v53, %v15679_v53  ;;  %4902 = vst [vmem:[#allocation2 + $0x17c] sm:$0xf] %v17304_v59 }
 0x319   : > { %v18457_v18 = vadd.f32 %v18456_v27, %v18455_v49  ;;  %v18396_v12 = vadd.f32 %v18395_v0, %v18394_v21  ;;  %18836 = vmatpush3.bf16.msra.mxu1 %v19998_v45  ;;  %v19995_v8 = vld [vmem:[#allocation2 + $0xb64] ss:$196 sps:$4 sm:$0xff]   ;;  %v17274_v0 = vpack.c.bf16 %v15586_v20, %v15586_v20  ;;  %4998 = vst [vmem:[#allocation2 + $0x180] sm:$0xf] %v17320_v26  ;;  %v15650_v30 = vld [vmem:[%s20403_s20 + $0xb4] sm:$0xff] }
 0x31a   : > { %v18458_v10 = vpop.f32.mrf.mxu1  ;;  %18837 = vmatprep.subr.bf16.mxu1 %v19999_v11  ;;  %12745 = vmatprep.mubr.bf16.mxu1 %v19995_v8  ;;  %4997 = vst [vmem:[#allocation2 + $0xbc] sm:$0xf] %v17319_v29  ;;  %v17306_v35 = vpack.c.bf16 %v15650_v30, %v15650_v30  ;;  %v15588_v38 = vld [vmem:[%s20403_s20 + $0xca] sm:$0xff]  ;;  %v15589_v29 = vld [vmem:[%s20403_s20 + $0xda] sm:$0xff] }
 0x31b   : > { %v18397_v7 = vpop.f32.mrf.mxu0  ;;  %v22474_v33 = vadd.f32 %v18457_v18, %v12207_v13  ;;  %v12210_v14 = vadd.f32 %v18396_v12, %v22289_v55  ;;  %v15585_v13 = vld [vmem:[%s20403_s20 + $0xaa] sm:$0xff]  ;;  %v15618_v18 = vld [vmem:[%s20403_s20 + $0xb3] sm:$0xff]  ;;  %12746 = vmatmul.mubr.bf16.gmra.mxu1 %v19993_v62  ;;  %4712 = vst [vmem:[#allocation2 + $0x2fc] sm:$0xf] %v17274_v0  ;;  %v17276_v2 = vpack.c.bf16 %v15588_v38, %v15588_v38  ;;  %v15653_v38 = vld [vmem:[%s20403_s20 + $0xdc] sm:$0xff] }
 0x31c   : > { %v18459_v36 = vpop.f32.mrf.mxu1  ;;  %v19988_v57 = vld [vmem:[#allocation2 + $0xb58] ss:$196 sps:$4 sm:$0xff]   ;;  %v17273_v27 = vpack.c.bf16 %v15585_v13, %v15585_v13  ;;  %4904 = vst [vmem:[#allocation2 + $0x304] sm:$0xf] %v17306_v35  ;;  %v15620_v62 = vld [vmem:[%s20403_s20 + $0xcb] sm:$0xff]  ;;  %v15590_v13 = vld [vmem:[%s20403_s20 + $0xe2] sm:$0xff] }
 0x31d   : > { %v18398_v16 = vpop.f32.mrf.mxu0  ;;  %v18460_v6 = vadd.f32 %v18459_v36, %v18458_v10  ;;  %12649 = vmatmul.mubr.bf16.gmra.mxu0 %v19988_v57  ;;  %18838 = vmatpush3.bf16.msra.mxu1 %v20003_v47  ;;  %v17289_v10 = vpack.c.bf16 %v15617_v24, %v15617_v24  ;;  %v15681_v36 = vld [vmem:[%s20403_s20 + $0xad] sm:$0xff]  ;;  %v17291_v47 = vpack.c.bf16 %v15619_v28, %v15619_v28  ;;  %v15622_v0 = vld [vmem:[%s20403_s20 + $0xe3] sm:$0xff] }
 0x31e   : > { %v18399_v43 = vadd.f32 %v18398_v16, %v18397_v7  ;;  %v18461_v55 = vpop.f32.mrf.mxu1  ;;  %v17290_v7 = vpack.c.bf16 %v15618_v18, %v15618_v18  ;;  %4711 = vst [vmem:[#allocation2 + $0x238] sm:$0xf] %v17273_v27  ;;  %v15682_v16 = vld [vmem:[%s20403_s20 + $0xb5] sm:$0xff]  ;;  %v17321_v42 = vpack.c.bf16 %v15681_v36, %v15681_v36  ;;  %4714 = vst [vmem:[#allocation2 + $0x484] sm:$0xf] %v17276_v2  ;;  %v15654_v28 = vld [vmem:[%s20403_s20 + $0xe4] sm:$0xff] }
 0x31f   : > { %v18400_v54 = vpop.f32.mrf.mxu0  ;;  %v22487_v50 = vadd.f32 %v18460_v6, %v12210_v14  ;;  %v15649_v14 = vld [vmem:[%s20403_s20 + $0xac] sm:$0xff]  ;;  %4807 = vst [vmem:[#allocation2 + $0x23c] sm:$0xf] %v17289_v10  ;;  %v17322_v6 = vpack.c.bf16 %v15682_v16, %v15682_v16  ;;  %v17292_v8 = vpack.c.bf16 %v15620_v62, %v15620_v62  ;;  %4809 = vst [vmem:[#allocation2 + $0x3c4] sm:$0xf] %v17291_v47  ;;  %v15621_v27 = vld [vmem:[%s20403_s20 + $0xdb] sm:$0xff] }
 0x320   : > { %v12215_v22 = vadd.f32 %v18399_v43, %v22297_v15  ;;  %v18462_v3 = vpop.f32.mrf.mxu1  ;;  %v17305_v51 = vpack.c.bf16 %v15649_v14, %v15649_v14  ;;  %4808 = vst [vmem:[#allocation2 + $0x300] sm:$0xf] %v17290_v7  ;;  %v15587_v43 = vld [vmem:[%s20403_s20 + $0xc2] sm:$0xff]  ;;  %4999 = vst [vmem:[#allocation2 + $0x244] sm:$0xf] %v17321_v42  ;;  %v17278_v26 = vpack.c.bf16 %v15590_v13, %v15590_v13  ;;  %v15592_v62 = vld [vmem:[%s20403_s20 + $0xfa] sm:$0xff] }
 0x321   : > { %v18401_v48 = vpop.f32.mrf.mxu0  ;;  %v18463_v56 = vadd.f32 %v18462_v3, %v18461_v55  ;;  %v17275_v40 = vpack.c.bf16 %v15587_v43, %v15587_v43  ;;  %5000 = vst [vmem:[#allocation2 + $0x308] sm:$0xf] %v17322_v6  ;;  %4810 = vst [vmem:[#allocation2 + $0x488] sm:$0xf] %v17292_v8  ;;  %v17293_v10 = vpack.c.bf16 %v15621_v27, %v15621_v27  ;;  %v20025_v42 = vld [vmem:[%s23618_s1 + $0xc20] sm:$0xff]   ;;  %v20032_v27 = vld [vmem:[%s23618_s1 + $0xc18] sm:$0xff]  }
 0x322   : > { %v18402_v15 = vadd.f32 %v18401_v48, %v18400_v54  ;;  %v18464_v49 = vpop.f32.mrf.mxu1  ;;  %v20000_v54 = vld [vmem:[#allocation2 + $0xb0] ss:$196 sps:$4 sm:$0xff]   ;;  %4903 = vst [vmem:[#allocation2 + $0x240] sm:$0xf] %v17305_v51  ;;  %v17294_v7 = vpack.c.bf16 %v15622_v0, %v15622_v0  ;;  %4716 = vst [vmem:[#allocation2 + $0x60c] sm:$0xf] %v17278_v26 }
 0x323   : > { %v18403_v21 = vpop.f32.mrf.mxu0  ;;  %v22502_v17 = vadd.f32 %v18463_v56, %v12215_v22  ;;  %v20002_v48 = vld [vmem:[#allocation2 + $0xb4] ss:$196 sps:$4 sm:$0xff]   ;;  %4713 = vst [vmem:[#allocation2 + $0x3c0] sm:$0xf] %v17275_v40  ;;  %4811 = vst [vmem:[#allocation2 + $0x54c] sm:$0xf] %v17293_v10 }
 0x324   : > { %v12218_v4 = vadd.f32 %v18402_v15, %v22309_v5  ;;  %v18465_v12 = vpop.f32.mrf.mxu1  ;;  %v20011_v15 = vld [vmem:[%s23618_s1 + $0xc30] sm:$0xff]   ;;  %12786 = vmatprep.mubr.bf16.mxu0 %v20002_v48  ;;  %4812 = vst [vmem:[#allocation2 + $0x610] sm:$0xf] %v17294_v7 }
 0x325   : > { %v18404_v45 = vpop.f32.mrf.mxu0  ;;  %v18466_v11 = vadd.f32 %v18465_v12, %v18464_v49  ;;  %v15652_v49 = vld [vmem:[%s20403_s20 + $0xcc] sm:$0xff]  ;;  %12787 = vmatmul.mubr.bf16.vlgmr.msra.gmra.mxu0 %v20000_v54  ;;  %v20005_v12 = vld [vmem:[#allocation2 + $0xb8] ss:$196 sps:$4 sm:$0xff]  }
 0x326   : > { %v18405_v5 = vadd.f32 %v18404_v45, %v18403_v21  ;;  %v18467_v57 = vpop.f32.mrf.mxu1  ;;  %v17308_v20 = vpack.c.bf16 %v15652_v49, %v15652_v49  ;;  %v20007_v45 = vld [vmem:[#allocation2 + $0xbc] ss:$196 sps:$4 sm:$0xff]   ;;  %18936 = vmatpush3.bf16.msra.mxu0 %v22493_v41  ;;  %v15655_v0 = vld [vmem:[%s20403_s20 + $0xf4] sm:$0xff] }
 0x327   : > { %v18406_v39 = vpop.f32.mrf.mxu0  ;;  %v22514_v55 = vadd.f32 %v18466_v11, %v12218_v4  ;;  %v17277_v4 = vpack.c.bf16 %v15589_v29, %v15589_v29  ;;  %18937 = vmatprep.subr.bf16.mxu0 %v20011_v15  ;;  %v20018_v11 = vld [vmem:[%s23618_s1 + $0xc28] sm:$0xff]   ;;  %12883 = vmatprep.mubr.bf16.mxu1 %v20007_v45  ;;  %v20010_v51 = vld [vmem:[#allocation2 + $0x23c] ss:$196 sps:$4 sm:$0xff]   ;;  %v17311_v10 = vpack.c.bf16 %v15655_v0, %v15655_v0 }
 0x328   : > { %v12223_v22 = vadd.f32 %v18405_v5, %v22326_v52  ;;  %v18468_v1 = vpop.f32.mrf.mxu1  ;;  %v15651_v52 = vld [vmem:[%s20403_s20 + $0xc4] sm:$0xff]  ;;  %4906 = vst [vmem:[#allocation2 + $0x48c] sm:$0xf] %v17308_v20  ;;  %12884 = vmatmul.mubr.bf16.vlgmr.msra.gmra.mxu1 %v20005_v12  ;;  %v20008_v16 = vld [vmem:[#allocation2 + $0x238] ss:$196 sps:$4 sm:$0xff]   ;;  %12794 = vmatprep.mubr.bf16.mxu0 %v20010_v51 }
 0x329   : > { %v18407_v3 = vpop.f32.mrf.mxu0  ;;  %v18469_v63 = vadd.f32 %v18468_v1, %v18467_v57  ;;  %v17307_v21 = vpack.c.bf16 %v15651_v52, %v15651_v52  ;;  %4715 = vst [vmem:[#allocation2 + $0x548] sm:$0xf] %v17277_v4  ;;  %v20014_v35 = vld [vmem:[#allocation2 + $0x244] ss:$196 sps:$4 sm:$0xff]   ;;  %v17310_v1 = vpack.c.bf16 %v15654_v28, %v15654_v28  ;;  %v20021_v52 = vld [vmem:[#allocation2 + $0x3cc] ss:$196 sps:$4 sm:$0xff]  }
 0x32a   : > { %v18408_v56 = vadd.f32 %v18407_v3, %v18406_v39  ;;  %v18470_v60 = vpop.f32.mrf.mxu1  ;;  %18938 = vmatpush3.bf16.msra.mxu0 %v20011_v15  ;;  %v20012_v2 = vld [vmem:[#allocation2 + $0x240] ss:$196 sps:$4 sm:$0xff]   ;;  %12891 = vmatprep.mubr.bf16.mxu1 %v20014_v35  ;;  %4909 = vst [vmem:[#allocation2 + $0x6d8] sm:$0xf] %v17311_v10 }
 0x32b   : > { %v18409_v53 = vpop.f32.mrf.mxu0  ;;  %v22523_v59 = vadd.f32 %v18469_v63, %v12223_v22  ;;  %4905 = vst [vmem:[#allocation2 + $0x3c8] sm:$0xf] %v17307_v21  ;;  %18939 = vmatprep.subr.bf16.mxu0 %v20018_v11  ;;  %v20017_v47 = vld [vmem:[#allocation2 + $0x3c4] ss:$196 sps:$4 sm:$0xff]   ;;  %v17309_v22 = vpack.c.bf16 %v15653_v38, %v15653_v38  ;;  %4908 = vst [vmem:[#allocation2 + $0x614] sm:$0xf] %v17310_v1 }
 0x32c   : > { %v12226_v23 = vadd.f32 %v18408_v56, %v22333_v46  ;;  %v18471_v24 = vpop.f32.mrf.mxu1  ;;  %v15623_v56 = vld [vmem:[%s20403_s20 + $0xf3] sm:$0xff]  ;;  %v20015_v21 = vld [vmem:[#allocation2 + $0x3c0] ss:$196 sps:$4 sm:$0xff]  }
 0x32d   : > { %v18410_v18 = vpop.f32.mrf.mxu0  ;;  %v18472_v14 = vadd.f32 %v18471_v24, %v18470_v60  ;;  %12795 = vmatmul.mubr.bf16.gmra.mxu0 %v20008_v16  ;;  %4907 = vst [vmem:[#allocation2 + $0x550] sm:$0xf] %v17309_v22  ;;  %v17280_v60 = vpack.c.bf16 %v15592_v62, %v15592_v62  ;;  %v20024_v13 = vld [vmem:[#allocation2 + $0x54c] ss:$196 sps:$4 sm:$0xff]   ;;  %v15624_v20 = vld [vmem:[%s20403_s20 + $0xfb] sm:$0xff] }
 0x32e   : > { %v18411_v46 = vadd.f32 %v18410_v18, %v18409_v53  ;;  %v18473_v5 = vpop.f32.mrf.mxu1  ;;  %12802 = vmatprep.mubr.bf16.mxu0 %v20017_v47  ;;  %18940 = vmatpush3.bf16.msra.mxu0 %v20018_v11  ;;  %v17295_v53 = vpack.c.bf16 %v15623_v56, %v15623_v56  ;;  %v17296_v26 = vpack.c.bf16 %v15624_v20, %v15624_v20  ;;  %v15656_v45 = vld [vmem:[%s20403_s20 + $0xfc] sm:$0xff]  ;;  %v15594_v11 = vld [vmem:[%s20403_s20 + $0x112] sm:$0xff]  ;;  %v20046_v20 = vld [vmem:[%s23618_s1 + $0xc08] sm:$0xff]  }
 0x32f   : > { %v18412_v30 = vpop.f32.mrf.mxu0  ;;  %v22534_v41 = vadd.f32 %v18472_v14, %v12226_v23  ;;  %18941 = vmatprep.subr.bf16.mxu0 %v20025_v42  ;;  %4718 = vst [vmem:[#allocation2 + $0x794] sm:$0xf] %v17280_v60  ;;  %v15626_v16 = vld [vmem:[%s20403_s20 + $0x113] sm:$0xff]  ;;  %v15595_v1 = vld [vmem:[%s20403_s20 + $0x122] sm:$0xff] }
 0x330   : > { %v12231_v36 = vadd.f32 %v18411_v46, %v22343_v44  ;;  %v18474_v57 = vpop.f32.mrf.mxu1  ;;  %v15591_v44 = vld [vmem:[%s20403_s20 + $0xf2] sm:$0xff]  ;;  %4813 = vst [vmem:[#allocation2 + $0x6d4] sm:$0xf] %v17295_v53  ;;  %12892 = vmatmul.mubr.bf16.gmra.mxu1 %v20012_v2  ;;  %v15593_v46 = vld [vmem:[%s20403_s20 + $0x10a] sm:$0xff]  ;;  %4814 = vst [vmem:[#allocation2 + $0x798] sm:$0xf] %v17296_v26 }
 0x331   : > { %v18413_v39 = vpop.f32.mrf.mxu0  ;;  %v18475_v6 = vadd.f32 %v18474_v57, %v18473_v5  ;;  %v17279_v63 = vpack.c.bf16 %v15591_v44, %v15591_v44  ;;  %12899 = vmatprep.mubr.bf16.mxu1 %v20021_v52  ;;  %v17312_v5 = vpack.c.bf16 %v15656_v45, %v15656_v45  ;;  %v17281_v51 = vpack.c.bf16 %v15593_v46, %v15593_v46  ;;  %v15657_v38 = vld [vmem:[%s20403_s20 + $0x10c] sm:$0xff]  ;;  %v15658_v47 = vld [vmem:[%s20403_s20 + $0x114] sm:$0xff]  ;;  %v15627_v52 = vld [vmem:[%s20403_s20 + $0x123] sm:$0xff] }
 0x332   : > { %v18414_v43 = vadd.f32 %v18413_v39, %v18412_v30  ;;  %v18476_v54 = vpop.f32.mrf.mxu1  ;;  %18942 = vmatpush3.bf16.msra.mxu0 %v20025_v42  ;;  %v20019_v28 = vld [vmem:[#allocation2 + $0x3c8] ss:$196 sps:$4 sm:$0xff]   ;;  %v17313_v44 = vpack.c.bf16 %v15657_v38, %v15657_v38  ;;  %v17314_v62 = vpack.c.bf16 %v15658_v47, %v15658_v47  ;;  %v15597_v10 = vld [vmem:[%s20403_s20 + $0x13a] sm:$0xff] }
 0x333   : > { %v18415_v40 = vpop.f32.mrf.mxu0  ;;  %v22543_v3 = vadd.f32 %v18475_v6, %v12231_v36  ;;  %4717 = vst [vmem:[#allocation2 + $0x6d0] sm:$0xf] %v17279_v63  ;;  %18943 = vmatprep.subr.bf16.mxu0 %v20032_v27  ;;  %v17282_v36 = vpack.c.bf16 %v15594_v11, %v15594_v11  ;;  %v17298_v6 = vpack.c.bf16 %v15626_v16, %v15626_v16  ;;  %4910 = vst [vmem:[#allocation2 + $0x79c] sm:$0xf] %v17312_v5  ;;  %v15659_v26 = vld [vmem:[%s20403_s20 + $0x124] sm:$0xff] }
 0x334   : > { %v12234_v48 = vadd.f32 %v18414_v43, %v22358_v25  ;;  %v18477_v15 = vpop.f32.mrf.mxu1  ;;  %v20039_v43 = vld [vmem:[%s23618_s1 + $0xc10] sm:$0xff]   ;;  %4719 = vst [vmem:[#allocation2 + $0x858] sm:$0xf] %v17281_v51  ;;  %4911 = vst [vmem:[#allocation2 + $0x860] sm:$0xf] %v17313_v44  ;;  %v17285_v11 = vpack.c.bf16 %v15597_v10, %v15597_v10 }
 0x335   : > { %v18416_v8 = vpop.f32.mrf.mxu0  ;;  %v18478_v49 = vadd.f32 %v18477_v15, %v18476_v54  ;;  %12803 = vmatmul.mubr.bf16.gmra.mxu0 %v20015_v21  ;;  %4720 = vst [vmem:[#allocation2 + $0x91c] sm:$0xf] %v17282_v36  ;;  %4816 = vst [vmem:[#allocation2 + $0x920] sm:$0xf] %v17298_v6  ;;  %v15596_v15 = vld [vmem:[%s20403_s20 + $0x12a] sm:$0xff] }
 0x336   : > { %v18417_v25 = vadd.f32 %v18416_v8, %v18415_v40  ;;  %12810 = vmatprep.mubr.bf16.mxu0 %v20024_v13  ;;  %18944 = vmatpush3.bf16.msra.mxu0 %v20032_v27  ;;  %v17283_v8 = vpack.c.bf16 %v15595_v1, %v15595_v1  ;;  %v15628_v21 = vld [vmem:[%s20403_s20 + $0x12b] sm:$0xff]  ;;  %4912 = vst [vmem:[#allocation2 + $0x924] sm:$0xf] %v17314_v62  ;;  %4723 = vst [vmem:[#allocation2 + $0xb68] sm:$0xf] %v17285_v11 }
 0x337   : > { %v18479_v23 = vpop.f32.mrf.mxu1  ;;  %v18418_v29 = vpop.f32.mrf.mxu0  ;;  %v22549_v4 = vadd.f32 %v18478_v49, %v12234_v48  ;;  %v20022_v48 = vld [vmem:[#allocation2 + $0x548] ss:$196 sps:$4 sm:$0xff]   ;;  %18945 = vmatprep.subr.bf16.mxu0 %v20039_v43  ;;  %v17284_v49 = vpack.c.bf16 %v15596_v15, %v15596_v15  ;;  %v17300_v13 = vpack.c.bf16 %v15628_v21, %v15628_v21  ;;  %v20031_v0 = vld [vmem:[#allocation2 + $0x6d4] ss:$196 sps:$4 sm:$0xff]  }
 0x338   : > { %v12239_v24 = vadd.f32 %v18417_v25, %v22366_v34  ;;  %v15625_v34 = vld [vmem:[%s20403_s20 + $0x10b] sm:$0xff]  ;;  %v17299_v25 = vpack.c.bf16 %v15627_v52, %v15627_v52  ;;  %12900 = vmatmul.mubr.bf16.gmra.mxu1 %v20019_v28  ;;  %4721 = vst [vmem:[#allocation2 + $0x9e0] sm:$0xf] %v17283_v8 }
 0x339   : > { %v18480_v18 = vpop.f32.mrf.mxu1  ;;  %v18419_v12 = vpop.f32.mrf.mxu0  ;;  %v17297_v42 = vpack.c.bf16 %v15625_v34, %v15625_v34  ;;  %v15660_v27 = vld [vmem:[%s20403_s20 + $0x12c] sm:$0xff]  ;;  %4722 = vst [vmem:[#allocation2 + $0xaa4] sm:$0xf] %v17284_v49  ;;  %4818 = vst [vmem:[#allocation2 + $0xaa8] sm:$0xf] %v17300_v13 }
 0x33a   : > { %v18481_v7 = vadd.f32 %v18480_v18, %v18479_v23  ;;  %v18420_v14 = vadd.f32 %v18419_v12, %v18418_v29  ;;  %18946 = vmatpush3.bf16.msra.mxu0 %v20039_v43  ;;  %4817 = vst [vmem:[#allocation2 + $0x9e4] sm:$0xf] %v17299_v25  ;;  %v17315_v18 = vpack.c.bf16 %v15659_v26, %v15659_v26  ;;  %v20035_v34 = vld [vmem:[#allocation2 + $0x6dc] ss:$196 sps:$4 sm:$0xff]   ;;  %v20029_v6 = vld [vmem:[#allocation2 + $0x6d0] ss:$196 sps:$4 sm:$0xff]  }
 0x33b   : > { %v18482_v30 = vpop.f32.mrf.mxu1  ;;  %v18421_v57 = vpop.f32.mrf.mxu0  ;;  %4815 = vst [vmem:[#allocation2 + $0x85c] sm:$0xf] %v17297_v42  ;;  %18947 = vmatprep.subr.bf16.mxu0 %v20046_v20  ;;  %v17316_v45 = vpack.c.bf16 %v15660_v27, %v15660_v27  ;;  %v15630_v42 = vld [vmem:[%s20403_s20 + $0x143] sm:$0xff]  ;;  %v20033_v15 = vld [vmem:[#allocation2 + $0x6d8] ss:$196 sps:$4 sm:$0xff]  }
 0x33c   : > { %v22561_v39 = vadd.f32 %v18481_v7, %v12239_v24  ;;  %v12242_v35 = vadd.f32 %v18420_v14, %v22377_v9  ;;  %v20028_v9 = vld [vmem:[#allocation2 + $0x554] ss:$196 sps:$4 sm:$0xff]   ;;  %v15598_v7 = vld [vmem:[%s20403_s20 + $0x142] sm:$0xff]  ;;  %4913 = vst [vmem:[#allocation2 + $0x9e8] sm:$0xf] %v17315_v18 }
 0x33d   : > { %v18483_v54 = vpop.f32.mrf.mxu1  ;;  %v18422_v40 = vpop.f32.mrf.mxu0  ;;  %12907 = vmatprep.mubr.bf16.mxu1 %v20028_v9  ;;  %v17286_v5 = vpack.c.bf16 %v15598_v7, %v15598_v7  ;;  %12811 = vmatmul.mubr.bf16.gmra.mxu0 %v20022_v48  ;;  %4914 = vst [vmem:[#allocation2 + $0xaac] sm:$0xf] %v17316_v45  ;;  %v15661_v9 = vld [vmem:[%s20403_s20 + $0x13c] sm:$0xff]  ;;  %v20042_v8 = vld [vmem:[#allocation2 + $0x864] ss:$196 sps:$4 sm:$0xff]  }
 0x33e   : > { %v18484_v2 = vadd.f32 %v18483_v54, %v18482_v30  ;;  %v18423_v22 = vadd.f32 %v18422_v40, %v18421_v57  ;;  %v20026_v30 = vld [vmem:[#allocation2 + $0x550] ss:$196 sps:$4 sm:$0xff]   ;;  %12818 = vmatprep.mubr.bf16.mxu0 %v20031_v0  ;;  %18948 = vmatpush3.bf16.msra.mxu0 %v20046_v20  ;;  %v15629_v57 = vld [vmem:[%s20403_s20 + $0x13b] sm:$0xff]  ;;  %v17302_v54 = vpack.c.bf16 %v15630_v42, %v15630_v42  ;;  %v15694_v25 = vld [vmem:[%s20403_s20 + $0x145] sm:$0xff] }
 0x33f   : > { %v18485_v63 = vpop.f32.mrf.mxu1  ;;  %v18424_v56 = vpop.f32.mrf.mxu0  ;;  %4724 = vst [vmem:[#allocation2 + $0xc2c] sm:$0xf] %v17286_v5  ;;  %v20053_v40 = vld [vmem:[%s23618_s1 + $0xc00] sm:$0xff]   ;;  %v17317_v1 = vpack.c.bf16 %v15661_v9, %v15661_v9  ;;  %v17334_v26 = vpack.c.bf16 %v15694_v25, %v15694_v25 }
 0x340   : > { %v22572_v60 = vadd.f32 %v18484_v2, %v12242_v35  ;;  %v12247_v53 = vadd.f32 %v18423_v22, %v22388_v31  ;;  %12908 = vmatmul.mubr.bf16.gmra.mxu1 %v20026_v30  ;;  %4820 = vst [vmem:[#allocation2 + $0xc30] sm:$0xf] %v17302_v54  ;;  %18949 = vmatprep.subr.bf16.mxu0 %v20053_v40  ;;  %v15715_v18 = vld [vmem:[%s20403_s20 + $0xc6] sm:$0xff]  ;;  %v15721_v54 = vld [vmem:[%s20403_s20 + $0x10e] sm:$0xff] }
 0x341   : > { %v18486_v23 = vpop.f32.mrf.mxu1  ;;  %v18425_v29 = vpop.f32.mrf.mxu0  ;;  %12915 = vmatprep.mubr.bf16.mxu1 %v20035_v34  ;;  %4915 = vst [vmem:[#allocation2 + $0xb70] sm:$0xf] %v17317_v1  ;;  %v17339_v11 = vpack.c.bf16 %v15715_v18, %v15715_v18  ;;  %v15718_v5 = vld [vmem:[%s20403_s20 + $0xe6] sm:$0xff]  ;;  %5012 = vst [vmem:[#allocation2 + $0xc38] sm:$0xf] %v17334_v26  ;;  %v15719_v34 = vld [vmem:[%s20403_s20 + $0xf6] sm:$0xff] }
 0x342   : > { %v18487_v31 = vadd.f32 %v18486_v23, %v18485_v63  ;;  %v18426_v24 = vadd.f32 %v18425_v29, %v18424_v56  ;;  %v20038_v2 = vld [vmem:[#allocation2 + $0x85c] ss:$196 sps:$4 sm:$0xff]   ;;  %v15662_v63 = vld [vmem:[%s20403_s20 + $0x144] sm:$0xff]  ;;  %18950 = vmatpush3.bf16.msra.mxu0 %v20053_v40  ;;  %v15724_v1 = vld [vmem:[%s20403_s20 + $0x12e] sm:$0xff] }
 0x343   : > { %v18488_v12 = vpop.f32.mrf.mxu1  ;;  %v18427_v51 = vpop.f32.mrf.mxu0  ;;  %v15693_v56 = vld [vmem:[%s20403_s20 + $0x13d] sm:$0xff]  ;;  %v17318_v49 = vpack.c.bf16 %v15662_v63, %v15662_v63  ;;  %5097 = vst [vmem:[#allocation2 + $0x3d0] sm:$0xf] %v17339_v11  ;;  %v15723_v40 = vld [vmem:[%s20403_s20 + $0x126] sm:$0xff] }
 0x344   : > { %v22583_v14 = vadd.f32 %v18487_v31, %v12247_v53  ;;  %v12250_v46 = vadd.f32 %v18426_v24, %v22392_v19  ;;  %v17301_v19 = vpack.c.bf16 %v15629_v57, %v15629_v57  ;;  %v17333_v21 = vpack.c.bf16 %v15693_v56, %v15693_v56  ;;  %v15711_v23 = vld [vmem:[%s20403_s20 + $0x96] sm:$0xff]  ;;  %v15712_v29 = vld [vmem:[%s20403_s20 + $0x9e] sm:$0xff]  ;;  %v15713_v31 = vld [vmem:[%s20403_s20 + $0xae] sm:$0xff] }
 0x345   : > { %v18489_v36 = vpop.f32.mrf.mxu1  ;;  %v18428_v35 = vpop.f32.mrf.mxu0  ;;  %12819 = vmatmul.mubr.bf16.gmra.mxu0 %v20029_v6  ;;  %4916 = vst [vmem:[#allocation2 + $0xc34] sm:$0xf] %v17318_v49  ;;  %v17335_v27 = vpack.c.bf16 %v15711_v23, %v15711_v23  ;;  %v17336_v0 = vpack.c.bf16 %v15712_v29, %v15712_v29  ;;  %v15714_v24 = vld [vmem:[%s20403_s20 + $0xb6] sm:$0xff]  ;;  %v17337_v10 = vpack.c.bf16 %v15713_v31, %v15713_v31  ;;  %v20040_v9 = vld [vmem:[#allocation2 + $0x860] ss:$196 sps:$4 sm:$0xff]  }
 0x346   : > { %v18490_v16 = vadd.f32 %v18489_v36, %v18488_v12  ;;  %v18429_v38 = vadd.f32 %v18428_v35, %v18427_v51  ;;  %4819 = vst [vmem:[#allocation2 + $0xb6c] sm:$0xf] %v17301_v19  ;;  %12826 = vmatprep.mubr.bf16.mxu0 %v20038_v2  ;;  %5011 = vst [vmem:[#allocation2 + $0xb74] sm:$0xf] %v17333_v21  ;;  %v17338_v7 = vpack.c.bf16 %v15714_v24, %v15714_v24  ;;  %v20036_v57 = vld [vmem:[#allocation2 + $0x858] ss:$196 sps:$4 sm:$0xff]  }
 0x347   : > { %v18491_v28 = vpop.f32.mrf.mxu1  ;;  %v18430_v44 = vpop.f32.mrf.mxu0  ;;  %5093 = vst [vmem:[#allocation2 + $0xc0] sm:$0xf] %v17335_v27  ;;  %5094 = vst [vmem:[#allocation2 + $0x184] sm:$0xf] %v17336_v0  ;;  %v17342_v36 = vpack.c.bf16 %v15718_v5, %v15718_v5  ;;  %v20045_v35 = vld [vmem:[#allocation2 + $0x9e4] ss:$196 sps:$4 sm:$0xff]   ;;  %v17343_v6 = vpack.c.bf16 %v15719_v34, %v15719_v34 }
 0x348   : > { %v22588_v43 = vadd.f32 %v18490_v16, %v12250_v46  ;;  %v12255_v47 = vadd.f32 %v18429_v38, %v22412_v37  ;;  %v15716_v46 = vld [vmem:[%s20403_s20 + $0xce] sm:$0xff]  ;;  %v15720_v16 = vld [vmem:[%s20403_s20 + $0xfe] sm:$0xff]  ;;  %12916 = vmatmul.mubr.bf16.gmra.mxu1 %v20033_v15  ;;  %5095 = vst [vmem:[#allocation2 + $0x248] sm:$0xf] %v17337_v10  ;;  %5096 = vst [vmem:[#allocation2 + $0x30c] sm:$0xf] %v17338_v7 }
 0x349   : > { %v18492_v22 = vpop.f32.mrf.mxu1  ;;  %v18431_v62 = vpop.f32.mrf.mxu0  ;;  %v17340_v30 = vpack.c.bf16 %v15716_v46, %v15716_v46  ;;  %v17344_v38 = vpack.c.bf16 %v15720_v16, %v15720_v16  ;;  %12923 = vmatprep.mubr.bf16.mxu1 %v20042_v8  ;;  %5100 = vst [vmem:[#allocation2 + $0x61c] sm:$0xf] %v17342_v36  ;;  %5101 = vst [vmem:[#allocation2 + $0x6e0] sm:$0xf] %v17343_v6  ;;  %v15726_v63 = vld [vmem:[%s20403_s20 + $0x146] sm:$0xff]  ;;  %v17348_v8 = vpack.c.bf16 %v15724_v1, %v15724_v1 }
 0x34a   : > { %v18493_v48 = vadd.f32 %v18492_v22, %v18491_v28  ;;  %v18432_v52 = vadd.f32 %v18431_v62, %v18430_v44  ;;  %v15722_v44 = vld [vmem:[%s20403_s20 + $0x116] sm:$0xff]  ;;  %v15725_v62 = vld [vmem:[%s20403_s20 + $0x13e] sm:$0xff]  ;;  %v20049_v56 = vld [vmem:[#allocation2 + $0x9ec] ss:$196 sps:$4 sm:$0xff]  }
 0x34b   : > { %v18494_v53 = vpop.f32.mrf.mxu1  ;;  %5098 = vst [vmem:[#allocation2 + $0x494] sm:$0xf] %v17340_v30  ;;  %5102 = vst [vmem:[#allocation2 + $0x7a4] sm:$0xf] %v17344_v38  ;;  %v17346_v22 = vpack.c.bf16 %v15722_v44, %v15722_v44  ;;  %v20047_v18 = vld [vmem:[#allocation2 + $0x9e8] ss:$196 sps:$4 sm:$0xff]  }
 0x34c   : > { %v22597_v37 = vadd.f32 %v18493_v48, %v12255_v47  ;;  %v12258_v13 = vadd.f32 %v18432_v52, %v22422_v61  ;;  %v18433_v12 = vpop.f32.mrf.mxu0  ;;  %v15717_v61 = vld [vmem:[%s20403_s20 + $0xde] sm:$0xff]  ;;  %v17345_v47 = vpack.c.bf16 %v15721_v54, %v15721_v54  ;;  %v17347_v48 = vpack.c.bf16 %v15723_v40, %v15723_v40  ;;  %5106 = vst [vmem:[#allocation2 + $0xab4] sm:$0xf] %v17348_v8  ;;  %v20050_v46 = vld [vmem:[#allocation2 + $0xb68] ss:$196 sps:$4 sm:$0xff]  }
 0x34d   : > { %v18495_v20 = vpop.f32.mrf.mxu1  ;;  %v17341_v51 = vpack.c.bf16 %v15717_v61, %v15717_v61  ;;  %v17349_v52 = vpack.c.bf16 %v15725_v62, %v15725_v62  ;;  %12827 = vmatmul.mubr.bf16.gmra.mxu0 %v20036_v57  ;;  %5104 = vst [vmem:[#allocation2 + $0x92c] sm:$0xf] %v17346_v22  ;;  %v20052_v26 = vld [vmem:[#allocation2 + $0xb6c] ss:$196 sps:$4 sm:$0xff]  }
 0x34e   : > { %v18496_v45 = vadd.f32 %v18495_v20, %v18494_v53  ;;  %v18434_v19 = vpop.f32.mrf.mxu0  ;;  %v17350_v53 = vpack.c.bf16 %v15726_v63, %v15726_v63  ;;  %5103 = vst [vmem:[#allocation2 + $0x868] sm:$0xf] %v17345_v47  ;;  %5105 = vst [vmem:[#allocation2 + $0x9f0] sm:$0xf] %v17347_v48  ;;  %12834 = vmatprep.mubr.bf16.mxu0 %v20045_v35  ;;  %v20057_v11 = vld [vmem:[#allocation2 + $0xc0] ss:$196 sps:$4 sm:$0xff]  }
 0x34f   : > { %v18435_v28 = vadd.f32 %v18434_v19, %v18433_v12  ;;  %5099 = vst [vmem:[#allocation2 + $0x558] sm:$0xf] %v17341_v51  ;;  %5107 = vst [vmem:[#allocation2 + $0xb78] sm:$0xf] %v17349_v52  ;;  %v20054_v34 = vld [vmem:[#allocation2 + $0xb70] ss:$196 sps:$4 sm:$0xff]  }
 0x350   : > { %v22611_v42 = vadd.f32 %v18496_v45, %v12258_v13  ;;  %v18436_v2 = vpop.f32.mrf.mxu0  ;;  %v18497_v49 = vpop.f32.mrf.mxu1  ;;  %5108 = vst [vmem:[#allocation2 + $0xc3c] sm:$0xf] %v17350_v53  ;;  %12924 = vmatmul.mubr.bf16.gmra.mxu1 %v20040_v9  ;;  %v20056_v45 = vld [vmem:[#allocation2 + $0xb74] ss:$196 sps:$4 sm:$0xff]  }
 0x351   : > { %v12263_v15 = vadd.f32 %v18435_v28, %v22446_v32  ;;  %v20043_v32 = vld [vmem:[#allocation2 + $0x9e0] ss:$196 sps:$4 sm:$0xff]   ;;  %12931 = vmatprep.mubr.bf16.mxu1 %v20049_v56 }
 0x352   : > { %v18437_v21 = vpop.f32.mrf.mxu0  ;;  %v18498_v23 = vpop.f32.mrf.mxu1  ;;  %v20059_v1 = vld [vmem:[#allocation2 + $0x3d0] ss:$196 sps:$4 sm:$0xff]  }
 0x353   : > { %v18438_v25 = vadd.f32 %v18437_v21, %v18436_v2  ;;  %v18499_v29 = vadd.f32 %v18498_v23, %v18497_v49  ;;  %v20058_v2 = vld [vmem:[#allocation2 + $0x248] ss:$196 sps:$4 sm:$0xff]  }
 0x354   : > { %v18500_v20 = vpop.f32.mrf.mxu1  ;;  %v18519_v31 = vpop.f32.mrf.mxu0 }
 0x355   : > { %v12266_v13 = vadd.f32 %v18438_v25, %v22455_v58  ;;  %v22621_v27 = vadd.f32 %v18499_v29, %v12263_v15  ;;  %12835 = vmatmul.mubr.bf16.gmra.mxu0 %v20043_v32 }
 0x356   : > { %v18501_v0 = vpop.f32.mrf.mxu1  ;;  %v18520_v12 = vpop.f32.mrf.mxu0  ;;  %12842 = vmatprep.mubr.bf16.mxu0 %v20052_v26  ;;  %v20060_v29 = vld [vmem:[#allocation2 + $0x558] ss:$196 sps:$4 sm:$0xff]  }
 0x357   : > { %v18502_v24 = vadd.f32 %v18501_v0, %v18500_v20  ;;  %v18521_v7 = vadd.f32 %v18520_v12, %v18519_v31  ;;  %v20061_v20 = vld [vmem:[#allocation2 + $0x6e0] ss:$196 sps:$4 sm:$0xff]  }
 0x358   : > { %v18522_v58 = vpop.f32.mrf.mxu0  ;;  %12932 = vmatmul.mubr.bf16.gmra.mxu1 %v20047_v18 }
 0x359   : > { %v22623_v10 = vadd.f32 %v18502_v24, %v12266_v13  ;;  %v12401_v61 = vadd.f32 %v18521_v7, %v22474_v33  ;;  %12939 = vmatprep.mubr.bf16.mxu1 %v20056_v45 }
 0x35a   : > { %v18523_v30 = vpop.f32.mrf.mxu0 }
 0x35b   : > { %v18524_v36 = vadd.f32 %v18523_v30, %v18522_v58 }
 0x35c   : > { %v18583_v5 = vpop.f32.mrf.mxu1 }
 0x35d   : > { %v12404_v35 = vadd.f32 %v18524_v36, %v22487_v50  ;;  %12843 = vmatmul.mubr.bf16.gmra.mxu0 %v20050_v46  ;;  %v20063_v36 = vld [vmem:[#allocation2 + $0x9f0] ss:$196 sps:$4 sm:$0xff]  }
 0x35e   : > { %v18584_v51 = vpop.f32.mrf.mxu1  ;;  %18951 = vmatprep.mubr.bf16.mxu0 %v20057_v11 }
 0x35f   : > { %v18585_v16 = vadd.f32 %v18584_v51, %v18583_v5  ;;  %v20062_v5 = vld [vmem:[#allocation2 + $0x868] ss:$196 sps:$4 sm:$0xff]  }
 0x360   : > { %v18586_v19 = vpop.f32.mrf.mxu1  ;;  %12940 = vmatmul.mubr.bf16.gmra.mxu1 %v20054_v34 }
 0x361   : > { %v22627_v6 = vadd.f32 %v18585_v16, %v12401_v61 }
 0x362   : > { %v18587_v28 = vpop.f32.mrf.mxu1 }
 0x363   : > { %v18525_v57 = vpop.f32.mrf.mxu0  ;;  %v18588_v33 = vadd.f32 %v18587_v28, %v18586_v19 }
 0x364   : > { %v18589_v9 = vpop.f32.mrf.mxu1 }
 0x365   : > { %v18526_v38 = vpop.f32.mrf.mxu0  ;;  %v22630_v47 = vadd.f32 %v18588_v33, %v12404_v35  ;;  %18952 = vmatmul.mubr.bf16.vlgmr.msra.gmra.mxu0 %v20058_v2  ;;  %v20064_v2 = vld [vmem:[#allocation2 + $0xb78] ss:$196 sps:$4 sm:$0xff]  }
 0x366   : > { %v18527_v54 = vadd.f32 %v18526_v38, %v18525_v57  ;;  %v18590_v50 = vpop.f32.mrf.mxu1  ;;  %18955 = vmatprep.mubr.bf16.mxu0 %v20059_v1 }
 0x367   : > { %v18528_v44 = vpop.f32.mrf.mxu0  ;;  %v18591_v62 = vadd.f32 %v18590_v50, %v18589_v9 }
 0x368   : > { %v12409_v40 = vadd.f32 %v18527_v54, %v22502_v17  ;;  %v18592_v15 = vpop.f32.mrf.mxu1 }
 0x369   : > { %v18529_v22 = vpop.f32.mrf.mxu0 }
 0x36a   : > { %v18530_v48 = vadd.f32 %v18529_v22, %v18528_v44  ;;  %v22633_v8 = vadd.f32 %v18591_v62, %v12409_v40  ;;  %v18593_v17 = vpop.f32.mrf.mxu1 }
 0x36b   : > { %v18531_v63 = vpop.f32.mrf.mxu0  ;;  %v18594_v49 = vadd.f32 %v18593_v17, %v18592_v15 }
 0x36c   : > { %v12412_v56 = vadd.f32 %v18530_v48, %v22514_v55 }
 0x36d   : > { %v18532_v52 = vpop.f32.mrf.mxu0  ;;  %18956 = vmatmul.mubr.bf16.gmra.mxu0 %v20060_v29 }
 0x36e   : > { %v18533_v53 = vadd.f32 %v18532_v52, %v18531_v63  ;;  %v22636_v13 = vadd.f32 %v18594_v49, %v12412_v56  ;;  %18959 = vmatprep.mubr.bf16.mxu0 %v20061_v20 }
 0x36f   : > { %v18534_v21 = vpop.f32.mrf.mxu0 }
 0x370   : > { %v12417_v25 = vadd.f32 %v18533_v53, %v22523_v59  ;;  %v18595_v23 = vpop.f32.mrf.mxu1 }
 0x371   : > { %v18535_v32 = vpop.f32.mrf.mxu0 }
 0x372   : > { %v18596_v26 = vpop.f32.mrf.mxu1  ;;  %v18536_v55 = vadd.f32 %v18535_v32, %v18534_v21 }
 0x373   : > { %v18597_v0 = vadd.f32 %v18596_v26, %v18595_v23  ;;  %v18537_v31 = vpop.f32.mrf.mxu0 }
 0x374   : > { %v12420_v24 = vadd.f32 %v18536_v55, %v22534_v41  ;;  %v18598_v18 = vpop.f32.mrf.mxu1 }
 0x375   : > { %v22639_v12 = vadd.f32 %v18597_v0, %v12417_v25  ;;  %v18538_v45 = vpop.f32.mrf.mxu0  ;;  %18960 = vmatmul.mubr.bf16.gmra.mxu0 %v20062_v5 }
 0x376   : > { %v18599_v7 = vpop.f32.mrf.mxu1  ;;  %v18539_v59 = vadd.f32 %v18538_v45, %v18537_v31  ;;  %18963 = vmatprep.mubr.bf16.mxu0 %v20063_v36 }
 0x377   : > { %v18600_v46 = vadd.f32 %v18599_v7, %v18598_v18  ;;  %v18540_v58 = vpop.f32.mrf.mxu0 }
 0x378   : > { %v12425_v11 = vadd.f32 %v18539_v59, %v22543_v3  ;;  %v18601_v61 = vpop.f32.mrf.mxu1 }
 0x379   : > { %v22642_v30 = vadd.f32 %v18600_v46, %v12420_v24  ;;  %v18541_v51 = vpop.f32.mrf.mxu0 }
 0x37a   : > { %v18602_v34 = vpop.f32.mrf.mxu1  ;;  %v18542_v41 = vadd.f32 %v18541_v51, %v18540_v58 }
 0x37b   : > { %v18603_v16 = vadd.f32 %v18602_v34, %v18601_v61  ;;  %v18543_v57 = vpop.f32.mrf.mxu0 }
 0x37c   : > { %v12428_v35 = vadd.f32 %v18542_v41, %v22549_v4  ;;  %v18604_v19 = vpop.f32.mrf.mxu1 }
 0x37d   : > { %v22645_v38 = vadd.f32 %v18603_v16, %v12425_v11  ;;  %v18544_v28 = vpop.f32.mrf.mxu0  ;;  %18964 = vmatmul.mubr.bf16.gmra.mxu0 %v20064_v2 }
 0x37e   : > { %v18605_v54 = vpop.f32.mrf.mxu1  ;;  %v18545_v3 = vadd.f32 %v18544_v28, %v18543_v57 }
 0x37f   : > { %v18606_v33 = vadd.f32 %v18605_v54, %v18604_v19  ;;  %v18546_v44 = vpop.f32.mrf.mxu0 }
 0x380   : > { %v12433_v40 = vadd.f32 %v18545_v3, %v22561_v39  ;;  %v18607_v9 = vpop.f32.mrf.mxu1 }
 0x381   : > { %v22648_v22 = vadd.f32 %v18606_v33, %v12428_v35  ;;  %v18547_v1 = vpop.f32.mrf.mxu0 }
 0x382   : > { %v18608_v50 = vpop.f32.mrf.mxu1  ;;  %v18548_v48 = vadd.f32 %v18547_v1, %v18546_v44 }
 0x383   : > { %v18609_v4 = vadd.f32 %v18608_v50, %v18607_v9 }
 0x384   : > { %v12436_v62 = vadd.f32 %v18548_v48, %v22572_v60  ;;  %v18610_v63 = vpop.f32.mrf.mxu1 }
 0x385   : > { %v18549_v56 = vpop.f32.mrf.mxu0  ;;  %v22651_v15 = vadd.f32 %v18609_v4, %v12433_v40 }
 0x386   : > { %v18611_v52 = vpop.f32.mrf.mxu1 }
 0x387   : > { %v18550_v17 = vpop.f32.mrf.mxu0  ;;  %v18612_v53 = vadd.f32 %v18611_v52, %v18610_v63 }
 0x388   : > { %v18551_v49 = vadd.f32 %v18550_v17, %v18549_v56  ;;  %v18613_v39 = vpop.f32.mrf.mxu1 }
 0x389   : > { %v18552_v21 = vpop.f32.mrf.mxu0  ;;  %v22653_v25 = vadd.f32 %v18612_v53, %v12436_v62 }
 0x38a   : > { %v12441_v23 = vadd.f32 %v18551_v49, %v22583_v14  ;;  %v18614_v29 = vpop.f32.mrf.mxu1 }
 0x38b   : > { %v18553_v32 = vpop.f32.mrf.mxu0  ;;  %v18615_v20 = vadd.f32 %v18614_v29, %v18613_v39 }
 0x38c   : > { %v18554_v26 = vadd.f32 %v18553_v32, %v18552_v21  ;;  %v18616_v60 = vpop.f32.mrf.mxu1 }
 0x38d   : > { %v22656_v55 = vadd.f32 %v18615_v20, %v12441_v23  ;;  %v18555_v31 = vpop.f32.mrf.mxu0 }
 0x38e   : > { %v12444_v0 = vadd.f32 %v18554_v26, %v22588_v43  ;;  %v18617_v24 = vpop.f32.mrf.mxu1 }
 0x38f   : > { %v18618_v18 = vadd.f32 %v18617_v24, %v18616_v60  ;;  %v18556_v45 = vpop.f32.mrf.mxu0 }
 0x390   : > { %v18557_v7 = vadd.f32 %v18556_v45, %v18555_v31  ;;  %v18619_v46 = vpop.f32.mrf.mxu1 }
 0x391   : > { %v22659_v59 = vadd.f32 %v18618_v18, %v12444_v0  ;;  %v18558_v58 = vpop.f32.mrf.mxu0 }
 0x392   : > { %v12449_v14 = vadd.f32 %v18557_v7, %v22597_v37  ;;  %v18620_v11 = vpop.f32.mrf.mxu1 }
 0x393   : > { %v18559_v61 = vpop.f32.mrf.mxu0  ;;  %v18621_v5 = vadd.f32 %v18620_v11, %v18619_v46 }
 0x394   : > { %v18560_v51 = vadd.f32 %v18559_v61, %v18558_v58  ;;  %v18622_v36 = vpop.f32.mrf.mxu1 }
 0x395   : > { %v22662_v34 = vadd.f32 %v18621_v5, %v12449_v14 }
 0x396   : > { %v12452_v43 = vadd.f32 %v18560_v51, %v22611_v42  ;;  %v18623_v41 = vpop.f32.mrf.mxu1 }
 0x397   : > { %v18624_v16 = vadd.f32 %v18623_v41, %v18622_v36  ;;  %v18561_v57 = vpop.f32.mrf.mxu0 }
 0x399   : > { %v22665_v35 = vadd.f32 %v18624_v16, %v12452_v43  ;;  %v18562_v19 = vpop.f32.mrf.mxu0 }
 0x39a   : > { %v18563_v28 = vadd.f32 %v18562_v19, %v18561_v57  ;;  %v18625_v54 = vpop.f32.mrf.mxu1 }
 0x39b   : > { %v18564_v3 = vpop.f32.mrf.mxu0 }
 0x39c   : > { %v12457_v37 = vadd.f32 %v18563_v28, %v22621_v27  ;;  %v18626_v33 = vpop.f32.mrf.mxu1 }
 0x39d   : > { %v18565_v44 = vpop.f32.mrf.mxu0  ;;  %v18627_v40 = vadd.f32 %v18626_v33, %v18625_v54 }
 0x39e   : > { %v18566_v9 = vadd.f32 %v18565_v44, %v18564_v3  ;;  %v18628_v2 = vpop.f32.mrf.mxu1 }
 0x39f   : > { %v22668_v1 = vadd.f32 %v18627_v40, %v12457_v37  ;;  %v18647_v4 = vpop.f32.mrf.mxu0 }
 0x3a0   : > { %v12460_v42 = vadd.f32 %v18566_v9, %v22623_v10  ;;  %v18629_v50 = vpop.f32.mrf.mxu1 }
 0x3a1   : > { %v18630_v48 = vadd.f32 %v18629_v50, %v18628_v2  ;;  %v18648_v63 = vpop.f32.mrf.mxu0 }
 0x3a2   : > { %v18649_v56 = vadd.f32 %v18648_v63, %v18647_v4 }
 0x3a3   : > { %v22671_v62 = vadd.f32 %v18630_v48, %v12460_v42  ;;  %v18650_v52 = vpop.f32.mrf.mxu0  ;;  %v18711_v27 = vpop.f32.mrf.mxu1 }
 0x3a4   : > { %v12595_v17 = vadd.f32 %v18649_v56, %v22627_v6 }
 0x3a5   : > { %v18651_v53 = vpop.f32.mrf.mxu0  ;;  %v18712_v49 = vpop.f32.mrf.mxu1 }
 0x3a6   : > { %v18652_v39 = vadd.f32 %v18651_v53, %v18650_v52  ;;  %v18713_v21 = vadd.f32 %v18712_v49, %v18711_v27 }
 0x3a7   : > { %v18653_v23 = vpop.f32.mrf.mxu0  ;;  %v18714_v32 = vpop.f32.mrf.mxu1 }
 0x3a8   : > { %v12598_v29 = vadd.f32 %v18652_v39, %v22630_v47  ;;  %v22675_v10 = vadd.f32 %v18713_v21, %v12595_v17 }
 0x3a9   : > { %v18654_v20 = vpop.f32.mrf.mxu0  ;;  %v18715_v26 = vpop.f32.mrf.mxu1 }
 0x3aa   : > { %v18655_v60 = vadd.f32 %v18654_v20, %v18653_v23  ;;  %v18716_v0 = vadd.f32 %v18715_v26, %v18714_v32 }
 0x3ab   : > { %v18656_v31 = vpop.f32.mrf.mxu0  ;;  %v18717_v18 = vpop.f32.mrf.mxu1 }
 0x3ac   : > { %v12603_v24 = vadd.f32 %v18655_v60, %v22633_v8  ;;  %v22678_v6 = vadd.f32 %v18716_v0, %v12598_v29 }
 0x3ad   : > { %v18657_v45 = vpop.f32.mrf.mxu0  ;;  %v18718_v7 = vpop.f32.mrf.mxu1 }
 0x3ae   : > { %v18658_v46 = vadd.f32 %v18657_v45, %v18656_v31  ;;  %v18719_v58 = vadd.f32 %v18718_v7, %v18717_v18 }
 0x3af   : > { %v18720_v11 = vpop.f32.mrf.mxu1 }
 0x3b0   : > { %v18659_v14 = vpop.f32.mrf.mxu0  ;;  %v12606_v47 = vadd.f32 %v18658_v46, %v22636_v13  ;;  %v22681_v61 = vadd.f32 %v18719_v58, %v12603_v24 }
 0x3b1   : > { %v18721_v51 = vpop.f32.mrf.mxu1 }
 0x3b2   : > { %v18660_v5 = vpop.f32.mrf.mxu0  ;;  %v18722_v43 = vadd.f32 %v18721_v51, %v18720_v11 }
 0x3b3   : > { %v18661_v36 = vadd.f32 %v18660_v5, %v18659_v14  ;;  %v18723_v16 = vpop.f32.mrf.mxu1 }
 0x3b4   : > { %v18662_v41 = vpop.f32.mrf.mxu0  ;;  %v22684_v57 = vadd.f32 %v18722_v43, %v12606_v47 }
 0x3b5   : > { %v12611_v8 = vadd.f32 %v18661_v36, %v22639_v12  ;;  %v18724_v28 = vpop.f32.mrf.mxu1 }
 0x3b6   : > { %v18663_v19 = vpop.f32.mrf.mxu0  ;;  %v18725_v3 = vadd.f32 %v18724_v28, %v18723_v16 }
 0x3b7   : > { %v18664_v54 = vadd.f32 %v18663_v19, %v18662_v41  ;;  %v18726_v33 = vpop.f32.mrf.mxu1 }
 0x3b8   : > { %v18665_v37 = vpop.f32.mrf.mxu0  ;;  %v22687_v44 = vadd.f32 %v18725_v3, %v12611_v8 }
 0x3b9   : > { %v12614_v13 = vadd.f32 %v18664_v54, %v22642_v30  ;;  %v18727_v9 = vpop.f32.mrf.mxu1 }
 0x3ba   : > { %v18666_v40 = vpop.f32.mrf.mxu0  ;;  %v18728_v42 = vadd.f32 %v18727_v9, %v18726_v33 }
 0x3bb   : > { %v18667_v2 = vadd.f32 %v18666_v40, %v18665_v37  ;;  %v18729_v48 = vpop.f32.mrf.mxu1 }
 0x3bc   : > { %v18668_v50 = vpop.f32.mrf.mxu0  ;;  %v22690_v4 = vadd.f32 %v18728_v42, %v12614_v13 }
 0x3bd   : > { %v12619_v12 = vadd.f32 %v18667_v2, %v22645_v38  ;;  %v18730_v56 = vpop.f32.mrf.mxu1 }
 0x3be   : > { %v18669_v63 = vpop.f32.mrf.mxu0  ;;  %v18731_v17 = vadd.f32 %v18730_v56, %v18729_v48 }
 0x3bf   : > { %v18670_v52 = vadd.f32 %v18669_v63, %v18668_v50  ;;  %v22695_v53 = vpop.f32.mrf.mxu1 }
 0x3c0   : > { %v18671_v27 = vpop.f32.mrf.mxu0  ;;  %v22697_v49 = vadd.f32 %v18731_v17, %v12619_v12 }
 0x3c1   : > { %v22693_v30 = vadd.f32 %v18670_v52, %v22648_v22  ;;  %v22699_v21 = vpop.f32.mrf.mxu1 }
 0x3c2   : > { %v18672_v39 = vpop.f32.mrf.mxu0 }
 0x3c3   : > { %v18673_v23 = vadd.f32 %v18672_v39, %v18671_v27  ;;  %v18735_v32 = vpop.f32.mrf.mxu1 }
 0x3c4   : > { %v18674_v38 = vpop.f32.mrf.mxu0 }
 0x3c5   : > { %v12627_v29 = vadd.f32 %v18673_v23, %v22651_v15  ;;  %v18736_v26 = vpop.f32.mrf.mxu1 }
 0x3c6   : > { %v18675_v20 = vpop.f32.mrf.mxu0  ;;  %v18737_v0 = vadd.f32 %v18736_v26, %v18735_v32 }
 0x3c7   : > { %v18676_v60 = vadd.f32 %v18675_v20, %v18674_v38  ;;  %v18738_v24 = vpop.f32.mrf.mxu1 }
 0x3c8   : > { %v18677_v31 = vpop.f32.mrf.mxu0  ;;  %v22703_v18 = vadd.f32 %v18737_v0, %v12627_v29 }
 0x3c9   : > { %v12630_v22 = vadd.f32 %v18676_v60, %v22653_v25  ;;  %v18739_v7 = vpop.f32.mrf.mxu1 }
 0x3ca   : > { %v18678_v45 = vpop.f32.mrf.mxu0  ;;  %v18740_v58 = vadd.f32 %v18739_v7, %v18738_v24 }
 0x3cb   : > { %v18679_v46 = vadd.f32 %v18678_v45, %v18677_v31  ;;  %v18741_v11 = vpop.f32.mrf.mxu1 }
 0x3cc   : > { %v18680_v14 = vpop.f32.mrf.mxu0  ;;  %v22706_v15 = vadd.f32 %v18740_v58, %v12630_v22 }
 0x3cd   : > { %v12635_v47 = vadd.f32 %v18679_v46, %v22656_v55  ;;  %v18742_v51 = vpop.f32.mrf.mxu1 }
 0x3ce   : > { %v18681_v5 = vpop.f32.mrf.mxu0  ;;  %v18743_v43 = vadd.f32 %v18742_v51, %v18741_v11 }
 0x3cf   : > { %v18682_v36 = vadd.f32 %v18681_v5, %v18680_v14  ;;  %v22711_v25 = vpop.f32.mrf.mxu1 }
 0x3d0   : > { %v22713_v8 = vadd.f32 %v18743_v43, %v12635_v47  ;;  %v18683_v16 = vpop.f32.mrf.mxu0 }
 0x3d1   : > { %v22709_v41 = vadd.f32 %v18682_v36, %v22659_v59  ;;  %v22715_v19 = vpop.f32.mrf.mxu1 }
 0x3d2   : > { %v18684_v28 = vpop.f32.mrf.mxu0 }
 0x3d3   : > { %v18685_v54 = vadd.f32 %v18684_v28, %v18683_v16  ;;  %v18747_v55 = vpop.f32.mrf.mxu1 }
 0x3d4   : > { %v18686_v3 = vpop.f32.mrf.mxu0 }
 0x3d5   : > { %v12643_v37 = vadd.f32 %v18685_v54, %v22662_v34  ;;  %v18748_v13 = vpop.f32.mrf.mxu1 }
 0x3d6   : > { %v18687_v33 = vpop.f32.mrf.mxu0  ;;  %v18749_v40 = vadd.f32 %v18748_v13, %v18747_v55 }
 0x3d7   : > { %v18688_v9 = vadd.f32 %v18687_v33, %v18686_v3  ;;  %v18750_v2 = vpop.f32.mrf.mxu1 }
 0x3d8   : > { %v22718_v59 = vadd.f32 %v18749_v40, %v12643_v37 }
 0x3d9   : > { %v12646_v42 = vadd.f32 %v18688_v9, %v22665_v35  ;;  %v18751_v50 = vpop.f32.mrf.mxu1 }
 0x3da   : > { %v18752_v48 = vadd.f32 %v18751_v50, %v18750_v2 }
 0x3db   : > { %v18753_v34 = vpop.f32.mrf.mxu1 }
 0x3dc   : > { %v22721_v63 = vadd.f32 %v18752_v48, %v12646_v42 }
 0x3dd   : > { %v18689_v12 = vpop.f32.mrf.mxu0  ;;  %v18754_v23 = vpop.f32.mrf.mxu1 }
 0x3de   : > { %23628 = vst [vmem:[#allocation3_spill] sm:$0xff] %v22721_v63  ;;  %v18755_v29 = vadd.f32 %v18754_v23, %v18753_v34 }
 0x3df   : > { %v18690_v56 = vpop.f32.mrf.mxu0  ;;  %v22727_v20 = vpop.f32.mrf.mxu1 }
 0x3e0   : > { %v18691_v52 = vadd.f32 %v18690_v56, %v18689_v12  ;;  %23630 = vst [vmem:[#allocation5_spill] sm:$0xff] %v22727_v20 }
 0x3e1   : > { %v18692_v17 = vpop.f32.mrf.mxu0  ;;  %v22731_v26 = vpop.f32.mrf.mxu1 }
 0x3e2   : > { %v12651_v27 = vadd.f32 %v18691_v52, %v22668_v1  ;;  %23632 = vst [vmem:[#allocation7_spill] sm:$0xff] %v22731_v26 }
 0x3e3   : > { %v18693_v39 = vpop.f32.mrf.mxu0 }
 0x3e4   : > { %v18694_v38 = vadd.f32 %v18693_v39, %v18692_v17  ;;  %v22729_v35 = vadd.f32 %v18755_v29, %v12651_v27 }
 0x3e5   : > { %v18775_v60 = vpop.f32.mrf.mxu0 }
 0x3e6   : > { %v22725_v32 = vadd.f32 %v18694_v38, %v22671_v62  ;;  %23631 = vst [vmem:[#allocation6_spill] sm:$0xff] %v22729_v35 }
 0x3e7   : > { %v18776_v0 = vpop.f32.mrf.mxu0 }
 0x3e8   : > { %23629 = vst [vmem:[#allocation4_spill] sm:$0xff] %v22725_v32  ;;  %v22733_v31 = vpop.f32.mrf.mxu1  ;;  %v18777_v26 = vadd.f32 %v18776_v0, %v18775_v60 }
 0x3e9   : > { %v18778_v22 = vpop.f32.mrf.mxu0 }
 0x3ea   : > { %v18840_v1 = vpop.f32.mrf.mxu1 }
 0x3eb   : > { %v18779_v24 = vpop.f32.mrf.mxu0 }
 0x3ec   : > { %v18780_v45 = vadd.f32 %v18779_v24, %v18778_v22  ;;  %v22735_v7 = vpop.f32.mrf.mxu1 }
 0x3ed   : > { %v18781_v46 = vpop.f32.mrf.mxu0 }
 0x3ee   : > { %v22738_v62 = vadd.f32 %v18780_v45, %v22678_v6  ;;  %v22740_v58 = vpop.f32.mrf.mxu1 }
 0x3ef   : > { %v18782_v14 = vpop.f32.mrf.mxu0 }
 0x3f0   : > { %v18845_v47 = vpop.f32.mrf.mxu1  ;;  %v18783_v35 = vadd.f32 %v18782_v14, %v18781_v46 }
 0x3f1   : > { %v18784_v11 = vpop.f32.mrf.mxu0 }
 0x3f2   : > { %v18846_v5 = vpop.f32.mrf.mxu1 }
 0x3f3   : > { %v18785_v51 = vpop.f32.mrf.mxu0 }
 0x3f4   : > { %v18848_v36 = vpop.f32.mrf.mxu1 }
 0x3f5   : > { %v18787_v43 = vpop.f32.mrf.mxu0 }
 0x3f6   : > { %v18849_v16 = vpop.f32.mrf.mxu1 }
 0x3f7   : > { %v18788_v28 = vpop.f32.mrf.mxu0 }
 0x3f8   : > { %v18789_v54 = vadd.f32 %v18788_v28, %v18787_v43  ;;  %v22742_v55 = vpop.f32.mrf.mxu1 }
 0x3f9   : > { %v22744_v3 = vpop.f32.mrf.mxu0 }
 0x3fa   : > { %v22747_v37 = vadd.f32 %v18789_v54, %v22687_v44  ;;  %v22749_v6 = vpop.f32.mrf.mxu1 }
 0x3fb   : > { %v22751_v13 = vpop.f32.mrf.mxu0 }
 0x3fc   : > { %v22753_v33 = vpop.f32.mrf.mxu1 }
 0x3fd   : > { %v22755_v40 = vpop.f32.mrf.mxu0 }
 0x3fe   : > { %v22757_v9 = vpop.f32.mrf.mxu1 }
 0x3ff   : > { %v22759_v2 = vpop.f32.mrf.mxu0 }
 0x400   : > { %v22761_v42 = vpop.f32.mrf.mxu1 }
 0x401   : > { %v18796_v50 = vpop.f32.mrf.mxu0 }
 0x402   : > { %v22763_v48 = vpop.f32.mrf.mxu1 }
 0x403   : > { %v18797_v12 = vpop.f32.mrf.mxu0 }
 0x404   : > { %v22765_v17 = vpop.f32.mrf.mxu1 }
 0x405   : > { %v18799_v44 = vpop.f32.mrf.mxu0 }
 0x406   : > { %v18861_v23 = vpop.f32.mrf.mxu1 }
 0x407   : > { %v18800_v56 = vpop.f32.mrf.mxu0 }
 0x408   : > { %v18801_v52 = vadd.f32 %v18800_v56, %v18799_v44  ;;  %v22778_v22 = vpop.f32.mrf.mxu1 }
 0x409   : > { %v22767_v27 = vpop.f32.mrf.mxu0  ;;  %23634 = vst [vmem:[#allocation9_spill] sm:$0xff] %v22778_v22 }
 0x40a   : > { %v22770_v34 = vadd.f32 %v18801_v52, %v22703_v18  ;;  %v22784_v43 = vpop.f32.mrf.mxu1 }
 0x40b   : > { %v22772_v39 = vpop.f32.mrf.mxu0  ;;  %23635 = vst [vmem:[#allocation10_spill] sm:$0xff] %v22784_v43  ;;  %v12797_v43 = vadd.f32 %v18783_v35, %v22681_v61 }
 0x40c   : > { %23633 = vst [vmem:[#allocation8_spill] sm:$0xff] %v22770_v34  ;;  %v22786_v18 = vpop.f32.mrf.mxu1 }
 0x40d   : > { %v22774_v38 = vpop.f32.mrf.mxu0 }
 0x40e   : > { %v22795_v32 = vpop.f32.mrf.mxu1 }
 0x40f   : > { %v22776_v29 = vpop.f32.mrf.mxu0 }
 0x410   : > { %v22802_v22 = vpop.f32.mrf.mxu1 }
 0x411   : > { %v22780_v24 = vpop.f32.mrf.mxu0 }
 0x412   : > { %v22811_v0 = vpop.f32.mrf.mxu1 }
 0x413   : > { %v22782_v45 = vpop.f32.mrf.mxu0 }
 0x415   : > { %v18811_v28 = vpop.f32.mrf.mxu0 }
 0x417   : > { %v18812_v54 = vpop.f32.mrf.mxu0 }
 0x418   : > { %v18813_v44 = vadd.f32 %v18812_v54, %v18811_v28  ;;  %v18847_v28 = vadd.f32 %v18846_v5, %v18845_v47  ;;  %v18786_v54 = vadd.f32 %v18785_v51, %v18784_v11  ;;  %v18844_v11 = vadd.f32 %v22740_v58, %v22735_v7 }
 0x419   : > { %v22788_v56 = vpop.f32.mrf.mxu0  ;;  %v18798_v51 = vadd.f32 %v18797_v12, %v18796_v50 }
 0x41a   : > { %23636 = vst [vmem:[#allocation11_spill] sm:$0xff] %v22788_v56  ;;  %v22791_v52 = vadd.f32 %v18813_v44, %v22718_v59  ;;  %v12789_v59 = vadd.f32 %v18777_v26, %v22675_v10  ;;  %v18841_v44 = vadd.f32 %v18840_v1, %v22733_v31  ;;  %v12800_v14 = vadd.f32 %v18786_v54, %v22684_v57  ;;  %v18872_v26 = vpop.f32.mrf.mxu1 }
 0x41b   : > { %v22793_v63 = vpop.f32.mrf.mxu0  ;;  %v12894_v60 = vadd.f32 %v18847_v28, %v12797_v43  ;;  %v18734_v57 = vadd.f32 %v22699_v21, %v22695_v53  ;;  %v18795_v53 = vadd.f32 %v22759_v2, %v22755_v40  ;;  %v18862_v28 = vadd.f32 %v18861_v23, %v22765_v17 }
 0x41c   : > { %23637 = vst [vmem:[#allocation12_spill] sm:$0xff] %v22791_v52  ;;  %23638 = vst [vmem:[#allocation13_spill] sm:$0xff] %v22793_v63  ;;  %v18850_v52 = vadd.f32 %v18849_v16, %v18848_v36  ;;  %v12886_v35 = vadd.f32 %v18841_v44, %v12789_v59  ;;  %v12889_v36 = vadd.f32 %v18844_v11, %v22738_v62  ;;  %v18873_v58 = vpop.f32.mrf.mxu1 }
 0x41d   : > { %v22797_v34 = vpop.f32.mrf.mxu0  ;;  %v12719_v43 = vadd.f32 %v18734_v57, %v22693_v30  ;;  %v18792_v62 = vadd.f32 %v22751_v13, %v22744_v3  ;;  %v12813_v40 = vadd.f32 %v18795_v53, %v22697_v49  ;;  %v18859_v2 = vadd.f32 %v22763_v48, %v22761_v42  ;;  %v20065_v42 = vld [vmem:[%s23622_s5 + $0x38] sm:$0xff]  }
 0x41e   : > { %v12897_v10 = vadd.f32 %v18850_v52, %v12800_v14  ;;  %v22841_v54 = vpop.f32.mrf.mxu1  ;;  %v18856_v13 = vadd.f32 %v22757_v9, %v22753_v33  ;;  %v18853_v49 = vadd.f32 %v22749_v6, %v22742_v55  ;;  %18967 = vmatprep.subr.bf16.mxu1 %v20065_v42  ;;  %v18746_v55 = vadd.f32 %v22715_v19, %v22711_v25 }
 0x41f   : > { %v22799_v20 = vpop.f32.mrf.mxu0  ;;  %v12816_v52 = vadd.f32 %v18798_v51, %v12719_v43  ;;  %v12808_v3 = vadd.f32 %v18792_v62, %v22690_v4  ;;  %v12910_v14 = vadd.f32 %v18859_v2, %v12813_v40  ;;  %18968 = vmatpush3.bf16.msra.mxu1 %v20065_v42  ;;  %v18810_v11 = vadd.f32 %v22782_v45, %v22780_v24  ;;  %v23643_v40 = vld [vmem:[#allocation8_spill] sm:$0xff] }
 0x420   : > { %v22851_v23 = vpop.f32.mrf.mxu1  ;;  %v12902_v6 = vadd.f32 %v18853_v49, %v22747_v37  ;;  %v12735_v57 = vadd.f32 %v18746_v55, %v22709_v41  ;;  %v18807_v25 = vadd.f32 %v22776_v29, %v22774_v38  ;;  %v18804_v24 = vadd.f32 %v22772_v39, %v22767_v27  ;;  %v20066_v27 = vld [vmem:[%s23622_s5 + $0x30] sm:$0xff]  }
 0x421   : > { %v22804_v56 = vpop.f32.mrf.mxu0  ;;  %v12913_v17 = vadd.f32 %v18862_v28, %v12816_v52  ;;  %v12905_v33 = vadd.f32 %v18856_v13, %v12808_v3  ;;  %v18871_v38 = vadd.f32 %v22811_v0, %v22802_v22  ;;  %18969 = vmatprep.subr.bf16.mxu1 %v20066_v27  ;;  %v23639_v0 = vld [vmem:[#allocation9_spill] sm:$0xff]  ;;  %v23642_v28 = vld [vmem:[#allocation7_spill] sm:$0xff] }
 0x422   : > { %v22864_v9 = vpop.f32.mrf.mxu1  ;;  %v12832_v45 = vadd.f32 %v18810_v11, %v12735_v57  ;;  %v12829_v41 = vadd.f32 %v18807_v25, %v22713_v8  ;;  %v12824_v39 = vadd.f32 %v18804_v24, %v22706_v15  ;;  %v20067_v15 = vld [vmem:[%s23622_s5 + $0x28] sm:$0xff]   ;;  %v23641_v52 = vld [vmem:[#allocation5_spill] sm:$0xff]  ;;  %v20068_v3 = vld [vmem:[%s23622_s5 + $0x20] sm:$0xff]  }
 0x423   : > { %v22808_v46 = vpop.f32.mrf.mxu0  ;;  %18970 = vmatpush3.bf16.msra.mxu1 %v20066_v27 }
 0x424   : > { %v12926_v53 = vadd.f32 %v18871_v38, %v12829_v41  ;;  %18971 = vmatprep.subr.bf16.mxu1 %v20067_v15  ;;  %v18822_v13 = vadd.f32 %v22808_v46, %v22804_v56  ;;  %v20069_v56 = vld [vmem:[%s23622_s5 + $0x18] sm:$0xff]   ;;  %v23645_v46 = vld [vmem:[#allocation11_spill] sm:$0xff] }
 0x425   : > { %v18953_v63 = vpop.f32.mrf.mxu0 }
 0x426   : > { %v22813_v61 = vadd.f32 %v18953_v63, %v12894_v60 }
 0x427   : > { %v12982_v47 = vpop.f32.mrf.mxu0  ;;  %18972 = vmatpush3.bf16.msra.mxu1 %v20067_v15 }
 0x428   : > { %v22817_v5 = vadd.f32 %v12982_v47, %v12886_v35  ;;  %13049 = vadd.xlane.f32.xlu1 %v22813_v61  ;;  %v13095_v7 = vmul.f32 %v22813_v61, %v22813_v61  ;;  %18973 = vmatprep.subr.bf16.mxu1 %v20068_v3 }
 0x429   : > { %v18954_v31 = vpop.f32.mrf.mxu0 }
 0x42a   : > { %v22822_v1 = vadd.f32 %v18954_v31, %v12897_v10  ;;  %13045 = vadd.xlane.f32.xlu0 %v22817_v5  ;;  %v13093_v30 = vmul.f32 %v22817_v5, %v22817_v5  ;;  %v22877_v31 = vpop.f32.mrf.mxu1 }
 0x42b   : > { %v12985_v63 = vpop.f32.mrf.mxu0  ;;  %18974 = vmatpush3.bf16.msra.mxu1 %v20068_v3  ;;  %v18880_v41 = vadd.f32 %v22877_v31, %v22864_v9 }
 0x42c   : > { %13051 = vadd.xlane.f32.xlu1 %v22822_v1  ;;  %v22832_v21 = vadd.f32 %v12985_v63, %v12889_v36  ;;  %v13096_v50 = vmul.f32 %v22822_v1, %v22822_v1  ;;  %v18874_v63 = vadd.f32 %v18873_v58, %v18872_v26  ;;  %v18881_v36 = vpop.f32.mrf.mxu1  ;;  %v18868_v26 = vadd.f32 %v22795_v32, %v22786_v18 }
 0x42d   : > { %v18957_v16 = vpop.f32.mrf.mxu0  ;;  %18975 = vmatprep.subr.bf16.mxu1 %v20069_v56 }
 0x42e   : > { %13113 = vadd.xlane.f32.xlu0 %v13095_v7  ;;  %v13094_v59 = vmul.f32 %v22832_v21, %v22832_v21  ;;  %v22861_v48 = vadd.f32 %v18957_v16, %v12910_v14  ;;  %v12929_v58 = vadd.f32 %v18874_v63, %v12832_v45  ;;  %v18882_v22 = vpop.f32.mrf.mxu1  ;;  %v23640_v16 = vld [vmem:[#allocation10_spill] sm:$0xff]  ;;  %v12921_v18 = vadd.f32 %v18868_v26, %v12824_v39  ;;  %v23644_v14 = vld [vmem:[#allocation4_spill] sm:$0xff]  ;;  %v20070_v45 = vld [vmem:[%s23622_s5 + $0x10] sm:$0xff]  }
 0x42f   : > { %v12998_v12 = vpop.f32.mrf.mxu0  ;;  %v18865_v43 = vadd.f32 %v23640_v16, %v23639_v0  ;;  %18976 = vmatpush3.bf16.msra.mxu1 %v20069_v56  ;;  %v23648_v63 = vld [vmem:[#allocation3_spill] sm:$0xff]  ;;  %v20071_v26 = vld [vmem:[%s23622_s5 + $0x8] sm:$0xff]  }
 0x430   : > { %13115 = vadd.xlane.f32.xlu1 %v13096_v50  ;;  %v22874_v10 = vadd.f32 %v12998_v12, %v12902_v6  ;;  %v13099_v51 = vmul.f32 %v22861_v48, %v22861_v48  ;;  %v18884_v62 = vpop.f32.mrf.mxu1  ;;  %v23646_v6 = vld [vmem:[#allocation13_spill] sm:$0xff]  ;;  %18977 = vmatprep.subr.bf16.mxu1 %v20070_v45 }
 0x431   : > { %v18958_v44 = vpop.f32.mrf.mxu0  ;;  %v12918_v2 = vadd.f32 %v18865_v43, %v23643_v40 }
 0x432   : > { %13109 = vadd.xlane.f32.xlu0 %v13093_v30  ;;  %v22855_v60 = vadd.f32 %v18958_v44, %v12913_v17  ;;  %v13097_v8 = vmul.f32 %v22874_v10, %v22874_v10  ;;  %v18758_v30 = vadd.f32 %v23642_v28, %v23641_v52  ;;  %v18885_v49 = vpop.f32.mrf.mxu1 }
 0x433   : > { %v13001_v4 = vpop.f32.mrf.mxu0  ;;  %v18886_v57 = vadd.f32 %v18885_v49, %v18884_v62  ;;  %18978 = vmatpush3.bf16.msra.mxu1 %v20070_v45 }
 0x434   : > { %13111 = vadd.xlane.f32.xlu1 %v13094_v59  ;;  %v22869_v35 = vadd.f32 %v13001_v4, %v12905_v33  ;;  %v13100_v19 = vmul.f32 %v22855_v60, %v22855_v60  ;;  %v12751_v42 = vadd.f32 %v18758_v30, %v23644_v14  ;;  %v18819_v4 = vadd.f32 %v22799_v20, %v22797_v34  ;;  %v23647_v34 = vld [vmem:[#allocation6_spill] sm:$0xff] }
 0x435   : > { %v18961_v47 = vpop.f32.mrf.mxu0  ;;  %18979 = vmatprep.subr.bf16.mxu1 %v20071_v26 }
 0x436   : > { %13047 = vadd.xlane.f32.xlu0 %v22832_v21  ;;  %v13098_v29 = vmul.f32 %v22869_v35, %v22869_v35  ;;  %v22909_v32 = vadd.f32 %v18961_v47, %v12926_v53  ;;  %v18816_v47 = vadd.f32 %v23646_v6, %v23645_v46  ;;  %v12848_v11 = vadd.f32 %v18822_v13, %v12751_v42 }
 0x437   : > { %v13014_v37 = vpop.f32.mrf.mxu0  ;;  %v12845_v25 = vadd.f32 %v18819_v4, %v23647_v34  ;;  %18980 = vmatpush3.bf16.msra.mxu1 %v20071_v26 }
 0x438   : > { %13059 = vadd.xlane.f32.xlu1 %v22855_v60  ;;  %v22923_v17 = vadd.f32 %v13014_v37, %v12918_v2  ;;  %v13103_v20 = vmul.f32 %v22909_v32, %v22909_v32  ;;  %v12945_v38 = vadd.f32 %v18886_v57, %v12848_v11 }
 0x439   : > { %v18962_v7 = vpop.f32.mrf.mxu0 }
 0x43a   : > { %13057 = vadd.xlane.f32.xlu0 %v22861_v48  ;;  %v22904_v50 = vadd.f32 %v18962_v7, %v12929_v58  ;;  %v23649_v58 = vld [vmem:[#allocation12_spill] sm:$0xff] }
 0x43b   : > { %v13017_v12 = vpop.f32.mrf.mxu0 }
 0x43c   : > { %13055 = vadd.xlane.f32.xlu1 %v22869_v35  ;;  %v22915_v59 = vadd.f32 %v13017_v12, %v12921_v18  ;;  %v13104_v33 = vmul.f32 %v22904_v50, %v22904_v50 }
 0x43d   : > { %v18965_v44 = vpop.f32.mrf.mxu0 }
 0x43e   : > { %13053 = vadd.xlane.f32.xlu0 %v22874_v10  ;;  %v13102_v37 = vmul.f32 %v22915_v59, %v22915_v59 }
 0x43f   : > { %v13030_v55 = vpop.f32.mrf.mxu0 }
 0x440   : > { %13123 = vadd.xlane.f32.xlu1 %v13100_v19  ;;  %v18883_v19 = vadd.f32 %v18882_v22, %v18881_v36  ;;  %v13101_v36 = vmul.f32 %v22923_v17, %v22923_v17 }
 0x441   : > { %v18966_v24 = vpop.f32.mrf.mxu0 }
 0x442   : > { %13121 = vadd.xlane.f32.xlu0 %v13099_v51  ;;  %v12840_v51 = vadd.f32 %v18816_v47, %v23648_v63  ;;  %v12942_v7 = vadd.f32 %v18883_v19, %v12845_v25  ;;  %v22952_v27 = vadd.f32 %v18966_v24, %v12945_v38 }
 0x443   : > { %v13033_v39 = vpop.f32.mrf.mxu0 }
 0x444   : > { %13119 = vadd.xlane.f32.xlu1 %v13098_v29  ;;  %v18877_v29 = vadd.f32 %v22851_v23, %v22841_v54  ;;  %v22957_v9 = vadd.f32 %v18965_v44, %v12942_v7  ;;  %v12937_v31 = vadd.f32 %v18880_v41, %v12840_v51  ;;  %v20072_v54 = vld [vmem:[%s23622_s5] sm:$0xff]   ;;  %v13108_v43 = vmul.f32 %v22952_v27, %v22952_v27 }
 0x445   : > { %18981 = vmatprep.subr.bf16.mxu1 %v20072_v54 }
 0x446   : > { %13117 = vadd.xlane.f32.xlu0 %v13097_v8  ;;  %v12934_v8 = vadd.f32 %v18877_v29, %v23649_v58  ;;  %v22961_v22 = vadd.f32 %v13033_v39, %v12937_v31  ;;  %18982 = vmatpush3.bf16.msra.mxu1 %v20072_v54  ;;  %v13107_v53 = vmul.f32 %v22957_v9, %v22957_v9 }
 0x448   : > { %13067 = vadd.xlane.f32.xlu1 %v22904_v50  ;;  %v22967_v23 = vadd.f32 %v13030_v55, %v12934_v8  ;;  %v13106_v0 = vmul.f32 %v22961_v22, %v22961_v22 }
 0x44a   : > { %13065 = vadd.xlane.f32.xlu0 %v22909_v32  ;;  %v13105_v16 = vmul.f32 %v22967_v23, %v22967_v23 }
 0x44c   : > { %13063 = vadd.xlane.f32.xlu1 %v22915_v59 }
 0x44e   : > { %13061 = vadd.xlane.f32.xlu0 %v22923_v17 }
 0x450   : > { %13131 = vadd.xlane.f32.xlu1 %v13104_v33 }
 0x452   : > { %13129 = vadd.xlane.f32.xlu0 %v13103_v20 }
 0x454   : > { %13127 = vadd.xlane.f32.xlu1 %v13102_v37 }
 0x456   : > { %13125 = vadd.xlane.f32.xlu0 %v13101_v36 }
 0x458   : > { %13075 = vadd.xlane.f32.xlu1 %v22952_v27 }
 0x45a   : > { %13073 = vadd.xlane.f32.xlu0 %v22957_v9 }
 0x45c   : > { %13071 = vadd.xlane.f32.xlu1 %v22961_v22 }
 0x45e   : > { %13069 = vadd.xlane.f32.xlu0 %v22967_v23 }
 0x460   : > { %13135 = vadd.xlane.f32.xlu1 %v13106_v0 }
 0x462   : > { %13133 = vadd.xlane.f32.xlu0 %v13105_v16 }
 0x464   : > { %13139 = vadd.xlane.f32.xlu1 %v13108_v43 }
 0x466   : > { %13137 = vadd.xlane.f32.xlu0 %v13107_v53 }
 0x4b1   : > { %v13050_v12 = vpop.xlane.xlu1 %13049 }
 0x4b2   : > { %v22979_v18 = vmul.f32 0.25, %v13050_v12 }
 0x4b3   : > { %v13046_v15 = vpop.xlane.xlu0 %13045 }
 0x4b4   : > { %v22981_v30 = vmul.f32 0.25, %v13046_v15  ;;  %v13159_v2 = vmul.f32 %v22979_v18, %v22979_v18 }
 0x4b5   : > { %v13052_v62 = vpop.xlane.xlu1 %13051 }
 0x4b6   : > { %v13080_v52 = vmul.f32 0.25, %v13052_v62  ;;  %v13157_v42 = vmul.f32 %v22981_v30, %v22981_v30 }
 0x4b7   : > { %v13114_v28 = vpop.xlane.xlu0 %13113 }
 0x4b8   : > { %v13143_v40 = vmul.f32 0.25, %v13114_v28  ;;  %v13160_v3 = vmul.f32 %v13080_v52, %v13080_v52  ;;  %v13192_v12 = vsub.f32 %v22822_v1, %v13080_v52 }
 0x4b9   : > { %v13116_v44 = vpop.xlane.xlu1 %13115 }
 0x4ba   : > { %v13144_v13 = vmul.f32 0.25, %v13116_v44  ;;  %v13175_v49 = vsub.f32 %v13143_v40, %v13159_v2  ;;  %v13189_v2 = vsub.f32 %v22817_v5, %v22981_v30  ;;  %v23011_v5 = vld [vmem:[%s23620_s3] ss:$0 sm:$0xff] }
 0x4bb   : > { %v13110_v14 = vpop.xlane.xlu0 %13109 }
 0x4bc   : > { %v13176_v4 = vsub.f32 %v13144_v13, %v13160_v3  ;;  %v13141_v33 = vmul.f32 0.25, %v13110_v14  ;;  %v13207_v6 = vadd.f32 1e-05, %v13175_v49  ;;  %v13191_v49 = vsub.f32 %v22813_v61, %v22979_v18 }
 0x4bd   : > { %v13112_v55 = vpop.xlane.xlu1 %13111 }
 0x4be   : > { %v13208_v56 = vadd.f32 1e-05, %v13176_v4  ;;  %v13173_v46 = vsub.f32 %v13141_v33, %v13157_v42  ;;  %v13142_v34 = vmul.f32 0.25, %v13112_v55 }
 0x4bf   : > { %v13048_v47 = vpop.xlane.xlu0 %13047 }
 0x4c0   : > { %v13205_v11 = vadd.f32 1e-05, %v13173_v46  ;;  %v13078_v57 = vmul.f32 0.25, %v13048_v47  ;;  %20081 = vrsqrt.f32 %v13208_v56 }
 0x4c1   : > { %v13060_v20 = vpop.xlane.xlu1 %13059 }
 0x4c2   : > { %20083 = vrsqrt.f32 %v13205_v11  ;;  %v13158_v25 = vmul.f32 %v13078_v57, %v13078_v57  ;;  %v22987_v63 = vmul.f32 0.25, %v13060_v20  ;;  %v13190_v30 = vsub.f32 %v22832_v21, %v13078_v57  ;;  %v23025_v21 = vld [vmem:[%s23621_s4] ss:$0 sm:$0xff] }
 0x4c3   : > { %20085 = vrsqrt.f32 %v13207_v6  ;;  %v13058_v19 = vpop.xlane.xlu0 %13057 }
 0x4c4   : > { %v13174_v37 = vsub.f32 %v13142_v34, %v13158_v25  ;;  %v22989_v41 = vmul.f32 0.25, %v13058_v19  ;;  %v13164_v36 = vmul.f32 %v22987_v63, %v22987_v63 }
 0x4c5   : > { %v13056_v24 = vpop.xlane.xlu1 %13055 }
 0x4c6   : > { %v13206_v45 = vadd.f32 1e-05, %v13174_v37  ;;  %v22993_v7 = vmul.f32 0.25, %v13056_v24  ;;  %v13163_v26 = vmul.f32 %v22989_v41, %v22989_v41 }
 0x4c7   : > { %v13054_v51 = vpop.xlane.xlu0 %13053 }
 0x4c8   : > { %20087 = vrsqrt.f32 %v13206_v45  ;;  %v22997_v31 = vmul.f32 0.25, %v13054_v51  ;;  %v13162_v15 = vmul.f32 %v22993_v7, %v22993_v7 }
 0x4c9   : > { %v13124_v38 = vpop.xlane.xlu1 %13123 }
 0x4ca   : > { %v13148_v29 = vmul.f32 0.25, %v13124_v38  ;;  %v13161_v44 = vmul.f32 %v22997_v31, %v22997_v31 }
 0x4cb   : > { %v13122_v39 = vpop.xlane.xlu0 %13121 }
 0x4cc   : > { %v13180_v58 = vsub.f32 %v13148_v29, %v13164_v36  ;;  %v13147_v8 = vmul.f32 0.25, %v13122_v39 }
 0x4cd   : > { %v13120_v54 = vpop.xlane.xlu1 %13119  ;;  %v20082_v0 = vpop.eup %20081 }
 0x4ce   : > { %v13212_v16 = vadd.f32 1e-05, %v13180_v58  ;;  %v13179_v43 = vsub.f32 %v13147_v8, %v13163_v26  ;;  %v13146_v62 = vmul.f32 0.25, %v13120_v54  ;;  %v13240_v14 = vmul.f32 %v20082_v0, %v13192_v12 }
 0x4cf   : > { %v20084_v53 = vpop.eup %20083  ;;  %v13118_v28 = vpop.xlane.xlu0 %13117 }
 0x4d0   : > { %v20086_v40 = vpop.eup %20085  ;;  %v13211_v3 = vadd.f32 1e-05, %v13179_v43  ;;  %v13145_v13 = vmul.f32 0.25, %v13118_v28  ;;  %20089 = vrsqrt.f32 %v13212_v16  ;;  %v13178_v1 = vsub.f32 %v13146_v62, %v13162_v15 }
 0x4d1   : > { %v13068_v52 = vpop.xlane.xlu1 %13067  ;;  %v13237_v4 = vmul.f32 %v20084_v53, %v13189_v2  ;;  %v13239_v33 = vmul.f32 %v20086_v40, %v13191_v49  ;;  %v13263_v61 = vmul.f32 %v23011_v5, %v13240_v14 }
 0x4d2   : > { %20091 = vrsqrt.f32 %v13211_v3  ;;  %v13177_v42 = vsub.f32 %v13145_v13, %v13161_v44  ;;  %v13210_v55 = vadd.f32 1e-05, %v13178_v1  ;;  %v23015_v18 = vmul.f32 0.25, %v13068_v52 }
 0x4d3   : > { %v13066_v56 = vpop.xlane.xlu0 %13065  ;;  %v13260_v20 = vmul.f32 %v23011_v5, %v13237_v4  ;;  %v13262_v34 = vmul.f32 %v23011_v5, %v13239_v33  ;;  %v13286_v45 = vadd.f32 %v23025_v21, %v13263_v61  ;;  %v13196_v44 = vsub.f32 %v22855_v60, %v22987_v63 }
 0x4d4   : > { %v13209_v46 = vadd.f32 1e-05, %v13177_v42  ;;  %20093 = vrsqrt.f32 %v13210_v55  ;;  %v23019_v25 = vmul.f32 0.25, %v13066_v56  ;;  %v13168_v57 = vmul.f32 %v23015_v18, %v23015_v18 }
 0x4d5   : > { %v20088_v6 = vpop.eup %20087  ;;  %v13064_v47 = vpop.xlane.xlu1 %13063  ;;  %v13283_v36 = vadd.f32 %v23025_v21, %v13260_v20  ;;  %v13285_v58 = vadd.f32 %v23025_v21, %v13262_v34  ;;  %v13195_v3 = vsub.f32 %v22861_v48, %v22989_v41  ;;  %v13194_v42 = vsub.f32 %v22869_v35, %v22993_v7 }
 0x4d6   : > { %v13238_v11 = vmul.f32 %v20088_v6, %v13190_v30  ;;  %20095 = vrsqrt.f32 %v13209_v46  ;;  %v23030_v51 = vmul.f32 0.25, %v13064_v47  ;;  %v13167_v39 = vmul.f32 %v23019_v25, %v23019_v25 }
 0x4d7   : > { %v13062_v19 = vpop.xlane.xlu0 %13061  ;;  %v13300_v53 = vpack.c.bf16 %v13286_v45, %v13285_v58  ;;  %v13193_v41 = vsub.f32 %v22874_v10, %v22997_v31 }
 0x4d8   : > { %v13261_v37 = vmul.f32 %v23011_v5, %v13238_v11  ;;  %v23037_v8 = vmul.f32 0.25, %v13062_v19  ;;  %v13166_v15 = vmul.f32 %v23030_v51, %v23030_v51 }
 0x4d9   : > { %v13132_v24 = vpop.xlane.xlu1 %13131 }
 0x4da   : > { %v13152_v38 = vmul.f32 0.25, %v13132_v24  ;;  %v13284_v29 = vadd.f32 %v23025_v21, %v13261_v37  ;;  %v13165_v49 = vmul.f32 %v23037_v8, %v23037_v8 }
 0x4db   : > { %v13130_v26 = vpop.xlane.xlu0 %13129 }
 0x4dc   : > { %v13184_v54 = vsub.f32 %v13152_v38, %v13168_v57  ;;  %v13151_v0 = vmul.f32 0.25, %v13130_v26  ;;  %v13299_v16 = vpack.c.bf16 %v13284_v29, %v13283_v36 }
 0x4dd   : > { %v13128_v43 = vpop.xlane.xlu1 %13127  ;;  %v20090_v12 = vpop.eup %20089 }
 0x4de   : > { %v13216_v62 = vadd.f32 1e-05, %v13184_v54  ;;  %v13183_v28 = vsub.f32 %v13151_v0, %v13167_v39  ;;  %v13150_v40 = vmul.f32 0.25, %v13128_v43  ;;  %18983 = vmatprep.mubr.bf16.mxu1 %v13299_v16  ;;  %v13244_v56 = vmul.f32 %v20090_v12, %v13196_v44 }
 0x4df   : > { %v20092_v2 = vpop.eup %20091  ;;  %18984 = vmatmul.mubr.bf16.vlgmr.msra.gmra.mxu1 %v13300_v53  ;;  %v13126_v13 = vpop.xlane.xlu0 %13125  ;;  %v13200_v44 = vsub.f32 %v22904_v50, %v23015_v18 }
 0x4e0   : > { %v13215_v14 = vadd.f32 1e-05, %v13183_v28  ;;  %v13182_v1 = vsub.f32 %v13150_v40, %v13166_v15  ;;  %v13149_v52 = vmul.f32 0.25, %v13126_v13  ;;  %20097 = vrsqrt.f32 %v13216_v62 }
 0x4e1   : > { %v13076_v4 = vpop.xlane.xlu1 %13075  ;;  %v13243_v33 = vmul.f32 %v20092_v2, %v13195_v3  ;;  %v20094_v55 = vpop.eup %20093  ;;  %v13267_v20 = vmul.f32 %v23011_v5, %v13244_v56  ;;  %v13199_v3 = vsub.f32 %v22909_v32, %v23019_v25  ;;  %v13198_v13 = vsub.f32 %v22915_v59, %v23030_v51 }
 0x4e2   : > { %20099 = vrsqrt.f32 %v13215_v14  ;;  %v13214_v60 = vadd.f32 1e-05, %v13182_v1  ;;  %v13181_v63 = vsub.f32 %v13149_v52, %v13165_v49  ;;  %v13242_v46 = vmul.f32 %v20094_v55, %v13194_v42 }
 0x4e3   : > { %v20096_v48 = vpop.eup %20095  ;;  %v13074_v30 = vpop.xlane.xlu0 %13073  ;;  %v13266_v61 = vmul.f32 %v23011_v5, %v13243_v33  ;;  %v23062_v45 = vmul.f32 0.25, %v13076_v4  ;;  %v13290_v29 = vadd.f32 %v23025_v21, %v13267_v20  ;;  %v13197_v33 = vsub.f32 %v22923_v17, %v23037_v8 }
 0x4e4   : > { %20101 = vrsqrt.f32 %v13214_v60  ;;  %v13213_v6 = vadd.f32 1e-05, %v13181_v63  ;;  %v13241_v35 = vmul.f32 %v20096_v48, %v13193_v41  ;;  %v13265_v7 = vmul.f32 %v23011_v5, %v13242_v46 }
 0x4e5   : > { %v13072_v47 = vpop.xlane.xlu1 %13071  ;;  %v13289_v10 = vadd.f32 %v23025_v21, %v13266_v61  ;;  %v23067_v39 = vmul.f32 0.25, %v13074_v30  ;;  %v13172_v15 = vmul.f32 %v23062_v45, %v23062_v45 }
 0x4e6   : > { %20103 = vrsqrt.f32 %v13213_v6  ;;  %v23053_v11 = vmul.f32 0.25, %v13072_v47  ;;  %v13264_v19 = vmul.f32 %v23011_v5, %v13241_v35  ;;  %v13288_v24 = vadd.f32 %v23025_v21, %v13265_v7 }
 0x4e7   : > { %v13070_v34 = vpop.xlane.xlu0 %13069  ;;  %v13302_v43 = vpack.c.bf16 %v13290_v29, %v13289_v10  ;;  %v13171_v49 = vmul.f32 %v23067_v39, %v23067_v39 }
 0x4e8   : > { %v23057_v37 = vmul.f32 0.25, %v13070_v34  ;;  %v13287_v57 = vadd.f32 %v23025_v21, %v13264_v19  ;;  %v13170_v38 = vmul.f32 %v23053_v11, %v23053_v11  ;;  %v13202_v47 = vsub.f32 %v22961_v22, %v23053_v11 }
 0x4e9   : > { %v13136_v31 = vpop.xlane.xlu1 %13135  ;;  %v13204_v19 = vsub.f32 %v22952_v27, %v23062_v45 }
 0x4ea   : > { %v13154_v36 = vmul.f32 0.25, %v13136_v31  ;;  %v13301_v58 = vpack.c.bf16 %v13288_v24, %v13287_v57  ;;  %v13169_v54 = vmul.f32 %v23057_v37, %v23057_v37  ;;  %v13201_v7 = vsub.f32 %v22967_v23, %v23057_v37 }
 0x4eb   : > { %v13134_v26 = vpop.xlane.xlu0 %13133  ;;  %v13203_v24 = vsub.f32 %v22957_v9, %v23067_v39  ;;  %v20073_v39 = vld [vmem:[%s23624_s7 + $0x38] sm:$0xff]  }
 0x4ec   : > { %v13186_v0 = vsub.f32 %v13154_v36, %v13170_v38  ;;  %v13153_v16 = vmul.f32 0.25, %v13134_v26  ;;  %18987 = vmatprep.mubr.bf16.mxu1 %v13301_v58  ;;  %18999 = vmatprep.subr.bf16.mxu0 %v20073_v39 }
 0x4ed   : > { %v13140_v53 = vpop.xlane.xlu1 %13139  ;;  %v20098_v12 = vpop.eup %20097  ;;  %18988 = vmatmul.mubr.bf16.gmra.mxu1 %v13302_v43  ;;  %19031 = vmatprep.subr.bf16.mxu1 %v20073_v39  ;;  %v20079_v43 = vld [vmem:[%s23624_s7 + $0x8] sm:$0xff]  }
 0x4ee   : > { %v13218_v62 = vadd.f32 1e-05, %v13186_v0  ;;  %v13185_v28 = vsub.f32 %v13153_v16, %v13169_v54  ;;  %v13156_v40 = vmul.f32 0.25, %v13140_v53  ;;  %v13248_v50 = vmul.f32 %v20098_v12, %v13200_v44  ;;  %19000 = vmatpush3.bf16.msra.mxu0 %v20073_v39  ;;  %19039 = vmatpush3.bf16.msra.mxu1 %v20073_v39  ;;  %v20074_v54 = vld [vmem:[%s23624_s7 + $0x30] sm:$0xff]   ;;  %v20077_v0 = vld [vmem:[%s23624_s7 + $0x18] sm:$0xff]   ;;  %v20080_v53 = vld [vmem:[%s23624_s7] sm:$0xff]  }
 0x4ef   : > { %v20100_v2 = vpop.eup %20099  ;;  %v13138_v14 = vpop.xlane.xlu0 %13137  ;;  %19001 = vmatprep.subr.bf16.mxu0 %v20074_v54  ;;  %19032 = vmatprep.subr.bf16.mxu1 %v20074_v54  ;;  %v20078_v16 = vld [vmem:[%s23624_s7 + $0x10] sm:$0xff]   ;;  %v23134_v12 = vld [vmem:[%s23623_s6] ss:$0 sm:$0xff] }
 0x4f0   : > { %20105 = vrsqrt.f32 %v13218_v62  ;;  %v13217_v1 = vadd.f32 1e-05, %v13185_v28  ;;  %v13188_v52 = vsub.f32 %v13156_v40, %v13172_v15  ;;  %v13155_v42 = vmul.f32 0.25, %v13138_v14 }
 0x4f1   : > { %v20102_v4 = vpop.eup %20101  ;;  %v13247_v55 = vmul.f32 %v20100_v2, %v13199_v3  ;;  %v13271_v48 = vmul.f32 %v23011_v5, %v13248_v50 }
 0x4f2   : > { %20107 = vrsqrt.f32 %v13217_v1  ;;  %v13220_v18 = vadd.f32 1e-05, %v13188_v52  ;;  %v13187_v32 = vsub.f32 %v13155_v42, %v13171_v49  ;;  %v13246_v25 = vmul.f32 %v20102_v4, %v13198_v13  ;;  %19002 = vmatpush3.bf16.msra.mxu0 %v20074_v54  ;;  %19040 = vmatpush3.bf16.msra.mxu1 %v20074_v54 }
 0x4f3   : > { %v20104_v60 = vpop.eup %20103  ;;  %v13270_v59 = vmul.f32 %v23011_v5, %v13247_v55  ;;  %v13294_v46 = vadd.f32 %v23025_v21, %v13271_v48 }
 0x4f4   : > { %20109 = vrsqrt.f32 %v13220_v18  ;;  %v13219_v51 = vadd.f32 1e-05, %v13187_v32  ;;  %v13245_v63 = vmul.f32 %v20104_v60, %v13197_v33  ;;  %v13269_v56 = vmul.f32 %v23011_v5, %v13246_v25 }
 0x4f5   : > { %v13293_v17 = vadd.f32 %v23025_v21, %v13270_v59 }
 0x4f6   : > { %20111 = vrsqrt.f32 %v13219_v51  ;;  %v13268_v41 = vmul.f32 %v23011_v5, %v13245_v63  ;;  %v13292_v30 = vadd.f32 %v23025_v21, %v13269_v56 }
 0x4f7   : > { %v13304_v61 = vpack.c.bf16 %v13294_v46, %v13293_v17 }
 0x4f8   : > { %v13291_v8 = vadd.f32 %v23025_v21, %v13268_v41 }
 0x4fa   : > { %v13303_v6 = vpack.c.bf16 %v13292_v30, %v13291_v8 }
 0x4fc   : > { %18991 = vmatprep.mubr.bf16.mxu1 %v13303_v6 }
 0x4fd   : > { %v20106_v35 = vpop.eup %20105  ;;  %18992 = vmatmul.mubr.bf16.gmra.mxu1 %v13304_v61 }
 0x4fe   : > { %v13250_v20 = vmul.f32 %v20106_v35, %v13202_v47 }
 0x4ff   : > { %v20108_v34 = vpop.eup %20107 }
 0x500   : > { %v13249_v10 = vmul.f32 %v20108_v34, %v13201_v7  ;;  %v13273_v31 = vmul.f32 %v23011_v5, %v13250_v20 }
 0x501   : > { %v20110_v57 = vpop.eup %20109 }
 0x502   : > { %v13272_v22 = vmul.f32 %v23011_v5, %v13249_v10  ;;  %v13252_v11 = vmul.f32 %v20110_v57, %v13204_v19  ;;  %v13296_v23 = vadd.f32 %v23025_v21, %v13273_v31 }
 0x503   : > { %v20112_v38 = vpop.eup %20111 }
 0x504   : > { %v13295_v36 = vadd.f32 %v23025_v21, %v13272_v22  ;;  %v13251_v37 = vmul.f32 %v20112_v38, %v13203_v24  ;;  %v13275_v29 = vmul.f32 %v23011_v5, %v13252_v11 }
 0x506   : > { %v13305_v26 = vpack.c.bf16 %v13296_v23, %v13295_v36  ;;  %v13274_v27 = vmul.f32 %v23011_v5, %v13251_v37  ;;  %v13298_v58 = vadd.f32 %v23025_v21, %v13275_v29  ;;  %v20075_v5 = vld [vmem:[%s23624_s7 + $0x28] sm:$0xff]  }
 0x507   : > { %19003 = vmatprep.subr.bf16.mxu0 %v20075_v5  ;;  %19033 = vmatprep.subr.bf16.mxu1 %v20075_v5 }
 0x508   : > { %18995 = vmatprep.mubr.bf16.mxu1 %v13305_v26  ;;  %v13297_v45 = vadd.f32 %v23025_v21, %v13274_v27  ;;  %19004 = vmatpush3.bf16.msra.mxu0 %v20075_v5  ;;  %v20076_v21 = vld [vmem:[%s23624_s7 + $0x20] sm:$0xff]  }
 0x509   : > { %19041 = vmatpush3.bf16.msra.mxu1 %v20075_v5  ;;  %19005 = vmatprep.subr.bf16.mxu0 %v20076_v21 }
 0x50a   : > { %v13306_v9 = vpack.c.bf16 %v13298_v58, %v13297_v45  ;;  %19034 = vmatprep.subr.bf16.mxu1 %v20076_v21 }
 0x50c   : > { %18996 = vmatmul.mubr.bf16.gmra.mxu1 %v13306_v9  ;;  %19006 = vmatpush3.bf16.msra.mxu0 %v20076_v21  ;;  %v20217_v9 = vmov -1.0  }
 0x50d   : > { %19042 = vmatpush3.bf16.msra.mxu1 %v20076_v21  ;;  %19007 = vmatprep.subr.bf16.mxu0 %v20077_v0 }
 0x50e   : > { %19035 = vmatprep.subr.bf16.mxu1 %v20077_v0 }
 0x510   : > { %19008 = vmatpush3.bf16.msra.mxu0 %v20077_v0 }
 0x511   : > { %19043 = vmatpush3.bf16.msra.mxu1 %v20077_v0  ;;  %19009 = vmatprep.subr.bf16.mxu0 %v20078_v16 }
 0x512   : > { %19036 = vmatprep.subr.bf16.mxu1 %v20078_v16 }
 0x514   : > { %19010 = vmatpush3.bf16.msra.mxu0 %v20078_v16 }
 0x515   : > { %19044 = vmatpush3.bf16.msra.mxu1 %v20078_v16  ;;  %19011 = vmatprep.subr.bf16.mxu0 %v20079_v43 }
 0x516   : > { %19037 = vmatprep.subr.bf16.mxu1 %v20079_v43 }
 0x518   : > { %19012 = vmatpush3.bf16.msra.mxu0 %v20079_v43 }
 0x519   : > { %19045 = vmatpush3.bf16.msra.mxu1 %v20079_v43  ;;  %19013 = vmatprep.subr.bf16.mxu0 %v20080_v53 }
 0x51a   : > { %19038 = vmatprep.subr.bf16.mxu1 %v20080_v53 }
 0x51c   : > { %19014 = vmatpush3.bf16.msra.mxu0 %v20080_v53 }
 0x51d   : > { %19046 = vmatpush3.bf16.msra.mxu1 %v20080_v53 }
 0x59f   : > { %v18985_v15 = vpop.f32.mrf.mxu1 }
 0x5a0   : > { %v13421_v62 = vadd.f32 %v18985_v15, %v23134_v12 }
 0x5a1   : > { %v13412_v28 = vpop.f32.mrf.mxu1 }
 0x5a2   : > { %v13493_v40 = vmul.f32 0.70710677, %v13421_v62  ;;  %v13413_v2 = vadd.f32 %v23134_v12, %v13412_v28  ;;  %v23203_v29 = vmul.f32 0.5, %v13421_v62 }
 0x5a3   : > { %v18986_v44 = vpop.f32.mrf.mxu1 }
 0x5a4   : > { %v23138_v3 = vand.u32 2147483647, %v13493_v40  ;;  %v23140_v13 = vmul.f32 0.70710677, %v13413_v2  ;;  %v23143_v49 = vadd.f32 %v18986_v44, %v23134_v12  ;;  %vm13509_vm0 = vcmp.ge.f32.partialorder %v13493_v40, 0.0 }
 0x5a5   : > { %v13415_v14 = vpop.f32.mrf.mxu1  ;;  %v23205_v26 = vmul.f32 0.5, %v13413_v2  ;;  %v23214_v39 = vsel %vm13509_vm0, 1.0, %v20217_v9 }
 0x5a6   : > { %v13557_v1 = vmul.f32 0.3275911, %v23138_v3  ;;  %v13539_v52 = vand.u32 2147483647, %v23140_v13  ;;  %v23148_v42 = vmul.f32 0.70710677, %v23143_v49  ;;  %v23151_v4 = vadd.f32 %v23134_v12, %v13415_v14 }
 0x5a7   : > { %v13765_v36 = vsub.f32 0.0, %v23138_v3  ;;  %vm13507_vm1 = vcmp.ge.f32.partialorder %v23140_v13, 0.0 }
 0x5a8   : > { %v13573_v33 = vadd.f32 1.0, %v13557_v1  ;;  %v13555_v55 = vmul.f32 0.3275911, %v13539_v52  ;;  %v23154_v50 = vand.u32 2147483647, %v23148_v42  ;;  %v13763_v23 = vsub.f32 0.0, %v13539_v52 }
 0x5a9   : > { %v23157_v18 = vmul.f32 0.70710677, %v23151_v4  ;;  %v13781_v15 = vmul.f32 %v13765_v36, %v23138_v3  ;;  %v23229_v14 = vsel %vm13507_vm1, 1.0, %v20217_v9  ;;  %v23232_v1 = vmul.f32 0.5, %v23143_v49 }
 0x5aa   : > { %20113 = vrcp.f32 %v13573_v33  ;;  %v13571_v32 = vadd.f32 1.0, %v13555_v55  ;;  %v13558_v25 = vmul.f32 0.3275911, %v23154_v50  ;;  %v13766_v16 = vsub.f32 0.0, %v23154_v50 }
 0x5ab   : > { %v23161_v60 = vand.u32 2147483647, %v23157_v18  ;;  %v13779_v62 = vmul.f32 %v13763_v23, %v13539_v52  ;;  %vm13510_vm2 = vcmp.ge.f32.partialorder %v23148_v42, 0.0  ;;  %vm13508_vm3 = vcmp.ge.f32.partialorder %v23157_v18, 0.0 }
 0x5ac   : > { %20115 = vrcp.f32 %v13571_v32  ;;  %v13574_v59 = vadd.f32 1.0, %v13558_v25  ;;  %v13782_v32 = vmul.f32 %v13766_v16, %v23154_v50 }
 0x5ad   : > { %v13556_v51 = vmul.f32 0.3275911, %v23161_v60  ;;  %v18989_v63 = vpop.f32.mrf.mxu1  ;;  %v13764_v44 = vsub.f32 0.0, %v23161_v60  ;;  %v13795_v49 = vmul.f32 1.442695, %v13779_v62 }
 0x5ae   : > { %20117 = vrcp.f32 %v13574_v59  ;;  %v23165_v56 = vadd.f32 %v18989_v63, %v23134_v12 }
 0x5af   : > { %v13572_v48 = vadd.f32 1.0, %v13556_v51  ;;  %v13428_v41 = vpop.f32.mrf.mxu1  ;;  %v13799_v51 = vmul.f32 1.442695, %v13781_v15 }
 0x5b0   : > { %v23168_v17 = vmul.f32 0.70710677, %v23165_v56  ;;  %v23171_v8 = vadd.f32 %v23134_v12, %v13428_v41  ;;  %v13780_v41 = vmul.f32 %v13764_v44, %v23161_v60 }
 0x5b1   : > { %20119 = vrcp.f32 %v13572_v48  ;;  %v18990_v30 = vpop.f32.mrf.mxu1 }
 0x5b2   : > { %v23174_v46 = vand.u32 2147483647, %v23168_v17  ;;  %v23177_v6 = vmul.f32 0.70710677, %v23171_v8  ;;  %v23180_v61 = vadd.f32 %v18990_v30, %v23134_v12  ;;  %v13797_v36 = vmul.f32 1.442695, %v13780_v41 }
 0x5b3   : > { %v13431_v47 = vpop.f32.mrf.mxu1  ;;  %vm13513_vm4 = vcmp.ge.f32.partialorder %v23168_v17, 0.0 }
 0x5b4   : > { %v13561_v35 = vmul.f32 0.3275911, %v23174_v46  ;;  %v23184_v7 = vand.u32 2147483647, %v23177_v6  ;;  %v23187_v20 = vmul.f32 0.70710677, %v23180_v61  ;;  %v23193_v31 = vadd.f32 %v23134_v12, %v13431_v47 }
 0x5b5   : > { %v23245_v47 = vmul.f32 0.5, %v23151_v4  ;;  %v23259_v4 = vsel %vm13510_vm2, 1.0, %v20217_v9  ;;  %vm13511_vm5 = vcmp.ge.f32.partialorder %v23177_v6, 0.0 }
 0x5b6   : > { %v13577_v19 = vadd.f32 1.0, %v13561_v35  ;;  %v13559_v10 = vmul.f32 0.3275911, %v23184_v7  ;;  %v23197_v24 = vand.u32 2147483647, %v23187_v20  ;;  %v13767_v15 = vsub.f32 0.0, %v23184_v7 }
 0x5b7   : > { %v23189_v34 = vpop.eup %20113  ;;  %v23209_v45 = vmul.f32 0.70710677, %v23193_v31  ;;  %vm13514_vm6 = vcmp.ge.f32.partialorder %v23187_v20, 0.0 }
 0x5b8   : > { %v13621_v57 = vmul.f32 1.0614054, %v23189_v34  ;;  %20121 = vrcp.f32 %v13577_v19  ;;  %v13575_v22 = vadd.f32 1.0, %v13559_v10  ;;  %v13562_v37 = vmul.f32 0.3275911, %v23197_v24 }
 0x5b9   : > { %v23199_v11 = vpop.eup %20115  ;;  %v23226_v13 = vand.u32 2147483647, %v23209_v45  ;;  %vm13512_vm7 = vcmp.ge.f32.partialorder %v23209_v45, 0.0 }
 0x5ba   : > { %v13637_v38 = vadd.f32 -1.4531521, %v13621_v57  ;;  %v13619_v27 = vmul.f32 1.0614054, %v23199_v11  ;;  %20123 = vrcp.f32 %v13575_v22  ;;  %v13578_v5 = vadd.f32 1.0, %v13562_v37 }
 0x5bb   : > { %v23211_v58 = vpop.eup %20117  ;;  %v13560_v25 = vmul.f32 0.3275911, %v23226_v13  ;;  %v13801_v57 = vmul.f32 1.442695, %v13782_v32  ;;  %v13768_v44 = vsub.f32 0.0, %v23226_v13 }
 0x5bc   : > { %v13653_v54 = vmul.f32 %v23189_v34, %v13637_v38  ;;  %v13635_v21 = vadd.f32 -1.4531521, %v13619_v27  ;;  %v13622_v0 = vmul.f32 1.0614054, %v23211_v58  ;;  %20125 = vrcp.f32 %v13578_v5 }
 0x5bd   : > { %v18993_v43 = vpop.f32.mrf.mxu1  ;;  %v13576_v30 = vadd.f32 1.0, %v13560_v25  ;;  %v23262_v38 = vsel %vm13508_vm3, 1.0, %v20217_v9  ;;  %v23267_v27 = vmul.f32 0.5, %v23165_v56 }
 0x5be   : > { %v13669_v53 = vadd.f32 1.4214138, %v13653_v54  ;;  %v23221_v28 = vpop.eup %20119  ;;  %v13651_v40 = vmul.f32 %v23199_v11, %v13635_v21  ;;  %v13638_v2 = vadd.f32 -1.4531521, %v13622_v0  ;;  %v23236_v52 = vadd.f32 %v18993_v43, %v23134_v12 }
 0x5bf   : > { %v13620_v3 = vmul.f32 1.0614054, %v23221_v28  ;;  %20127 = vrcp.f32 %v13576_v30  ;;  %v13769_v54 = vsub.f32 0.0, %v23174_v46  ;;  %v13444_v25 = vpop.f32.mrf.mxu1  ;;  %v13783_v30 = vmul.f32 %v13767_v15, %v23184_v7 }
 0x5c0   : > { %v13667_v33 = vadd.f32 1.4214138, %v13651_v40  ;;  %v13654_v55 = vmul.f32 %v23211_v58, %v13638_v2  ;;  %v13685_v59 = vmul.f32 %v23189_v34, %v13669_v53  ;;  %v23250_v35 = vmul.f32 0.70710677, %v23236_v52 }
 0x5c1   : > { %v13636_v63 = vadd.f32 -1.4531521, %v13620_v3  ;;  %20129 = vpow2.f32 %v13799_v51  ;;  %v13770_v2 = vsub.f32 0.0, %v23197_v24 }
 0x5c2   : > { %v13670_v48 = vadd.f32 1.4214138, %v13654_v55  ;;  %v13683_v19 = vmul.f32 %v23199_v11, %v13667_v33  ;;  %v13701_v60 = vadd.f32 -0.28449672, %v13685_v59  ;;  %20131 = vpow2.f32 %v13795_v49 }
 0x5c3   : > { %v13652_v50 = vmul.f32 %v23221_v28, %v13636_v63  ;;  %v23271_v5 = vand.u32 2147483647, %v23250_v35  ;;  %20133 = vpow2.f32 %v13801_v57  ;;  %v13785_v33 = vmul.f32 %v13769_v54, %v23174_v46 }
 0x5c4   : > { %v13686_v10 = vmul.f32 %v23211_v58, %v13670_v48  ;;  %v13699_v21 = vadd.f32 -0.28449672, %v13683_v19  ;;  %v13717_v43 = vmul.f32 %v23189_v34, %v13701_v60  ;;  %20135 = vpow2.f32 %v13797_v36 }
 0x5c5   : > { %v23254_v22 = vpop.eup %20121  ;;  %v13668_v18 = vadd.f32 1.4214138, %v13652_v50  ;;  %v13565_v56 = vmul.f32 0.3275911, %v23271_v5  ;;  %v13786_v46 = vmul.f32 %v13770_v2, %v23197_v24  ;;  %v13784_v19 = vmul.f32 %v13768_v44, %v23226_v13 }
 0x5c6   : > { %v13625_v23 = vmul.f32 1.0614054, %v23254_v22  ;;  %v13702_v0 = vadd.f32 -0.28449672, %v13686_v10  ;;  %v13715_v59 = vmul.f32 %v23199_v11, %v13699_v21  ;;  %v13733_v48 = vadd.f32 0.2548296, %v13717_v43 }
 0x5c7   : > { %v13684_v37 = vmul.f32 %v23221_v28, %v13668_v18  ;;  %v23273_v42 = vpop.eup %20123  ;;  %v13581_v49 = vadd.f32 1.0, %v13565_v56  ;;  %v23294_v10 = vadd.f32 %v23134_v12, %v13444_v25  ;;  %v23303_v13 = vmul.f32 0.5, %v23171_v8 }
 0x5c8   : > { %v13641_v16 = vadd.f32 -1.4531521, %v13625_v23  ;;  %v13623_v53 = vmul.f32 1.0614054, %v23273_v42  ;;  %v13718_v51 = vmul.f32 %v23211_v58, %v13702_v0  ;;  %v13731_v23 = vadd.f32 0.2548296, %v13715_v59 }
 0x5c9   : > { %v23279_v62 = vpop.eup %20125  ;;  %v13700_v3 = vadd.f32 -0.28449672, %v13684_v37  ;;  %20137 = vrcp.f32 %v13581_v49  ;;  %v13807_v37 = vmul.f32 1.442695, %v13785_v33  ;;  %v13749_v24 = vmul.f32 %v23189_v34, %v13733_v48 }
 0x5ca   : > { %v13657_v40 = vmul.f32 %v23254_v22, %v13641_v16  ;;  %v13639_v55 = vadd.f32 -1.4531521, %v13623_v53  ;;  %v13626_v32 = vmul.f32 1.0614054, %v23279_v62  ;;  %v13734_v7 = vadd.f32 0.2548296, %v13718_v51 }
 0x5cb   : > { %v13716_v57 = vmul.f32 %v23221_v28, %v13700_v3  ;;  %v13803_v21 = vmul.f32 1.442695, %v13783_v30  ;;  %v13805_v15 = vmul.f32 1.442695, %v13784_v19  ;;  %v23308_v56 = vmul.f32 0.70710677, %v23294_v10 }
 0x5cc   : > { %v13673_v63 = vadd.f32 1.4214138, %v13657_v40  ;;  %v13655_v41 = vmul.f32 %v23273_v42, %v13639_v55  ;;  %v13642_v50 = vadd.f32 -1.4531521, %v13626_v32  ;;  %v23299_v54 = vpop.eup %20127  ;;  %v13809_v34 = vmul.f32 1.442695, %v13786_v46  ;;  %v18994_v32 = vpop.f32.mrf.mxu1 }
 0x5cd   : > { %v13624_v53 = vmul.f32 1.0614054, %v23299_v54  ;;  %v13732_v2 = vadd.f32 0.2548296, %v13716_v57  ;;  %v13747_v8 = vmul.f32 %v23199_v11, %v13731_v23  ;;  %v13750_v33 = vmul.f32 %v23211_v58, %v13734_v7 }
 0x5ce   : > { %v13689_v60 = vmul.f32 %v23254_v22, %v13673_v63  ;;  %v13671_v18 = vadd.f32 1.4214138, %v13655_v41  ;;  %v13658_v36 = vmul.f32 %v23279_v62, %v13642_v50  ;;  %v20130_v16 = vpop.eup %20129  ;;  %20139 = vpow2.f32 %v13807_v37 }
 0x5cf   : > { %v20132_v40 = vpop.eup %20131  ;;  %v13640_v55 = vadd.f32 -1.4531521, %v13624_v53  ;;  %v13829_v59 = vmul.f32 %v20130_v16, %v13749_v24  ;;  %20141 = vpow2.f32 %v13803_v21  ;;  %v23316_v48 = vand.u32 2147483647, %v23308_v56 }
 0x5d0   : > { %v13674_v0 = vadd.f32 1.4214138, %v13658_v36  ;;  %v13687_v43 = vmul.f32 %v23273_v42, %v13671_v18  ;;  %v13705_v44 = vadd.f32 -0.28449672, %v13689_v60  ;;  %v20134_v25 = vpop.eup %20133  ;;  %20143 = vpow2.f32 %v13805_v15 }
 0x5d1   : > { %v13656_v49 = vmul.f32 %v23299_v54, %v13640_v55  ;;  %v20136_v41 = vpop.eup %20135  ;;  %v13748_v11 = vmul.f32 %v23221_v28, %v13732_v2  ;;  %20145 = vpow2.f32 %v13809_v34  ;;  %v23321_v30 = vadd.f32 %v18994_v32, %v23134_v12 }
 0x5d2   : > { %v13690_v3 = vmul.f32 %v23279_v62, %v13674_v0  ;;  %v13703_v63 = vadd.f32 -0.28449672, %v13687_v43  ;;  %v13721_v58 = vmul.f32 %v23254_v22, %v13705_v44  ;;  %v13827_v50 = vmul.f32 %v20132_v40, %v13747_v8  ;;  %v13447_v44 = vpop.f32.mrf.mxu1 }
 0x5d3   : > { %v13830_v46 = vmul.f32 %v20134_v25, %v13750_v33  ;;  %v13672_v19 = vadd.f32 1.4214138, %v13656_v49  ;;  %v13563_v57 = vmul.f32 0.3275911, %v23316_v48  ;;  %v13845_v60 = vsub.f32 1.0, %v13829_v59 }
 0x5d4   : > { %v13706_v51 = vadd.f32 -0.28449672, %v13690_v3  ;;  %v23327_v18 = vsel %vm13513_vm4, 1.0, %v20217_v9  ;;  %v23332_v28 = vsel %vm13511_vm5, 1.0, %v20217_v9  ;;  %v13719_v23 = vmul.f32 %v23273_v42, %v13703_v63 }
 0x5d5   : > { %v23337_v7 = vmul.f32 0.5, %v23180_v61  ;;  %v13688_v37 = vmul.f32 %v23299_v54, %v13672_v19  ;;  %v13579_v24 = vadd.f32 1.0, %v13563_v57  ;;  %v13828_v17 = vmul.f32 %v20136_v41, %v13748_v11 }
 0x5d6   : > { %v13722_v36 = vmul.f32 %v23279_v62, %v13706_v51  ;;  %v23340_v21 = vpop.eup %20137  ;;  %v13737_v0 = vadd.f32 0.2548296, %v13721_v58  ;;  %v23344_v6 = vmul.f32 0.70710677, %v23321_v30  ;;  %v13843_v16 = vsub.f32 1.0, %v13827_v50  ;;  %v18997_v51 = vpop.f32.mrf.mxu1 }
 0x5d7   : > { %v13846_v43 = vsub.f32 1.0, %v13830_v46  ;;  %v13704_v53 = vadd.f32 -0.28449672, %v13688_v37  ;;  %20147 = vrcp.f32 %v13579_v24  ;;  %v13861_v15 = vmul.f32 %v13845_v60, %v23214_v39 }
 0x5d8   : > { %v13738_v61 = vadd.f32 0.2548296, %v13722_v36  ;;  %v23348_v40 = vmul.f32 0.5, %v23193_v31  ;;  %v13629_v2 = vmul.f32 1.0614054, %v23340_v21  ;;  %v23352_v34 = vsel %vm13514_vm6, 1.0, %v20217_v9 }
 0x5d9   : > { %v13735_v3 = vadd.f32 0.2548296, %v13719_v23  ;;  %v13720_v20 = vmul.f32 %v23299_v54, %v13704_v53  ;;  %v13773_v8 = vsub.f32 0.0, %v23271_v5  ;;  %v13844_v33 = vsub.f32 1.0, %v13828_v17 }
 0x5da   : > { %v13753_v55 = vmul.f32 %v23254_v22, %v13737_v0  ;;  %v23359_v39 = vand.u32 2147483647, %v23344_v6  ;;  %v13859_v31 = vmul.f32 %v13843_v16, %v23229_v14  ;;  %v13862_v32 = vmul.f32 %v13846_v43, %v23259_v4 }
 0x5db   : > { %v13736_v25 = vadd.f32 0.2548296, %v13720_v20  ;;  %v23364_v59 = vadd.f32 %v23134_v12, %v13447_v44  ;;  %v20140_v63 = vpop.eup %20139  ;;  %v13877_v49 = vadd.f32 1.0, %v13861_v15  ;;  %v13754_v41 = vmul.f32 %v23279_v62, %v13738_v61 }
 0x5dc   : > { %v13645_v11 = vadd.f32 -1.4531521, %v13629_v2  ;;  %v13566_v22 = vmul.f32 0.3275911, %v23359_v39  ;;  %v20142_v58 = vpop.eup %20141  ;;  %v13751_v50 = vmul.f32 %v23273_v42, %v13735_v3  ;;  %v13789_v14 = vmul.f32 %v13773_v8, %v23271_v5  ;;  %v13460_v5 = vpop.f32.mrf.mxu1 }
 0x5dd   : > { %v13752_v46 = vmul.f32 %v23299_v54, %v13736_v25  ;;  %v23372_v4 = vmul.f32 0.70710677, %v23364_v59  ;;  %v20144_v19 = vpop.eup %20143  ;;  %v13860_v57 = vmul.f32 %v13844_v33, %v23262_v38  ;;  %v13833_v60 = vmul.f32 %v20140_v63, %v13753_v55 }
 0x5de   : > { %v13528_v62 = vsel %vm13512_vm7, 1.0, %v20217_v9  ;;  %v13582_v36 = vadd.f32 1.0, %v13566_v22  ;;  %v20146_v23 = vpop.eup %20145  ;;  %v13875_v37 = vadd.f32 1.0, %v13859_v31  ;;  %v13878_v24 = vadd.f32 1.0, %v13862_v32 }
 0x5df   : > { %v13832_v42 = vmul.f32 %v20144_v19, %v13752_v46  ;;  %v23379_v54 = vand.u32 2147483647, %v23372_v4  ;;  %v13834_v17 = vmul.f32 %v20146_v23, %v13754_v41  ;;  %v13661_v0 = vmul.f32 %v23340_v21, %v13645_v11 }
 0x5e0   : > { %v13771_v16 = vsub.f32 0.0, %v23316_v48  ;;  %20149 = vrcp.f32 %v13582_v36  ;;  %v13893_v38 = vmul.f32 %v13877_v49, %v23203_v29  ;;  %v13831_v43 = vmul.f32 %v20142_v58, %v13751_v50 }
 0x5e1   : > { %v13815_v45 = vmul.f32 1.442695, %v13789_v14  ;;  %v13564_v53 = vmul.f32 0.3275911, %v23379_v54  ;;  %v13876_v15 = vadd.f32 1.0, %v13860_v57  ;;  %v13849_v61 = vsub.f32 1.0, %v13833_v60 }
 0x5e2   : > { %v23386_v2 = vadd.f32 %v18997_v51, %v23134_v12  ;;  %v23389_v44 = vadd.f32 %v23134_v12, %v13460_v5  ;;  %v13891_v3 = vmul.f32 %v13875_v37, %v23205_v26  ;;  %v13894_v20 = vmul.f32 %v13878_v24, %v23232_v1 }
 0x5e3   : > { %v13848_v8 = vsub.f32 1.0, %v13832_v42  ;;  %v13580_v33 = vadd.f32 1.0, %v13564_v53  ;;  %v13850_v29 = vsub.f32 1.0, %v13834_v17  ;;  %v13677_v31 = vadd.f32 1.4214138, %v13661_v0 }
 0x5e4   : > { %v23393_v55 = vpop.eup %20147  ;;  %v13787_v32 = vmul.f32 %v13771_v16, %v23316_v48  ;;  %v23397_v25 = vmul.f32 0.70710677, %v23386_v2  ;;  %v13847_v51 = vsub.f32 1.0, %v13831_v43  ;;  %v23401_v49 = vmul.f32 0.70710677, %v23389_v44  ;;  %v18998_v48 = vpop.f32.mrf.mxu1 }
 0x5e5   : > { %v13627_v63 = vmul.f32 1.0614054, %v23393_v55  ;;  %20151 = vrcp.f32 %v13580_v33  ;;  %v13892_v26 = vmul.f32 %v13876_v15, %v23245_v47  ;;  %v13865_v1 = vmul.f32 %v13849_v61, %v23327_v18 }
 0x5e6   : > { %v13774_v41 = vsub.f32 0.0, %v23359_v39  ;;  %v23407_v11 = vand.u32 2147483647, %v23397_v25  ;;  %v13908_v22 = vpack.c.bf16 %v13894_v20, %v13893_v38  ;;  %v13864_v58 = vmul.f32 %v13848_v8, %v13528_v62 }
 0x5e7   : > { %20153 = vpow2.f32 %v13815_v45  ;;  %v13643_v50 = vadd.f32 -1.4531521, %v13627_v63  ;;  %v13866_v46 = vmul.f32 %v13850_v29, %v23352_v34  ;;  %v13693_v14 = vmul.f32 %v23340_v21, %v13677_v31 }
 0x5e8   : > { %v13811_v19 = vmul.f32 1.442695, %v13787_v32  ;;  %v13569_v57 = vmul.f32 0.3275911, %v23407_v11  ;;  %v13863_v47 = vmul.f32 %v13847_v51, %v23332_v28  ;;  %v23415_v60 = vand.u32 2147483647, %v23401_v49  ;;  %v13463_v28 = vpop.f32.mrf.mxu1 }
 0x5e9   : > { %v13659_v18 = vmul.f32 %v23393_v55, %v13643_v50  ;;  %v23418_v36 = vadd.f32 %v18998_v48, %v23134_v12  ;;  %v13881_v62 = vadd.f32 1.0, %v13865_v1  ;;  %v13790_v23 = vmul.f32 %v13774_v41, %v23359_v39 }
 0x5ea   : > { %v13585_v37 = vadd.f32 1.0, %v13569_v57  ;;  %v13907_v34 = vpack.c.bf16 %v13892_v26, %v13891_v3  ;;  %v13880_v24 = vadd.f32 1.0, %v13864_v58  ;;  %v13772_v5 = vsub.f32 0.0, %v23379_v54 }
 0x5eb   : > { %v13675_v42 = vadd.f32 1.4214138, %v13659_v18  ;;  %v13567_v17 = vmul.f32 0.3275911, %v23415_v60  ;;  %v13882_v0 = vadd.f32 1.0, %v13866_v46  ;;  %v13879_v45 = vadd.f32 1.0, %v13863_v47 }
 0x5ec   : > { %v13709_v16 = vadd.f32 -0.28449672, %v13693_v14  ;;  %20155 = vrcp.f32 %v13585_v37  ;;  %v23424_v38 = vmul.f32 0.70710677, %v23418_v36  ;;  %19015 = vmatprep.mubr.bf16.mxu0 %v13907_v34  ;;  %v13817_v61 = vmul.f32 1.442695, %v13790_v23 }
 0x5ed   : > { %v23426_v43 = vpop.eup %20149  ;;  %v13691_v39 = vmul.f32 %v23393_v55, %v13675_v42  ;;  %20157 = vpow2.f32 %v13811_v19  ;;  %v13583_v53 = vadd.f32 1.0, %v13567_v17  ;;  %19016 = vmatmul.mubr.bf16.vlgmr.msra.gmra.mxu0 %v13908_v22  ;;  %v23434_v20 = vadd.f32 %v23134_v12, %v13463_v28 }
 0x5ee   : > { %v13630_v15 = vmul.f32 1.0614054, %v23426_v43  ;;  %v23431_v3 = vand.u32 2147483647, %v23424_v38  ;;  %v13896_v8 = vmul.f32 %v13880_v24, %v23348_v40  ;;  %v13788_v29 = vmul.f32 %v13772_v5, %v23379_v54 }
 0x5ef   : > { %v13707_v33 = vadd.f32 -0.28449672, %v13691_v39  ;;  %20159 = vrcp.f32 %v13583_v53  ;;  %v13898_v31 = vmul.f32 %v13882_v0, %v23337_v7  ;;  %v13725_v32 = vmul.f32 %v23340_v21, %v13709_v16 }
 0x5f0   : > { %v13646_v51 = vadd.f32 -1.4531521, %v13630_v15  ;;  %v13570_v63 = vmul.f32 0.3275911, %v23431_v3  ;;  %v13897_v26 = vmul.f32 %v13881_v62, %v23267_v27  ;;  %v13895_v1 = vmul.f32 %v13879_v45, %v23303_v13 }
 0x5f1   : > { %v13723_v12 = vmul.f32 %v23393_v55, %v13707_v33  ;;  %20161 = vpow2.f32 %v13817_v61  ;;  %v23448_v48 = vmul.f32 0.70710677, %v23434_v20  ;;  %v13813_v22 = vmul.f32 1.442695, %v13788_v29 }
 0x5f2   : > { %v23444_v41 = vpop.eup %20151  ;;  %v13662_v40 = vmul.f32 %v23426_v43, %v13646_v51  ;;  %v13586_v54 = vadd.f32 1.0, %v13570_v63  ;;  %v13909_v58 = vpack.c.bf16 %v13896_v8, %v13895_v1  ;;  %v13910_v46 = vpack.c.bf16 %v13898_v31, %v13897_v26 }
 0x5f3   : > { %v13628_v7 = vmul.f32 1.0614054, %v23444_v41  ;;  %v13741_v27 = vadd.f32 0.2548296, %v13725_v32  ;;  %v13739_v13 = vadd.f32 0.2548296, %v13723_v12 }
 0x5f4   : > { %v20154_v50 = vpop.eup %20153  ;;  %v13678_v14 = vadd.f32 1.4214138, %v13662_v40  ;;  %20163 = vrcp.f32 %v13586_v54  ;;  %v23452_v57 = vand.u32 2147483647, %v23448_v48  ;;  %19019 = vmatprep.mubr.bf16.mxu0 %v13909_v58  ;;  %v13777_v62 = vsub.f32 0.0, %v23407_v11 }
 0x5f5   : > { %v13644_v19 = vadd.f32 -1.4531521, %v13628_v7  ;;  %19020 = vmatmul.mubr.bf16.gmra.mxu0 %v13910_v46  ;;  %20165 = vpow2.f32 %v13813_v22  ;;  %vm13517_vm8 = vcmp.ge.f32.partialorder %v23250_v35, 0.0  ;;  %v13757_v37 = vmul.f32 %v23340_v21, %v13741_v27 }
 0x5f6   : > { %v13694_v47 = vmul.f32 %v23426_v43, %v13678_v14  ;;  %v13568_v23 = vmul.f32 0.3275911, %v23452_v57  ;;  %v13755_v42 = vmul.f32 %v23393_v55, %v13739_v13  ;;  %v13775_v17 = vsub.f32 0.0, %v23415_v60 }
 0x5f7   : > { %v13660_v18 = vmul.f32 %v23444_v41, %v13644_v19  ;;  %vm13515_vm9 = vcmp.ge.f32.partialorder %v23308_v56, 0.0  ;;  %v13778_v35 = vsub.f32 0.0, %v23431_v3  ;;  %v13533_v21 = vsel %vm13517_vm8, 1.0, %v20217_v9 }
 0x5f8   : > { %v13710_v34 = vadd.f32 -0.28449672, %v13694_v47  ;;  %v13584_v28 = vadd.f32 1.0, %v13568_v23  ;;  %v13793_v53 = vmul.f32 %v13777_v62, %v23407_v11  ;;  %v13837_v15 = vmul.f32 %v20154_v50, %v13757_v37 }
 0x5f9   : > { %v23460_v24 = vpop.eup %20155  ;;  %v13676_v5 = vadd.f32 1.4214138, %v13660_v18  ;;  %vm13518_vm10 = vcmp.ge.f32.partialorder %v23344_v6, 0.0  ;;  %v13791_v32 = vmul.f32 %v13775_v17, %v23415_v60  ;;  %v13531_v51 = vsel %vm13515_vm9, 1.0, %v20217_v9 }
 0x5fa   : > { %v20158_v0 = vpop.eup %20157  ;;  %v13726_v16 = vmul.f32 %v23426_v43, %v13710_v34  ;;  %v13633_v45 = vmul.f32 1.0614054, %v23460_v24  ;;  %20167 = vrcp.f32 %v13584_v28  ;;  %v13794_v26 = vmul.f32 %v13778_v35, %v23431_v3 }
 0x5fb   : > { %v13692_v39 = vmul.f32 %v23444_v41, %v13676_v5  ;;  %v13835_v33 = vmul.f32 %v20158_v0, %v13755_v42  ;;  %v13534_v6 = vsel %vm13518_vm10, 1.0, %v20217_v9  ;;  %v13823_v40 = vmul.f32 1.442695, %v13793_v53 }
 0x5fc   : > { %v23471_v55 = vpop.eup %20159  ;;  %v13742_v61 = vadd.f32 0.2548296, %v13726_v16  ;;  %v13649_v8 = vadd.f32 -1.4531521, %v13633_v45  ;;  %v13853_v7 = vsub.f32 1.0, %v13837_v15  ;;  %v13776_v58 = vsub.f32 0.0, %v23452_v57 }
 0x5fd   : > { %v13708_v29 = vadd.f32 -0.28449672, %v13692_v39  ;;  %v13631_v31 = vmul.f32 1.0614054, %v23471_v55  ;;  %v13851_v50 = vsub.f32 1.0, %v13835_v33  ;;  %vm13516_vm11 = vcmp.ge.f32.partialorder %v23372_v4, 0.0 }
 0x5fe   : > { %v13758_v11 = vmul.f32 %v23426_v43, %v13742_v61  ;;  %v13665_v63 = vmul.f32 %v23460_v24, %v13649_v8  ;;  %v20162_v1 = vpop.eup %20161  ;;  %v13819_v27 = vmul.f32 1.442695, %v13791_v32  ;;  %v13825_v19 = vmul.f32 1.442695, %v13794_v26 }
 0x5ff   : > { %v13724_v12 = vmul.f32 %v23444_v41, %v13708_v29  ;;  %v13647_v54 = vadd.f32 -1.4531521, %v13631_v31  ;;  %20169 = vpow2.f32 %v13823_v40  ;;  %v13792_v42 = vmul.f32 %v13776_v58, %v23452_v57 }
 0x600   : > { %v13838_v22 = vmul.f32 %v20162_v1, %v13758_v11  ;;  %v13681_v60 = vadd.f32 1.4214138, %v13665_v63  ;;  %v13867_v5 = vmul.f32 %v13851_v50, %v13531_v51  ;;  %20171 = vpow2.f32 %v13819_v27 }
 0x601   : > { %v23485_v56 = vpop.eup %20163  ;;  %v13740_v43 = vadd.f32 0.2548296, %v13724_v12  ;;  %v13663_v46 = vmul.f32 %v23471_v55, %v13647_v54  ;;  %v13869_v0 = vmul.f32 %v13853_v7, %v13533_v21  ;;  %20173 = vpow2.f32 %v13825_v19 }
 0x602   : > { %v13854_v3 = vsub.f32 1.0, %v13838_v22  ;;  %v13697_v14 = vmul.f32 %v23460_v24, %v13681_v60  ;;  %v13634_v13 = vmul.f32 1.0614054, %v23485_v56  ;;  %v20166_v62 = vpop.eup %20165  ;;  %v13821_v61 = vmul.f32 1.442695, %v13792_v42 }
 0x603   : > { %v13756_v47 = vmul.f32 %v23444_v41, %v13740_v43  ;;  %v13679_v18 = vadd.f32 1.4214138, %v13663_v46  ;;  %v13532_v41 = vsel %vm13516_vm11, 1.0, %v20217_v9  ;;  %v13883_v8 = vadd.f32 1.0, %v13867_v5 }
 0x604   : > { %v13870_v23 = vmul.f32 %v13854_v3, %v13534_v6  ;;  %v13713_v37 = vadd.f32 -0.28449672, %v13697_v14  ;;  %v13650_v34 = vadd.f32 -1.4531521, %v13634_v13  ;;  %v13885_v31 = vadd.f32 1.0, %v13869_v0 }
 0x605   : > { %v13836_v17 = vmul.f32 %v20166_v62, %v13756_v47  ;;  %v13695_v28 = vmul.f32 %v23471_v55, %v13679_v18  ;;  %v13483_v32 = vmul.f32 0.5, %v23294_v10  ;;  %v13486_v51 = vmul.f32 0.5, %v23321_v30 }
 0x606   : > { %v13666_v16 = vmul.f32 %v23485_v56, %v13650_v34  ;;  %v13886_v53 = vadd.f32 1.0, %v13870_v23  ;;  %v13729_v15 = vmul.f32 %v23460_v24, %v13713_v37  ;;  %v13484_v11 = vmul.f32 0.5, %v23364_v59 }
 0x607   : > { %v13852_v45 = vsub.f32 1.0, %v13836_v17  ;;  %v13711_v35 = vadd.f32 -0.28449672, %v13695_v28  ;;  %v20168_v39 = vpop.eup %20167  ;;  %v13485_v6 = vmul.f32 0.5, %v23236_v52  ;;  %v13899_v7 = vmul.f32 %v13883_v8, %v13483_v32 }
 0x608   : > { %v13682_v57 = vadd.f32 1.4214138, %v13666_v16  ;;  %v13632_v21 = vmul.f32 1.0614054, %v20168_v39  ;;  %v13902_v12 = vmul.f32 %v13886_v53, %v13486_v51  ;;  %v13745_v40 = vadd.f32 0.2548296, %v13729_v15 }
 0x609   : > { %v13868_v33 = vmul.f32 %v13852_v45, %v13532_v41  ;;  %v13727_v29 = vmul.f32 %v23471_v55, %v13711_v35  ;;  %20175 = vpow2.f32 %v13821_v61  ;;  %v13901_v58 = vmul.f32 %v13885_v31, %v13485_v6 }
 0x60a   : > { %v13698_v4 = vmul.f32 %v23485_v56, %v13682_v57  ;;  %v13648_v1 = vadd.f32 -1.4531521, %v13632_v21  ;;  %v13761_v27 = vmul.f32 %v23460_v24, %v13745_v40  ;;  %vm13522_vm12 = vcmp.ge.f32.partialorder %v23424_v38, 0.0 }
 0x60b   : > { %v13884_v63 = vadd.f32 1.0, %v13868_v33  ;;  %v13743_v26 = vadd.f32 0.2548296, %v13727_v29  ;;  %v13912_v46 = vpack.c.bf16 %v13902_v12, %v13901_v58  ;;  %vm13519_vm13 = vcmp.ge.f32.partialorder %v23401_v49, 0.0 }
 0x60c   : > { %v13714_v54 = vadd.f32 -0.28449672, %v13698_v4  ;;  %v13664_v60 = vmul.f32 %v20168_v39, %v13648_v1  ;;  %v20170_v59 = vpop.eup %20169  ;;  %vm13521_vm14 = vcmp.ge.f32.partialorder %v23397_v25, 0.0  ;;  %v13538_v5 = vsel %vm13522_vm12, 1.0, %v20217_v9  ;;  %v16550_v4 = vld [vmem:[%s20403_s20 + $0x63] sm:$0xff]  ;;  %v16548_v1 = vld [vmem:[%s20403_s20 + $0x4b] sm:$0xff] }
 0x60d   : > { %v13900_v22 = vmul.f32 %v13884_v63, %v13484_v11  ;;  %v13759_v30 = vmul.f32 %v23471_v55, %v13743_v26  ;;  %v20172_v14 = vpop.eup %20171  ;;  %v13841_v62 = vmul.f32 %v20170_v59, %v13761_v27  ;;  %v13535_v28 = vsel %vm13519_vm13, 1.0, %v20217_v9 }
 0x60e   : > { %v13730_v10 = vmul.f32 %v23485_v56, %v13714_v54  ;;  %v13680_v50 = vadd.f32 1.4214138, %v13664_v60  ;;  %v20174_v19 = vpop.eup %20173  ;;  %v13537_v16 = vsel %vm13521_vm14, 1.0, %v20217_v9  ;;  %vm13520_vm15 = vcmp.ge.f32.partialorder %v23448_v48, 0.0 }
 0x60f   : > { %v13911_v43 = vpack.c.bf16 %v13900_v22, %v13899_v7  ;;  %v13839_v47 = vmul.f32 %v20172_v14, %v13759_v30  ;;  %v13857_v42 = vsub.f32 1.0, %v13841_v62  ;;  %v13536_v53 = vsel %vm13520_vm15, 1.0, %v20217_v9  ;;  %v16551_v7 = vld [vmem:[%s20403_s20 + $0x6b] sm:$0xff]  ;;  %v16549_v30 = vld [vmem:[%s20403_s20 + $0x53] sm:$0xff] }
 0x610   : > { %v13746_v3 = vadd.f32 0.2548296, %v13730_v10  ;;  %v13696_v52 = vmul.f32 %v20168_v39, %v13680_v50  ;;  %v13487_v61 = vmul.f32 0.5, %v23389_v44  ;;  %v13488_v8 = vmul.f32 0.5, %v23434_v20 }
 0x611   : > { %19023 = vmatprep.mubr.bf16.mxu1 %v13911_v43  ;;  %v13855_v34 = vsub.f32 1.0, %v13839_v47  ;;  %v13873_v45 = vmul.f32 %v13857_v42, %v13537_v16  ;;  %v13489_v48 = vmul.f32 0.5, %v23386_v2  ;;  %v23526_v2 = vld [vmem:[%s23625_s8] ss:$0 sm:$0xff] }
 0x612   : > { %v13762_v13 = vmul.f32 %v23485_v56, %v13746_v3  ;;  %19024 = vmatmul.mubr.bf16.vlgmr.msra.gmra.mxu1 %v13912_v46  ;;  %v13712_v18 = vadd.f32 -0.28449672, %v13696_v52  ;;  %v16554_v3 = vld [vmem:[%s20403_s20 + $0x93] sm:$0xff] }
 0x613   : > { %v13871_v41 = vmul.f32 %v13855_v34, %v13535_v28  ;;  %v13889_v57 = vadd.f32 1.0, %v13873_v45 }
 0x614   : > { %v13842_v23 = vmul.f32 %v20174_v19, %v13762_v13  ;;  %v13728_v37 = vmul.f32 %v20168_v39, %v13712_v18  ;;  %v16552_v19 = vld [vmem:[%s20403_s20 + $0x7b] sm:$0xff] }
 0x615   : > { %v13887_v25 = vadd.f32 1.0, %v13871_v41  ;;  %v13905_v32 = vmul.f32 %v13889_v57, %v13489_v48  ;;  %v16558_v41 = vld [vmem:[%s20403_s20 + $0xc3] sm:$0xff] }
 0x616   : > { %v13858_v55 = vsub.f32 1.0, %v13842_v23  ;;  %v13744_v24 = vadd.f32 0.2548296, %v13728_v37  ;;  %v20176_v17 = vpop.eup %20175  ;;  %v16555_v37 = vld [vmem:[%s20403_s20 + $0x9b] sm:$0xff] }
 0x617   : > { %v13903_v21 = vmul.f32 %v13887_v25, %v13487_v61 }
 0x618   : > { %v13760_v56 = vmul.f32 %v20168_v39, %v13744_v24  ;;  %v13874_v0 = vmul.f32 %v13858_v55, %v13538_v5  ;;  %v13490_v39 = vmul.f32 0.5, %v23418_v36  ;;  %v23531_v36 = vld [vmem:[%s23626_s9] ss:$0 sm:$0xff]  ;;  %v16553_v5 = vld [vmem:[%s20403_s20 + $0x83] sm:$0xff] }
 0x61a   : > { %v13840_v38 = vmul.f32 %v20176_v17, %v13760_v56  ;;  %v13890_v35 = vadd.f32 1.0, %v13874_v0 }
 0x61c   : > { %v13856_v49 = vsub.f32 1.0, %v13840_v38  ;;  %v13906_v29 = vmul.f32 %v13890_v35, %v13490_v39  ;;  %v16556_v35 = vld [vmem:[%s20403_s20 + $0xab] sm:$0xff] }
 0x61d   : > { %v16559_v39 = vld [vmem:[%s20403_s20 + $0xcb] sm:$0xff] }
 0x61e   : > { %v13872_v15 = vmul.f32 %v13856_v49, %v13536_v53  ;;  %v13914_v51 = vpack.c.bf16 %v13906_v29, %v13905_v32  ;;  %v16557_v29 = vld [vmem:[%s20403_s20 + $0xb3] sm:$0xff] }
 0x620   : > { %v13888_v33 = vadd.f32 1.0, %v13872_v15 }
 0x622   : > { %v13904_v31 = vmul.f32 %v13888_v33, %v13488_v8 }
 0x624   : > { %v13913_v9 = vpack.c.bf16 %v13904_v31, %v13903_v21 }
 0x626   : > { %19027 = vmatprep.mubr.bf16.mxu1 %v13913_v9 }
 0x627   : > { %19028 = vmatmul.mubr.bf16.gmra.mxu1 %v13914_v51 }
 0x6ad   : > { %v19017_v44 = vpop.f32.mrf.mxu0 }
 0x6ae   : > { %v14029_v20 = vadd.f32 %v19017_v44, %v23526_v2  ;;  %v16562_v44 = vld [vmem:[%s20403_s20 + $0xf3] sm:$0xff] }
 0x6af   : > { %v14020_v11 = vpop.f32.mrf.mxu0 }
 0x6b0   : > { %v14108_v63 = vmul.f32 %v23531_v36, %v14029_v20  ;;  %v14021_v26 = vadd.f32 %v23526_v2, %v14020_v11 }
 0x6b1   : > { %v19018_v6 = vpop.f32.mrf.mxu0 }
 0x6b2   : > { %v14124_v12 = vadd.f32 %v16550_v4, %v14108_v63  ;;  %v14106_v40 = vmul.f32 %v23531_v36, %v14021_v26  ;;  %v14032_v54 = vadd.f32 %v19018_v6, %v23526_v2  ;;  %v16560_v63 = vld [vmem:[%s20403_s20 + $0xdb] sm:$0xff] }
 0x6b3   : > { %v14023_v22 = vpop.f32.mrf.mxu0 }
 0x6b4   : > { %14140 = vst [vmem:[%s23540_s26 + $0x10] sm:$0xff] %v14124_v12  ;;  %v14122_v60 = vadd.f32 %v16548_v1, %v14106_v40  ;;  %v14109_v58 = vmul.f32 %v23531_v36, %v14032_v54  ;;  %v14024_v10 = vadd.f32 %v23526_v2, %v14023_v22  ;;  %v16563_v40 = vld [vmem:[%s20403_s20 + $0xfb] sm:$0xff] }
 0x6b5   : > { %v19021_v59 = vpop.f32.mrf.mxu0 }
 0x6b6   : > { %14138 = vst [vmem:[%s23540_s26] sm:$0xff] %v14122_v60  ;;  %v14125_v50 = vadd.f32 %v16551_v7, %v14109_v58  ;;  %v14107_v43 = vmul.f32 %v23531_v36, %v14024_v10  ;;  %v14045_v46 = vadd.f32 %v19021_v59, %v23526_v2  ;;  %v16561_v58 = vld [vmem:[%s20403_s20 + $0xe3] sm:$0xff] }
 0x6b7   : > { %v14036_v52 = vpop.f32.mrf.mxu0 }
 0x6b8   : > { %14141 = vst [vmem:[%s23540_s26 + $0x18] sm:$0xff] %v14125_v50  ;;  %v14123_v27 = vadd.f32 %v16549_v30, %v14107_v43  ;;  %v14112_v14 = vmul.f32 %v23531_v36, %v14045_v46  ;;  %v14037_v13 = vadd.f32 %v23526_v2, %v14036_v52 }
 0x6b9   : > { %v19022_v47 = vpop.f32.mrf.mxu0 }
 0x6ba   : > { %14139 = vst [vmem:[%s23540_s26 + $0x8] sm:$0xff] %v14123_v27  ;;  %v14128_v18 = vadd.f32 %v16554_v3, %v14112_v14  ;;  %v14110_v62 = vmul.f32 %v23531_v36, %v14037_v13  ;;  %v14048_v23 = vadd.f32 %v19022_v47, %v23526_v2 }
 0x6bb   : > { %v14039_v55 = vpop.f32.mrf.mxu0 }
 0x6bc   : > { %14144 = vst [vmem:[%s23540_s26 + $0x30] sm:$0xff] %v14128_v18  ;;  %v14126_v34 = vadd.f32 %v16552_v19, %v14110_v62  ;;  %v14113_v24 = vmul.f32 %v23531_v36, %v14048_v23  ;;  %v14040_v42 = vadd.f32 %v23526_v2, %v14039_v55 }
 0x6be   : > { %14142 = vst [vmem:[%s23540_s26 + $0x20] sm:$0xff] %v14126_v34  ;;  %v14129_v56 = vadd.f32 %v16555_v37, %v14113_v24  ;;  %v14111_v17 = vmul.f32 %v23531_v36, %v14040_v42 }
 0x6c0   : > { %14145 = vst [vmem:[%s23540_s26 + $0x38] sm:$0xff] %v14129_v56  ;;  %v14127_v28 = vadd.f32 %v16553_v5, %v14111_v17 }
 0x6c2   : > { %14143 = vst [vmem:[%s23540_s26 + $0x28] sm:$0xff] %v14127_v28 }
 0x6d2   : > { %v19025_v0 = vpop.f32.mrf.mxu1 }
 0x6d3   : > { %v14061_v16 = vadd.f32 %v19025_v0, %v23526_v2 }
 0x6d4   : > { %v14052_v38 = vpop.f32.mrf.mxu1 }
 0x6d5   : > { %v14116_v45 = vmul.f32 %v23531_v36, %v14061_v16  ;;  %v14053_v49 = vadd.f32 %v23526_v2, %v14052_v38 }
 0x6d6   : > { %v19026_v53 = vpop.f32.mrf.mxu1 }
 0x6d7   : > { %v14132_v25 = vadd.f32 %v16558_v41, %v14116_v45  ;;  %v14114_v15 = vmul.f32 %v23531_v36, %v14053_v49  ;;  %v14064_v57 = vadd.f32 %v19026_v53, %v23526_v2 }
 0x6d8   : > { %v14055_v61 = vpop.f32.mrf.mxu1 }
 0x6d9   : > { %14148 = vst [vmem:[%s23540_s26 + $0x50] sm:$0xff] %v14132_v25  ;;  %v14130_v8 = vadd.f32 %v16556_v35, %v14114_v15  ;;  %v14117_v33 = vmul.f32 %v23531_v36, %v14064_v57  ;;  %v14056_v48 = vadd.f32 %v23526_v2, %v14055_v61 }
 0x6db   : > { %14146 = vst [vmem:[%s23540_s26 + $0x40] sm:$0xff] %v14130_v8  ;;  %v14133_v21 = vadd.f32 %v16559_v39, %v14117_v33  ;;  %v14115_v31 = vmul.f32 %v23531_v36, %v14056_v48 }
 0x6dd   : > { %14149 = vst [vmem:[%s23540_s26 + $0x58] sm:$0xff] %v14133_v21  ;;  %v14131_v32 = vadd.f32 %v16557_v29, %v14115_v31 }
 0x6df   : > { %14147 = vst [vmem:[%s23540_s26 + $0x48] sm:$0xff] %v14131_v32 }
 0x6e7   : > { %v19029_v9 = vpop.f32.mrf.mxu1 }
 0x6e8   : > { %v14077_v51 = vadd.f32 %v19029_v9, %v23526_v2 }
 0x6e9   : > { %v14068_v20 = vpop.f32.mrf.mxu1 }
 0x6ea   : > { %v14120_v4 = vmul.f32 %v23531_v36, %v14077_v51  ;;  %v14069_v11 = vadd.f32 %v23526_v2, %v14068_v20 }
 0x6eb   : > { %v19030_v26 = vpop.f32.mrf.mxu1 }
 0x6ec   : > { %v14136_v1 = vadd.f32 %v16562_v44, %v14120_v4  ;;  %v14118_v6 = vmul.f32 %v23531_v36, %v14069_v11  ;;  %v14080_v12 = vadd.f32 %v19030_v26, %v23526_v2 }
 0x6ed   : > { %v14071_v54 = vpop.f32.mrf.mxu1 }
 0x6ee   : > { %14152 = vst [vmem:[%s23540_s26 + $0x70] sm:$0xff] %v14136_v1  ;;  %v14134_v7 = vadd.f32 %v16560_v63, %v14118_v6  ;;  %v14121_v22 = vmul.f32 %v23531_v36, %v14080_v12  ;;  %v14072_v60 = vadd.f32 %v23526_v2, %v14071_v54 }
 0x6f0   : > { %14150 = vst [vmem:[%s23540_s26 + $0x60] sm:$0xff] %v14134_v7  ;;  %v14137_v10 = vadd.f32 %v16563_v40, %v14121_v22  ;;  %v14119_v30 = vmul.f32 %v23531_v36, %v14072_v60 }
 0x6f2   : > { %14153 = vst [vmem:[%s23540_s26 + $0x78] sm:$0xff] %v14137_v10  ;;  %v14135_v50 = vadd.f32 %v16561_v58, %v14119_v30 }
 0x6f4   : > { %14151 = vst [vmem:[%s23540_s26 + $0x68] sm:$0xff] %v14135_v50 }
 0x6f5 PF: > { %s20_s17 = sadd.s32 1, %s20215_s17   ;;  %s23650_s13 = smov %s20207_s15 }
 0x6f6   : > { %p17_p7 = scmp.ge.s32.totalorder %s20_s17, 6   ;;  %s23651_s14 = smov %s20211_s16 }
 0x6f7   : > { %s23652_s15 = smov %s23655_s18  ;;  %s23653_s16 = smov %s23659_s19 }
 0x6f8   :  { %19 = sbr.rel (!%p17_p7) target bundleno = 3 (0x3), region = 97 }

</bundles_post_ra>
